<compile_context>
chip_gen: v6e
topology: v6e:2x2x1
jax: 0.10.0
libtpu: 0.0.40
codegen_flags: <defaults>
</compile_context>

<pallas_src>
import math

import numpy as np
import jax
import jax.numpy as jnp
from jax.experimental import pallas as pl
from jax.experimental.pallas import tpu as pltpu

LANE = 128          # every carried activation keeps its channel dim padded to 128
TM = 512            # flattened output rows per grid step (M tile)

# real channel counts carried between encoder layers (lane-padded to 128 in HBM)
C_STEM, C_L1, C_L2, C_L3 = 8, 16, 24, 32


def _round_up(x, m):
    return (x + m - 1) // m * m


# ----------------------------------------------------------------------------
# Core Pallas kernel: M-tiled multi-tap matmul-conv (value accumulation)
# ----------------------------------------------------------------------------
# out[m, :] = relu( sum_g  x_flat[m + off_g, :] @ W_g  + bias )
# The kernel sees one (TM + halo)-row window of x per grid step; each tap is a
# statically shifted MXU dot accumulated in a traced f32 value, stored once.

def _make_kernel(offsets, tm, relu):
    offsets = tuple(int(o) for o in offsets)

    def kernel(x_ref, w_ref, b_ref, o_ref):
        # x_ref: (1, 1, tm+halo, K) bf16   w_ref: (taps, K, Cout_p) bf16
        # b_ref: (1, 1, Cout_p) f32        o_ref: (1, tm, Cout_p) bf16
        o0 = offsets[0]
        acc = jnp.dot(x_ref[0, 0, o0:o0 + tm, :], w_ref[0],
                      preferred_element_type=jnp.float32)
        for g in range(1, len(offsets)):
            og = offsets[g]
            acc = acc + jnp.dot(x_ref[0, 0, og:og + tm, :], w_ref[g],
                                preferred_element_type=jnp.float32)
        acc = acc + b_ref[0]
        if relu:
            acc = jnp.maximum(acc, 0.0)
        o_ref[0] = acc.astype(o_ref.dtype)

    return kernel


def _vmem_limit(tm, halo, k, cout, taps):
    blk = ((tm + halo) * k + tm * cout + taps * k * cout) * 2 + cout * 4
    est = 2 * blk + tm * cout * 4            # double-buffered blocks + f32 accumulator
    return int(min(max(4 * est, 32 * 1024 * 1024), 56 * 1024 * 1024))


def matconv(x_flat, w_packed, bias, offsets, mo, relu, tm_max=TM):
    """x_flat: (N, Min, K) bf16;  w_packed: (taps, K, Cout_p) bf16;
    bias: (Nb, 1, Cout_p) f32 with Nb in {1, N} (per-batch bias fuses the ASPP pool
    branch);  offsets: static per-tap row shifts.  Returns (N, mo, Cout_p) bf16."""
    n, min_rows, k = x_flat.shape
    taps, k2, cout_p = w_packed.shape
    assert k == k2 and taps == len(offsets)

    halo = int(max(offsets))
    tm = min(tm_max, _round_up(mo, 8))
    n_m = -(-mo // tm)
    m_pad = n_m * tm

    # Build per-tile input windows.  Single-tap convs (halo==0) tile exactly (a free
    # reshape); multi-tap convs duplicate `halo` overlap rows in the wrapper so that
    # every grid step gets a self-contained (tm+halo)-row window.
    if halo == 0:
        if min_rows < m_pad:
            x_flat = jnp.pad(x_flat, ((0, 0), (0, m_pad - min_rows), (0, 0)))
        elif min_rows > m_pad:
            x_flat = x_flat[:, :m_pad]
        x_tiles = x_flat.reshape(n, n_m, tm, k)
    else:
        need = m_pad + halo
        if min_rows < need:
            x_flat = jnp.pad(x_flat, ((0, 0), (0, need - min_rows), (0, 0)))
        x_tiles = jnp.stack(
            [x_flat[:, m * tm: m * tm + tm + halo] for m in range(n_m)], axis=1)

    nb = bias.shape[0]
    bias_map = (lambda b, m: (b, 0, 0)) if nb == n else (lambda b, m: (0, 0, 0))

    kernel = _make_kernel(offsets, tm, relu)
    out = pl.pallas_call(
        kernel,
        out_shape=jax.ShapeDtypeStruct((n, m_pad, cout_p), jnp.bfloat16),
        grid=(n, n_m),
        in_specs=[
            pl.BlockSpec((1, 1, tm + halo, k), lambda b, m: (b, m, 0, 0)),
            pl.BlockSpec((taps, k, cout_p), lambda b, m: (0, 0, 0)),
            pl.BlockSpec((1, 1, cout_p), bias_map),
        ],
        out_specs=pl.BlockSpec((1, tm, cout_p), lambda b, m: (b, m, 0)),
        compiler_params=pltpu.CompilerParams(
            dimension_semantics=("parallel", "parallel"),
            vmem_limit_bytes=_vmem_limit(tm, halo, k, cout_p, taps),
        ),
    )(x_tiles, w_packed, bias)

    return out[:, :mo] if m_pad != mo else out


# ----------------------------------------------------------------------------
# Conv wrappers (geometry only — all math happens in matconv)
# ----------------------------------------------------------------------------
def _im2col_s2(x):
    """Exact 3x3 / stride-2 / pad-1 patch gather.  x: (N,H,W,Creal) -> (N,Ho,Wo,9*Creal)."""
    n, h, w, c = x.shape
    ho, wo = (h - 1) // 2 + 1, (w - 1) // 2 + 1
    xp = jnp.pad(x, ((0, 0), (1, 1), (1, 1), (0, 0)))
    cols = [xp[:, ki:ki + 2 * (ho - 1) + 1:2, kj:kj + 2 * (wo - 1) + 1:2, :]
            for ki in range(3) for kj in range(3)]
    return jnp.concatenate(cols, axis=-1), ho, wo


def conv_s2(x_real, params, relu=True):
    """Stride-2 3x3 conv as ONE strided-im2col matmul (Creal is tiny in the encoder)."""
    w, b = params
    patches, ho, wo = _im2col_s2(x_real)
    n, _, _, c = patches.shape
    k_pad = w.shape[1]
    if c < k_pad:
        patches = jnp.pad(patches, ((0, 0), (0, 0), (0, 0), (0, k_pad - c)))
    x_flat = patches.reshape(n, ho * wo, k_pad)
    out = matconv(x_flat, w, b, (0,), ho * wo, relu)
    return out.reshape(n, ho, wo, -1)


def conv1x1(x, params, relu=True):
    w, b = params
    n, h, ww, c = x.shape
    out = matconv(x.reshape(n, h * ww, c), w, b, (0,), h * ww, relu)
    return out.reshape(n, h, ww, -1)


def conv3x3(x, params, dil=1, relu=True):
    """'same' 3x3 stride-1 conv (pad = dil) as 9 shifted-dot taps inside the kernel."""
    w, b = params
    n, h, ww, c = x.shape
    wp = ww + 2 * dil
    xp = jnp.pad(x, ((0, 0), (dil, dil), (dil, dil), (0, 0)))
    x_flat = xp.reshape(n, (h + 2 * dil) * wp, c)
    offs = tuple(i * dil * wp + j * dil for i in range(3) for j in range(3))
    out = matconv(x_flat, w, b, offs, h * wp, relu)
    return out.reshape(n, h, wp, -1)[:, :, :ww]


def aspp_fused(x, w_cat, bias_per_batch):
    """Fused ASPP: 1x1 + 3x3(d=2) + 3x3(d=3) branches lane-packed at Cout offsets
    0/16/32, plus the image-pool branch delivered as a per-batch bias at offset 48.
    Reads the /16 feature once; 19 shifted taps on a common pad-3 frame."""
    n, h, ww, c = x.shape
    p = 3
    wp = ww + 2 * p
    xp = jnp.pad(x, ((0, 0), (p, p), (p, p), (0, 0)))
    x_flat = xp.reshape(n, (h + 2 * p) * wp, c)
    offs = [p * wp + p]                                               # 1x1 branch
    for d in (2, 3):                                                  # dilated branches
        offs += [(p - d + i * d) * wp + (p - d + j * d)
                 for i in range(3) for j in range(3)]
    out = matconv(x_flat, w_cat, bias_per_batch, tuple(offs), h * wp, relu=True)
    return out.reshape(n, h, wp, -1)[:, :, :ww]


# ----------------------------------------------------------------------------
# Parameters: PyTorch-layout init + one-time packing (transpose / lane-pad / bf16)
# ----------------------------------------------------------------------------
_CONV_SHAPES = {
    # encoder stand-in (each stride 2 -> /16 overall; low-level feature at /4)
    "stem":      (8, 3, 3, 3),
    "l1":        (16, 8, 3, 3),
    "l2":        (24, 16, 3, 3),
    "l3":        (32, 24, 3, 3),
    # ASPP
    "aspp0":     (16, 32, 1, 1),
    "aspp1":     (16, 32, 3, 3),
    "aspp2":     (16, 32, 3, 3),
    "aspp_pool": (16, 32, 1, 1),
    "aspp_proj": (32, 64, 1, 1),
    # decoder
    "dec_low":   (8, 16, 1, 1),
    "dec1":      (32, 40, 3, 3),
    "dec2":      (32, 32, 3, 3),
    "depth":     (1, 32, 3, 3),
    "sigma":     (1, 32, 3, 3),
}


def _np_wb(w, b):
    return (np.asarray(jax.device_get(w), np.float32),
            np.asarray(jax.device_get(b), np.float32))


def _pack_im2col(w, b, k_pad, cout_pad=LANE, cout_offset=0):
    """Weights for a single-tap (im2col'd) conv: rows ordered (ki, kj) major,
    input-channel minor — matching _im2col_s2's concat order."""
    w, b = _np_wb(w, b)
    cout, cin, kh, kw = w.shape
    wm = np.zeros((1, k_pad, cout_pad), np.float32)
    wk = np.transpose(w, (2, 3, 1, 0)).reshape(kh * kw * cin, cout)
    wm[0, :kh * kw * cin, cout_offset:cout_offset + cout] = wk
    bp = np.zeros((1, 1, cout_pad), np.float32)
    bp[0, 0, cout_offset:cout_offset + cout] = b
    return jnp.asarray(wm, jnp.bfloat16), jnp.asarray(bp, jnp.float32)


def _pack_taps(w, b, cin_pad=LANE, cout_pad=LANE, in_layout=None, cout_offset=0):
    """Weights for the multi-tap kernel: (taps, cin_pad, cout_pad), input channels
    placed at the lane offsets given by in_layout, output channels at cout_offset."""
    w, b = _np_wb(w, b)
    cout, cin, kh, kw = w.shape
    if in_layout is None:
        in_layout = [(0, cin)]
    assert sum(nc for _, nc in in_layout) == cin
    wt = np.zeros((kh * kw, cin_pad, cout_pad), np.float32)
    for g, (ki, kj) in enumerate((i, j) for i in range(kh) for j in range(kw)):
        c0 = 0
        for lane_off, nc in in_layout:
            wt[g, lane_off:lane_off + nc, cout_offset:cout_offset + cout] = \
                w[:, c0:c0 + nc, ki, kj].T
            c0 += nc
    bp = np.zeros((1, 1, cout_pad), np.float32)
    bp[0, 0, cout_offset:cout_offset + cout] = b
    return jnp.asarray(wt, jnp.bfloat16), jnp.asarray(bp, jnp.float32)


def init_params(key):
    """Deterministic synthetic parameters in the PyTorch (Cout, Cin, kh, kw) layout."""
    params = {}
    keys = jax.random.split(key, len(_CONV_SHAPES))
    for k, (name, (cout, cin, kh, kw)) in zip(keys, _CONV_SHAPES.items()):
        scale = 1.0 / math.sqrt(cin * kh * kw)
        params[name + "_w"] = jax.random.normal(k, (cout, cin, kh, kw), jnp.float32) * scale
        params[name + "_b"] = jnp.zeros((cout,), jnp.float32)
    return params


def prepare_params(params):
    """One-time weight packing (outside the jitted forward)."""
    P = {}
    # encoder: strided-im2col single-tap convs (K = 9*Cin real, padded)
    P["stem"] = _pack_im2col(params["stem_w"], params["stem_b"], k_pad=32)
    P["l1"] = _pack_im2col(params["l1_w"], params["l1_b"], k_pad=128)
    P["l2"] = _pack_im2col(params["l2_w"], params["l2_b"], k_pad=256)
    P["l3"] = _pack_im2col(params["l3_w"], params["l3_b"], k_pad=256)
    # fused ASPP: branch outputs lane-packed at 0 / 16 / 32, pool branch at 48
    w0, b0 = _pack_taps(params["aspp0_w"], params["aspp0_b"], cout_offset=0)
    w1, b1 = _pack_taps(params["aspp1_w"], params["aspp1_b"], cout_offset=16)
    w2, b2 = _pack_taps(params["aspp2_w"], params["aspp2_b"], cout_offset=32)
    P["aspp_w"] = jnp.concatenate([w0, w1, w2], axis=0)          # (19, 128, 128)
    P["aspp_b"] = b0 + b1 + b2                                   # disjoint lanes
    P["aspp_pool"] = _pack_taps(params["aspp_pool_w"], params["aspp_pool_b"],
                                cout_offset=48)
    P["aspp_proj"] = _pack_taps(params["aspp_proj_w"], params["aspp_proj_b"])
    # decoder: low-level reduction packed at lane 32 so [up | low_red] is one add
    P["dec_low"] = _pack_taps(params["dec_low_w"], params["dec_low_b"], cout_offset=32)
    P["dec1"] = _pack_taps(params["dec1_w"], params["dec1_b"],
                           in_layout=[(0, 32), (32, 8)])
    P["dec2"] = _pack_taps(params["dec2_w"], params["dec2_b"])
    w_heads = jnp.concatenate([params["depth_w"], params["sigma_w"]], axis=0)
    b_heads = jnp.concatenate([params["depth_b"], params["sigma_b"]], axis=0)
    P["heads"] = _pack_taps(w_heads, b_heads)                    # ch0=depth, ch1=sigma
    return P


# ----------------------------------------------------------------------------
# AttDepth forward
# ----------------------------------------------------------------------------
def att_depth_forward(x_nchw, P):
    """x: NCHW float32.  Returns (depth, loss_sigma), both NCHW (N, 1, H, W)."""
    n, _, H, W = x_nchw.shape
    x = jnp.transpose(x_nchw, (0, 2, 3, 1)).astype(jnp.bfloat16)          # NHWC bf16

    # ---- encoder (resnext101_32x8d stand-in): /16 output + /4 low-level feature
    h1 = conv_s2(x, P["stem"])                                            # /2,  8 real
    low = conv_s2(h1[..., :C_STEM], P["l1"])                              # /4,  16 real
    h3 = conv_s2(low[..., :C_L1], P["l2"])                                # /8,  24 real
    h4 = conv_s2(h3[..., :C_L2], P["l3"])                                 # /16, 32 real

    # ---- ASPP (fused): image-pool branch is a 2-row matmul, rides in as a per-batch bias
    pooled = jnp.mean(h4.astype(jnp.float32), axis=(1, 2))                # (N, 128)
    wpool, bpool = P["aspp_pool"]
    pool_pre = pooled @ wpool[0].astype(jnp.float32) + bpool[0]           # lanes 48..63
    bias_aspp = P["aspp_b"] + pool_pre[:, None, :]                        # (N, 1, 128)
    aspp_cat = aspp_fused(h4, P["aspp_w"], bias_aspp)                     # 64 real, lanes 0..63
    aspp_out = conv1x1(aspp_cat, P["aspp_proj"])                          # 32 real

    # ---- decoder
    low_red = conv1x1(low, P["dec_low"])                                  # 8 real at lanes 32..39
    # TODO(synk): jax.image.resize uses half-pixel centers; PyTorch F.interpolate with
    #             align_corners=True would differ slightly (fidelity, not stability).
    up = jax.image.resize(aspp_out.astype(jnp.float32),
                          (n, low.shape[1], low.shape[2], aspp_out.shape[-1]),
                          method="bilinear").astype(jnp.bfloat16)
    d = up + low_red                                 # packed concat: disjoint lanes 0..31 / 32..39
    d = conv3x3(d, P["dec1"])
    d = conv3x3(d, P["dec2"])
    heads = conv3x3(d, P["heads"], relu=False)                            # ch0=depth, ch1=sigma

    heads = jax.image.resize(heads[..., :2].astype(jnp.float32), (n, H, W, 2),
                             method="bilinear")
    depth = jnp.transpose(heads[..., 0:1], (0, 3, 1, 2))
    loss_sigma = jnp.transpose(heads[..., 1:2], (0, 3, 1, 2))
    return depth, loss_sigma


# ----------------------------------------------------------------------------
if __name__ == "__main__":
    key = jax.random.PRNGKey(0)
    pkey, xkey = jax.random.split(key)
    raw_params = init_params(pkey)
    P = prepare_params(raw_params)        # one-time packing, outside the jitted forward

    x = jax.random.normal(xkey, (2, 3, 64, 64), jnp.float32)   # NCHW input

    fwd = jax.jit(att_depth_forward)
    depth, loss_sigma = fwd(x, P)
    jax.block_until_ready((depth, loss_sigma))

    assert depth.shape == (2, 1, 64, 64), depth.shape
    assert loss_sigma.shape == (2, 1, 64, 64), loss_sigma.shape
    assert bool(jnp.all(jnp.isfinite(depth))) and bool(jnp.all(jnp.isfinite(loss_sigma)))
    print("KERNEL_OK")
</pallas_src>

<mosaic_0001>
module attributes {stable_mosaic.version = 11 : i64} {
  func.func @kernel(%arg0: i32, %arg1: i32, %arg2: memref<1x1x512x32xbf16, #tpu.memory_space<vmem>>, %arg3: memref<1x32x128xbf16, #tpu.memory_space<vmem>>, %arg4: memref<1x1x128xf32, #tpu.memory_space<vmem>>, %arg5: memref<1x512x128xbf16, #tpu.memory_space<vmem>>) attributes {dimension_semantics = [#tpu.dimension_semantics<parallel>, #tpu.dimension_semantics<parallel>], iteration_bounds = array<i64: 2, 2>, scalar_prefetch = 0 : i64, scratch_operands = 0 : i64, tpu.core_type = #tpu.core_type<tc>, window_params = [{transform_indices = @transform_0, window_bounds = array<i64: 1, 1, 512, 32>}, {pipeline_mode = #tpu.pipeline_mode<synchronous>, transform_indices = @transform_1, window_bounds = array<i64: 1, 32, 128>}, {pipeline_mode = #tpu.pipeline_mode<synchronous>, transform_indices = @transform_2, window_bounds = array<i64: 1, 1, 128>}, {transform_indices = @transform_3, window_bounds = array<i64: 1, 512, 128>}]} {
    %c0 = arith.constant 0 : index
    %c0_0 = arith.constant 0 : index
    %c0_1 = arith.constant 0 : index
    %c0_2 = arith.constant 0 : index
    %0 = vector.load %arg2[%c0, %c0_0, %c0_1, %c0_2] : memref<1x1x512x32xbf16, #tpu.memory_space<vmem>>, vector<1x1x512x32xbf16>
    %1 = vector.shape_cast %0 : vector<1x1x512x32xbf16> to vector<512x32xbf16>
    %c0_3 = arith.constant 0 : index
    %c0_4 = arith.constant 0 : index
    %c0_5 = arith.constant 0 : index
    %2 = vector.load %arg3[%c0_3, %c0_4, %c0_5] : memref<1x32x128xbf16, #tpu.memory_space<vmem>>, vector<1x32x128xbf16>
    %3 = vector.shape_cast %2 : vector<1x32x128xbf16> to vector<32x128xbf16>
    %cst = arith.constant dense<0.000000e+00> : vector<512x128xf32>
    %4 = tpu.matmul %1, %3, %cst {dimension_numbers = #tpu.dot_dimension_numbers<[1], [0], [0], [1], [0, 0, 1, 1], [], []>} : vector<512x32xbf16>, vector<32x128xbf16>, vector<512x128xf32> -> vector<512x128xf32>
    %c0_6 = arith.constant 0 : index
    %c0_7 = arith.constant 0 : index
    %c0_8 = arith.constant 0 : index
    %5 = vector.load %arg4[%c0_6, %c0_7, %c0_8] : memref<1x1x128xf32, #tpu.memory_space<vmem>>, vector<1x1x128xf32>
    %6 = vector.shape_cast %5 : vector<1x1x128xf32> to vector<1x128xf32>
    %7 = vector.broadcast %6 : vector<1x128xf32> to vector<512x128xf32>
    %8 = arith.addf %4, %7 : vector<512x128xf32>
    %cst_9 = arith.constant 0.000000e+00 : f32
    %9 = vector.broadcast %cst_9 : f32 to vector<512x128xf32>
    %10 = arith.maximumf %8, %9 : vector<512x128xf32>
    %11 = arith.truncf %10 : vector<512x128xf32> to vector<512x128xbf16>
    %c0_10 = arith.constant 0 : index
    %c0_11 = arith.constant 0 : index
    %c0_12 = arith.constant 0 : index
    %12 = vector.load %arg5[%c0_10, %c0_11, %c0_12] : memref<1x512x128xbf16, #tpu.memory_space<vmem>>, vector<1x512x128xbf16>
    %13 = vector.shape_cast %12 : vector<1x512x128xbf16> to vector<512x128xbf16>
    %14 = vector.shape_cast %11 : vector<512x128xbf16> to vector<1x512x128xbf16>
    tpu.vector_store %arg5[%c0_10, %c0_11, %c0_12], %14 {strides = array<i32>} : memref<1x512x128xbf16, #tpu.memory_space<vmem>>, vector<1x512x128xbf16>,
    return
  }
  func.func @transform_0(%arg0: i32, %arg1: i32) -> (i32, i32, i32, i32) {
    %c0_i32 = arith.constant 0 : i32
    %c0_i32_0 = arith.constant 0 : i32
    %c0_i32_1 = arith.constant 0 : i32
    return %arg0, %arg1, %c0_i32, %c0_i32_0 : i32, i32, i32, i32
  }
  func.func @transform_1(%arg0: i32, %arg1: i32) -> (i32, i32, i32) {
    %c0_i32 = arith.constant 0 : i32
    %c0_i32_0 = arith.constant 0 : i32
    %c0_i32_1 = arith.constant 0 : i32
    %c0_i32_2 = arith.constant 0 : i32
    return %c0_i32, %c0_i32_0, %c0_i32_1 : i32, i32, i32
  }
  func.func @transform_2(%arg0: i32, %arg1: i32) -> (i32, i32, i32) {
    %c0_i32 = arith.constant 0 : i32
    %c0_i32_0 = arith.constant 0 : i32
    %c0_i32_1 = arith.constant 0 : i32
    %c0_i32_2 = arith.constant 0 : i32
    return %c0_i32, %c0_i32_0, %c0_i32_1 : i32, i32, i32
  }
  func.func @transform_3(%arg0: i32, %arg1: i32) -> (i32, i32, i32) {
    %c0_i32 = arith.constant 0 : i32
    %c0_i32_0 = arith.constant 0 : i32
    return %arg0, %arg1, %c0_i32 : i32, i32, i32
  }
}

module attributes {stable_mosaic.version = 11 : i64} {
  func.func @kernel(%arg0: i32, %arg1: i32, %arg2: memref<1x1x256x128xbf16, #tpu.memory_space<vmem>>, %arg3: memref<1x128x128xbf16, #tpu.memory_space<vmem>>, %arg4: memref<1x1x128xf32, #tpu.memory_space<vmem>>, %arg5: memref<1x256x128xbf16, #tpu.memory_space<vmem>>) attributes {dimension_semantics = [#tpu.dimension_semantics<parallel>, #tpu.dimension_semantics<parallel>], iteration_bounds = array<i64: 2, 1>, scalar_prefetch = 0 : i64, scratch_operands = 0 : i64, tpu.core_type = #tpu.core_type<tc>, window_params = [{transform_indices = @transform_0, window_bounds = array<i64: 1, 1, 256, 128>}, {pipeline_mode = #tpu.pipeline_mode<synchronous>, transform_indices = @transform_1, window_bounds = array<i64: 1, 128, 128>}, {pipeline_mode = #tpu.pipeline_mode<synchronous>, transform_indices = @transform_2, window_bounds = array<i64: 1, 1, 128>}, {transform_indices = @transform_3, window_bounds = array<i64: 1, 256, 128>}]} {
    %c0 = arith.constant 0 : index
    %c0_0 = arith.constant 0 : index
    %c0_1 = arith.constant 0 : index
    %c0_2 = arith.constant 0 : index
    %0 = vector.load %arg2[%c0, %c0_0, %c0_1, %c0_2] : memref<1x1x256x128xbf16, #tpu.memory_space<vmem>>, vector<1x1x256x128xbf16>
    %1 = vector.shape_cast %0 : vector<1x1x256x128xbf16> to vector<256x128xbf16>
    %c0_3 = arith.constant 0 : index
    %c0_4 = arith.constant 0 : index
    %c0_5 = arith.constant 0 : index
    %2 = vector.load %arg3[%c0_3, %c0_4, %c0_5] : memref<1x128x128xbf16, #tpu.memory_space<vmem>>, vector<1x128x128xbf16>
    %3 = vector.shape_cast %2 : vector<1x128x128xbf16> to vector<128x128xbf16>
    %cst = arith.constant dense<0.000000e+00> : vector<256x128xf32>
    %4 = tpu.matmul %1, %3, %cst {dimension_numbers = #tpu.dot_dimension_numbers<[1], [0], [0], [1], [0, 0, 1, 1], [], []>} : vector<256x128xbf16>, vector<128x128xbf16>, vector<256x128xf32> -> vector<256x128xf32>
    %c0_6 = arith.constant 0 : index
    %c0_7 = arith.constant 0 : index
    %c0_8 = arith.constant 0 : index
    %5 = vector.load %arg4[%c0_6, %c0_7, %c0_8] : memref<1x1x128xf32, #tpu.memory_space<vmem>>, vector<1x1x128xf32>
    %6 = vector.shape_cast %5 : vector<1x1x128xf32> to vector<1x128xf32>
    %7 = vector.broadcast %6 : vector<1x128xf32> to vector<256x128xf32>
    %8 = arith.addf %4, %7 : vector<256x128xf32>
    %cst_9 = arith.constant 0.000000e+00 : f32
    %9 = vector.broadcast %cst_9 : f32 to vector<256x128xf32>
    %10 = arith.maximumf %8, %9 : vector<256x128xf32>
    %11 = arith.truncf %10 : vector<256x128xf32> to vector<256x128xbf16>
    %c0_10 = arith.constant 0 : index
    %c0_11 = arith.constant 0 : index
    %c0_12 = arith.constant 0 : index
    %12 = vector.load %arg5[%c0_10, %c0_11, %c0_12] : memref<1x256x128xbf16, #tpu.memory_space<vmem>>, vector<1x256x128xbf16>
    %13 = vector.shape_cast %12 : vector<1x256x128xbf16> to vector<256x128xbf16>
    %14 = vector.shape_cast %11 : vector<256x128xbf16> to vector<1x256x128xbf16>
    tpu.vector_store %arg5[%c0_10, %c0_11, %c0_12], %14 {strides = array<i32>} : memref<1x256x128xbf16, #tpu.memory_space<vmem>>, vector<1x256x128xbf16>,
    return
  }
  func.func @transform_0(%arg0: i32, %arg1: i32) -> (i32, i32, i32, i32) {
    %c0_i32 = arith.constant 0 : i32
    %c0_i32_0 = arith.constant 0 : i32
    %c0_i32_1 = arith.constant 0 : i32
    return %arg0, %arg1, %c0_i32, %c0_i32_0 : i32, i32, i32, i32
  }
  func.func @transform_1(%arg0: i32, %arg1: i32) -> (i32, i32, i32) {
    %c0_i32 = arith.constant 0 : i32
    %c0_i32_0 = arith.constant 0 : i32
    %c0_i32_1 = arith.constant 0 : i32
    %c0_i32_2 = arith.constant 0 : i32
    return %c0_i32, %c0_i32_0, %c0_i32_1 : i32, i32, i32
  }
  func.func @transform_2(%arg0: i32, %arg1: i32) -> (i32, i32, i32) {
    %c0_i32 = arith.constant 0 : i32
    %c0_i32_0 = arith.constant 0 : i32
    %c0_i32_1 = arith.constant 0 : i32
    %c0_i32_2 = arith.constant 0 : i32
    return %c0_i32, %c0_i32_0, %c0_i32_1 : i32, i32, i32
  }
  func.func @transform_3(%arg0: i32, %arg1: i32) -> (i32, i32, i32) {
    %c0_i32 = arith.constant 0 : i32
    %c0_i32_0 = arith.constant 0 : i32
    return %arg0, %arg1, %c0_i32 : i32, i32, i32
  }
}

module attributes {stable_mosaic.version = 11 : i64} {
  func.func @kernel(%arg0: i32, %arg1: i32, %arg2: memref<1x1x64x256xbf16, #tpu.memory_space<vmem>>, %arg3: memref<1x256x128xbf16, #tpu.memory_space<vmem>>, %arg4: memref<1x1x128xf32, #tpu.memory_space<vmem>>, %arg5: memref<1x64x128xbf16, #tpu.memory_space<vmem>>) attributes {dimension_semantics = [#tpu.dimension_semantics<parallel>, #tpu.dimension_semantics<parallel>], iteration_bounds = array<i64: 2, 1>, scalar_prefetch = 0 : i64, scratch_operands = 0 : i64, tpu.core_type = #tpu.core_type<tc>, window_params = [{transform_indices = @transform_0, window_bounds = array<i64: 1, 1, 64, 256>}, {pipeline_mode = #tpu.pipeline_mode<synchronous>, transform_indices = @transform_1, window_bounds = array<i64: 1, 256, 128>}, {pipeline_mode = #tpu.pipeline_mode<synchronous>, transform_indices = @transform_2, window_bounds = array<i64: 1, 1, 128>}, {transform_indices = @transform_3, window_bounds = array<i64: 1, 64, 128>}]} {
    %c0 = arith.constant 0 : index
    %c0_0 = arith.constant 0 : index
    %c0_1 = arith.constant 0 : index
    %c0_2 = arith.constant 0 : index
    %0 = vector.load %arg2[%c0, %c0_0, %c0_1, %c0_2] : memref<1x1x64x256xbf16, #tpu.memory_space<vmem>>, vector<1x1x64x256xbf16>
    %1 = vector.shape_cast %0 : vector<1x1x64x256xbf16> to vector<64x256xbf16>
    %c0_3 = arith.constant 0 : index
    %c0_4 = arith.constant 0 : index
    %c0_5 = arith.constant 0 : index
    %2 = vector.load %arg3[%c0_3, %c0_4, %c0_5] : memref<1x256x128xbf16, #tpu.memory_space<vmem>>, vector<1x256x128xbf16>
    %3 = vector.shape_cast %2 : vector<1x256x128xbf16> to vector<256x128xbf16>
    %cst = arith.constant dense<0.000000e+00> : vector<64x128xf32>
    %4 = tpu.matmul %1, %3, %cst {dimension_numbers = #tpu.dot_dimension_numbers<[1], [0], [0], [1], [0, 0, 1, 1], [], []>} : vector<64x256xbf16>, vector<256x128xbf16>, vector<64x128xf32> -> vector<64x128xf32>
    %c0_6 = arith.constant 0 : index
    %c0_7 = arith.constant 0 : index
    %c0_8 = arith.constant 0 : index
    %5 = vector.load %arg4[%c0_6, %c0_7, %c0_8] : memref<1x1x128xf32, #tpu.memory_space<vmem>>, vector<1x1x128xf32>
    %6 = vector.shape_cast %5 : vector<1x1x128xf32> to vector<1x128xf32>
    %7 = vector.broadcast %6 : vector<1x128xf32> to vector<64x128xf32>
    %8 = arith.addf %4, %7 : vector<64x128xf32>
    %cst_9 = arith.constant 0.000000e+00 : f32
    %9 = vector.broadcast %cst_9 : f32 to vector<64x128xf32>
    %10 = arith.maximumf %8, %9 : vector<64x128xf32>
    %11 = arith.truncf %10 : vector<64x128xf32> to vector<64x128xbf16>
    %c0_10 = arith.constant 0 : index
    %c0_11 = arith.constant 0 : index
    %c0_12 = arith.constant 0 : index
    %12 = vector.load %arg5[%c0_10, %c0_11, %c0_12] : memref<1x64x128xbf16, #tpu.memory_space<vmem>>, vector<1x64x128xbf16>
    %13 = vector.shape_cast %12 : vector<1x64x128xbf16> to vector<64x128xbf16>
    %14 = vector.shape_cast %11 : vector<64x128xbf16> to vector<1x64x128xbf16>
    tpu.vector_store %arg5[%c0_10, %c0_11, %c0_12], %14 {strides = array<i32>} : memref<1x64x128xbf16, #tpu.memory_space<vmem>>, vector<1x64x128xbf16>,
    return
  }
  func.func @transform_0(%arg0: i32, %arg1: i32) -> (i32, i32, i32, i32) {
    %c0_i32 = arith.constant 0 : i32
    %c0_i32_0 = arith.constant 0 : i32
    %c0_i32_1 = arith.constant 0 : i32
    return %arg0, %arg1, %c0_i32, %c0_i32_0 : i32, i32, i32, i32
  }
  func.func @transform_1(%arg0: i32, %arg1: i32) -> (i32, i32, i32) {
    %c0_i32 = arith.constant 0 : i32
    %c0_i32_0 = arith.constant 0 : i32
    %c0_i32_1 = arith.constant 0 : i32
    %c0_i32_2 = arith.constant 0 : i32
    return %c0_i32, %c0_i32_0, %c0_i32_1 : i32, i32, i32
  }
  func.func @transform_2(%arg0: i32, %arg1: i32) -> (i32, i32, i32) {
    %c0_i32 = arith.constant 0 : i32
    %c0_i32_0 = arith.constant 0 : i32
    %c0_i32_1 = arith.constant 0 : i32
    %c0_i32_2 = arith.constant 0 : i32
    return %c0_i32, %c0_i32_0, %c0_i32_1 : i32, i32, i32
  }
  func.func @transform_3(%arg0: i32, %arg1: i32) -> (i32, i32, i32) {
    %c0_i32 = arith.constant 0 : i32
    %c0_i32_0 = arith.constant 0 : i32
    return %arg0, %arg1, %c0_i32 : i32, i32, i32
  }
}

module attributes {stable_mosaic.version = 11 : i64} {
  func.func @kernel(%arg0: i32, %arg1: i32, %arg2: memref<1x1x16x256xbf16, #tpu.memory_space<vmem>>, %arg3: memref<1x256x128xbf16, #tpu.memory_space<vmem>>, %arg4: memref<1x1x128xf32, #tpu.memory_space<vmem>>, %arg5: memref<1x16x128xbf16, #tpu.memory_space<vmem>>) attributes {dimension_semantics = [#tpu.dimension_semantics<parallel>, #tpu.dimension_semantics<parallel>], iteration_bounds = array<i64: 2, 1>, scalar_prefetch = 0 : i64, scratch_operands = 0 : i64, tpu.core_type = #tpu.core_type<tc>, window_params = [{transform_indices = @transform_0, window_bounds = array<i64: 1, 1, 16, 256>}, {pipeline_mode = #tpu.pipeline_mode<synchronous>, transform_indices = @transform_1, window_bounds = array<i64: 1, 256, 128>}, {pipeline_mode = #tpu.pipeline_mode<synchronous>, transform_indices = @transform_2, window_bounds = array<i64: 1, 1, 128>}, {transform_indices = @transform_3, window_bounds = array<i64: 1, 16, 128>}]} {
    %c0 = arith.constant 0 : index
    %c0_0 = arith.constant 0 : index
    %c0_1 = arith.constant 0 : index
    %c0_2 = arith.constant 0 : index
    %0 = vector.load %arg2[%c0, %c0_0, %c0_1, %c0_2] : memref<1x1x16x256xbf16, #tpu.memory_space<vmem>>, vector<1x1x16x256xbf16>
    %1 = vector.shape_cast %0 : vector<1x1x16x256xbf16> to vector<16x256xbf16>
    %c0_3 = arith.constant 0 : index
    %c0_4 = arith.constant 0 : index
    %c0_5 = arith.constant 0 : index
    %2 = vector.load %arg3[%c0_3, %c0_4, %c0_5] : memref<1x256x128xbf16, #tpu.memory_space<vmem>>, vector<1x256x128xbf16>
    %3 = vector.shape_cast %2 : vector<1x256x128xbf16> to vector<256x128xbf16>
    %cst = arith.constant dense<0.000000e+00> : vector<16x128xf32>
    %4 = tpu.matmul %1, %3, %cst {dimension_numbers = #tpu.dot_dimension_numbers<[1], [0], [0], [1], [0, 0, 1, 1], [], []>} : vector<16x256xbf16>, vector<256x128xbf16>, vector<16x128xf32> -> vector<16x128xf32>
    %c0_6 = arith.constant 0 : index
    %c0_7 = arith.constant 0 : index
    %c0_8 = arith.constant 0 : index
    %5 = vector.load %arg4[%c0_6, %c0_7, %c0_8] : memref<1x1x128xf32, #tpu.memory_space<vmem>>, vector<1x1x128xf32>
    %6 = vector.shape_cast %5 : vector<1x1x128xf32> to vector<1x128xf32>
    %7 = vector.broadcast %6 : vector<1x128xf32> to vector<16x128xf32>
    %8 = arith.addf %4, %7 : vector<16x128xf32>
    %cst_9 = arith.constant 0.000000e+00 : f32
    %9 = vector.broadcast %cst_9 : f32 to vector<16x128xf32>
    %10 = arith.maximumf %8, %9 : vector<16x128xf32>
    %11 = arith.truncf %10 : vector<16x128xf32> to vector<16x128xbf16>
    %c0_10 = arith.constant 0 : index
    %c0_11 = arith.constant 0 : index
    %c0_12 = arith.constant 0 : index
    %12 = vector.load %arg5[%c0_10, %c0_11, %c0_12] : memref<1x16x128xbf16, #tpu.memory_space<vmem>>, vector<1x16x128xbf16>
    %13 = vector.shape_cast %12 : vector<1x16x128xbf16> to vector<16x128xbf16>
    %14 = vector.shape_cast %11 : vector<16x128xbf16> to vector<1x16x128xbf16>
    tpu.vector_store %arg5[%c0_10, %c0_11, %c0_12], %14 {strides = array<i32>} : memref<1x16x128xbf16, #tpu.memory_space<vmem>>, vector<1x16x128xbf16>,
    return
  }
  func.func @transform_0(%arg0: i32, %arg1: i32) -> (i32, i32, i32, i32) {
    %c0_i32 = arith.constant 0 : i32
    %c0_i32_0 = arith.constant 0 : i32
    %c0_i32_1 = arith.constant 0 : i32
    return %arg0, %arg1, %c0_i32, %c0_i32_0 : i32, i32, i32, i32
  }
  func.func @transform_1(%arg0: i32, %arg1: i32) -> (i32, i32, i32) {
    %c0_i32 = arith.constant 0 : i32
    %c0_i32_0 = arith.constant 0 : i32
    %c0_i32_1 = arith.constant 0 : i32
    %c0_i32_2 = arith.constant 0 : i32
    return %c0_i32, %c0_i32_0, %c0_i32_1 : i32, i32, i32
  }
  func.func @transform_2(%arg0: i32, %arg1: i32) -> (i32, i32, i32) {
    %c0_i32 = arith.constant 0 : i32
    %c0_i32_0 = arith.constant 0 : i32
    %c0_i32_1 = arith.constant 0 : i32
    %c0_i32_2 = arith.constant 0 : i32
    return %c0_i32, %c0_i32_0, %c0_i32_1 : i32, i32, i32
  }
  func.func @transform_3(%arg0: i32, %arg1: i32) -> (i32, i32, i32) {
    %c0_i32 = arith.constant 0 : i32
    %c0_i32_0 = arith.constant 0 : i32
    return %arg0, %arg1, %c0_i32 : i32, i32, i32
  }
}

module attributes {stable_mosaic.version = 11 : i64} {
  func.func @kernel(%arg0: i32, %arg1: i32, %arg2: memref<1x1x16x128xbf16, #tpu.memory_space<vmem>>, %arg3: memref<1x128x128xbf16, #tpu.memory_space<vmem>>, %arg4: memref<1x1x128xf32, #tpu.memory_space<vmem>>, %arg5: memref<1x16x128xbf16, #tpu.memory_space<vmem>>) attributes {dimension_semantics = [#tpu.dimension_semantics<parallel>, #tpu.dimension_semantics<parallel>], iteration_bounds = array<i64: 2, 1>, scalar_prefetch = 0 : i64, scratch_operands = 0 : i64, tpu.core_type = #tpu.core_type<tc>, window_params = [{transform_indices = @transform_0, window_bounds = array<i64: 1, 1, 16, 128>}, {pipeline_mode = #tpu.pipeline_mode<synchronous>, transform_indices = @transform_1, window_bounds = array<i64: 1, 128, 128>}, {pipeline_mode = #tpu.pipeline_mode<synchronous>, transform_indices = @transform_2, window_bounds = array<i64: 1, 1, 128>}, {transform_indices = @transform_3, window_bounds = array<i64: 1, 16, 128>}]} {
    %c0 = arith.constant 0 : index
    %c0_0 = arith.constant 0 : index
    %c0_1 = arith.constant 0 : index
    %c0_2 = arith.constant 0 : index
    %0 = vector.load %arg2[%c0, %c0_0, %c0_1, %c0_2] : memref<1x1x16x128xbf16, #tpu.memory_space<vmem>>, vector<1x1x16x128xbf16>
    %1 = vector.shape_cast %0 : vector<1x1x16x128xbf16> to vector<16x128xbf16>
    %c0_3 = arith.constant 0 : index
    %c0_4 = arith.constant 0 : index
    %c0_5 = arith.constant 0 : index
    %2 = vector.load %arg3[%c0_3, %c0_4, %c0_5] : memref<1x128x128xbf16, #tpu.memory_space<vmem>>, vector<1x128x128xbf16>
    %3 = vector.shape_cast %2 : vector<1x128x128xbf16> to vector<128x128xbf16>
    %cst = arith.constant dense<0.000000e+00> : vector<16x128xf32>
    %4 = tpu.matmul %1, %3, %cst {dimension_numbers = #tpu.dot_dimension_numbers<[1], [0], [0], [1], [0, 0, 1, 1], [], []>} : vector<16x128xbf16>, vector<128x128xbf16>, vector<16x128xf32> -> vector<16x128xf32>
    %c0_6 = arith.constant 0 : index
    %c0_7 = arith.constant 0 : index
    %c0_8 = arith.constant 0 : index
    %5 = vector.load %arg4[%c0_6, %c0_7, %c0_8] : memref<1x1x128xf32, #tpu.memory_space<vmem>>, vector<1x1x128xf32>
    %6 = vector.shape_cast %5 : vector<1x1x128xf32> to vector<1x128xf32>
    %7 = vector.broadcast %6 : vector<1x128xf32> to vector<16x128xf32>
    %8 = arith.addf %4, %7 : vector<16x128xf32>
    %cst_9 = arith.constant 0.000000e+00 : f32
    %9 = vector.broadcast %cst_9 : f32 to vector<16x128xf32>
    %10 = arith.maximumf %8, %9 : vector<16x128xf32>
    %11 = arith.truncf %10 : vector<16x128xf32> to vector<16x128xbf16>
    %c0_10 = arith.constant 0 : index
    %c0_11 = arith.constant 0 : index
    %c0_12 = arith.constant 0 : index
    %12 = vector.load %arg5[%c0_10, %c0_11, %c0_12] : memref<1x16x128xbf16, #tpu.memory_space<vmem>>, vector<1x16x128xbf16>
    %13 = vector.shape_cast %12 : vector<1x16x128xbf16> to vector<16x128xbf16>
    %14 = vector.shape_cast %11 : vector<16x128xbf16> to vector<1x16x128xbf16>
    tpu.vector_store %arg5[%c0_10, %c0_11, %c0_12], %14 {strides = array<i32>} : memref<1x16x128xbf16, #tpu.memory_space<vmem>>, vector<1x16x128xbf16>,
    return
  }
  func.func @transform_0(%arg0: i32, %arg1: i32) -> (i32, i32, i32, i32) {
    %c0_i32 = arith.constant 0 : i32
    %c0_i32_0 = arith.constant 0 : i32
    %c0_i32_1 = arith.constant 0 : i32
    return %arg0, %arg1, %c0_i32, %c0_i32_0 : i32, i32, i32, i32
  }
  func.func @transform_1(%arg0: i32, %arg1: i32) -> (i32, i32, i32) {
    %c0_i32 = arith.constant 0 : i32
    %c0_i32_0 = arith.constant 0 : i32
    %c0_i32_1 = arith.constant 0 : i32
    %c0_i32_2 = arith.constant 0 : i32
    return %c0_i32, %c0_i32_0, %c0_i32_1 : i32, i32, i32
  }
  func.func @transform_2(%arg0: i32, %arg1: i32) -> (i32, i32, i32) {
    %c0_i32 = arith.constant 0 : i32
    %c0_i32_0 = arith.constant 0 : i32
    %c0_i32_1 = arith.constant 0 : i32
    %c0_i32_2 = arith.constant 0 : i32
    return %c0_i32, %c0_i32_0, %c0_i32_1 : i32, i32, i32
  }
  func.func @transform_3(%arg0: i32, %arg1: i32) -> (i32, i32, i32) {
    %c0_i32 = arith.constant 0 : i32
    %c0_i32_0 = arith.constant 0 : i32
    return %arg0, %arg1, %c0_i32 : i32, i32, i32
  }
}

module attributes {stable_mosaic.version = 11 : i64} {
  func.func @kernel(%arg0: i32, %arg1: i32, %arg2: memref<1x1x106x128xbf16, #tpu.memory_space<vmem>>, %arg3: memref<19x128x128xbf16, #tpu.memory_space<vmem>>, %arg4: memref<1x1x128xf32, #tpu.memory_space<vmem>>, %arg5: memref<1x40x128xbf16, #tpu.memory_space<vmem>>) attributes {dimension_semantics = [#tpu.dimension_semantics<parallel>, #tpu.dimension_semantics<parallel>], iteration_bounds = array<i64: 2, 1>, scalar_prefetch = 0 : i64, scratch_operands = 0 : i64, tpu.core_type = #tpu.core_type<tc>, window_params = [{transform_indices = @transform_0, window_bounds = array<i64: 1, 1, 106, 128>}, {pipeline_mode = #tpu.pipeline_mode<synchronous>, transform_indices = @transform_1, window_bounds = array<i64: 19, 128, 128>}, {transform_indices = @transform_2, window_bounds = array<i64: 1, 1, 128>}, {transform_indices = @transform_3, window_bounds = array<i64: 1, 40, 128>}]} {
    %c0 = arith.constant 0 : index
    %c0_0 = arith.constant 0 : index
    %c33 = arith.constant 33 : index
    %c0_1 = arith.constant 0 : index
    %0 = vector.load %arg2[%c0, %c0_0, %c33, %c0_1] : memref<1x1x106x128xbf16, #tpu.memory_space<vmem>>, vector<1x1x40x128xbf16>
    %1 = vector.shape_cast %0 : vector<1x1x40x128xbf16> to vector<40x128xbf16>
    %c0_2 = arith.constant 0 : index
    %c0_3 = arith.constant 0 : index
    %c0_4 = arith.constant 0 : index
    %2 = vector.load %arg3[%c0_2, %c0_3, %c0_4] : memref<19x128x128xbf16, #tpu.memory_space<vmem>>, vector<1x128x128xbf16>
    %3 = vector.shape_cast %2 : vector<1x128x128xbf16> to vector<128x128xbf16>
    %cst = arith.constant dense<0.000000e+00> : vector<40x128xf32>
    %4 = tpu.matmul %1, %3, %cst {dimension_numbers = #tpu.dot_dimension_numbers<[1], [0], [0], [1], [0, 0, 1, 1], [], []>} : vector<40x128xbf16>, vector<128x128xbf16>, vector<40x128xf32> -> vector<40x128xf32>
    %c0_5 = arith.constant 0 : index
    %c0_6 = arith.constant 0 : index
    %c11 = arith.constant 11 : index
    %c0_7 = arith.constant 0 : index
    %5 = vector.load %arg2[%c0_5, %c0_6, %c11, %c0_7] : memref<1x1x106x128xbf16, #tpu.memory_space<vmem>>, vector<1x1x40x128xbf16>
    %6 = vector.shape_cast %5 : vector<1x1x40x128xbf16> to vector<40x128xbf16>
    %c1 = arith.constant 1 : index
    %c0_8 = arith.constant 0 : index
    %c0_9 = arith.constant 0 : index
    %7 = vector.load %arg3[%c1, %c0_8, %c0_9] : memref<19x128x128xbf16, #tpu.memory_space<vmem>>, vector<1x128x128xbf16>
    %8 = vector.shape_cast %7 : vector<1x128x128xbf16> to vector<128x128xbf16>
    %cst_10 = arith.constant dense<0.000000e+00> : vector<40x128xf32>
    %9 = tpu.matmul %6, %8, %cst_10 {dimension_numbers = #tpu.dot_dimension_numbers<[1], [0], [0], [1], [0, 0, 1, 1], [], []>} : vector<40x128xbf16>, vector<128x128xbf16>, vector<40x128xf32> -> vector<40x128xf32>
    %10 = arith.addf %4, %9 : vector<40x128xf32>
    %c0_11 = arith.constant 0 : index
    %c0_12 = arith.constant 0 : index
    %c13 = arith.constant 13 : index
    %c0_13 = arith.constant 0 : index
    %11 = vector.load %arg2[%c0_11, %c0_12, %c13, %c0_13] : memref<1x1x106x128xbf16, #tpu.memory_space<vmem>>, vector<1x1x40x128xbf16>
    %12 = vector.shape_cast %11 : vector<1x1x40x128xbf16> to vector<40x128xbf16>
    %c2 = arith.constant 2 : index
    %c0_14 = arith.constant 0 : index
    %c0_15 = arith.constant 0 : index
    %13 = vector.load %arg3[%c2, %c0_14, %c0_15] : memref<19x128x128xbf16, #tpu.memory_space<vmem>>, vector<1x128x128xbf16>
    %14 = vector.shape_cast %13 : vector<1x128x128xbf16> to vector<128x128xbf16>
    %cst_16 = arith.constant dense<0.000000e+00> : vector<40x128xf32>
    %15 = tpu.matmul %12, %14, %cst_16 {dimension_numbers = #tpu.dot_dimension_numbers<[1], [0], [0], [1], [0, 0, 1, 1], [], []>} : vector<40x128xbf16>, vector<128x128xbf16>, vector<40x128xf32> -> vector<40x128xf32>
    %16 = arith.addf %10, %15 : vector<40x128xf32>
    %c0_17 = arith.constant 0 : index
    %c0_18 = arith.constant 0 : index
    %c15 = arith.constant 15 : index
    %c0_19 = arith.constant 0 : index
    %17 = vector.load %arg2[%c0_17, %c0_18, %c15, %c0_19] : memref<1x1x106x128xbf16, #tpu.memory_space<vmem>>, vector<1x1x40x128xbf16>
    %18 = vector.shape_cast %17 : vector<1x1x40x128xbf16> to vector<40x128xbf16>
    %c3 = arith.constant 3 : index
    %c0_20 = arith.constant 0 : index
    %c0_21 = arith.constant 0 : index
    %19 = vector.load %arg3[%c3, %c0_20, %c0_21] : memref<19x128x128xbf16, #tpu.memory_space<vmem>>, vector<1x128x128xbf16>
    %20 = vector.shape_cast %19 : vector<1x128x128xbf16> to vector<128x128xbf16>
    %cst_22 = arith.constant dense<0.000000e+00> : vector<40x128xf32>
    %21 = tpu.matmul %18, %20, %cst_22 {dimension_numbers = #tpu.dot_dimension_numbers<[1], [0], [0], [1], [0, 0, 1, 1], [], []>} : vector<40x128xbf16>, vector<128x128xbf16>, vector<40x128xf32> -> vector<40x128xf32>
    %22 = arith.addf %16, %21 : vector<40x128xf32>
    %c0_23 = arith.constant 0 : index
    %c0_24 = arith.constant 0 : index
    %c31 = arith.constant 31 : index
    %c0_25 = arith.constant 0 : index
    %23 = vector.load %arg2[%c0_23, %c0_24, %c31, %c0_25] : memref<1x1x106x128xbf16, #tpu.memory_space<vmem>>, vector<1x1x40x128xbf16>
    %24 = vector.shape_cast %23 : vector<1x1x40x128xbf16> to vector<40x128xbf16>
    %c4 = arith.constant 4 : index
    %c0_26 = arith.constant 0 : index
    %c0_27 = arith.constant 0 : index
    %25 = vector.load %arg3[%c4, %c0_26, %c0_27] : memref<19x128x128xbf16, #tpu.memory_space<vmem>>, vector<1x128x128xbf16>
    %26 = vector.shape_cast %25 : vector<1x128x128xbf16> to vector<128x128xbf16>
    %cst_28 = arith.constant dense<0.000000e+00> : vector<40x128xf32>
    %27 = tpu.matmul %24, %26, %cst_28 {dimension_numbers = #tpu.dot_dimension_numbers<[1], [0], [0], [1], [0, 0, 1, 1], [], []>} : vector<40x128xbf16>, vector<128x128xbf16>, vector<40x128xf32> -> vector<40x128xf32>
    %28 = arith.addf %22, %27 : vector<40x128xf32>
    %c0_29 = arith.constant 0 : index
    %c0_30 = arith.constant 0 : index
    %c33_31 = arith.constant 33 : index
    %c0_32 = arith.constant 0 : index
    %29 = vector.load %arg2[%c0_29, %c0_30, %c33_31, %c0_32] : memref<1x1x106x128xbf16, #tpu.memory_space<vmem>>, vector<1x1x40x128xbf16>
    %30 = vector.shape_cast %29 : vector<1x1x40x128xbf16> to vector<40x128xbf16>
    %c5 = arith.constant 5 : index
    %c0_33 = arith.constant 0 : index
    %c0_34 = arith.constant 0 : index
    %31 = vector.load %arg3[%c5, %c0_33, %c0_34] : memref<19x128x128xbf16, #tpu.memory_space<vmem>>, vector<1x128x128xbf16>
    %32 = vector.shape_cast %31 : vector<1x128x128xbf16> to vector<128x128xbf16>
    %cst_35 = arith.constant dense<0.000000e+00> : vector<40x128xf32>
    %33 = tpu.matmul %30, %32, %cst_35 {dimension_numbers = #tpu.dot_dimension_numbers<[1], [0], [0], [1], [0, 0, 1, 1], [], []>} : vector<40x128xbf16>, vector<128x128xbf16>, vector<40x128xf32> -> vector<40x128xf32>
    %34 = arith.addf %28, %33 : vector<40x128xf32>
    %c0_36 = arith.constant 0 : index
    %c0_37 = arith.constant 0 : index
    %c35 = arith.constant 35 : index
    %c0_38 = arith.constant 0 : index
    %35 = vector.load %arg2[%c0_36, %c0_37, %c35, %c0_38] : memref<1x1x106x128xbf16, #tpu.memory_space<vmem>>, vector<1x1x40x128xbf16>
    %36 = vector.shape_cast %35 : vector<1x1x40x128xbf16> to vector<40x128xbf16>
    %c6 = arith.constant 6 : index
    %c0_39 = arith.constant 0 : index
    %c0_40 = arith.constant 0 : index
    %37 = vector.load %arg3[%c6, %c0_39, %c0_40] : memref<19x128x128xbf16, #tpu.memory_space<vmem>>, vector<1x128x128xbf16>
    %38 = vector.shape_cast %37 : vector<1x128x128xbf16> to vector<128x128xbf16>
    %cst_41 = arith.constant dense<0.000000e+00> : vector<40x128xf32>
    %39 = tpu.matmul %36, %38, %cst_41 {dimension_numbers = #tpu.dot_dimension_numbers<[1], [0], [0], [1], [0, 0, 1, 1], [], []>} : vector<40x128xbf16>, vector<128x128xbf16>, vector<40x128xf32> -> vector<40x128xf32>
    %40 = arith.addf %34, %39 : vector<40x128xf32>
    %c0_42 = arith.constant 0 : index
    %c0_43 = arith.constant 0 : index
    %c51 = arith.constant 51 : index
    %c0_44 = arith.constant 0 : index
    %41 = vector.load %arg2[%c0_42, %c0_43, %c51, %c0_44] : memref<1x1x106x128xbf16, #tpu.memory_space<vmem>>, vector<1x1x40x128xbf16>
    %42 = vector.shape_cast %41 : vector<1x1x40x128xbf16> to vector<40x128xbf16>
    %c7 = arith.constant 7 : index
    %c0_45 = arith.constant 0 : index
    %c0_46 = arith.constant 0 : index
    %43 = vector.load %arg3[%c7, %c0_45, %c0_46] : memref<19x128x128xbf16, #tpu.memory_space<vmem>>, vector<1x128x128xbf16>
    %44 = vector.shape_cast %43 : vector<1x128x128xbf16> to vector<128x128xbf16>
    %cst_47 = arith.constant dense<0.000000e+00> : vector<40x128xf32>
    %45 = tpu.matmul %42, %44, %cst_47 {dimension_numbers = #tpu.dot_dimension_numbers<[1], [0], [0], [1], [0, 0, 1, 1], [], []>} : vector<40x128xbf16>, vector<128x128xbf16>, vector<40x128xf32> -> vector<40x128xf32>
    %46 = arith.addf %40, %45 : vector<40x128xf32>
    %c0_48 = arith.constant 0 : index
    %c0_49 = arith.constant 0 : index
    %c53 = arith.constant 53 : index
    %c0_50 = arith.constant 0 : index
    %47 = vector.load %arg2[%c0_48, %c0_49, %c53, %c0_50] : memref<1x1x106x128xbf16, #tpu.memory_space<vmem>>, vector<1x1x40x128xbf16>
    %48 = vector.shape_cast %47 : vector<1x1x40x128xbf16> to vector<40x128xbf16>
    %c8 = arith.constant 8 : index
    %c0_51 = arith.constant 0 : index
    %c0_52 = arith.constant 0 : index
    %49 = vector.load %arg3[%c8, %c0_51, %c0_52] : memref<19x128x128xbf16, #tpu.memory_space<vmem>>, vector<1x128x128xbf16>
    %50 = vector.shape_cast %49 : vector<1x128x128xbf16> to vector<128x128xbf16>
    %cst_53 = arith.constant dense<0.000000e+00> : vector<40x128xf32>
    %51 = tpu.matmul %48, %50, %cst_53 {dimension_numbers = #tpu.dot_dimension_numbers<[1], [0], [0], [1], [0, 0, 1, 1], [], []>} : vector<40x128xbf16>, vector<128x128xbf16>, vector<40x128xf32> -> vector<40x128xf32>
    %52 = arith.addf %46, %51 : vector<40x128xf32>
    %c0_54 = arith.constant 0 : index
    %c0_55 = arith.constant 0 : index
    %c55 = arith.constant 55 : index
    %c0_56 = arith.constant 0 : index
    %53 = vector.load %arg2[%c0_54, %c0_55, %c55, %c0_56] : memref<1x1x106x128xbf16, #tpu.memory_space<vmem>>, vector<1x1x40x128xbf16>
    %54 = vector.shape_cast %53 : vector<1x1x40x128xbf16> to vector<40x128xbf16>
    %c9 = arith.constant 9 : index
    %c0_57 = arith.constant 0 : index
    %c0_58 = arith.constant 0 : index
    %55 = vector.load %arg3[%c9, %c0_57, %c0_58] : memref<19x128x128xbf16, #tpu.memory_space<vmem>>, vector<1x128x128xbf16>
    %56 = vector.shape_cast %55 : vector<1x128x128xbf16> to vector<128x128xbf16>
    %cst_59 = arith.constant dense<0.000000e+00> : vector<40x128xf32>
    %57 = tpu.matmul %54, %56, %cst_59 {dimension_numbers = #tpu.dot_dimension_numbers<[1], [0], [0], [1], [0, 0, 1, 1], [], []>} : vector<40x128xbf16>, vector<128x128xbf16>, vector<40x128xf32> -> vector<40x128xf32>
    %58 = arith.addf %52, %57 : vector<40x128xf32>
    %c0_60 = arith.constant 0 : index
    %c0_61 = arith.constant 0 : index
    %c0_62 = arith.constant 0 : index
    %c0_63 = arith.constant 0 : index
    %59 = vector.load %arg2[%c0_60, %c0_61, %c0_62, %c0_63] : memref<1x1x106x128xbf16, #tpu.memory_space<vmem>>, vector<1x1x40x128xbf16>
    %60 = vector.shape_cast %59 : vector<1x1x40x128xbf16> to vector<40x128xbf16>
    %c10 = arith.constant 10 : index
    %c0_64 = arith.constant 0 : index
    %c0_65 = arith.constant 0 : index
    %61 = vector.load %arg3[%c10, %c0_64, %c0_65] : memref<19x128x128xbf16, #tpu.memory_space<vmem>>, vector<1x128x128xbf16>
    %62 = vector.shape_cast %61 : vector<1x128x128xbf16> to vector<128x128xbf16>
    %cst_66 = arith.constant dense<0.000000e+00> : vector<40x128xf32>
    %63 = tpu.matmul %60, %62, %cst_66 {dimension_numbers = #tpu.dot_dimension_numbers<[1], [0], [0], [1], [0, 0, 1, 1], [], []>} : vector<40x128xbf16>, vector<128x128xbf16>, vector<40x128xf32> -> vector<40x128xf32>
    %64 = arith.addf %58, %63 : vector<40x128xf32>
    %c0_67 = arith.constant 0 : index
    %c0_68 = arith.constant 0 : index
    %c3_69 = arith.constant 3 : index
    %c0_70 = arith.constant 0 : index
    %65 = vector.load %arg2[%c0_67, %c0_68, %c3_69, %c0_70] : memref<1x1x106x128xbf16, #tpu.memory_space<vmem>>, vector<1x1x40x128xbf16>
    %66 = vector.shape_cast %65 : vector<1x1x40x128xbf16> to vector<40x128xbf16>
    %c11_71 = arith.constant 11 : index
    %c0_72 = arith.constant 0 : index
    %c0_73 = arith.constant 0 : index
    %67 = vector.load %arg3[%c11_71, %c0_72, %c0_73] : memref<19x128x128xbf16, #tpu.memory_space<vmem>>, vector<1x128x128xbf16>
    %68 = vector.shape_cast %67 : vector<1x128x128xbf16> to vector<128x128xbf16>
    %cst_74 = arith.constant dense<0.000000e+00> : vector<40x128xf32>
    %69 = tpu.matmul %66, %68, %cst_74 {dimension_numbers = #tpu.dot_dimension_numbers<[1], [0], [0], [1], [0, 0, 1, 1], [], []>} : vector<40x128xbf16>, vector<128x128xbf16>, vector<40x128xf32> -> vector<40x128xf32>
    %70 = arith.addf %64, %69 : vector<40x128xf32>
    %c0_75 = arith.constant 0 : index
    %c0_76 = arith.constant 0 : index
    %c6_77 = arith.constant 6 : index
    %c0_78 = arith.constant 0 : index
    %71 = vector.load %arg2[%c0_75, %c0_76, %c6_77, %c0_78] : memref<1x1x106x128xbf16, #tpu.memory_space<vmem>>, vector<1x1x40x128xbf16>
    %72 = vector.shape_cast %71 : vector<1x1x40x128xbf16> to vector<40x128xbf16>
    %c12 = arith.constant 12 : index
    %c0_79 = arith.constant 0 : index
    %c0_80 = arith.constant 0 : index
    %73 = vector.load %arg3[%c12, %c0_79, %c0_80] : memref<19x128x128xbf16, #tpu.memory_space<vmem>>, vector<1x128x128xbf16>
    %74 = vector.shape_cast %73 : vector<1x128x128xbf16> to vector<128x128xbf16>
    %cst_81 = arith.constant dense<0.000000e+00> : vector<40x128xf32>
    %75 = tpu.matmul %72, %74, %cst_81 {dimension_numbers = #tpu.dot_dimension_numbers<[1], [0], [0], [1], [0, 0, 1, 1], [], []>} : vector<40x128xbf16>, vector<128x128xbf16>, vector<40x128xf32> -> vector<40x128xf32>
    %76 = arith.addf %70, %75 : vector<40x128xf32>
    %c0_82 = arith.constant 0 : index
    %c0_83 = arith.constant 0 : index
    %c30 = arith.constant 30 : index
    %c0_84 = arith.constant 0 : index
    %77 = vector.load %arg2[%c0_82, %c0_83, %c30, %c0_84] : memref<1x1x106x128xbf16, #tpu.memory_space<vmem>>, vector<1x1x40x128xbf16>
    %78 = vector.shape_cast %77 : vector<1x1x40x128xbf16> to vector<40x128xbf16>
    %c13_85 = arith.constant 13 : index
    %c0_86 = arith.constant 0 : index
    %c0_87 = arith.constant 0 : index
    %79 = vector.load %arg3[%c13_85, %c0_86, %c0_87] : memref<19x128x128xbf16, #tpu.memory_space<vmem>>, vector<1x128x128xbf16>
    %80 = vector.shape_cast %79 : vector<1x128x128xbf16> to vector<128x128xbf16>
    %cst_88 = arith.constant dense<0.000000e+00> : vector<40x128xf32>
    %81 = tpu.matmul %78, %80, %cst_88 {dimension_numbers = #tpu.dot_dimension_numbers<[1], [0], [0], [1], [0, 0, 1, 1], [], []>} : vector<40x128xbf16>, vector<128x128xbf16>, vector<40x128xf32> -> vector<40x128xf32>
    %82 = arith.addf %76, %81 : vector<40x128xf32>
    %c0_89 = arith.constant 0 : index
    %c0_90 = arith.constant 0 : index
    %c33_91 = arith.constant 33 : index
    %c0_92 = arith.constant 0 : index
    %83 = vector.load %arg2[%c0_89, %c0_90, %c33_91, %c0_92] : memref<1x1x106x128xbf16, #tpu.memory_space<vmem>>, vector<1x1x40x128xbf16>
    %84 = vector.shape_cast %83 : vector<1x1x40x128xbf16> to vector<40x128xbf16>
    %c14 = arith.constant 14 : index
    %c0_93 = arith.constant 0 : index
    %c0_94 = arith.constant 0 : index
    %85 = vector.load %arg3[%c14, %c0_93, %c0_94] : memref<19x128x128xbf16, #tpu.memory_space<vmem>>, vector<1x128x128xbf16>
    %86 = vector.shape_cast %85 : vector<1x128x128xbf16> to vector<128x128xbf16>
    %cst_95 = arith.constant dense<0.000000e+00> : vector<40x128xf32>
    %87 = tpu.matmul %84, %86, %cst_95 {dimension_numbers = #tpu.dot_dimension_numbers<[1], [0], [0], [1], [0, 0, 1, 1], [], []>} : vector<40x128xbf16>, vector<128x128xbf16>, vector<40x128xf32> -> vector<40x128xf32>
    %88 = arith.addf %82, %87 : vector<40x128xf32>
    %c0_96 = arith.constant 0 : index
    %c0_97 = arith.constant 0 : index
    %c36 = arith.constant 36 : index
    %c0_98 = arith.constant 0 : index
    %89 = vector.load %arg2[%c0_96, %c0_97, %c36, %c0_98] : memref<1x1x106x128xbf16, #tpu.memory_space<vmem>>, vector<1x1x40x128xbf16>
    %90 = vector.shape_cast %89 : vector<1x1x40x128xbf16> to vector<40x128xbf16>
    %c15_99 = arith.constant 15 : index
    %c0_100 = arith.constant 0 : index
    %c0_101 = arith.constant 0 : index
    %91 = vector.load %arg3[%c15_99, %c0_100, %c0_101] : memref<19x128x128xbf16, #tpu.memory_space<vmem>>, vector<1x128x128xbf16>
    %92 = vector.shape_cast %91 : vector<1x128x128xbf16> to vector<128x128xbf16>
    %cst_102 = arith.constant dense<0.000000e+00> : vector<40x128xf32>
    %93 = tpu.matmul %90, %92, %cst_102 {dimension_numbers = #tpu.dot_dimension_numbers<[1], [0], [0], [1], [0, 0, 1, 1], [], []>} : vector<40x128xbf16>, vector<128x128xbf16>, vector<40x128xf32> -> vector<40x128xf32>
    %94 = arith.addf %88, %93 : vector<40x128xf32>
    %c0_103 = arith.constant 0 : index
    %c0_104 = arith.constant 0 : index
    %c60 = arith.constant 60 : index
    %c0_105 = arith.constant 0 : index
    %95 = vector.load %arg2[%c0_103, %c0_104, %c60, %c0_105] : memref<1x1x106x128xbf16, #tpu.memory_space<vmem>>, vector<1x1x40x128xbf16>
    %96 = vector.shape_cast %95 : vector<1x1x40x128xbf16> to vector<40x128xbf16>
    %c16 = arith.constant 16 : index
    %c0_106 = arith.constant 0 : index
    %c0_107 = arith.constant 0 : index
    %97 = vector.load %arg3[%c16, %c0_106, %c0_107] : memref<19x128x128xbf16, #tpu.memory_space<vmem>>, vector<1x128x128xbf16>
    %98 = vector.shape_cast %97 : vector<1x128x128xbf16> to vector<128x128xbf16>
    %cst_108 = arith.constant dense<0.000000e+00> : vector<40x128xf32>
    %99 = tpu.matmul %96, %98, %cst_108 {dimension_numbers = #tpu.dot_dimension_numbers<[1], [0], [0], [1], [0, 0, 1, 1], [], []>} : vector<40x128xbf16>, vector<128x128xbf16>, vector<40x128xf32> -> vector<40x128xf32>
    %100 = arith.addf %94, %99 : vector<40x128xf32>
    %c0_109 = arith.constant 0 : index
    %c0_110 = arith.constant 0 : index
    %c63 = arith.constant 63 : index
    %c0_111 = arith.constant 0 : index
    %101 = vector.load %arg2[%c0_109, %c0_110, %c63, %c0_111] : memref<1x1x106x128xbf16, #tpu.memory_space<vmem>>, vector<1x1x40x128xbf16>
    %102 = vector.shape_cast %101 : vector<1x1x40x128xbf16> to vector<40x128xbf16>
    %c17 = arith.constant 17 : index
    %c0_112 = arith.constant 0 : index
    %c0_113 = arith.constant 0 : index
    %103 = vector.load %arg3[%c17, %c0_112, %c0_113] : memref<19x128x128xbf16, #tpu.memory_space<vmem>>, vector<1x128x128xbf16>
    %104 = vector.shape_cast %103 : vector<1x128x128xbf16> to vector<128x128xbf16>
    %cst_114 = arith.constant dense<0.000000e+00> : vector<40x128xf32>
    %105 = tpu.matmul %102, %104, %cst_114 {dimension_numbers = #tpu.dot_dimension_numbers<[1], [0], [0], [1], [0, 0, 1, 1], [], []>} : vector<40x128xbf16>, vector<128x128xbf16>, vector<40x128xf32> -> vector<40x128xf32>
    %106 = arith.addf %100, %105 : vector<40x128xf32>
    %c0_115 = arith.constant 0 : index
    %c0_116 = arith.constant 0 : index
    %c66 = arith.constant 66 : index
    %c0_117 = arith.constant 0 : index
    %107 = vector.load %arg2[%c0_115, %c0_116, %c66, %c0_117] : memref<1x1x106x128xbf16, #tpu.memory_space<vmem>>, vector<1x1x40x128xbf16>
    %108 = vector.shape_cast %107 : vector<1x1x40x128xbf16> to vector<40x128xbf16>
    %c18 = arith.constant 18 : index
    %c0_118 = arith.constant 0 : index
    %c0_119 = arith.constant 0 : index
    %109 = vector.load %arg3[%c18, %c0_118, %c0_119] : memref<19x128x128xbf16, #tpu.memory_space<vmem>>, vector<1x128x128xbf16>
    %110 = vector.shape_cast %109 : vector<1x128x128xbf16> to vector<128x128xbf16>
    %cst_120 = arith.constant dense<0.000000e+00> : vector<40x128xf32>
    %111 = tpu.matmul %108, %110, %cst_120 {dimension_numbers = #tpu.dot_dimension_numbers<[1], [0], [0], [1], [0, 0, 1, 1], [], []>} : vector<40x128xbf16>, vector<128x128xbf16>, vector<40x128xf32> -> vector<40x128xf32>
    %112 = arith.addf %106, %111 : vector<40x128xf32>
    %c0_121 = arith.constant 0 : index
    %c0_122 = arith.constant 0 : index
    %c0_123 = arith.constant 0 : index
    %113 = vector.load %arg4[%c0_121, %c0_122, %c0_123] : memref<1x1x128xf32, #tpu.memory_space<vmem>>, vector<1x1x128xf32>
    %114 = vector.shape_cast %113 : vector<1x1x128xf32> to vector<1x128xf32>
    %115 = vector.broadcast %114 : vector<1x128xf32> to vector<40x128xf32>
    %116 = arith.addf %112, %115 : vector<40x128xf32>
    %cst_124 = arith.constant 0.000000e+00 : f32
    %117 = vector.broadcast %cst_124 : f32 to vector<40x128xf32>
    %118 = arith.maximumf %116, %117 : vector<40x128xf32>
    %119 = arith.truncf %118 : vector<40x128xf32> to vector<40x128xbf16>
    %c0_125 = arith.constant 0 : index
    %c0_126 = arith.constant 0 : index
    %c0_127 = arith.constant 0 : index
    %120 = vector.load %arg5[%c0_125, %c0_126, %c0_127] : memref<1x40x128xbf16, #tpu.memory_space<vmem>>, vector<1x40x128xbf16>
    %121 = vector.shape_cast %120 : vector<1x40x128xbf16> to vector<40x128xbf16>
    %122 = vector.shape_cast %119 : vector<40x128xbf16> to vector<1x40x128xbf16>
    tpu.vector_store %arg5[%c0_125, %c0_126, %c0_127], %122 {strides = array<i32>} : memref<1x40x128xbf16, #tpu.memory_space<vmem>>, vector<1x40x128xbf16>,
    return
  }
  func.func @transform_0(%arg0: i32, %arg1: i32) -> (i32, i32, i32, i32) {
    %c0_i32 = arith.constant 0 : i32
    %c0_i32_0 = arith.constant 0 : i32
    %c0_i32_1 = arith.constant 0 : i32
    return %arg0, %arg1, %c0_i32, %c0_i32_0 : i32, i32, i32, i32
  }
  func.func @transform_1(%arg0: i32, %arg1: i32) -> (i32, i32, i32) {
    %c0_i32 = arith.constant 0 : i32
    %c0_i32_0 = arith.constant 0 : i32
    %c0_i32_1 = arith.constant 0 : i32
    %c0_i32_2 = arith.constant 0 : i32
    return %c0_i32, %c0_i32_0, %c0_i32_1 : i32, i32, i32
  }
  func.func @transform_2(%arg0: i32, %arg1: i32) -> (i32, i32, i32) {
    %c0_i32 = arith.constant 0 : i32
    %c0_i32_0 = arith.constant 0 : i32
    %c0_i32_1 = arith.constant 0 : i32
    return %arg0, %c0_i32, %c0_i32_0 : i32, i32, i32
  }
  func.func @transform_3(%arg0: i32, %arg1: i32) -> (i32, i32, i32) {
    %c0_i32 = arith.constant 0 : i32
    %c0_i32_0 = arith.constant 0 : i32
    return %arg0, %arg1, %c0_i32 : i32, i32, i32
  }
}

module attributes {stable_mosaic.version = 11 : i64} {
  func.func @kernel(%arg0: i32, %arg1: i32, %arg2: memref<1x1x326x128xbf16, #tpu.memory_space<vmem>>, %arg3: memref<9x128x128xbf16, #tpu.memory_space<vmem>>, %arg4: memref<1x1x128xf32, #tpu.memory_space<vmem>>, %arg5: memref<1x288x128xbf16, #tpu.memory_space<vmem>>) attributes {dimension_semantics = [#tpu.dimension_semantics<parallel>, #tpu.dimension_semantics<parallel>], iteration_bounds = array<i64: 2, 1>, scalar_prefetch = 0 : i64, scratch_operands = 0 : i64, tpu.core_type = #tpu.core_type<tc>, window_params = [{transform_indices = @transform_0, window_bounds = array<i64: 1, 1, 326, 128>}, {pipeline_mode = #tpu.pipeline_mode<synchronous>, transform_indices = @transform_1, window_bounds = array<i64: 9, 128, 128>}, {pipeline_mode = #tpu.pipeline_mode<synchronous>, transform_indices = @transform_2, window_bounds = array<i64: 1, 1, 128>}, {transform_indices = @transform_3, window_bounds = array<i64: 1, 288, 128>}]} {
    %c0 = arith.constant 0 : index
    %c0_0 = arith.constant 0 : index
    %c0_1 = arith.constant 0 : index
    %c0_2 = arith.constant 0 : index
    %0 = vector.load %arg2[%c0, %c0_0, %c0_1, %c0_2] : memref<1x1x326x128xbf16, #tpu.memory_space<vmem>>, vector<1x1x288x128xbf16>
    %1 = vector.shape_cast %0 : vector<1x1x288x128xbf16> to vector<288x128xbf16>
    %c0_3 = arith.constant 0 : index
    %c0_4 = arith.constant 0 : index
    %c0_5 = arith.constant 0 : index
    %2 = vector.load %arg3[%c0_3, %c0_4, %c0_5] : memref<9x128x128xbf16, #tpu.memory_space<vmem>>, vector<1x128x128xbf16>
    %3 = vector.shape_cast %2 : vector<1x128x128xbf16> to vector<128x128xbf16>
    %cst = arith.constant dense<0.000000e+00> : vector<288x128xf32>
    %4 = tpu.matmul %1, %3, %cst {dimension_numbers = #tpu.dot_dimension_numbers<[1], [0], [0], [1], [0, 0, 1, 1], [], []>} : vector<288x128xbf16>, vector<128x128xbf16>, vector<288x128xf32> -> vector<288x128xf32>
    %c0_6 = arith.constant 0 : index
    %c0_7 = arith.constant 0 : index
    %c1 = arith.constant 1 : index
    %c0_8 = arith.constant 0 : index
    %5 = vector.load %arg2[%c0_6, %c0_7, %c1, %c0_8] : memref<1x1x326x128xbf16, #tpu.memory_space<vmem>>, vector<1x1x288x128xbf16>
    %6 = vector.shape_cast %5 : vector<1x1x288x128xbf16> to vector<288x128xbf16>
    %c1_9 = arith.constant 1 : index
    %c0_10 = arith.constant 0 : index
    %c0_11 = arith.constant 0 : index
    %7 = vector.load %arg3[%c1_9, %c0_10, %c0_11] : memref<9x128x128xbf16, #tpu.memory_space<vmem>>, vector<1x128x128xbf16>
    %8 = vector.shape_cast %7 : vector<1x128x128xbf16> to vector<128x128xbf16>
    %cst_12 = arith.constant dense<0.000000e+00> : vector<288x128xf32>
    %9 = tpu.matmul %6, %8, %cst_12 {dimension_numbers = #tpu.dot_dimension_numbers<[1], [0], [0], [1], [0, 0, 1, 1], [], []>} : vector<288x128xbf16>, vector<128x128xbf16>, vector<288x128xf32> -> vector<288x128xf32>
    %10 = arith.addf %4, %9 : vector<288x128xf32>
    %c0_13 = arith.constant 0 : index
    %c0_14 = arith.constant 0 : index
    %c2 = arith.constant 2 : index
    %c0_15 = arith.constant 0 : index
    %11 = vector.load %arg2[%c0_13, %c0_14, %c2, %c0_15] : memref<1x1x326x128xbf16, #tpu.memory_space<vmem>>, vector<1x1x288x128xbf16>
    %12 = vector.shape_cast %11 : vector<1x1x288x128xbf16> to vector<288x128xbf16>
    %c2_16 = arith.constant 2 : index
    %c0_17 = arith.constant 0 : index
    %c0_18 = arith.constant 0 : index
    %13 = vector.load %arg3[%c2_16, %c0_17, %c0_18] : memref<9x128x128xbf16, #tpu.memory_space<vmem>>, vector<1x128x128xbf16>
    %14 = vector.shape_cast %13 : vector<1x128x128xbf16> to vector<128x128xbf16>
    %cst_19 = arith.constant dense<0.000000e+00> : vector<288x128xf32>
    %15 = tpu.matmul %12, %14, %cst_19 {dimension_numbers = #tpu.dot_dimension_numbers<[1], [0], [0], [1], [0, 0, 1, 1], [], []>} : vector<288x128xbf16>, vector<128x128xbf16>, vector<288x128xf32> -> vector<288x128xf32>
    %16 = arith.addf %10, %15 : vector<288x128xf32>
    %c0_20 = arith.constant 0 : index
    %c0_21 = arith.constant 0 : index
    %c18 = arith.constant 18 : index
    %c0_22 = arith.constant 0 : index
    %17 = vector.load %arg2[%c0_20, %c0_21, %c18, %c0_22] : memref<1x1x326x128xbf16, #tpu.memory_space<vmem>>, vector<1x1x288x128xbf16>
    %18 = vector.shape_cast %17 : vector<1x1x288x128xbf16> to vector<288x128xbf16>
    %c3 = arith.constant 3 : index
    %c0_23 = arith.constant 0 : index
    %c0_24 = arith.constant 0 : index
    %19 = vector.load %arg3[%c3, %c0_23, %c0_24] : memref<9x128x128xbf16, #tpu.memory_space<vmem>>, vector<1x128x128xbf16>
    %20 = vector.shape_cast %19 : vector<1x128x128xbf16> to vector<128x128xbf16>
    %cst_25 = arith.constant dense<0.000000e+00> : vector<288x128xf32>
    %21 = tpu.matmul %18, %20, %cst_25 {dimension_numbers = #tpu.dot_dimension_numbers<[1], [0], [0], [1], [0, 0, 1, 1], [], []>} : vector<288x128xbf16>, vector<128x128xbf16>, vector<288x128xf32> -> vector<288x128xf32>
    %22 = arith.addf %16, %21 : vector<288x128xf32>
    %c0_26 = arith.constant 0 : index
    %c0_27 = arith.constant 0 : index
    %c19 = arith.constant 19 : index
    %c0_28 = arith.constant 0 : index
    %23 = vector.load %arg2[%c0_26, %c0_27, %c19, %c0_28] : memref<1x1x326x128xbf16, #tpu.memory_space<vmem>>, vector<1x1x288x128xbf16>
    %24 = vector.shape_cast %23 : vector<1x1x288x128xbf16> to vector<288x128xbf16>
    %c4 = arith.constant 4 : index
    %c0_29 = arith.constant 0 : index
    %c0_30 = arith.constant 0 : index
    %25 = vector.load %arg3[%c4, %c0_29, %c0_30] : memref<9x128x128xbf16, #tpu.memory_space<vmem>>, vector<1x128x128xbf16>
    %26 = vector.shape_cast %25 : vector<1x128x128xbf16> to vector<128x128xbf16>
    %cst_31 = arith.constant dense<0.000000e+00> : vector<288x128xf32>
    %27 = tpu.matmul %24, %26, %cst_31 {dimension_numbers = #tpu.dot_dimension_numbers<[1], [0], [0], [1], [0, 0, 1, 1], [], []>} : vector<288x128xbf16>, vector<128x128xbf16>, vector<288x128xf32> -> vector<288x128xf32>
    %28 = arith.addf %22, %27 : vector<288x128xf32>
    %c0_32 = arith.constant 0 : index
    %c0_33 = arith.constant 0 : index
    %c20 = arith.constant 20 : index
    %c0_34 = arith.constant 0 : index
    %29 = vector.load %arg2[%c0_32, %c0_33, %c20, %c0_34] : memref<1x1x326x128xbf16, #tpu.memory_space<vmem>>, vector<1x1x288x128xbf16>
    %30 = vector.shape_cast %29 : vector<1x1x288x128xbf16> to vector<288x128xbf16>
    %c5 = arith.constant 5 : index
    %c0_35 = arith.constant 0 : index
    %c0_36 = arith.constant 0 : index
    %31 = vector.load %arg3[%c5, %c0_35, %c0_36] : memref<9x128x128xbf16, #tpu.memory_space<vmem>>, vector<1x128x128xbf16>
    %32 = vector.shape_cast %31 : vector<1x128x128xbf16> to vector<128x128xbf16>
    %cst_37 = arith.constant dense<0.000000e+00> : vector<288x128xf32>
    %33 = tpu.matmul %30, %32, %cst_37 {dimension_numbers = #tpu.dot_dimension_numbers<[1], [0], [0], [1], [0, 0, 1, 1], [], []>} : vector<288x128xbf16>, vector<128x128xbf16>, vector<288x128xf32> -> vector<288x128xf32>
    %34 = arith.addf %28, %33 : vector<288x128xf32>
    %c0_38 = arith.constant 0 : index
    %c0_39 = arith.constant 0 : index
    %c36 = arith.constant 36 : index
    %c0_40 = arith.constant 0 : index
    %35 = vector.load %arg2[%c0_38, %c0_39, %c36, %c0_40] : memref<1x1x326x128xbf16, #tpu.memory_space<vmem>>, vector<1x1x288x128xbf16>
    %36 = vector.shape_cast %35 : vector<1x1x288x128xbf16> to vector<288x128xbf16>
    %c6 = arith.constant 6 : index
    %c0_41 = arith.constant 0 : index
    %c0_42 = arith.constant 0 : index
    %37 = vector.load %arg3[%c6, %c0_41, %c0_42] : memref<9x128x128xbf16, #tpu.memory_space<vmem>>, vector<1x128x128xbf16>
    %38 = vector.shape_cast %37 : vector<1x128x128xbf16> to vector<128x128xbf16>
    %cst_43 = arith.constant dense<0.000000e+00> : vector<288x128xf32>
    %39 = tpu.matmul %36, %38, %cst_43 {dimension_numbers = #tpu.dot_dimension_numbers<[1], [0], [0], [1], [0, 0, 1, 1], [], []>} : vector<288x128xbf16>, vector<128x128xbf16>, vector<288x128xf32> -> vector<288x128xf32>
    %40 = arith.addf %34, %39 : vector<288x128xf32>
    %c0_44 = arith.constant 0 : index
    %c0_45 = arith.constant 0 : index
    %c37 = arith.constant 37 : index
    %c0_46 = arith.constant 0 : index
    %41 = vector.load %arg2[%c0_44, %c0_45, %c37, %c0_46] : memref<1x1x326x128xbf16, #tpu.memory_space<vmem>>, vector<1x1x288x128xbf16>
    %42 = vector.shape_cast %41 : vector<1x1x288x128xbf16> to vector<288x128xbf16>
    %c7 = arith.constant 7 : index
    %c0_47 = arith.constant 0 : index
    %c0_48 = arith.constant 0 : index
    %43 = vector.load %arg3[%c7, %c0_47, %c0_48] : memref<9x128x128xbf16, #tpu.memory_space<vmem>>, vector<1x128x128xbf16>
    %44 = vector.shape_cast %43 : vector<1x128x128xbf16> to vector<128x128xbf16>
    %cst_49 = arith.constant dense<0.000000e+00> : vector<288x128xf32>
    %45 = tpu.matmul %42, %44, %cst_49 {dimension_numbers = #tpu.dot_dimension_numbers<[1], [0], [0], [1], [0, 0, 1, 1], [], []>} : vector<288x128xbf16>, vector<128x128xbf16>, vector<288x128xf32> -> vector<288x128xf32>
    %46 = arith.addf %40, %45 : vector<288x128xf32>
    %c0_50 = arith.constant 0 : index
    %c0_51 = arith.constant 0 : index
    %c38 = arith.constant 38 : index
    %c0_52 = arith.constant 0 : index
    %47 = vector.load %arg2[%c0_50, %c0_51, %c38, %c0_52] : memref<1x1x326x128xbf16, #tpu.memory_space<vmem>>, vector<1x1x288x128xbf16>
    %48 = vector.shape_cast %47 : vector<1x1x288x128xbf16> to vector<288x128xbf16>
    %c8 = arith.constant 8 : index
    %c0_53 = arith.constant 0 : index
    %c0_54 = arith.constant 0 : index
    %49 = vector.load %arg3[%c8, %c0_53, %c0_54] : memref<9x128x128xbf16, #tpu.memory_space<vmem>>, vector<1x128x128xbf16>
    %50 = vector.shape_cast %49 : vector<1x128x128xbf16> to vector<128x128xbf16>
    %cst_55 = arith.constant dense<0.000000e+00> : vector<288x128xf32>
    %51 = tpu.matmul %48, %50, %cst_55 {dimension_numbers = #tpu.dot_dimension_numbers<[1], [0], [0], [1], [0, 0, 1, 1], [], []>} : vector<288x128xbf16>, vector<128x128xbf16>, vector<288x128xf32> -> vector<288x128xf32>
    %52 = arith.addf %46, %51 : vector<288x128xf32>
    %c0_56 = arith.constant 0 : index
    %c0_57 = arith.constant 0 : index
    %c0_58 = arith.constant 0 : index
    %53 = vector.load %arg4[%c0_56, %c0_57, %c0_58] : memref<1x1x128xf32, #tpu.memory_space<vmem>>, vector<1x1x128xf32>
    %54 = vector.shape_cast %53 : vector<1x1x128xf32> to vector<1x128xf32>
    %55 = vector.broadcast %54 : vector<1x128xf32> to vector<288x128xf32>
    %56 = arith.addf %52, %55 : vector<288x128xf32>
    %cst_59 = arith.constant 0.000000e+00 : f32
    %57 = vector.broadcast %cst_59 : f32 to vector<288x128xf32>
    %58 = arith.maximumf %56, %57 : vector<288x128xf32>
    %59 = arith.truncf %58 : vector<288x128xf32> to vector<288x128xbf16>
    %c0_60 = arith.constant 0 : index
    %c0_61 = arith.constant 0 : index
    %c0_62 = arith.constant 0 : index
    %60 = vector.load %arg5[%c0_60, %c0_61, %c0_62] : memref<1x288x128xbf16, #tpu.memory_space<vmem>>, vector<1x288x128xbf16>
    %61 = vector.shape_cast %60 : vector<1x288x128xbf16> to vector<288x128xbf16>
    %62 = vector.shape_cast %59 : vector<288x128xbf16> to vector<1x288x128xbf16>
    tpu.vector_store %arg5[%c0_60, %c0_61, %c0_62], %62 {strides = array<i32>} : memref<1x288x128xbf16, #tpu.memory_space<vmem>>, vector<1x288x128xbf16>,
    return
  }
  func.func @transform_0(%arg0: i32, %arg1: i32) -> (i32, i32, i32, i32) {
    %c0_i32 = arith.constant 0 : i32
    %c0_i32_0 = arith.constant 0 : i32
    %c0_i32_1 = arith.constant 0 : i32
    return %arg0, %arg1, %c0_i32, %c0_i32_0 : i32, i32, i32, i32
  }
  func.func @transform_1(%arg0: i32, %arg1: i32) -> (i32, i32, i32) {
    %c0_i32 = arith.constant 0 : i32
    %c0_i32_0 = arith.constant 0 : i32
    %c0_i32_1 = arith.constant 0 : i32
    %c0_i32_2 = arith.constant 0 : i32
    return %c0_i32, %c0_i32_0, %c0_i32_1 : i32, i32, i32
  }
  func.func @transform_2(%arg0: i32, %arg1: i32) -> (i32, i32, i32) {
    %c0_i32 = arith.constant 0 : i32
    %c0_i32_0 = arith.constant 0 : i32
    %c0_i32_1 = arith.constant 0 : i32
    %c0_i32_2 = arith.constant 0 : i32
    return %c0_i32, %c0_i32_0, %c0_i32_1 : i32, i32, i32
  }
  func.func @transform_3(%arg0: i32, %arg1: i32) -> (i32, i32, i32) {
    %c0_i32 = arith.constant 0 : i32
    %c0_i32_0 = arith.constant 0 : i32
    return %arg0, %arg1, %c0_i32 : i32, i32, i32
  }
}

module attributes {stable_mosaic.version = 11 : i64} {
  func.func @kernel(%arg0: i32, %arg1: i32, %arg2: memref<1x1x326x128xbf16, #tpu.memory_space<vmem>>, %arg3: memref<9x128x128xbf16, #tpu.memory_space<vmem>>, %arg4: memref<1x1x128xf32, #tpu.memory_space<vmem>>, %arg5: memref<1x288x128xbf16, #tpu.memory_space<vmem>>) attributes {dimension_semantics = [#tpu.dimension_semantics<parallel>, #tpu.dimension_semantics<parallel>], iteration_bounds = array<i64: 2, 1>, scalar_prefetch = 0 : i64, scratch_operands = 0 : i64, tpu.core_type = #tpu.core_type<tc>, window_params = [{transform_indices = @transform_0, window_bounds = array<i64: 1, 1, 326, 128>}, {pipeline_mode = #tpu.pipeline_mode<synchronous>, transform_indices = @transform_1, window_bounds = array<i64: 9, 128, 128>}, {pipeline_mode = #tpu.pipeline_mode<synchronous>, transform_indices = @transform_2, window_bounds = array<i64: 1, 1, 128>}, {transform_indices = @transform_3, window_bounds = array<i64: 1, 288, 128>}]} {
    %c0 = arith.constant 0 : index
    %c0_0 = arith.constant 0 : index
    %c0_1 = arith.constant 0 : index
    %c0_2 = arith.constant 0 : index
    %0 = vector.load %arg2[%c0, %c0_0, %c0_1, %c0_2] : memref<1x1x326x128xbf16, #tpu.memory_space<vmem>>, vector<1x1x288x128xbf16>
    %1 = vector.shape_cast %0 : vector<1x1x288x128xbf16> to vector<288x128xbf16>
    %c0_3 = arith.constant 0 : index
    %c0_4 = arith.constant 0 : index
    %c0_5 = arith.constant 0 : index
    %2 = vector.load %arg3[%c0_3, %c0_4, %c0_5] : memref<9x128x128xbf16, #tpu.memory_space<vmem>>, vector<1x128x128xbf16>
    %3 = vector.shape_cast %2 : vector<1x128x128xbf16> to vector<128x128xbf16>
    %cst = arith.constant dense<0.000000e+00> : vector<288x128xf32>
    %4 = tpu.matmul %1, %3, %cst {dimension_numbers = #tpu.dot_dimension_numbers<[1], [0], [0], [1], [0, 0, 1, 1], [], []>} : vector<288x128xbf16>, vector<128x128xbf16>, vector<288x128xf32> -> vector<288x128xf32>
    %c0_6 = arith.constant 0 : index
    %c0_7 = arith.constant 0 : index
    %c1 = arith.constant 1 : index
    %c0_8 = arith.constant 0 : index
    %5 = vector.load %arg2[%c0_6, %c0_7, %c1, %c0_8] : memref<1x1x326x128xbf16, #tpu.memory_space<vmem>>, vector<1x1x288x128xbf16>
    %6 = vector.shape_cast %5 : vector<1x1x288x128xbf16> to vector<288x128xbf16>
    %c1_9 = arith.constant 1 : index
    %c0_10 = arith.constant 0 : index
    %c0_11 = arith.constant 0 : index
    %7 = vector.load %arg3[%c1_9, %c0_10, %c0_11] : memref<9x128x128xbf16, #tpu.memory_space<vmem>>, vector<1x128x128xbf16>
    %8 = vector.shape_cast %7 : vector<1x128x128xbf16> to vector<128x128xbf16>
    %cst_12 = arith.constant dense<0.000000e+00> : vector<288x128xf32>
    %9 = tpu.matmul %6, %8, %cst_12 {dimension_numbers = #tpu.dot_dimension_numbers<[1], [0], [0], [1], [0, 0, 1, 1], [], []>} : vector<288x128xbf16>, vector<128x128xbf16>, vector<288x128xf32> -> vector<288x128xf32>
    %10 = arith.addf %4, %9 : vector<288x128xf32>
    %c0_13 = arith.constant 0 : index
    %c0_14 = arith.constant 0 : index
    %c2 = arith.constant 2 : index
    %c0_15 = arith.constant 0 : index
    %11 = vector.load %arg2[%c0_13, %c0_14, %c2, %c0_15] : memref<1x1x326x128xbf16, #tpu.memory_space<vmem>>, vector<1x1x288x128xbf16>
    %12 = vector.shape_cast %11 : vector<1x1x288x128xbf16> to vector<288x128xbf16>
    %c2_16 = arith.constant 2 : index
    %c0_17 = arith.constant 0 : index
    %c0_18 = arith.constant 0 : index
    %13 = vector.load %arg3[%c2_16, %c0_17, %c0_18] : memref<9x128x128xbf16, #tpu.memory_space<vmem>>, vector<1x128x128xbf16>
    %14 = vector.shape_cast %13 : vector<1x128x128xbf16> to vector<128x128xbf16>
    %cst_19 = arith.constant dense<0.000000e+00> : vector<288x128xf32>
    %15 = tpu.matmul %12, %14, %cst_19 {dimension_numbers = #tpu.dot_dimension_numbers<[1], [0], [0], [1], [0, 0, 1, 1], [], []>} : vector<288x128xbf16>, vector<128x128xbf16>, vector<288x128xf32> -> vector<288x128xf32>
    %16 = arith.addf %10, %15 : vector<288x128xf32>
    %c0_20 = arith.constant 0 : index
    %c0_21 = arith.constant 0 : index
    %c18 = arith.constant 18 : index
    %c0_22 = arith.constant 0 : index
    %17 = vector.load %arg2[%c0_20, %c0_21, %c18, %c0_22] : memref<1x1x326x128xbf16, #tpu.memory_space<vmem>>, vector<1x1x288x128xbf16>
    %18 = vector.shape_cast %17 : vector<1x1x288x128xbf16> to vector<288x128xbf16>
    %c3 = arith.constant 3 : index
    %c0_23 = arith.constant 0 : index
    %c0_24 = arith.constant 0 : index
    %19 = vector.load %arg3[%c3, %c0_23, %c0_24] : memref<9x128x128xbf16, #tpu.memory_space<vmem>>, vector<1x128x128xbf16>
    %20 = vector.shape_cast %19 : vector<1x128x128xbf16> to vector<128x128xbf16>
    %cst_25 = arith.constant dense<0.000000e+00> : vector<288x128xf32>
    %21 = tpu.matmul %18, %20, %cst_25 {dimension_numbers = #tpu.dot_dimension_numbers<[1], [0], [0], [1], [0, 0, 1, 1], [], []>} : vector<288x128xbf16>, vector<128x128xbf16>, vector<288x128xf32> -> vector<288x128xf32>
    %22 = arith.addf %16, %21 : vector<288x128xf32>
    %c0_26 = arith.constant 0 : index
    %c0_27 = arith.constant 0 : index
    %c19 = arith.constant 19 : index
    %c0_28 = arith.constant 0 : index
    %23 = vector.load %arg2[%c0_26, %c0_27, %c19, %c0_28] : memref<1x1x326x128xbf16, #tpu.memory_space<vmem>>, vector<1x1x288x128xbf16>
    %24 = vector.shape_cast %23 : vector<1x1x288x128xbf16> to vector<288x128xbf16>
    %c4 = arith.constant 4 : index
    %c0_29 = arith.constant 0 : index
    %c0_30 = arith.constant 0 : index
    %25 = vector.load %arg3[%c4, %c0_29, %c0_30] : memref<9x128x128xbf16, #tpu.memory_space<vmem>>, vector<1x128x128xbf16>
    %26 = vector.shape_cast %25 : vector<1x128x128xbf16> to vector<128x128xbf16>
    %cst_31 = arith.constant dense<0.000000e+00> : vector<288x128xf32>
    %27 = tpu.matmul %24, %26, %cst_31 {dimension_numbers = #tpu.dot_dimension_numbers<[1], [0], [0], [1], [0, 0, 1, 1], [], []>} : vector<288x128xbf16>, vector<128x128xbf16>, vector<288x128xf32> -> vector<288x128xf32>
    %28 = arith.addf %22, %27 : vector<288x128xf32>
    %c0_32 = arith.constant 0 : index
    %c0_33 = arith.constant 0 : index
    %c20 = arith.constant 20 : index
    %c0_34 = arith.constant 0 : index
    %29 = vector.load %arg2[%c0_32, %c0_33, %c20, %c0_34] : memref<1x1x326x128xbf16, #tpu.memory_space<vmem>>, vector<1x1x288x128xbf16>
    %30 = vector.shape_cast %29 : vector<1x1x288x128xbf16> to vector<288x128xbf16>
    %c5 = arith.constant 5 : index
    %c0_35 = arith.constant 0 : index
    %c0_36 = arith.constant 0 : index
    %31 = vector.load %arg3[%c5, %c0_35, %c0_36] : memref<9x128x128xbf16, #tpu.memory_space<vmem>>, vector<1x128x128xbf16>
    %32 = vector.shape_cast %31 : vector<1x128x128xbf16> to vector<128x128xbf16>
    %cst_37 = arith.constant dense<0.000000e+00> : vector<288x128xf32>
    %33 = tpu.matmul %30, %32, %cst_37 {dimension_numbers = #tpu.dot_dimension_numbers<[1], [0], [0], [1], [0, 0, 1, 1], [], []>} : vector<288x128xbf16>, vector<128x128xbf16>, vector<288x128xf32> -> vector<288x128xf32>
    %34 = arith.addf %28, %33 : vector<288x128xf32>
    %c0_38 = arith.constant 0 : index
    %c0_39 = arith.constant 0 : index
    %c36 = arith.constant 36 : index
    %c0_40 = arith.constant 0 : index
    %35 = vector.load %arg2[%c0_38, %c0_39, %c36, %c0_40] : memref<1x1x326x128xbf16, #tpu.memory_space<vmem>>, vector<1x1x288x128xbf16>
    %36 = vector.shape_cast %35 : vector<1x1x288x128xbf16> to vector<288x128xbf16>
    %c6 = arith.constant 6 : index
    %c0_41 = arith.constant 0 : index
    %c0_42 = arith.constant 0 : index
    %37 = vector.load %arg3[%c6, %c0_41, %c0_42] : memref<9x128x128xbf16, #tpu.memory_space<vmem>>, vector<1x128x128xbf16>
    %38 = vector.shape_cast %37 : vector<1x128x128xbf16> to vector<128x128xbf16>
    %cst_43 = arith.constant dense<0.000000e+00> : vector<288x128xf32>
    %39 = tpu.matmul %36, %38, %cst_43 {dimension_numbers = #tpu.dot_dimension_numbers<[1], [0], [0], [1], [0, 0, 1, 1], [], []>} : vector<288x128xbf16>, vector<128x128xbf16>, vector<288x128xf32> -> vector<288x128xf32>
    %40 = arith.addf %34, %39 : vector<288x128xf32>
    %c0_44 = arith.constant 0 : index
    %c0_45 = arith.constant 0 : index
    %c37 = arith.constant 37 : index
    %c0_46 = arith.constant 0 : index
    %41 = vector.load %arg2[%c0_44, %c0_45, %c37, %c0_46] : memref<1x1x326x128xbf16, #tpu.memory_space<vmem>>, vector<1x1x288x128xbf16>
    %42 = vector.shape_cast %41 : vector<1x1x288x128xbf16> to vector<288x128xbf16>
    %c7 = arith.constant 7 : index
    %c0_47 = arith.constant 0 : index
    %c0_48 = arith.constant 0 : index
    %43 = vector.load %arg3[%c7, %c0_47, %c0_48] : memref<9x128x128xbf16, #tpu.memory_space<vmem>>, vector<1x128x128xbf16>
    %44 = vector.shape_cast %43 : vector<1x128x128xbf16> to vector<128x128xbf16>
    %cst_49 = arith.constant dense<0.000000e+00> : vector<288x128xf32>
    %45 = tpu.matmul %42, %44, %cst_49 {dimension_numbers = #tpu.dot_dimension_numbers<[1], [0], [0], [1], [0, 0, 1, 1], [], []>} : vector<288x128xbf16>, vector<128x128xbf16>, vector<288x128xf32> -> vector<288x128xf32>
    %46 = arith.addf %40, %45 : vector<288x128xf32>
    %c0_50 = arith.constant 0 : index
    %c0_51 = arith.constant 0 : index
    %c38 = arith.constant 38 : index
    %c0_52 = arith.constant 0 : index
    %47 = vector.load %arg2[%c0_50, %c0_51, %c38, %c0_52] : memref<1x1x326x128xbf16, #tpu.memory_space<vmem>>, vector<1x1x288x128xbf16>
    %48 = vector.shape_cast %47 : vector<1x1x288x128xbf16> to vector<288x128xbf16>
    %c8 = arith.constant 8 : index
    %c0_53 = arith.constant 0 : index
    %c0_54 = arith.constant 0 : index
    %49 = vector.load %arg3[%c8, %c0_53, %c0_54] : memref<9x128x128xbf16, #tpu.memory_space<vmem>>, vector<1x128x128xbf16>
    %50 = vector.shape_cast %49 : vector<1x128x128xbf16> to vector<128x128xbf16>
    %cst_55 = arith.constant dense<0.000000e+00> : vector<288x128xf32>
    %51 = tpu.matmul %48, %50, %cst_55 {dimension_numbers = #tpu.dot_dimension_numbers<[1], [0], [0], [1], [0, 0, 1, 1], [], []>} : vector<288x128xbf16>, vector<128x128xbf16>, vector<288x128xf32> -> vector<288x128xf32>
    %52 = arith.addf %46, %51 : vector<288x128xf32>
    %c0_56 = arith.constant 0 : index
    %c0_57 = arith.constant 0 : index
    %c0_58 = arith.constant 0 : index
    %53 = vector.load %arg4[%c0_56, %c0_57, %c0_58] : memref<1x1x128xf32, #tpu.memory_space<vmem>>, vector<1x1x128xf32>
    %54 = vector.shape_cast %53 : vector<1x1x128xf32> to vector<1x128xf32>
    %55 = vector.broadcast %54 : vector<1x128xf32> to vector<288x128xf32>
    %56 = arith.addf %52, %55 : vector<288x128xf32>
    %57 = arith.truncf %56 : vector<288x128xf32> to vector<288x128xbf16>
    %c0_59 = arith.constant 0 : index
    %c0_60 = arith.constant 0 : index
    %c0_61 = arith.constant 0 : index
    %58 = vector.load %arg5[%c0_59, %c0_60, %c0_61] : memref<1x288x128xbf16, #tpu.memory_space<vmem>>, vector<1x288x128xbf16>
    %59 = vector.shape_cast %58 : vector<1x288x128xbf16> to vector<288x128xbf16>
    %60 = vector.shape_cast %57 : vector<288x128xbf16> to vector<1x288x128xbf16>
    tpu.vector_store %arg5[%c0_59, %c0_60, %c0_61], %60 {strides = array<i32>} : memref<1x288x128xbf16, #tpu.memory_space<vmem>>, vector<1x288x128xbf16>,
    return
  }
  func.func @transform_0(%arg0: i32, %arg1: i32) -> (i32, i32, i32, i32) {
    %c0_i32 = arith.constant 0 : i32
    %c0_i32_0 = arith.constant 0 : i32
    %c0_i32_1 = arith.constant 0 : i32
    return %arg0, %arg1, %c0_i32, %c0_i32_0 : i32, i32, i32, i32
  }
  func.func @transform_1(%arg0: i32, %arg1: i32) -> (i32, i32, i32) {
    %c0_i32 = arith.constant 0 : i32
    %c0_i32_0 = arith.constant 0 : i32
    %c0_i32_1 = arith.constant 0 : i32
    %c0_i32_2 = arith.constant 0 : i32
    return %c0_i32, %c0_i32_0, %c0_i32_1 : i32, i32, i32
  }
  func.func @transform_2(%arg0: i32, %arg1: i32) -> (i32, i32, i32) {
    %c0_i32 = arith.constant 0 : i32
    %c0_i32_0 = arith.constant 0 : i32
    %c0_i32_1 = arith.constant 0 : i32
    %c0_i32_2 = arith.constant 0 : i32
    return %c0_i32, %c0_i32_0, %c0_i32_1 : i32, i32, i32
  }
  func.func @transform_3(%arg0: i32, %arg1: i32) -> (i32, i32, i32) {
    %c0_i32 = arith.constant 0 : i32
    %c0_i32_0 = arith.constant 0 : i32
    return %arg0, %arg1, %c0_i32 : i32, i32, i32
  }
}

</mosaic_0001>

<bundles_post_ra>
// kernel: att_depth_forward.10
= control target key start
LH: loop header
LB: loop body
LE: loop exit
PB: predicated region body
PF: predicated region fallthrough
CT: control target
= control target key end

     0   :  { %s1958_s12 = smov 0   ;;  %s1960_s13 = smov 0   ;;  %s2196_s0 = inlined_call_operand.vmem [shape: bf16[2,2,512,32], index: 0, kind: input, shape index: {}]   ;;  %s2197_s1 = inlined_call_operand.vmem [shape: bf16[1,32,128], index: 1, kind: input, shape index: {}]   ;;  %s2198_s2 = inlined_call_operand.vmem [shape: f32[1,1,128], index: 2, kind: input, shape index: {}]   ;;  %s2199_s3 = inlined_call_operand.vmem [shape: bf16[2,1024,128], index: 3, kind: output, shape index: {}]  }
   0x1   :  { %s1962_s14 = smov 0   ;;  %s1964_s15 = smov 0  }
   0x2   :  { %s1966_s16 = smov 0  }
   0x3 LB: > { %s22_s17 = sadd.s32 1, %s1928_s14  ;;  %s25_s18 = sadd.s32 1, %s1932_s15  ;;  %s1936_s16 = sphi %s1966_s16, %s13_s16   ;;  %s1932_s15 = sphi %s1964_s15, %s2203_s15   ;;  %s1928_s14 = sphi %s1962_s14, %s2202_s14   ;;  %s1924_s13 = sphi %s1960_s13, %s2201_s13   ;;  %s1920_s12 = sphi %s1958_s12, %s2200_s12  }
   0x4   : > { %p23_p0 = scmp.ge.s32.totalorder %s22_s17, 2  ;;  %p1323_p1 = scmp.ge.s32.totalorder %s1936_s16, 1 }
   0x5   : > { %p157_p2 = scmp.lt.s32.totalorder %s1936_s16, 5 }
   0x6   : > { %s2205_s17 = smov (%p23_p0, %s22_s17), 0  ;;  %s2207_s18 = smov (!%p23_p0, %s25_s18), %s1932_s15 }
   0x7   : > { %p158_p3 = pnand %p1323_p1, %p157_p2  ;;  %p27_p4 = scmp.ge.s32.totalorder %s2207_s18, 2 }
   0x8   : > { %p189_p5 = scmp.lt.s32.totalorder (!%p158_p3), %s1924_s13, 1  ;;  %p191_p6 = scmp.lt.s32.totalorder (!%p158_p3), %s1920_s12, 1 }
   0x9   : > { %s2209_s18 = smov (%p27_p4, %s2207_s18), 0  ;;  %161 = sbr.rel (%p158_p3) target bundleno = 286 (0x11e), region = 32 }
   0xa   : > { %s1327_s4 = sshll.u32 (!%p158_p3), %s1920_s12, 6 }
   0xb   : > { %p201_p7 = scmp.lt.s32.totalorder (!%p158_p3), %s1327_s4, 127 }
   0xe   : > { %v1864_v0 = vld [vmem:[%s2197_s1 + $0x8] sm:$0xff]   ;;  %v1865_v1 = vld [vmem:[%s2197_s1] sm:$0xff]   ;;  %s2211_s13 = smov (!%p189_p5, %s1924_s13), 1  ;;  %vm456_vm0 = vcmask 261120   ;;  %s2213_s4 = smov (!%p201_p7, %s1327_s4), 127 }
   0xf   : > { %1752 = vmatprep.subr.bf16.mxu0 %v1864_v0  ;;  %1820 = vmatprep.subr.bf16.mxu1 %v1864_v0  ;;  %s192_s23 = scalar_select %p191_p6, %s1920_s12, 1  ;;  %v2076_v35 = vld [vmem:[%s2198_s2] ss:$0 sm:$0xff] }
  0x10   : > { %1753 = vmatpush3.bf16.msra.mxu0 %v1864_v0  ;;  %1822 = vmatpush3.bf16.msra.mxu1 %v1864_v0  ;;  %s1325_s24 = sshll.u32 %s2211_s13, 7 }
  0x11   : > { %1754 = vmatprep.subr.bf16.mxu0 %v1865_v1  ;;  %1821 = vmatprep.subr.bf16.mxu1 %v1865_v1  ;;  %s1324_s25 = sshll.u32 %s192_s23, 6  ;;  %s204_s7 = sadd.s32 %s1325_s24, %s2213_s4 }
  0x12   : > { %s195_s26 = sadd.s32 %s1325_s24, %s1324_s25  ;;  %s1329_s8 = sshll.u32 %s204_s7, 2 }
  0x13   : > { %s1326_s27 = sshll.u32 %s195_s26, 2  ;;  %s2090_s11 = scalar_lea.vmem %s2199_s3, %s1329_s8 }
  0x14   : > { %1755 = vmatpush3.bf16.msra.mxu0 %v1865_v1  ;;  %1823 = vmatpush3.bf16.msra.mxu1 %v1865_v1  ;;  %s2006_s30 = scalar_lea.vmem %s2196_s0, %s1326_s27 }
  0x15   : > { %v1866_v2 = vld [vmem:[%s2006_s30] sm:$0xff]   ;;  %v1868_v4 = vld [vmem:[%s2006_s30 + $0x8] sm:$0xff]   ;;  %v1870_v6 = vld [vmem:[%s2006_s30 + $0x10] sm:$0xff]  }
  0x16   : > { %v1867_v3 = vld [vmem:[%s2006_s30 + $0x80] sm:$0xff]   ;;  %1756 = vmatprep.mubr.msk.bf16.mxu0 %vm456_vm0, %v1866_v2  ;;  %v1869_v5 = vld [vmem:[%s2006_s30 + $0x88] sm:$0xff]   ;;  %v1871_v7 = vld [vmem:[%s2006_s30 + $0x90] sm:$0xff]  }
  0x17   : > { %1788 = vmatprep.mubr.msk.bf16.mxu1 %vm456_vm0, %v1867_v3  ;;  %1757 = vmatmul.mubr.msk.bf16.vlgmr.msra.gmra.mxu0 %vm456_vm0, %v1868_v4  ;;  %v1872_v8 = vld [vmem:[%s2006_s30 + $0x18] sm:$0xff]   ;;  %v1874_v10 = vld [vmem:[%s2006_s30 + $0x20] sm:$0xff]   ;;  %v1876_v12 = vld [vmem:[%s2006_s30 + $0x28] sm:$0xff]  }
  0x18   : > { %1789 = vmatmul.mubr.msk.bf16.vlgmr.msra.gmra.mxu1 %vm456_vm0, %v1869_v5  ;;  %1760 = vmatprep.mubr.msk.bf16.mxu0 %vm456_vm0, %v1870_v6  ;;  %v1873_v9 = vld [vmem:[%s2006_s30 + $0x98] sm:$0xff]   ;;  %v1875_v11 = vld [vmem:[%s2006_s30 + $0xa0] sm:$0xff]   ;;  %v1877_v13 = vld [vmem:[%s2006_s30 + $0xa8] sm:$0xff]  }
  0x19   : > { %1792 = vmatprep.mubr.msk.bf16.mxu1 %vm456_vm0, %v1871_v7  ;;  %v1878_v14 = vld [vmem:[%s2006_s30 + $0x30] sm:$0xff]   ;;  %v1880_v16 = vld [vmem:[%s2006_s30 + $0x38] sm:$0xff]   ;;  %v1882_v18 = vld [vmem:[%s2006_s30 + $0x40] sm:$0xff]  }
  0x1a   : > { %v1879_v15 = vld [vmem:[%s2006_s30 + $0xb0] sm:$0xff]   ;;  %v1881_v17 = vld [vmem:[%s2006_s30 + $0xb8] sm:$0xff]   ;;  %v1883_v19 = vld [vmem:[%s2006_s30 + $0xc0] sm:$0xff]  }
  0x1b   : > { %v1884_v20 = vld [vmem:[%s2006_s30 + $0x48] sm:$0xff]   ;;  %v1886_v22 = vld [vmem:[%s2006_s30 + $0x50] sm:$0xff]   ;;  %v1888_v24 = vld [vmem:[%s2006_s30 + $0x58] sm:$0xff]  }
  0x1c   : > { %v1885_v21 = vld [vmem:[%s2006_s30 + $0xc8] sm:$0xff]   ;;  %v1887_v23 = vld [vmem:[%s2006_s30 + $0xd0] sm:$0xff]   ;;  %v1889_v25 = vld [vmem:[%s2006_s30 + $0xd8] sm:$0xff]  }
  0x1d   : > { %v1890_v26 = vld [vmem:[%s2006_s30 + $0x60] sm:$0xff]   ;;  %v1892_v28 = vld [vmem:[%s2006_s30 + $0x68] sm:$0xff]   ;;  %v1894_v30 = vld [vmem:[%s2006_s30 + $0x70] sm:$0xff]  }
  0x1e   : > { %v1891_v27 = vld [vmem:[%s2006_s30 + $0xe0] sm:$0xff]   ;;  %v1893_v29 = vld [vmem:[%s2006_s30 + $0xe8] sm:$0xff]   ;;  %v1895_v31 = vld [vmem:[%s2006_s30 + $0xf0] sm:$0xff]  }
  0x1f   : > { %1761 = vmatmul.mubr.msk.bf16.gmra.mxu0 %vm456_vm0, %v1872_v8  ;;  %v1896_v32 = vld [vmem:[%s2006_s30 + $0x78] sm:$0xff]  }
  0x20   : > { %1793 = vmatmul.mubr.msk.bf16.gmra.mxu1 %vm456_vm0, %v1873_v9  ;;  %1764 = vmatprep.mubr.msk.bf16.mxu0 %vm456_vm0, %v1874_v10  ;;  %v1897_v33 = vld [vmem:[%s2006_s30 + $0xf8] sm:$0xff]  }
  0x21   : > { %1796 = vmatprep.mubr.msk.bf16.mxu1 %vm456_vm0, %v1875_v11 }
  0x27   : > { %1765 = vmatmul.mubr.msk.bf16.gmra.mxu0 %vm456_vm0, %v1876_v12 }
  0x28   : > { %1797 = vmatmul.mubr.msk.bf16.gmra.mxu1 %vm456_vm0, %v1877_v13  ;;  %1768 = vmatprep.mubr.msk.bf16.mxu0 %vm456_vm0, %v1878_v14 }
  0x29   : > { %1800 = vmatprep.mubr.msk.bf16.mxu1 %vm456_vm0, %v1879_v15 }
  0x2f   : > { %1769 = vmatmul.mubr.msk.bf16.gmra.mxu0 %vm456_vm0, %v1880_v16 }
  0x30   : > { %1801 = vmatmul.mubr.msk.bf16.gmra.mxu1 %vm456_vm0, %v1881_v17  ;;  %1772 = vmatprep.mubr.msk.bf16.mxu0 %vm456_vm0, %v1882_v18 }
  0x31   : > { %1804 = vmatprep.mubr.msk.bf16.mxu1 %vm456_vm0, %v1883_v19 }
  0x37   : > { %1773 = vmatmul.mubr.msk.bf16.gmra.mxu0 %vm456_vm0, %v1884_v20 }
  0x38   : > { %1805 = vmatmul.mubr.msk.bf16.gmra.mxu1 %vm456_vm0, %v1885_v21  ;;  %1776 = vmatprep.mubr.msk.bf16.mxu0 %vm456_vm0, %v1886_v22 }
  0x39   : > { %1808 = vmatprep.mubr.msk.bf16.mxu1 %vm456_vm0, %v1887_v23 }
  0x3f   : > { %1777 = vmatmul.mubr.msk.bf16.gmra.mxu0 %vm456_vm0, %v1888_v24 }
  0x40   : > { %1809 = vmatmul.mubr.msk.bf16.gmra.mxu1 %vm456_vm0, %v1889_v25  ;;  %1780 = vmatprep.mubr.msk.bf16.mxu0 %vm456_vm0, %v1890_v26 }
  0x41   : > { %1812 = vmatprep.mubr.msk.bf16.mxu1 %vm456_vm0, %v1891_v27 }
  0x47   : > { %1781 = vmatmul.mubr.msk.bf16.gmra.mxu0 %vm456_vm0, %v1892_v28 }
  0x48   : > { %1813 = vmatmul.mubr.msk.bf16.gmra.mxu1 %vm456_vm0, %v1893_v29  ;;  %1784 = vmatprep.mubr.msk.bf16.mxu0 %vm456_vm0, %v1894_v30 }
  0x49   : > { %1816 = vmatprep.mubr.msk.bf16.mxu1 %vm456_vm0, %v1895_v31 }
  0x4f   : > { %1785 = vmatmul.mubr.msk.bf16.gmra.mxu0 %vm456_vm0, %v1896_v32 }
  0x50   : > { %1817 = vmatmul.mubr.msk.bf16.gmra.mxu1 %vm456_vm0, %v1897_v33 }
  0xd7   : > { %v1758_v34 = vpop.f32.mrf.mxu0 }
  0xd8   : > { %v1790_v36 = vpop.f32.mrf.mxu1  ;;  %v596_v38 = vadd.f32 %v1758_v34, %v2076_v35 }
  0xd9   : > { %v587_v37 = vpop.f32.mrf.mxu0  ;;  %v724_v40 = vadd.f32 %v1790_v36, %v2076_v35 }
  0xda   : > { %v715_v39 = vpop.f32.mrf.mxu1  ;;  %v588_v42 = vadd.f32 %v2076_v35, %v587_v37  ;;  %v844_v48 = vmax.f32 %v596_v38, 0.0 }
  0xdb   : > { %v1759_v41 = vpop.f32.mrf.mxu0  ;;  %v716_v45 = vadd.f32 %v2076_v35, %v715_v39  ;;  %v876_v52 = vmax.f32 %v724_v40, 0.0 }
  0xdc   : > { %v599_v43 = vadd.f32 %v1759_v41, %v2076_v35  ;;  %v1791_v44 = vpop.f32.mrf.mxu1  ;;  %v842_v56 = vmax.f32 %v588_v42, 0.0 }
  0xdd   : > { %v727_v46 = vadd.f32 %v1791_v44, %v2076_v35  ;;  %v590_v47 = vpop.f32.mrf.mxu0  ;;  %v874_v60 = vmax.f32 %v716_v45, 0.0 }
  0xde   : > { %v845_v49 = vmax.f32 %v599_v43, 0.0  ;;  %v591_v50 = vadd.f32 %v2076_v35, %v590_v47  ;;  %v718_v51 = vpop.f32.mrf.mxu1 }
  0xdf   : > { %v877_v53 = vmax.f32 %v727_v46, 0.0  ;;  %v719_v54 = vadd.f32 %v2076_v35, %v718_v51  ;;  %v1762_v55 = vpop.f32.mrf.mxu0 }
  0xe0   : > { %v1535_v57 = vpack.c.bf16 %v845_v49, %v844_v48  ;;  %v843_v58 = vmax.f32 %v591_v50, 0.0  ;;  %v1794_v59 = vpop.f32.mrf.mxu1  ;;  %v612_v1 = vadd.f32 %v1762_v55, %v2076_v35 }
  0xe1   : > { %v1615_v61 = vpack.c.bf16 %v877_v53, %v876_v52  ;;  %v875_v62 = vmax.f32 %v719_v54, 0.0  ;;  %v603_v63 = vpop.f32.mrf.mxu0  ;;  %v740_v4 = vadd.f32 %v1794_v59, %v2076_v35 }
  0xe2   : > { %1687 = vst [vmem:[%s2090_s11 + $0x8] sm:$0xff] %v1535_v57   ;;  %v1530_v0 = vpack.c.bf16 %v843_v58, %v842_v56  ;;  %v731_v2 = vpop.f32.mrf.mxu1  ;;  %v604_v6 = vadd.f32 %v2076_v35, %v603_v63  ;;  %v848_v12 = vmax.f32 %v612_v1, 0.0 }
  0xe3   : > { %1703 = vst [vmem:[%s2090_s11 + $0x88] sm:$0xff] %v1615_v61   ;;  %v1610_v3 = vpack.c.bf16 %v875_v62, %v874_v60  ;;  %v1763_v5 = vpop.f32.mrf.mxu0  ;;  %v732_v9 = vadd.f32 %v2076_v35, %v731_v2  ;;  %v880_v16 = vmax.f32 %v740_v4, 0.0 }
  0xe4   : > { %1531 = vst [vmem:[%s2090_s11] sm:$0xff] %v1530_v0   ;;  %v615_v7 = vadd.f32 %v1763_v5, %v2076_v35  ;;  %v1795_v8 = vpop.f32.mrf.mxu1  ;;  %v846_v20 = vmax.f32 %v604_v6, 0.0 }
  0xe5   : > { %1702 = vst [vmem:[%s2090_s11 + $0x80] sm:$0xff] %v1610_v3   ;;  %v743_v10 = vadd.f32 %v1795_v8, %v2076_v35  ;;  %v606_v11 = vpop.f32.mrf.mxu0  ;;  %v878_v24 = vmax.f32 %v732_v9, 0.0 }
  0xe6   : > { %v849_v13 = vmax.f32 %v615_v7, 0.0  ;;  %v607_v14 = vadd.f32 %v2076_v35, %v606_v11  ;;  %v734_v15 = vpop.f32.mrf.mxu1 }
  0xe7   : > { %v881_v17 = vmax.f32 %v743_v10, 0.0  ;;  %v735_v18 = vadd.f32 %v2076_v35, %v734_v15  ;;  %v1766_v19 = vpop.f32.mrf.mxu0 }
  0xe8   : > { %v1545_v21 = vpack.c.bf16 %v849_v13, %v848_v12  ;;  %v847_v22 = vmax.f32 %v607_v14, 0.0  ;;  %v1798_v23 = vpop.f32.mrf.mxu1  ;;  %v628_v29 = vadd.f32 %v1766_v19, %v2076_v35 }
  0xe9   : > { %v1625_v25 = vpack.c.bf16 %v881_v17, %v880_v16  ;;  %v879_v26 = vmax.f32 %v735_v18, 0.0  ;;  %v619_v27 = vpop.f32.mrf.mxu0  ;;  %v756_v32 = vadd.f32 %v1798_v23, %v2076_v35 }
  0xea   : > { %1689 = vst [vmem:[%s2090_s11 + $0x18] sm:$0xff] %v1545_v21   ;;  %v1540_v28 = vpack.c.bf16 %v847_v22, %v846_v20  ;;  %v747_v30 = vpop.f32.mrf.mxu1  ;;  %v620_v34 = vadd.f32 %v2076_v35, %v619_v27  ;;  %v852_v41 = vmax.f32 %v628_v29, 0.0 }
  0xeb   : > { %1705 = vst [vmem:[%s2090_s11 + $0x98] sm:$0xff] %v1625_v25   ;;  %v1620_v31 = vpack.c.bf16 %v879_v26, %v878_v24  ;;  %v1767_v33 = vpop.f32.mrf.mxu0  ;;  %v748_v38 = vadd.f32 %v2076_v35, %v747_v30  ;;  %v884_v45 = vmax.f32 %v756_v32, 0.0 }
  0xec   : > { %1688 = vst [vmem:[%s2090_s11 + $0x10] sm:$0xff] %v1540_v28   ;;  %v631_v36 = vadd.f32 %v1767_v33, %v2076_v35  ;;  %v1799_v37 = vpop.f32.mrf.mxu1  ;;  %v850_v49 = vmax.f32 %v620_v34, 0.0 }
  0xed   : > { %1704 = vst [vmem:[%s2090_s11 + $0x90] sm:$0xff] %v1620_v31   ;;  %v759_v39 = vadd.f32 %v1799_v37, %v2076_v35  ;;  %v622_v40 = vpop.f32.mrf.mxu0  ;;  %v882_v53 = vmax.f32 %v748_v38, 0.0 }
  0xee   : > { %v853_v42 = vmax.f32 %v631_v36, 0.0  ;;  %v623_v43 = vadd.f32 %v2076_v35, %v622_v40  ;;  %v750_v44 = vpop.f32.mrf.mxu1 }
  0xef   : > { %v885_v46 = vmax.f32 %v759_v39, 0.0  ;;  %v751_v47 = vadd.f32 %v2076_v35, %v750_v44  ;;  %v1770_v48 = vpop.f32.mrf.mxu0 }
  0xf0   : > { %v1555_v50 = vpack.c.bf16 %v853_v42, %v852_v41  ;;  %v851_v51 = vmax.f32 %v623_v43, 0.0  ;;  %v1802_v52 = vpop.f32.mrf.mxu1  ;;  %v644_v58 = vadd.f32 %v1770_v48, %v2076_v35 }
  0xf1   : > { %v1635_v54 = vpack.c.bf16 %v885_v46, %v884_v45  ;;  %v883_v55 = vmax.f32 %v751_v47, 0.0  ;;  %v635_v56 = vpop.f32.mrf.mxu0  ;;  %v772_v61 = vadd.f32 %v1802_v52, %v2076_v35 }
  0xf2   : > { %1691 = vst [vmem:[%s2090_s11 + $0x28] sm:$0xff] %v1555_v50   ;;  %v1550_v57 = vpack.c.bf16 %v851_v51, %v850_v49  ;;  %v763_v59 = vpop.f32.mrf.mxu1  ;;  %v636_v63 = vadd.f32 %v2076_v35, %v635_v56  ;;  %v856_v5 = vmax.f32 %v644_v58, 0.0 }
  0xf3   : > { %1707 = vst [vmem:[%s2090_s11 + $0xa8] sm:$0xff] %v1635_v54   ;;  %v1630_v60 = vpack.c.bf16 %v883_v55, %v882_v53  ;;  %v1771_v62 = vpop.f32.mrf.mxu0  ;;  %v764_v2 = vadd.f32 %v2076_v35, %v763_v59  ;;  %v888_v9 = vmax.f32 %v772_v61, 0.0 }
  0xf4   : > { %1690 = vst [vmem:[%s2090_s11 + $0x20] sm:$0xff] %v1550_v57   ;;  %v647_v0 = vadd.f32 %v1771_v62, %v2076_v35  ;;  %v1803_v1 = vpop.f32.mrf.mxu1  ;;  %v854_v13 = vmax.f32 %v636_v63, 0.0 }
  0xf5   : > { %1706 = vst [vmem:[%s2090_s11 + $0xa0] sm:$0xff] %v1630_v60   ;;  %v775_v3 = vadd.f32 %v1803_v1, %v2076_v35  ;;  %v638_v4 = vpop.f32.mrf.mxu0  ;;  %v886_v17 = vmax.f32 %v764_v2, 0.0 }
  0xf6   : > { %v857_v6 = vmax.f32 %v647_v0, 0.0  ;;  %v639_v7 = vadd.f32 %v2076_v35, %v638_v4  ;;  %v766_v8 = vpop.f32.mrf.mxu1 }
  0xf7   : > { %v889_v10 = vmax.f32 %v775_v3, 0.0  ;;  %v767_v11 = vadd.f32 %v2076_v35, %v766_v8  ;;  %v1774_v12 = vpop.f32.mrf.mxu0 }
  0xf8   : > { %v1565_v14 = vpack.c.bf16 %v857_v6, %v856_v5  ;;  %v855_v15 = vmax.f32 %v639_v7, 0.0  ;;  %v1806_v16 = vpop.f32.mrf.mxu1  ;;  %v660_v22 = vadd.f32 %v1774_v12, %v2076_v35 }
  0xf9   : > { %v1645_v18 = vpack.c.bf16 %v889_v10, %v888_v9  ;;  %v887_v19 = vmax.f32 %v767_v11, 0.0  ;;  %v651_v20 = vpop.f32.mrf.mxu0  ;;  %v788_v25 = vadd.f32 %v1806_v16, %v2076_v35 }
  0xfa   : > { %1693 = vst [vmem:[%s2090_s11 + $0x38] sm:$0xff] %v1565_v14   ;;  %v1560_v21 = vpack.c.bf16 %v855_v15, %v854_v13  ;;  %v779_v23 = vpop.f32.mrf.mxu1  ;;  %v652_v27 = vadd.f32 %v2076_v35, %v651_v20  ;;  %v860_v33 = vmax.f32 %v660_v22, 0.0 }
  0xfb   : > { %1709 = vst [vmem:[%s2090_s11 + $0xb8] sm:$0xff] %v1645_v18   ;;  %v1640_v24 = vpack.c.bf16 %v887_v19, %v886_v17  ;;  %v1775_v26 = vpop.f32.mrf.mxu0  ;;  %v780_v30 = vadd.f32 %v2076_v35, %v779_v23  ;;  %v892_v38 = vmax.f32 %v788_v25, 0.0 }
  0xfc   : > { %1692 = vst [vmem:[%s2090_s11 + $0x30] sm:$0xff] %v1560_v21   ;;  %v663_v28 = vadd.f32 %v1775_v26, %v2076_v35  ;;  %v1807_v29 = vpop.f32.mrf.mxu1  ;;  %v858_v42 = vmax.f32 %v652_v27, 0.0 }
  0xfd   : > { %1708 = vst [vmem:[%s2090_s11 + $0xb0] sm:$0xff] %v1640_v24   ;;  %v791_v31 = vadd.f32 %v1807_v29, %v2076_v35  ;;  %v654_v32 = vpop.f32.mrf.mxu0  ;;  %v890_v46 = vmax.f32 %v780_v30, 0.0 }
  0xfe   : > { %v861_v34 = vmax.f32 %v663_v28, 0.0  ;;  %v655_v36 = vadd.f32 %v2076_v35, %v654_v32  ;;  %v782_v37 = vpop.f32.mrf.mxu1 }
  0xff   : > { %v893_v39 = vmax.f32 %v791_v31, 0.0  ;;  %v783_v40 = vadd.f32 %v2076_v35, %v782_v37  ;;  %v1778_v41 = vpop.f32.mrf.mxu0 }
 0x100   : > { %v1575_v43 = vpack.c.bf16 %v861_v34, %v860_v33  ;;  %v859_v44 = vmax.f32 %v655_v36, 0.0  ;;  %v1810_v45 = vpop.f32.mrf.mxu1  ;;  %v676_v51 = vadd.f32 %v1778_v41, %v2076_v35 }
 0x101   : > { %v1655_v47 = vpack.c.bf16 %v893_v39, %v892_v38  ;;  %v891_v48 = vmax.f32 %v783_v40, 0.0  ;;  %v667_v49 = vpop.f32.mrf.mxu0  ;;  %v804_v54 = vadd.f32 %v1810_v45, %v2076_v35 }
 0x102   : > { %1695 = vst [vmem:[%s2090_s11 + $0x48] sm:$0xff] %v1575_v43   ;;  %v1570_v50 = vpack.c.bf16 %v859_v44, %v858_v42  ;;  %v795_v52 = vpop.f32.mrf.mxu1  ;;  %v668_v56 = vadd.f32 %v2076_v35, %v667_v49  ;;  %v864_v62 = vmax.f32 %v676_v51, 0.0 }
 0x103   : > { %1711 = vst [vmem:[%s2090_s11 + $0xc8] sm:$0xff] %v1655_v47   ;;  %v1650_v53 = vpack.c.bf16 %v891_v48, %v890_v46  ;;  %v1779_v55 = vpop.f32.mrf.mxu0  ;;  %v796_v59 = vadd.f32 %v2076_v35, %v795_v52  ;;  %v896_v2 = vmax.f32 %v804_v54, 0.0 }
 0x104   : > { %1694 = vst [vmem:[%s2090_s11 + $0x40] sm:$0xff] %v1570_v50   ;;  %v679_v57 = vadd.f32 %v1779_v55, %v2076_v35  ;;  %v1811_v58 = vpop.f32.mrf.mxu1  ;;  %v862_v6 = vmax.f32 %v668_v56, 0.0 }
 0x105   : > { %1710 = vst [vmem:[%s2090_s11 + $0xc0] sm:$0xff] %v1650_v53   ;;  %v807_v60 = vadd.f32 %v1811_v58, %v2076_v35  ;;  %v670_v61 = vpop.f32.mrf.mxu0  ;;  %v894_v10 = vmax.f32 %v796_v59, 0.0 }
 0x106   : > { %v865_v63 = vmax.f32 %v679_v57, 0.0  ;;  %v671_v0 = vadd.f32 %v2076_v35, %v670_v61  ;;  %v798_v1 = vpop.f32.mrf.mxu1 }
 0x107   : > { %v897_v3 = vmax.f32 %v807_v60, 0.0  ;;  %v799_v4 = vadd.f32 %v2076_v35, %v798_v1  ;;  %v1782_v5 = vpop.f32.mrf.mxu0 }
 0x108   : > { %v1585_v7 = vpack.c.bf16 %v865_v63, %v864_v62  ;;  %v863_v8 = vmax.f32 %v671_v0, 0.0  ;;  %v1814_v9 = vpop.f32.mrf.mxu1  ;;  %v692_v15 = vadd.f32 %v1782_v5, %v2076_v35 }
 0x109   : > { %v1665_v11 = vpack.c.bf16 %v897_v3, %v896_v2  ;;  %v895_v12 = vmax.f32 %v799_v4, 0.0  ;;  %v683_v13 = vpop.f32.mrf.mxu0  ;;  %v820_v18 = vadd.f32 %v1814_v9, %v2076_v35 }
 0x10a   : > { %1697 = vst [vmem:[%s2090_s11 + $0x58] sm:$0xff] %v1585_v7   ;;  %v1580_v14 = vpack.c.bf16 %v863_v8, %v862_v6  ;;  %v811_v16 = vpop.f32.mrf.mxu1  ;;  %v684_v20 = vadd.f32 %v2076_v35, %v683_v13  ;;  %v868_v26 = vmax.f32 %v692_v15, 0.0 }
 0x10b   : > { %1713 = vst [vmem:[%s2090_s11 + $0xd8] sm:$0xff] %v1665_v11   ;;  %v1660_v17 = vpack.c.bf16 %v895_v12, %v894_v10  ;;  %v1783_v19 = vpop.f32.mrf.mxu0  ;;  %v812_v23 = vadd.f32 %v2076_v35, %v811_v16  ;;  %v900_v30 = vmax.f32 %v820_v18, 0.0 }
 0x10c   : > { %1696 = vst [vmem:[%s2090_s11 + $0x50] sm:$0xff] %v1580_v14   ;;  %v695_v21 = vadd.f32 %v1783_v19, %v2076_v35  ;;  %v1815_v22 = vpop.f32.mrf.mxu1  ;;  %v866_v34 = vmax.f32 %v684_v20, 0.0 }
 0x10d   : > { %1712 = vst [vmem:[%s2090_s11 + $0xd0] sm:$0xff] %v1660_v17   ;;  %v823_v24 = vadd.f32 %v1815_v22, %v2076_v35  ;;  %v686_v25 = vpop.f32.mrf.mxu0  ;;  %v898_v39 = vmax.f32 %v812_v23, 0.0 }
 0x10e   : > { %v869_v27 = vmax.f32 %v695_v21, 0.0  ;;  %v687_v28 = vadd.f32 %v2076_v35, %v686_v25  ;;  %v814_v29 = vpop.f32.mrf.mxu1 }
 0x10f   : > { %v901_v31 = vmax.f32 %v823_v24, 0.0  ;;  %v815_v32 = vadd.f32 %v2076_v35, %v814_v29  ;;  %v1786_v33 = vpop.f32.mrf.mxu0 }
 0x110   : > { %v1595_v36 = vpack.c.bf16 %v869_v27, %v868_v26  ;;  %v867_v37 = vmax.f32 %v687_v28, 0.0  ;;  %v1818_v38 = vpop.f32.mrf.mxu1  ;;  %v708_v44 = vadd.f32 %v1786_v33, %v2076_v35 }
 0x111   : > { %v1675_v40 = vpack.c.bf16 %v901_v31, %v900_v30  ;;  %v899_v41 = vmax.f32 %v815_v32, 0.0  ;;  %v699_v42 = vpop.f32.mrf.mxu0  ;;  %v836_v47 = vadd.f32 %v1818_v38, %v2076_v35 }
 0x112   : > { %1699 = vst [vmem:[%s2090_s11 + $0x68] sm:$0xff] %v1595_v36   ;;  %v1590_v43 = vpack.c.bf16 %v867_v37, %v866_v34  ;;  %v827_v45 = vpop.f32.mrf.mxu1  ;;  %v700_v49 = vadd.f32 %v2076_v35, %v699_v42  ;;  %v872_v55 = vmax.f32 %v708_v44, 0.0 }
 0x113   : > { %1715 = vst [vmem:[%s2090_s11 + $0xe8] sm:$0xff] %v1675_v40   ;;  %v1670_v46 = vpack.c.bf16 %v899_v41, %v898_v39  ;;  %v1787_v48 = vpop.f32.mrf.mxu0  ;;  %v828_v52 = vadd.f32 %v2076_v35, %v827_v45  ;;  %v904_v59 = vmax.f32 %v836_v47, 0.0 }
 0x114   : > { %1698 = vst [vmem:[%s2090_s11 + $0x60] sm:$0xff] %v1590_v43   ;;  %v711_v50 = vadd.f32 %v1787_v48, %v2076_v35  ;;  %v1819_v51 = vpop.f32.mrf.mxu1  ;;  %v870_v62 = vmax.f32 %v700_v49, 0.0 }
 0x115   : > { %1714 = vst [vmem:[%s2090_s11 + $0xe0] sm:$0xff] %v1670_v46   ;;  %v839_v53 = vadd.f32 %v1819_v51, %v2076_v35  ;;  %v702_v54 = vpop.f32.mrf.mxu0  ;;  %v902_v1 = vmax.f32 %v828_v52, 0.0 }
 0x116   : > { %v873_v56 = vmax.f32 %v711_v50, 0.0  ;;  %v703_v57 = vadd.f32 %v2076_v35, %v702_v54  ;;  %v830_v58 = vpop.f32.mrf.mxu1 }
 0x117   : > { %v905_v60 = vmax.f32 %v839_v53, 0.0  ;;  %v831_v61 = vadd.f32 %v2076_v35, %v830_v58 }
 0x118   : > { %v1605_v63 = vpack.c.bf16 %v873_v56, %v872_v55  ;;  %v871_v0 = vmax.f32 %v703_v57, 0.0 }
 0x119   : > { %v1685_v2 = vpack.c.bf16 %v905_v60, %v904_v59  ;;  %v903_v3 = vmax.f32 %v831_v61, 0.0 }
 0x11a   : > { %1701 = vst [vmem:[%s2090_s11 + $0x78] sm:$0xff] %v1605_v63   ;;  %v1600_v4 = vpack.c.bf16 %v871_v0, %v870_v62 }
 0x11b   : > { %1717 = vst [vmem:[%s2090_s11 + $0xf8] sm:$0xff] %v1685_v2   ;;  %v1680_v5 = vpack.c.bf16 %v903_v3, %v902_v1 }
 0x11c   : > { %1700 = vst [vmem:[%s2090_s11 + $0x70] sm:$0xff] %v1600_v4  }
 0x11d   : > { %1716 = vst [vmem:[%s2090_s11 + $0xf0] sm:$0xff] %v1680_v5  }
 0x11e PF: > { %s13_s16 = sadd.s32 1, %s1936_s16   ;;  %s2200_s12 = smov %s1928_s14 }
 0x11f   : > { %p10_p8 = scmp.ge.s32.totalorder %s13_s16, 6   ;;  %s2201_s13 = smov %s1932_s15 }
 0x120   : > { %s2202_s14 = smov %s2205_s17  ;;  %s2203_s15 = smov %s2209_s18 }
 0x121   :  { %12 = sbr.rel (!%p10_p8) target bundleno = 3 (0x3), region = 62 }

// kernel: att_depth_forward.11
= control target key start
LH: loop header
LB: loop body
LE: loop exit
PB: predicated region body
PF: predicated region fallthrough
CT: control target
= control target key end

     0   :  { %s1228_s12 = smov 0   ;;  %s1230_s13 = smov 0   ;;  %s1365_s0 = inlined_call_operand.vmem [shape: bf16[2,1,256,128], index: 0, kind: input, shape index: {}]   ;;  %s1366_s1 = inlined_call_operand.vmem [shape: bf16[1,128,128], index: 1, kind: input, shape index: {}]   ;;  %s1367_s2 = inlined_call_operand.vmem [shape: f32[1,1,128], index: 2, kind: input, shape index: {}]   ;;  %s1368_s3 = inlined_call_operand.vmem [shape: bf16[2,256,128], index: 3, kind: output, shape index: {}]  }
   0x1   :  { %s1232_s14 = smov 0  }
   0x2 LB: > { %s25_s15 = sadd.s32 1, %s1202_s13  ;;  %p855_p0 = scmp.ge.s32.totalorder %s1206_s14, 1  ;;  %s1206_s14 = sphi %s1232_s14, %s13_s14   ;;  %s1202_s13 = sphi %s1230_s13, %s1370_s13   ;;  %s1198_s12 = sphi %s1228_s12, %s1369_s12  }
   0x3   : > { %p27_p1 = scmp.ge.s32.totalorder %s25_s15, 2  ;;  %p157_p2 = scmp.lt.s32.totalorder %s1206_s14, 3 }
   0x5   : > { %s1372_s15 = smov (%p27_p1, %s25_s15), 0  ;;  %p158_p3 = pnand %p855_p0, %p157_p2 }
   0x6   : > { %p189_p4 = scmp.lt.s32.totalorder (!%p158_p3), %s1198_s12, 1 }
   0x7   : > { %161 = sbr.rel (%p158_p3) target bundleno = 275 (0x113), region = 32 }
   0xc   : > { %v1160_v0 = vld [vmem:[%s1366_s1 + $0x38] sm:$0xff]   ;;  %v1161_v1 = vld [vmem:[%s1366_s1 + $0x30] sm:$0xff]   ;;  %s1374_s12 = smov (!%p189_p4, %s1198_s12), 1  ;;  %v1162_v2 = vld [vmem:[%s1366_s1 + $0x28] sm:$0xff]  }
   0xd   : > { %1072 = vmatprep.subr.bf16.mxu0 %v1160_v0  ;;  %1120 = vmatprep.subr.bf16.mxu1 %v1160_v0  ;;  %s919_s22 = sshll.u32 %s1374_s12, 7  ;;  %v1163_v3 = vld [vmem:[%s1366_s1 + $0x20] sm:$0xff]   ;;  %v1164_v6 = vld [vmem:[%s1366_s1 + $0x18] sm:$0xff]   ;;  %v1165_v7 = vld [vmem:[%s1366_s1 + $0x10] sm:$0xff]  }
   0xe   : > { %1073 = vmatpush3.bf16.msra.mxu0 %v1160_v0  ;;  %1128 = vmatpush3.bf16.msra.mxu1 %v1160_v0  ;;  %s1263_s25 = scalar_lea.vmem %s1365_s0, %s919_s22  ;;  %v1166_v8 = vld [vmem:[%s1366_s1 + $0x8] sm:$0xff]   ;;  %v1167_v9 = vld [vmem:[%s1366_s1] sm:$0xff]   ;;  %s1314_s17 = scalar_lea.vmem %s1368_s3, %s919_s22 }
   0xf   : > { %1074 = vmatprep.subr.bf16.mxu0 %v1161_v1  ;;  %1121 = vmatprep.subr.bf16.mxu1 %v1161_v1  ;;  %v1168_v4 = vld [vmem:[%s1263_s25] sm:$0xff]   ;;  %v1170_v10 = vld [vmem:[%s1263_s25 + $0x8] sm:$0xff]   ;;  %v1172_v12 = vld [vmem:[%s1263_s25 + $0x10] sm:$0xff]  }
  0x10   : > { %v1169_v5 = vld [vmem:[%s1263_s25 + $0x40] sm:$0xff]   ;;  %1088 = vmatprep.mubr.bf16.mxu0 %v1168_v4  ;;  %v1171_v11 = vld [vmem:[%s1263_s25 + $0x48] sm:$0xff]   ;;  %v1173_v13 = vld [vmem:[%s1263_s25 + $0x50] sm:$0xff]  }
  0x11   : > { %1104 = vmatprep.mubr.bf16.mxu1 %v1169_v5  ;;  %v1174_v14 = vld [vmem:[%s1263_s25 + $0x18] sm:$0xff]   ;;  %v1176_v16 = vld [vmem:[%s1263_s25 + $0x20] sm:$0xff]   ;;  %v1178_v18 = vld [vmem:[%s1263_s25 + $0x28] sm:$0xff]  }
  0x12   : > { %1075 = vmatpush3.bf16.msra.mxu0 %v1161_v1  ;;  %1129 = vmatpush3.bf16.msra.mxu1 %v1161_v1  ;;  %v1175_v15 = vld [vmem:[%s1263_s25 + $0x58] sm:$0xff]   ;;  %v1177_v17 = vld [vmem:[%s1263_s25 + $0x60] sm:$0xff]   ;;  %v1179_v19 = vld [vmem:[%s1263_s25 + $0x68] sm:$0xff]  }
  0x13   : > { %1076 = vmatprep.subr.bf16.mxu0 %v1162_v2  ;;  %1122 = vmatprep.subr.bf16.mxu1 %v1162_v2  ;;  %v1180_v20 = vld [vmem:[%s1263_s25 + $0x30] sm:$0xff]   ;;  %v1182_v22 = vld [vmem:[%s1263_s25 + $0x38] sm:$0xff]   ;;  %v1299_v24 = vld [vmem:[%s1367_s2] ss:$0 sm:$0xff] }
  0x14   : > { %v1181_v21 = vld [vmem:[%s1263_s25 + $0x70] sm:$0xff]   ;;  %v1183_v23 = vld [vmem:[%s1263_s25 + $0x78] sm:$0xff]  }
  0x16   : > { %1077 = vmatpush3.bf16.msra.mxu0 %v1162_v2  ;;  %1130 = vmatpush3.bf16.msra.mxu1 %v1162_v2 }
  0x17   : > { %1078 = vmatprep.subr.bf16.mxu0 %v1163_v3  ;;  %1123 = vmatprep.subr.bf16.mxu1 %v1163_v3 }
  0x1a   : > { %1079 = vmatpush3.bf16.msra.mxu0 %v1163_v3  ;;  %1131 = vmatpush3.bf16.msra.mxu1 %v1163_v3 }
  0x1b   : > { %1080 = vmatprep.subr.bf16.mxu0 %v1164_v6  ;;  %1124 = vmatprep.subr.bf16.mxu1 %v1164_v6 }
  0x1e   : > { %1081 = vmatpush3.bf16.msra.mxu0 %v1164_v6  ;;  %1132 = vmatpush3.bf16.msra.mxu1 %v1164_v6 }
  0x1f   : > { %1082 = vmatprep.subr.bf16.mxu0 %v1165_v7  ;;  %1125 = vmatprep.subr.bf16.mxu1 %v1165_v7 }
  0x22   : > { %1083 = vmatpush3.bf16.msra.mxu0 %v1165_v7  ;;  %1133 = vmatpush3.bf16.msra.mxu1 %v1165_v7 }
  0x23   : > { %1084 = vmatprep.subr.bf16.mxu0 %v1166_v8  ;;  %1126 = vmatprep.subr.bf16.mxu1 %v1166_v8 }
  0x26   : > { %1085 = vmatpush3.bf16.msra.mxu0 %v1166_v8  ;;  %1134 = vmatpush3.bf16.msra.mxu1 %v1166_v8 }
  0x27   : > { %1086 = vmatprep.subr.bf16.mxu0 %v1167_v9  ;;  %1127 = vmatprep.subr.bf16.mxu1 %v1167_v9 }
  0x2a   : > { %1087 = vmatpush3.bf16.msra.mxu0 %v1167_v9  ;;  %1135 = vmatpush3.bf16.msra.mxu1 %v1167_v9 }
  0x2d   : > { %1089 = vmatmul.mubr.bf16.vlgmr.msra.gmra.mxu0 %v1170_v10  ;;  %1105 = vmatmul.mubr.bf16.vlgmr.msra.gmra.mxu1 %v1171_v11 }
  0x2e   : > { %1092 = vmatprep.mubr.bf16.mxu0 %v1172_v12  ;;  %1108 = vmatprep.mubr.bf16.mxu1 %v1173_v13 }
  0x35   : > { %1093 = vmatmul.mubr.bf16.gmra.mxu0 %v1174_v14  ;;  %1109 = vmatmul.mubr.bf16.gmra.mxu1 %v1175_v15 }
  0x36   : > { %1096 = vmatprep.mubr.bf16.mxu0 %v1176_v16  ;;  %1112 = vmatprep.mubr.bf16.mxu1 %v1177_v17 }
  0x3d   : > { %1097 = vmatmul.mubr.bf16.gmra.mxu0 %v1178_v18  ;;  %1113 = vmatmul.mubr.bf16.gmra.mxu1 %v1179_v19 }
  0x3e   : > { %1100 = vmatprep.mubr.bf16.mxu0 %v1180_v20  ;;  %1116 = vmatprep.mubr.bf16.mxu1 %v1181_v21 }
  0x45   : > { %1101 = vmatmul.mubr.bf16.gmra.mxu0 %v1182_v22  ;;  %1117 = vmatmul.mubr.bf16.gmra.mxu1 %v1183_v23 }
  0xed   : > { %v1090_v25 = vpop.f32.mrf.mxu0  ;;  %v1106_v26 = vpop.f32.mrf.mxu1 }
  0xee   : > { %v451_v27 = vadd.f32 %v1090_v25, %v1299_v24  ;;  %v515_v28 = vadd.f32 %v1106_v26, %v1299_v24 }
  0xef   : > { %v442_v29 = vpop.f32.mrf.mxu0  ;;  %v506_v30 = vpop.f32.mrf.mxu1 }
  0xf0   : > { %v443_v31 = vadd.f32 %v1299_v24, %v442_v29  ;;  %v507_v32 = vadd.f32 %v1299_v24, %v506_v30  ;;  %v571_v37 = vmax.f32 %v451_v27, 0.0  ;;  %v587_v38 = vmax.f32 %v515_v28, 0.0 }
  0xf1   : > { %v1091_v33 = vpop.f32.mrf.mxu0  ;;  %v1107_v34 = vpop.f32.mrf.mxu1 }
  0xf2   : > { %v454_v35 = vadd.f32 %v1091_v33, %v1299_v24  ;;  %v518_v36 = vadd.f32 %v1107_v34, %v1299_v24  ;;  %v569_v45 = vmax.f32 %v443_v31, 0.0  ;;  %v585_v46 = vmax.f32 %v507_v32, 0.0 }
  0xf3   : > { %v445_v39 = vpop.f32.mrf.mxu0  ;;  %v509_v40 = vpop.f32.mrf.mxu1 }
  0xf4   : > { %v572_v41 = vmax.f32 %v454_v35, 0.0  ;;  %v588_v42 = vmax.f32 %v518_v36, 0.0  ;;  %v446_v43 = vadd.f32 %v1299_v24, %v445_v39  ;;  %v510_v44 = vadd.f32 %v1299_v24, %v509_v40 }
  0xf5   : > { %v1094_v47 = vpop.f32.mrf.mxu0  ;;  %v1110_v48 = vpop.f32.mrf.mxu1 }
  0xf6   : > { %v961_v49 = vpack.c.bf16 %v572_v41, %v571_v37  ;;  %v1001_v50 = vpack.c.bf16 %v588_v42, %v587_v38  ;;  %v570_v51 = vmax.f32 %v446_v43, 0.0  ;;  %v586_v52 = vmax.f32 %v510_v44, 0.0 }
  0xf7   : > { %v467_v53 = vadd.f32 %v1094_v47, %v1299_v24  ;;  %v531_v54 = vadd.f32 %v1110_v48, %v1299_v24  ;;  %v458_v55 = vpop.f32.mrf.mxu0  ;;  %v522_v56 = vpop.f32.mrf.mxu1 }
  0xf8   : > { %1033 = vst [vmem:[%s1314_s17 + $0x8] sm:$0xff] %v961_v49   ;;  %1041 = vst [vmem:[%s1314_s17 + $0x48] sm:$0xff] %v1001_v50   ;;  %v956_v57 = vpack.c.bf16 %v570_v51, %v569_v45  ;;  %v996_v58 = vpack.c.bf16 %v586_v52, %v585_v46  ;;  %v459_v59 = vadd.f32 %v1299_v24, %v458_v55 }
  0xf9   : > { %v523_v60 = vadd.f32 %v1299_v24, %v522_v56  ;;  %v1095_v61 = vpop.f32.mrf.mxu0  ;;  %v1111_v62 = vpop.f32.mrf.mxu1  ;;  %v575_v1 = vmax.f32 %v467_v53, 0.0  ;;  %v591_v2 = vmax.f32 %v531_v54, 0.0 }
  0xfa   : > { %957 = vst [vmem:[%s1314_s17] sm:$0xff] %v956_v57   ;;  %1040 = vst [vmem:[%s1314_s17 + $0x40] sm:$0xff] %v996_v58   ;;  %v470_v63 = vadd.f32 %v1095_v61, %v1299_v24  ;;  %v534_v0 = vadd.f32 %v1111_v62, %v1299_v24  ;;  %v573_v9 = vmax.f32 %v459_v59, 0.0 }
  0xfb   : > { %v461_v3 = vpop.f32.mrf.mxu0  ;;  %v525_v4 = vpop.f32.mrf.mxu1  ;;  %v589_v10 = vmax.f32 %v523_v60, 0.0 }
  0xfc   : > { %v576_v5 = vmax.f32 %v470_v63, 0.0  ;;  %v592_v6 = vmax.f32 %v534_v0, 0.0  ;;  %v462_v7 = vadd.f32 %v1299_v24, %v461_v3  ;;  %v526_v8 = vadd.f32 %v1299_v24, %v525_v4 }
  0xfd   : > { %v1098_v11 = vpop.f32.mrf.mxu0  ;;  %v1114_v12 = vpop.f32.mrf.mxu1 }
  0xfe   : > { %v971_v13 = vpack.c.bf16 %v576_v5, %v575_v1  ;;  %v1011_v14 = vpack.c.bf16 %v592_v6, %v591_v2  ;;  %v574_v15 = vmax.f32 %v462_v7, 0.0  ;;  %v590_v16 = vmax.f32 %v526_v8, 0.0 }
  0xff   : > { %v483_v17 = vadd.f32 %v1098_v11, %v1299_v24  ;;  %v547_v18 = vadd.f32 %v1114_v12, %v1299_v24  ;;  %v474_v19 = vpop.f32.mrf.mxu0  ;;  %v538_v20 = vpop.f32.mrf.mxu1 }
 0x100   : > { %1035 = vst [vmem:[%s1314_s17 + $0x18] sm:$0xff] %v971_v13   ;;  %1043 = vst [vmem:[%s1314_s17 + $0x58] sm:$0xff] %v1011_v14   ;;  %v966_v21 = vpack.c.bf16 %v574_v15, %v573_v9  ;;  %v1006_v22 = vpack.c.bf16 %v590_v16, %v589_v10  ;;  %v475_v23 = vadd.f32 %v1299_v24, %v474_v19 }
 0x101   : > { %v539_v25 = vadd.f32 %v1299_v24, %v538_v20  ;;  %v1099_v26 = vpop.f32.mrf.mxu0  ;;  %v1115_v27 = vpop.f32.mrf.mxu1  ;;  %v579_v30 = vmax.f32 %v483_v17, 0.0  ;;  %v595_v31 = vmax.f32 %v547_v18, 0.0 }
 0x102   : > { %1034 = vst [vmem:[%s1314_s17 + $0x10] sm:$0xff] %v966_v21   ;;  %1042 = vst [vmem:[%s1314_s17 + $0x50] sm:$0xff] %v1006_v22   ;;  %v486_v28 = vadd.f32 %v1099_v26, %v1299_v24  ;;  %v550_v29 = vadd.f32 %v1115_v27, %v1299_v24  ;;  %v577_v38 = vmax.f32 %v475_v23, 0.0 }
 0x103   : > { %v477_v32 = vpop.f32.mrf.mxu0  ;;  %v541_v33 = vpop.f32.mrf.mxu1  ;;  %v593_v39 = vmax.f32 %v539_v25, 0.0 }
 0x104   : > { %v580_v34 = vmax.f32 %v486_v28, 0.0  ;;  %v596_v35 = vmax.f32 %v550_v29, 0.0  ;;  %v478_v36 = vadd.f32 %v1299_v24, %v477_v32  ;;  %v542_v37 = vadd.f32 %v1299_v24, %v541_v33 }
 0x105   : > { %v1102_v40 = vpop.f32.mrf.mxu0  ;;  %v1118_v41 = vpop.f32.mrf.mxu1 }
 0x106   : > { %v981_v42 = vpack.c.bf16 %v580_v34, %v579_v30  ;;  %v1021_v43 = vpack.c.bf16 %v596_v35, %v595_v31  ;;  %v578_v44 = vmax.f32 %v478_v36, 0.0  ;;  %v594_v45 = vmax.f32 %v542_v37, 0.0 }
 0x107   : > { %v499_v46 = vadd.f32 %v1102_v40, %v1299_v24  ;;  %v563_v47 = vadd.f32 %v1118_v41, %v1299_v24  ;;  %v490_v48 = vpop.f32.mrf.mxu0  ;;  %v554_v49 = vpop.f32.mrf.mxu1 }
 0x108   : > { %1037 = vst [vmem:[%s1314_s17 + $0x28] sm:$0xff] %v981_v42   ;;  %1045 = vst [vmem:[%s1314_s17 + $0x68] sm:$0xff] %v1021_v43   ;;  %v976_v50 = vpack.c.bf16 %v578_v44, %v577_v38  ;;  %v1016_v51 = vpack.c.bf16 %v594_v45, %v593_v39  ;;  %v491_v52 = vadd.f32 %v1299_v24, %v490_v48 }
 0x109   : > { %v555_v53 = vadd.f32 %v1299_v24, %v554_v49  ;;  %v1103_v54 = vpop.f32.mrf.mxu0  ;;  %v1119_v55 = vpop.f32.mrf.mxu1  ;;  %v583_v58 = vmax.f32 %v499_v46, 0.0  ;;  %v599_v59 = vmax.f32 %v563_v47, 0.0 }
 0x10a   : > { %1036 = vst [vmem:[%s1314_s17 + $0x20] sm:$0xff] %v976_v50   ;;  %1044 = vst [vmem:[%s1314_s17 + $0x60] sm:$0xff] %v1016_v51   ;;  %v502_v56 = vadd.f32 %v1103_v54, %v1299_v24  ;;  %v566_v57 = vadd.f32 %v1119_v55, %v1299_v24  ;;  %v581_v2 = vmax.f32 %v491_v52, 0.0 }
 0x10b   : > { %v493_v60 = vpop.f32.mrf.mxu0  ;;  %v557_v61 = vpop.f32.mrf.mxu1  ;;  %v597_v3 = vmax.f32 %v555_v53, 0.0 }
 0x10c   : > { %v584_v62 = vmax.f32 %v502_v56, 0.0  ;;  %v600_v63 = vmax.f32 %v566_v57, 0.0  ;;  %v494_v0 = vadd.f32 %v1299_v24, %v493_v60  ;;  %v558_v1 = vadd.f32 %v1299_v24, %v557_v61 }
 0x10e   : > { %v991_v4 = vpack.c.bf16 %v584_v62, %v583_v58  ;;  %v1031_v5 = vpack.c.bf16 %v600_v63, %v599_v59  ;;  %v582_v6 = vmax.f32 %v494_v0, 0.0  ;;  %v598_v7 = vmax.f32 %v558_v1, 0.0 }
 0x110   : > { %1039 = vst [vmem:[%s1314_s17 + $0x38] sm:$0xff] %v991_v4   ;;  %1047 = vst [vmem:[%s1314_s17 + $0x78] sm:$0xff] %v1031_v5   ;;  %v986_v8 = vpack.c.bf16 %v582_v6, %v581_v2  ;;  %v1026_v9 = vpack.c.bf16 %v598_v7, %v597_v3 }
 0x112   : > { %1038 = vst [vmem:[%s1314_s17 + $0x30] sm:$0xff] %v986_v8   ;;  %1046 = vst [vmem:[%s1314_s17 + $0x70] sm:$0xff] %v1026_v9  }
 0x113 PF: > { %s13_s14 = sadd.s32 1, %s1206_s14   ;;  %s1369_s12 = smov %s1202_s13 }
 0x114   : > { %p10_p5 = scmp.ge.s32.totalorder %s13_s14, 4   ;;  %s1370_s13 = smov %s1372_s15 }
 0x116   :  { %12 = sbr.rel (!%p10_p5) target bundleno = 2 (0x2), region = 62 }

// kernel: att_depth_forward.12
= control target key start
LH: loop header
LB: loop body
LE: loop exit
PB: predicated region body
PF: predicated region fallthrough
CT: control target
= control target key end

     0   :  { %s824_s12 = smov 0   ;;  %s826_s13 = smov 0   ;;  %s922_s0 = inlined_call_operand.vmem [shape: bf16[2,1,64,256], index: 0, kind: input, shape index: {}]   ;;  %s923_s1 = inlined_call_operand.vmem [shape: bf16[1,256,128], index: 1, kind: input, shape index: {}]   ;;  %s924_s2 = inlined_call_operand.vmem [shape: f32[1,1,128], index: 2, kind: input, shape index: {}]   ;;  %s925_s3 = inlined_call_operand.vmem [shape: bf16[2,64,128], index: 3, kind: output, shape index: {}]  }
   0x1   :  { %s828_s14 = smov 0  }
   0x2 LB: > { %s25_s15 = sadd.s32 1, %s798_s13  ;;  %p599_p0 = scmp.ge.s32.totalorder %s802_s14, 1  ;;  %s802_s14 = sphi %s828_s14, %s13_s14   ;;  %s798_s13 = sphi %s826_s13, %s927_s13   ;;  %s794_s12 = sphi %s824_s12, %s926_s12  }
   0x3   : > { %p27_p1 = scmp.ge.s32.totalorder %s25_s15, 2  ;;  %p157_p2 = scmp.lt.s32.totalorder %s802_s14, 3 }
   0x5   : > { %s929_s15 = smov (%p27_p1, %s25_s15), 0  ;;  %p158_p3 = pnand %p599_p0, %p157_p2 }
   0x6   : > { %p189_p4 = scmp.lt.s32.totalorder (!%p158_p3), %s794_s12, 1 }
   0x7   : > { %161 = sbr.rel (%p158_p3) target bundleno = 261 (0x105), region = 32 }
   0xc   : > { %v752_v0 = vld [vmem:[%s923_s1 + $0x78] sm:$0xff]   ;;  %v754_v2 = vld [vmem:[%s923_s1 + $0x70] sm:$0xff]   ;;  %v756_v4 = vld [vmem:[%s923_s1 + $0x68] sm:$0xff]   ;;  %s931_s12 = smov (!%p189_p4, %s794_s12), 1 }
   0xd   : > { %v753_v1 = vld [vmem:[%s923_s1 + $0x38] sm:$0xff]   ;;  %672 = vmatprep.subr.bf16.mxu0 %v752_v0  ;;  %712 = vmatprep.subr.bf16.mxu1 %v752_v0  ;;  %v755_v3 = vld [vmem:[%s923_s1 + $0x30] sm:$0xff]   ;;  %v757_v5 = vld [vmem:[%s923_s1 + $0x28] sm:$0xff]   ;;  %s639_s5 = sshll.u32 %s931_s12, 6  ;;  %s640_s4 = sshll.u32 %s931_s12, 5 }
   0xe   : > { %673 = vmatpush3.bf16.msra.mxu0 %v753_v1  ;;  %720 = vmatpush3.bf16.msra.mxu1 %v753_v1  ;;  %v758_v6 = vld [vmem:[%s923_s1 + $0x60] sm:$0xff]   ;;  %v760_v8 = vld [vmem:[%s923_s1 + $0x58] sm:$0xff]   ;;  %s875_s10 = scalar_lea.vmem %s922_s0, %s639_s5  ;;  %v762_v10 = vld [vmem:[%s923_s1 + $0x50] sm:$0xff]   ;;  %s206_s7 = scalar_lea.vmem %s925_s3, %s640_s4 }
   0xf   : > { %674 = vmatprep.subr.bf16.mxu0 %v754_v2  ;;  %713 = vmatprep.subr.bf16.mxu1 %v754_v2  ;;  %v759_v7 = vld [vmem:[%s923_s1 + $0x20] sm:$0xff]   ;;  %v761_v9 = vld [vmem:[%s923_s1 + $0x18] sm:$0xff]   ;;  %v763_v13 = vld [vmem:[%s923_s1 + $0x10] sm:$0xff]  }
  0x10   : > { %v770_v11 = vld [vmem:[%s875_s10 + $0x4] ss:$8 sps:$4 sm:$0xff]   ;;  %v768_v18 = vld [vmem:[%s875_s10] ss:$8 sps:$4 sm:$0xff]   ;;  %v774_v20 = vld [vmem:[%s875_s10 + $0x14] ss:$8 sps:$4 sm:$0xff]  }
  0x11   : > { %v773_v12 = vld [vmem:[%s875_s10 + $0x24] ss:$8 sps:$4 sm:$0xff]   ;;  %424 = vmatprep.mubr.bf16.mxu0 %v770_v11  ;;  %v771_v19 = vld [vmem:[%s875_s10 + $0x20] ss:$8 sps:$4 sm:$0xff]   ;;  %v776_v21 = vld [vmem:[%s875_s10 + $0x34] ss:$8 sps:$4 sm:$0xff]  }
  0x12   : > { %675 = vmatpush3.bf16.msra.mxu0 %v755_v3  ;;  %721 = vmatpush3.bf16.msra.mxu1 %v755_v3  ;;  %v764_v14 = vld [vmem:[%s923_s1 + $0x48] sm:$0xff]   ;;  %v766_v16 = vld [vmem:[%s923_s1 + $0x40] sm:$0xff]   ;;  %v778_v22 = vld [vmem:[%s875_s10 + $0x10] ss:$8 sps:$4 sm:$0xff]  }
  0x13   : > { %676 = vmatprep.subr.bf16.mxu0 %v756_v4  ;;  %714 = vmatprep.subr.bf16.mxu1 %v756_v4  ;;  %v765_v15 = vld [vmem:[%s923_s1 + $0x8] sm:$0xff]   ;;  %v767_v17 = vld [vmem:[%s923_s1] sm:$0xff]   ;;  %v779_v23 = vld [vmem:[%s875_s10 + $0x30] ss:$8 sps:$4 sm:$0xff]  }
  0x14   : > { %440 = vmatprep.mubr.bf16.mxu1 %v773_v12  ;;  %v604_v28 = vld [vmem:[%s924_s2] ss:$0 sm:$0xff] }
  0x16   : > { %677 = vmatpush3.bf16.msra.mxu0 %v757_v5  ;;  %722 = vmatpush3.bf16.msra.mxu1 %v757_v5 }
  0x17   : > { %678 = vmatprep.subr.bf16.mxu0 %v758_v6  ;;  %715 = vmatprep.subr.bf16.mxu1 %v758_v6 }
  0x1a   : > { %679 = vmatpush3.bf16.msra.mxu0 %v759_v7  ;;  %723 = vmatpush3.bf16.msra.mxu1 %v759_v7 }
  0x1b   : > { %680 = vmatprep.subr.bf16.mxu0 %v760_v8  ;;  %716 = vmatprep.subr.bf16.mxu1 %v760_v8 }
  0x1e   : > { %681 = vmatpush3.bf16.msra.mxu0 %v761_v9  ;;  %724 = vmatpush3.bf16.msra.mxu1 %v761_v9 }
  0x1f   : > { %682 = vmatprep.subr.bf16.mxu0 %v762_v10  ;;  %717 = vmatprep.subr.bf16.mxu1 %v762_v10 }
  0x22   : > { %683 = vmatpush3.bf16.msra.mxu0 %v763_v13  ;;  %725 = vmatpush3.bf16.msra.mxu1 %v763_v13 }
  0x23   : > { %684 = vmatprep.subr.bf16.mxu0 %v764_v14  ;;  %718 = vmatprep.subr.bf16.mxu1 %v764_v14 }
  0x26   : > { %685 = vmatpush3.bf16.msra.mxu0 %v765_v15  ;;  %726 = vmatpush3.bf16.msra.mxu1 %v765_v15 }
  0x27   : > { %686 = vmatprep.subr.bf16.mxu0 %v766_v16  ;;  %719 = vmatprep.subr.bf16.mxu1 %v766_v16 }
  0x2a   : > { %687 = vmatpush3.bf16.msra.mxu0 %v767_v17  ;;  %727 = vmatpush3.bf16.msra.mxu1 %v767_v17 }
  0x2d   : > { %425 = vmatmul.mubr.bf16.vlgmr.msra.gmra.mxu0 %v768_v18  ;;  %441 = vmatmul.mubr.bf16.vlgmr.msra.gmra.mxu1 %v771_v19 }
  0x2e   : > { %432 = vmatprep.mubr.bf16.mxu0 %v774_v20  ;;  %448 = vmatprep.mubr.bf16.mxu1 %v776_v21 }
  0x35   : > { %433 = vmatmul.mubr.bf16.gmra.mxu0 %v778_v22  ;;  %449 = vmatmul.mubr.bf16.gmra.mxu1 %v779_v23 }
  0xed   : > { %v688_v24 = vpop.f32.mrf.mxu0  ;;  %v700_v25 = vpop.f32.mrf.mxu1 }
  0xef   : > { %v689_v26 = vpop.f32.mrf.mxu0  ;;  %v701_v27 = vpop.f32.mrf.mxu1 }
  0xf0   : > { %v690_v29 = vadd.f32 %v689_v26, %v688_v24  ;;  %v702_v30 = vadd.f32 %v701_v27, %v700_v25 }
  0xf1   : > { %v691_v31 = vpop.f32.mrf.mxu0  ;;  %v703_v32 = vpop.f32.mrf.mxu1 }
  0xf2   : > { %v427_v33 = vadd.f32 %v690_v29, %v604_v28  ;;  %v443_v34 = vadd.f32 %v702_v30, %v604_v28 }
  0xf3   : > { %v692_v35 = vpop.f32.mrf.mxu0  ;;  %v704_v36 = vpop.f32.mrf.mxu1 }
  0xf4   : > { %v693_v37 = vadd.f32 %v692_v35, %v691_v31  ;;  %v705_v38 = vadd.f32 %v704_v36, %v703_v32  ;;  %v457_v43 = vmax.f32 %v427_v33, 0.0  ;;  %v461_v44 = vmax.f32 %v443_v34, 0.0 }
  0xf5   : > { %v694_v39 = vpop.f32.mrf.mxu0  ;;  %v706_v40 = vpop.f32.mrf.mxu1 }
  0xf6   : > { %v430_v41 = vadd.f32 %v693_v37, %v604_v28  ;;  %v446_v42 = vadd.f32 %v705_v38, %v604_v28 }
  0xf7   : > { %v695_v45 = vpop.f32.mrf.mxu0  ;;  %v707_v46 = vpop.f32.mrf.mxu1 }
  0xf8   : > { %v458_v47 = vmax.f32 %v430_v41, 0.0  ;;  %v462_v48 = vmax.f32 %v446_v42, 0.0  ;;  %v696_v49 = vadd.f32 %v695_v45, %v694_v39  ;;  %v708_v50 = vadd.f32 %v707_v46, %v706_v40 }
  0xf9   : > { %v697_v51 = vpop.f32.mrf.mxu0  ;;  %v709_v52 = vpop.f32.mrf.mxu1 }
  0xfa   : > { %v652_v53 = vpack.c.bf16 %v458_v47, %v457_v43  ;;  %v662_v54 = vpack.c.bf16 %v462_v48, %v461_v44  ;;  %v435_v57 = vadd.f32 %v696_v49, %v604_v28  ;;  %v451_v58 = vadd.f32 %v708_v50, %v604_v28 }
  0xfb   : > { %v698_v55 = vpop.f32.mrf.mxu0  ;;  %v710_v56 = vpop.f32.mrf.mxu1 }
  0xfc   : > { %653 = vst [vmem:[%s206_s7] sm:$0xff] %v652_v53   ;;  %670 = vst [vmem:[%s206_s7 + $0x10] sm:$0xff] %v662_v54   ;;  %v699_v59 = vadd.f32 %v698_v55, %v697_v51  ;;  %v711_v60 = vadd.f32 %v710_v56, %v709_v52  ;;  %v459_v63 = vmax.f32 %v435_v57, 0.0  ;;  %v463_v0 = vmax.f32 %v451_v58, 0.0 }
  0xfe   : > { %v438_v61 = vadd.f32 %v699_v59, %v604_v28  ;;  %v454_v62 = vadd.f32 %v711_v60, %v604_v28 }
 0x100   : > { %v460_v1 = vmax.f32 %v438_v61, 0.0  ;;  %v464_v2 = vmax.f32 %v454_v62, 0.0 }
 0x102   : > { %v657_v3 = vpack.c.bf16 %v460_v1, %v459_v63  ;;  %v667_v4 = vpack.c.bf16 %v464_v2, %v463_v0 }
 0x104   : > { %669 = vst [vmem:[%s206_s7 + $0x8] sm:$0xff] %v657_v3   ;;  %671 = vst [vmem:[%s206_s7 + $0x18] sm:$0xff] %v667_v4  }
 0x105 PF: > { %s13_s14 = sadd.s32 1, %s802_s14   ;;  %s926_s12 = smov %s798_s13 }
 0x106   : > { %p10_p5 = scmp.ge.s32.totalorder %s13_s14, 4   ;;  %s927_s13 = smov %s929_s15 }
 0x108   :  { %12 = sbr.rel (!%p10_p5) target bundleno = 2 (0x2), region = 62 }

// kernel: att_depth_forward.13
= control target key start
LH: loop header
LB: loop body
LE: loop exit
PB: predicated region body
PF: predicated region fallthrough
CT: control target
= control target key end

     0   :  { %s649_s12 = smov 0   ;;  %s651_s13 = smov 0   ;;  %s737_s0 = inlined_call_operand.vmem [shape: bf16[2,1,16,256], index: 0, kind: input, shape index: {}]   ;;  %s738_s1 = inlined_call_operand.vmem [shape: bf16[1,256,128], index: 1, kind: input, shape index: {}]   ;;  %s739_s2 = inlined_call_operand.vmem [shape: f32[1,1,128], index: 2, kind: input, shape index: {}]   ;;  %s740_s3 = inlined_call_operand.vmem [shape: bf16[2,16,128], index: 3, kind: output, shape index: {}]  }
   0x1   :  { %s653_s14 = smov 0  }
   0x2 LB: > { %s25_s15 = sadd.s32 1, %s623_s13  ;;  %p503_p0 = scmp.ge.s32.totalorder %s627_s14, 1  ;;  %s627_s14 = sphi %s653_s14, %s13_s14   ;;  %s623_s13 = sphi %s651_s13, %s742_s13   ;;  %s619_s12 = sphi %s649_s12, %s741_s12  }
   0x3   : > { %p27_p1 = scmp.ge.s32.totalorder %s25_s15, 2  ;;  %p157_p2 = scmp.lt.s32.totalorder %s627_s14, 3 }
   0x5   : > { %s744_s15 = smov (%p27_p1, %s25_s15), 0  ;;  %p158_p3 = pnand %p503_p0, %p157_p2 }
   0x6   : > { %p189_p4 = scmp.lt.s32.totalorder (!%p158_p3), %s619_s12, 1 }
   0x7   : > { %161 = sbr.rel (%p158_p3) target bundleno = 253 (0xfd), region = 32 }
   0xc   : > { %v586_v0 = vld [vmem:[%s738_s1 + $0x78] sm:$0xff]   ;;  %v588_v2 = vld [vmem:[%s738_s1 + $0x70] sm:$0xff]   ;;  %v590_v4 = vld [vmem:[%s738_s1 + $0x68] sm:$0xff]   ;;  %s746_s12 = smov (!%p189_p4, %s619_s12), 1 }
   0xd   : > { %v587_v1 = vld [vmem:[%s738_s1 + $0x38] sm:$0xff]   ;;  %540 = vmatprep.subr.bf16.mxu0 %v586_v0  ;;  %v589_v3 = vld [vmem:[%s738_s1 + $0x30] sm:$0xff]   ;;  %v591_v5 = vld [vmem:[%s738_s1 + $0x28] sm:$0xff]   ;;  %s531_s5 = sshll.u32 %s746_s12, 4  ;;  %s532_s4 = sshll.u32 %s746_s12, 3 }
   0xe   : > { %541 = vmatpush3.bf16.msra.mxu0 %v587_v1  ;;  %v592_v6 = vld [vmem:[%s738_s1 + $0x60] sm:$0xff]   ;;  %v594_v8 = vld [vmem:[%s738_s1 + $0x58] sm:$0xff]   ;;  %s197_s10 = scalar_lea.vmem %s737_s0, %s531_s5  ;;  %v596_v10 = vld [vmem:[%s738_s1 + $0x50] sm:$0xff]   ;;  %s206_s7 = scalar_lea.vmem %s740_s3, %s532_s4 }
   0xf   : > { %542 = vmatprep.subr.bf16.mxu0 %v588_v2  ;;  %v593_v7 = vld [vmem:[%s738_s1 + $0x20] sm:$0xff]   ;;  %v595_v9 = vld [vmem:[%s738_s1 + $0x18] sm:$0xff]   ;;  %v597_v12 = vld [vmem:[%s738_s1 + $0x10] sm:$0xff]  }
  0x10   : > { %v604_v11 = vld [vmem:[%s197_s10 + $0x4] ss:$8 sps:$4 sm:$0xff]   ;;  %v602_v17 = vld [vmem:[%s197_s10] ss:$8 sps:$4 sm:$0xff]  }
  0x11   : > { %388 = vmatprep.mubr.bf16.mxu0 %v604_v11  ;;  %v598_v13 = vld [vmem:[%s738_s1 + $0x48] sm:$0xff]   ;;  %v600_v15 = vld [vmem:[%s738_s1 + $0x40] sm:$0xff]  }
  0x12   : > { %543 = vmatpush3.bf16.msra.mxu0 %v589_v3  ;;  %v599_v14 = vld [vmem:[%s738_s1 + $0x8] sm:$0xff]   ;;  %v601_v16 = vld [vmem:[%s738_s1] sm:$0xff]  }
  0x13   : > { %544 = vmatprep.subr.bf16.mxu0 %v590_v4  ;;  %v508_v21 = vld [vmem:[%s739_s2] ss:$0 sm:$0xff] }
  0x16   : > { %545 = vmatpush3.bf16.msra.mxu0 %v591_v5 }
  0x17   : > { %546 = vmatprep.subr.bf16.mxu0 %v592_v6 }
  0x1a   : > { %547 = vmatpush3.bf16.msra.mxu0 %v593_v7 }
  0x1b   : > { %548 = vmatprep.subr.bf16.mxu0 %v594_v8 }
  0x1e   : > { %549 = vmatpush3.bf16.msra.mxu0 %v595_v9 }
  0x1f   : > { %550 = vmatprep.subr.bf16.mxu0 %v596_v10 }
  0x22   : > { %551 = vmatpush3.bf16.msra.mxu0 %v597_v12 }
  0x23   : > { %552 = vmatprep.subr.bf16.mxu0 %v598_v13 }
  0x26   : > { %553 = vmatpush3.bf16.msra.mxu0 %v599_v14 }
  0x27   : > { %554 = vmatprep.subr.bf16.mxu0 %v600_v15 }
  0x2a   : > { %555 = vmatpush3.bf16.msra.mxu0 %v601_v16 }
  0x2d   : > { %389 = vmatmul.mubr.bf16.vlgmr.msra.gmra.mxu0 %v602_v17 }
  0xed   : > { %v556_v18 = vpop.f32.mrf.mxu0 }
  0xef   : > { %v557_v19 = vpop.f32.mrf.mxu0 }
  0xf0   : > { %v558_v20 = vadd.f32 %v557_v19, %v556_v18 }
  0xf1   : > { %v559_v22 = vpop.f32.mrf.mxu0 }
  0xf2   : > { %v391_v24 = vadd.f32 %v558_v20, %v508_v21 }
  0xf3   : > { %v560_v23 = vpop.f32.mrf.mxu0 }
  0xf4   : > { %v561_v25 = vadd.f32 %v560_v23, %v559_v22  ;;  %v397_v27 = vmax.f32 %v391_v24, 0.0 }
  0xf6   : > { %v394_v26 = vadd.f32 %v561_v25, %v508_v21 }
  0xf8   : > { %v398_v28 = vmax.f32 %v394_v26, 0.0 }
  0xfa   : > { %v538_v29 = vpack.c.bf16 %v398_v28, %v397_v27 }
  0xfc   : > { %539 = vst [vmem:[%s206_s7] sm:$0xff] %v538_v29  }
  0xfd PF: > { %s13_s14 = sadd.s32 1, %s627_s14   ;;  %s741_s12 = smov %s623_s13 }
  0xfe   : > { %p10_p5 = scmp.ge.s32.totalorder %s13_s14, 4   ;;  %s742_s13 = smov %s744_s15 }
 0x100   :  { %12 = sbr.rel (!%p10_p5) target bundleno = 2 (0x2), region = 62 }

// kernel: att_depth_forward.15
= control target key start
LH: loop header
LB: loop body
LE: loop exit
PB: predicated region body
PF: predicated region fallthrough
CT: control target
= control target key end

     0   :  { %s573_s12 = smov 0   ;;  %s575_s13 = smov 0   ;;  %s640_s0 = inlined_call_operand.vmem [shape: bf16[2,1,16,128], index: 0, kind: input, shape index: {}]   ;;  %s641_s1 = inlined_call_operand.vmem [shape: bf16[1,128,128], index: 1, kind: input, shape index: {}]   ;;  %s642_s2 = inlined_call_operand.vmem [shape: f32[1,1,128], index: 2, kind: input, shape index: {}]   ;;  %s643_s3 = inlined_call_operand.vmem [shape: bf16[2,16,128], index: 3, kind: output, shape index: {}]  }
   0x1   :  { %s577_s14 = smov 0  }
   0x2 LB: > { %s25_s15 = sadd.s32 1, %s545_s13  ;;  %p435_p0 = scmp.ge.s32.totalorder %s549_s14, 1  ;;  %s549_s14 = sphi %s577_s14, %s13_s14   ;;  %s545_s13 = sphi %s575_s13, %s645_s13   ;;  %s541_s12 = sphi %s573_s12, %s644_s12  }
   0x3   : > { %p27_p1 = scmp.ge.s32.totalorder %s25_s15, 2  ;;  %p157_p2 = scmp.lt.s32.totalorder %s549_s14, 3 }
   0x5   : > { %s647_s15 = smov (%p27_p1, %s25_s15), 0  ;;  %p158_p3 = pnand %p435_p0, %p157_p2 }
   0x6   : > { %p189_p4 = scmp.lt.s32.totalorder (!%p158_p3), %s541_s12, 1 }
   0x7   : > { %161 = sbr.rel (%p158_p3) target bundleno = 249 (0xf9), region = 32 }
   0xc   : > { %v518_v0 = vld [vmem:[%s641_s1 + $0x38] sm:$0xff]   ;;  %v551_v1 = vmov 0.0   ;;  %v519_v2 = vld [vmem:[%s641_s1 + $0x30] sm:$0xff]   ;;  %vm552_vm0 = vmmov 0   ;;  %s649_s12 = smov (!%p189_p4, %s541_s12), 1  ;;  %v520_v3 = vld [vmem:[%s641_s1 + $0x28] sm:$0xff]  }
   0xd   : > { %472 = vmatprep.subr.bf16.mxu0 %v551_v1  ;;  %488 = vmatprep.mubr.msk.bf16.mxu0 %vm552_vm0, %v551_v1  ;;  %s454_s22 = sshll.u32 %s649_s12, 3  ;;  %v521_v4 = vld [vmem:[%s641_s1 + $0x20] sm:$0xff]   ;;  %v522_v5 = vld [vmem:[%s641_s1 + $0x18] sm:$0xff]   ;;  %v523_v6 = vld [vmem:[%s641_s1 + $0x10] sm:$0xff]  }
   0xe   : > { %473 = vmatpush3.bf16.msra.mxu0 %v518_v0  ;;  %s197_s25 = scalar_lea.vmem %s640_s0, %s454_s22  ;;  %v524_v7 = vld [vmem:[%s641_s1 + $0x8] sm:$0xff]   ;;  %v525_v8 = vld [vmem:[%s641_s1] sm:$0xff]   ;;  %s206_s17 = scalar_lea.vmem %s643_s3, %s454_s22 }
   0xf   : > { %474 = vmatprep.subr.bf16.mxu0 %v551_v1  ;;  %v526_v9 = vld [vmem:[%s197_s25] sm:$0xff]  }
  0x10   : > { %v440_v10 = vld [vmem:[%s642_s2] ss:$0 sm:$0xff] }
  0x12   : > { %475 = vmatpush3.bf16.msra.mxu0 %v519_v2 }
  0x13   : > { %476 = vmatprep.subr.bf16.mxu0 %v551_v1 }
  0x16   : > { %477 = vmatpush3.bf16.msra.mxu0 %v520_v3 }
  0x17   : > { %478 = vmatprep.subr.bf16.mxu0 %v551_v1 }
  0x1a   : > { %479 = vmatpush3.bf16.msra.mxu0 %v521_v4 }
  0x1b   : > { %480 = vmatprep.subr.bf16.mxu0 %v551_v1 }
  0x1e   : > { %481 = vmatpush3.bf16.msra.mxu0 %v522_v5 }
  0x1f   : > { %482 = vmatprep.subr.bf16.mxu0 %v551_v1 }
  0x22   : > { %483 = vmatpush3.bf16.msra.mxu0 %v523_v6 }
  0x23   : > { %484 = vmatprep.subr.bf16.mxu0 %v551_v1 }
  0x26   : > { %485 = vmatpush3.bf16.msra.mxu0 %v524_v7 }
  0x27   : > { %486 = vmatprep.subr.bf16.mxu0 %v551_v1 }
  0x2a   : > { %487 = vmatpush3.bf16.msra.mxu0 %v525_v8 }
  0x2d   : > { %489 = vmatmul.mubr.bf16.vlgmr.msra.gmra.mxu0 %v526_v9 }
  0xed   : > { %v322_v11 = vpop.f32.mrf.mxu0 }
  0xee   : > { %v323_v13 = vadd.f32 %v440_v10, %v322_v11 }
  0xef   : > { %v490_v12 = vpop.f32.mrf.mxu0 }
  0xf0   : > { %v329_v17 = vmax.f32 %v323_v13, 0.0 }
  0xf1   : > { %v325_v14 = vpop.f32.mrf.mxu0 }
  0xf2   : > { %v326_v15 = vadd.f32 %v440_v10, %v325_v14 }
  0xf3   : > { %v491_v16 = vpop.f32.mrf.mxu0 }
  0xf4   : > { %v330_v18 = vmax.f32 %v326_v15, 0.0 }
  0xf6   : > { %v461_v19 = vpack.c.bf16 %v330_v18, %v329_v17 }
  0xf8   : > { %462 = vst [vmem:[%s206_s17] sm:$0xff] %v461_v19  }
  0xf9 PF: > { %s13_s14 = sadd.s32 1, %s549_s14   ;;  %s644_s12 = smov %s545_s13 }
  0xfa   : > { %p10_p5 = scmp.ge.s32.totalorder %s13_s14, 4   ;;  %s645_s13 = smov %s647_s15 }
  0xfc   :  { %12 = sbr.rel (!%p10_p5) target bundleno = 2 (0x2), region = 62 }

// kernel: att_depth_forward.14
= control target key start
LH: loop header
LB: loop body
LE: loop exit
PB: predicated region body
PF: predicated region fallthrough
CT: control target
= control target key end

     0   :  { %s4849_s12 = smov 0   ;;  %s4851_s13 = smov 0   ;;  %s5871_s0 = inlined_call_operand.vmem [shape: bf16[2,1,106,128], index: 0, kind: input, shape index: {}]   ;;  %s5872_s1 = inlined_call_operand.vmem [shape: bf16[19,128,128], index: 1, kind: input, shape index: {}]   ;;  %s5873_s2 = inlined_call_operand.vmem [shape: f32[2,1,128], index: 2, kind: input, shape index: {}]   ;;  %s5874_s3 = inlined_call_operand.vmem [shape: bf16[2,40,128], index: 3, kind: output, shape index: {}]  }
   0x1   :  { %s4853_s14 = smov 0  }
   0x2 LB: > { %s25_s15 = sadd.s32 1, %s4821_s13  ;;  %p3316_p0 = scmp.ge.s32.totalorder %s4825_s14, 1  ;;  %s4825_s14 = sphi %s4853_s14, %s13_s14   ;;  %s4821_s13 = sphi %s4851_s13, %s5876_s13   ;;  %s4817_s12 = sphi %s4849_s12, %s5875_s12  }
   0x3   : > { %p27_p1 = scmp.ge.s32.totalorder %s25_s15, 2  ;;  %p165_p2 = scmp.lt.s32.totalorder %s4825_s14, 3 }
   0x5   : > { %s5878_s15 = smov (%p27_p1, %s25_s15), 0  ;;  %p166_p3 = pnand %p3316_p0, %p165_p2 }
   0x6   : > { %p200_p4 = scmp.lt.s32.totalorder (!%p166_p3), %s4817_s12, 1 }
   0x7   : > { %169 = sbr.rel (%p166_p3) target bundleno = 544 (0x220), region = 32 }
   0xc   : > { %v4608_v0 = vld [vmem:[%s5872_s1 + $0x78] sm:$0xff]   ;;  %v4827_v1 = vmov 0.0   ;;  %v4610_v3 = vld [vmem:[%s5872_s1 + $0x70] sm:$0xff]   ;;  %vm4828_vm0 = vmmov 0   ;;  %s5880_s12 = smov (!%p200_p4, %s4817_s12), 1  ;;  %v4612_v5 = vld [vmem:[%s5872_s1 + $0x68] sm:$0xff]  }
   0xd   : > { %4032 = vmatprep.subr.bf16.mxu0 %v4827_v1  ;;  %4060 = vmatprep.subr.bf16.mxu1 %v4827_v1  ;;  %v4609_v2 = vld [vmem:[%s5872_s1 + $0x38] sm:$0xff]   ;;  %v4611_v4 = vld [vmem:[%s5872_s1 + $0x30] sm:$0xff]   ;;  %v4613_v6 = vld [vmem:[%s5872_s1 + $0x28] sm:$0xff]   ;;  %s4580_s28 = smul.u32 56, %s5880_s12  ;;  %vm281_vm1 = vsmask.f32 6400  ;;  %s211_s16 = scalar_lea.vmem %s5873_s2, %s5880_s12 }
   0xe   : > { %4033 = vmatpush3.bf16.msra.mxu0 %v4608_v0  ;;  %4048 = vmatprep.mubr.msk.bf16.mxu0 %vm4828_vm0, %v4827_v1  ;;  %v4614_v7 = vld [vmem:[%s5872_s1 + $0x60] sm:$0xff]   ;;  %v4616_v9 = vld [vmem:[%s5872_s1 + $0x58] sm:$0xff]   ;;  %v4618_v14 = vld [vmem:[%s5872_s1 + $0x50] sm:$0xff]   ;;  %vm426_vm2 = vsmask.f32 7424  ;;  %vm2175_vm5 = vcmask 1044480  }
   0xf   : > { %4061 = vmatpush3.bf16.msra.mxu1 %v4609_v2  ;;  %4034 = vmatprep.subr.bf16.mxu0 %v4827_v1  ;;  %v4615_v8 = vld [vmem:[%s5872_s1 + $0x20] sm:$0xff]   ;;  %s4909_s8 = scalar_lea.vmem %s5871_s0, %s4580_s28  ;;  %v4617_v10 = vld [vmem:[%s5872_s1 + $0x18] sm:$0xff]   ;;  %v4619_v21 = vld [vmem:[%s5872_s1 + $0x10] sm:$0xff]   ;;  %vm582_vm3 = vsmask.f32 5376  ;;  %vm2578_vm6 = vcmask 1045504  }
  0x10   : > { %4062 = vmatprep.subr.bf16.mxu1 %v4827_v1  ;;  %4076 = vmatprep.mubr.msk.bf16.mxu1 %vm4828_vm0, %v4827_v1  ;;  %v223_v11 = vld [vmem:[%s4909_s8 + $0x10] sm:$0xf]  ;;  %v245_v12 = vld [vmem:[%s4909_s8 + $0x4] sm:$0xe]  ;;  %v4922_v13 = vld [vmem:[%s4909_s8 + $0x8] sm:$0xf] }
  0x11   : > { %v247_v15 = vld [vmem:[%s4909_s8 + $0xc] sm:$0xf]  ;;  %v3335_v16 = vcombine.low %v245_v12, %v4922_v13  ;;  %v4930_v17 = vld [vmem:[%s4909_s8 + $0x14] sm:$0xf]  ;;  %v4934_v20 = vld [vmem:[%s4909_s8 + $0x18] sm:$0xff]   ;;  %vm3052_vm7 = vcmask 1046528  }
  0x12   : > { %4035 = vmatpush3.bf16.msra.mxu0 %v4610_v3  ;;  %v3336_v18 = vcombine.low %v247_v15, %v223_v11  ;;  %v3346_v19 = vcombine.low %v223_v11, %v4930_v17  ;;  %v4620_v27 = vld [vmem:[%s5872_s1 + $0x48] sm:$0xff]   ;;  %v435_v33 = vshll.u32 %v4934_v20, 16  ;;  %v439_v37 = vshrl.u32 %v4934_v20, 16  ;;  %v4622_v38 = vld [vmem:[%s5872_s1 + $0x40] sm:$0xff]   ;;  %v248_v48 = vld [vmem:[%s4909_s8 + $0x18] sm:$0x3] }
  0x13   : > { %4063 = vmatpush3.bf16.msra.mxu1 %v4611_v4  ;;  %4036 = vmatprep.subr.bf16.mxu0 %v4827_v1  ;;  %v283_v22 = vshrl.u32 %v3335_v16, 16  ;;  %v286_v23 = vshll.u32 %v3335_v16, 16  ;;  %v4621_v28 = vld [vmem:[%s5872_s1 + $0x8] sm:$0xff]   ;;  %v4623_v42 = vld [vmem:[%s5872_s1] sm:$0xff]   ;;  %v3337_v50 = vcombine.low %v4930_v17, %v248_v48  ;;  %v4628_v52 = vld [vmem:[%s5872_s1 + $0xb8] sm:$0xff]   ;;  %s4581_s17 = smul.u32 20, %s5880_s12 }
  0x14   : > { %4064 = vmatprep.subr.bf16.mxu1 %v4827_v1  ;;  %v4941_v24 = vshrl.u32 %v3336_v18, 16  ;;  %v4943_v25 = vshll.u32 %v3336_v18, 16  ;;  %v430_v26 = vshll.u32 %v3346_v19, 16  ;;  %v428_v34 = vshrl.u32 %v3346_v19, 16  ;;  %v4965_v45 = vld [vmem:[%s4909_s8 + $0x20] sm:$0xf] }
  0x15   : > { %v285_v29 = vrot.slane %v283_v22, 1  ;;  %v288_v30 = vrot.slane %v286_v23, 2  ;;  %v1211_v36 = vrot.slane %v435_v33, 2  ;;  %v1210_v41 = vrot.slane %v439_v37, 1  ;;  %v228_v46 = vld [vmem:[%s4909_s8 + $0x24] sm:$0x1]  ;;  %s220_s20 = scalar_lea.vmem %s5874_s3, %s4581_s17 }
  0x16   : > { %4037 = vmatpush3.bf16.msra.mxu0 %v4612_v5  ;;  %v293_v31 = vrot.slane %v4941_v24, 1  ;;  %v296_v32 = vrot.slane %v4943_v25, 2  ;;  %v432_v35 = vrot.slane %v430_v26, 1  ;;  %v437_v44 = vrot.slane %v435_v33, 1  ;;  %v4629_v54 = vld [vmem:[%s5872_s1 + $0xf8] sm:$0xff]   ;;  %v4630_v60 = vld [vmem:[%s5872_s1 + $0xb0] sm:$0xff]  }
  0x17   : > { %4065 = vmatpush3.bf16.msra.mxu1 %v4613_v6  ;;  %4038 = vmatprep.subr.bf16.mxu0 %v4827_v1  ;;  %v289_v39 = vor.u32 %v288_v30, %v285_v29  ;;  %v3348_v47 = vcombine.low %v4965_v45, %v228_v46  ;;  %v4971_v49 = vor.u32 %v1211_v36, %v1210_v41  ;;  %v300_v56 = vshrl.u32 %v3337_v50, 16  ;;  %v4631_v61 = vld [vmem:[%s5872_s1 + $0xf0] sm:$0xff]   ;;  %v4632_v2 = vld [vmem:[%s5872_s1 + $0xa8] sm:$0xff]   ;;  %v4637_v6 = vld [vmem:[%s5872_s1 + $0xa0] sm:$0xff]  }
  0x18   : > { %4066 = vmatprep.subr.bf16.mxu1 %v4827_v1  ;;  %v297_v40 = vor.u32 %v296_v32, %v293_v31  ;;  %v433_v43 = vor.u32 %v432_v35, %v428_v34  ;;  %v303_v57 = vshll.u32 %v3337_v50, 16  ;;  %v441_v62 = vor.u32 %v439_v37, %v437_v44  ;;  %v4633_v4 = vld [vmem:[%s5872_s1 + $0xe8] sm:$0xff]   ;;  %v4639_v11 = vld [vmem:[%s5872_s1 + $0x98] sm:$0xff]   ;;  %v4641_v18 = vld [vmem:[%s5872_s1 + $0x90] sm:$0xff]  }
  0x19   : > { %v443_v55 = vshll.u32 %v3348_v47, 16  ;;  %v302_v58 = vrot.slane %v300_v56, 1  ;;  %v4640_v16 = vld [vmem:[%s5872_s1 + $0xd8] sm:$0xff]   ;;  %v591_v19 = vrot.slane %v4941_v24, 2  ;;  %v592_v20 = vrot.slane %v4943_v25, 3  ;;  %v4644_v31 = vld [vmem:[%s5872_s1 + $0xc8] sm:$0xff]  }
  0x1a   : > { %4039 = vmatpush3.bf16.msra.mxu0 %v4614_v7  ;;  %v298_v51 = vsel %vm281_vm1, %v289_v39, %v297_v40  ;;  %v4979_v53 = vsel %vm426_vm2, %v433_v43, %v437_v44  ;;  %v305_v59 = vrot.slane %v303_v57, 2  ;;  %v4638_v7 = vld [vmem:[%s5872_s1 + $0xe0] sm:$0xff]   ;;  %v751_v29 = vrot.slane %v4943_v25, 4  ;;  %v717_v30 = vld [vmem:[%s4909_s8 + $0x18] sm:$0xf] }
  0x1b   : > { %4067 = vmatpush3.bf16.msra.mxu1 %v4615_v8  ;;  %4040 = vmatprep.subr.bf16.mxu0 %v4827_v1  ;;  %v445_v63 = vrot.slane %v443_v55, 1  ;;  %v447_v8 = vshrl.u32 %v3348_v47, 16  ;;  %v3400_v25 = vcombine.low %v4930_v17, %v717_v30  ;;  %v4645_v37 = vld [vmem:[%s5872_s1 + $0x80] sm:$0xff]   ;;  %vm741_vm4 = vsmask.f32 4352  ;;  %v4649_v48 = vld [vmem:[%s5872_s1 + $0x138] sm:$0xff]  }
  0x1c   : > { %4068 = vmatprep.subr.bf16.mxu1 %v4827_v1  ;;  %v306_v0 = vor.u32 %v305_v59, %v302_v58  ;;  %v4650_v55 = vld [vmem:[%s5872_s1 + $0x178] sm:$0xff]   ;;  %v4651_v58 = vld [vmem:[%s5872_s1 + $0x130] sm:$0xff]  }
  0x1d   : > { %v5008_v5 = vsel %vm426_vm2, %v441_v62, %v445_v63  ;;  %v5029_v12 = vor.u32 %v447_v8, %v445_v63  ;;  %v755_v46 = vshrl.u32 %v3400_v25, 16  ;;  %v758_v47 = vshll.u32 %v3400_v25, 16  ;;  %v4654_v63 = vld [vmem:[%s5872_s1 + $0x128] sm:$0xff]   ;;  %v5126_v8 = vld [vmem:[%s4909_s8 + $0x14] sm:$0xff]  }
  0x1e   : > { %4041 = vmatpush3.bf16.msra.mxu0 %v4616_v9  ;;  %v307_v3 = vsel %vm281_vm1, %v297_v40, %v306_v0  ;;  %v557_v9 = vld [vmem:[%s4909_s8 + $0x4] sm:$0xc]  ;;  %v593_v40 = vor.u32 %v592_v20, %v591_v19  ;;  %v879_v19 = vld [vmem:[%s4909_s8 + $0x1c] sm:$0xf]  ;;  %v880_v20 = vld [vmem:[%s4909_s8 + $0x20] sm:$0xf] }
  0x1f   : > { %4069 = vmatpush3.bf16.msra.mxu1 %v4617_v10  ;;  %4042 = vmatprep.subr.bf16.mxu0 %v4827_v1  ;;  %v716_v10 = vld [vmem:[%s4909_s8 + $0x4] sm:$0x8]  ;;  %v757_v56 = vrot.slane %v755_v46, 3  ;;  %v760_v57 = vrot.slane %v758_v47, 4  ;;  %v4674_v46 = vld [vmem:[%s5872_s1 + $0x1a8] sm:$0xff]  }
  0x20   : > { %4070 = vmatprep.subr.bf16.mxu1 %v4827_v1  ;;  %v3399_v15 = vcombine.low %v716_v10, %v4922_v13  ;;  %v4661_v10 = vld [vmem:[%s5872_s1 + $0x110] sm:$0xff]   ;;  %v4675_v47 = vld [vmem:[%s5872_s1 + $0x1e8] sm:$0xff]  }
  0x22   : > { %4043 = vmatpush3.bf16.msra.mxu0 %v4618_v14  ;;  %v3373_v14 = vcombine.low %v557_v9, %v4922_v13  ;;  %v750_v13 = vrot.slane %v4941_v24, 3  ;;  %v743_v26 = vshrl.u32 %v3399_v15, 16  ;;  %v4643_v24 = vld [vmem:[%s5872_s1 + $0x88] sm:$0xff]   ;;  %v4660_v9 = vld [vmem:[%s5872_s1 + $0x158] sm:$0xff]  }
  0x23   : > { %4071 = vmatpush3.bf16.msra.mxu1 %v4619_v21  ;;  %4044 = vmatprep.subr.bf16.mxu0 %v4827_v1  ;;  %v4642_v21 = vld [vmem:[%s5872_s1 + $0xd0] sm:$0xff]  }
  0x24   : > { %4072 = vmatprep.subr.bf16.mxu1 %v4827_v1  ;;  %v584_v22 = vshrl.u32 %v3373_v14, 16  ;;  %v587_v23 = vshll.u32 %v3373_v14, 16  ;;  %v745_v35 = vrot.slane %v743_v26, 3  ;;  %v752_v44 = vor.u32 %v751_v29, %v750_v13  ;;  %v4663_v13 = vld [vmem:[%s5872_s1 + $0x108] sm:$0xff]  }
  0x26   : > { %4045 = vmatpush3.bf16.msra.mxu0 %v4620_v27  ;;  %v746_v27 = vshll.u32 %v3399_v15, 16  ;;  %v586_v32 = vrot.slane %v584_v22, 2  ;;  %v589_v33 = vrot.slane %v587_v23, 3 }
  0x27   : > { %4073 = vmatpush3.bf16.msra.mxu1 %v4621_v28  ;;  %4046 = vmatprep.subr.bf16.mxu0 %v4827_v1  ;;  %v558_v28 = vld [vmem:[%s4909_s8 + $0x18] sm:$0x7] }
  0x28   : > { %4074 = vmatprep.subr.bf16.mxu1 %v4827_v1  ;;  %v3374_v34 = vcombine.low %v4930_v17, %v558_v28  ;;  %v748_v36 = vrot.slane %v746_v27, 4  ;;  %v590_v39 = vor.u32 %v589_v33, %v586_v32  ;;  %v3427_v27 = vcombine.low %v879_v19, %v880_v20  ;;  %v4664_v28 = vld [vmem:[%s5872_s1 + $0x148] sm:$0xff]   ;;  %v4666_v33 = vld [vmem:[%s5872_s1 + $0x140] sm:$0xff]  }
  0x2a   : > { %4047 = vmatpush3.bf16.msra.mxu0 %v4622_v38  ;;  %v4646_v38 = vld [vmem:[%s5872_s1 + $0xc0] sm:$0xff]   ;;  %v596_v41 = vshrl.u32 %v3374_v34, 16  ;;  %v749_v43 = vor.u32 %v748_v36, %v745_v35  ;;  %v594_v50 = vsel %vm582_vm3, %v590_v39, %v593_v40  ;;  %v934_v32 = vshll.u32 %v3427_v27, 16 }
  0x2b   : > { %4075 = vmatpush3.bf16.msra.mxu1 %v4623_v42  ;;  %4088 = vmatprep.subr.bf16.mxu0 %v4827_v1  ;;  %v599_v42 = vshll.u32 %v3374_v34, 16  ;;  %v4669_v34 = vld [vmem:[%s5872_s1 + $0x1b8] sm:$0xff]   ;;  %v2315_v39 = vrot.slane %v5126_v8, 3 }
  0x2c   : > { %4116 = vmatprep.subr.bf16.mxu1 %v4827_v1  ;;  %v936_v25 = vrot.slane %v934_v32, 4 }
  0x2d   : > { %4049 = vmatmul.mubr.bf16.vlgmr.msra.gmra.mxu0 %v298_v51  ;;  %v598_v51 = vrot.slane %v596_v41, 2 }
  0x2e   : > { %4077 = vmatmul.mubr.bf16.vlgmr.msra.gmra.mxu1 %v4979_v53  ;;  %4089 = vmatpush3.bf16.msra.mxu0 %v4628_v52  ;;  %v601_v52 = vrot.slane %v599_v42, 3  ;;  %v4672_v42 = vld [vmem:[%s5872_s1 + $0x1f0] sm:$0xff]  }
  0x2f   : > { %4117 = vmatpush3.bf16.msra.mxu1 %v4629_v54  ;;  %4090 = vmatprep.subr.bf16.mxu0 %v4827_v1  ;;  %v753_v54 = vsel %vm741_vm4, %v749_v43, %v752_v44 }
  0x30   : > { %4118 = vmatprep.subr.bf16.mxu1 %v4827_v1  ;;  %4080 = vmatprep.mubr.msk.bf16.mxu1 %vm4828_vm0, %v4827_v1  ;;  %v602_v59 = vor.u32 %v601_v52, %v598_v51  ;;  %v5208_v51 = vld [vmem:[%s4909_s8 + $0x1c] sm:$0xf]  ;;  %v4676_v52 = vld [vmem:[%s5872_s1 + $0x1a0] sm:$0xff]  }
  0x31   : > { %4052 = vmatprep.mubr.msk.bf16.mxu0 %vm4828_vm0, %v4827_v1 }
  0x32   : > { %4091 = vmatpush3.bf16.msra.mxu0 %v4630_v60  ;;  %v4652_v60 = vld [vmem:[%s5872_s1 + $0x170] sm:$0xff]   ;;  %v603_v62 = vsel %vm582_vm3, %v593_v40, %v602_v59 }
  0x33   : > { %4119 = vmatpush3.bf16.msra.mxu1 %v4631_v61  ;;  %4092 = vmatprep.subr.bf16.mxu0 %v4827_v1  ;;  %v761_v61 = vor.u32 %v760_v57, %v757_v56  ;;  %v4671_v40 = vld [vmem:[%s5872_s1 + $0x1b0] sm:$0xff]   ;;  %v4688_v57 = vld [vmem:[%s4909_s8 + $0x20] sm:$0xff]  }
  0x34   : > { %4120 = vmatprep.subr.bf16.mxu1 %v4827_v1 }
  0x35   : > { %4053 = vmatmul.mubr.bf16.gmra.mxu0 %v307_v3  ;;  %v4657_v3 = vld [vmem:[%s5872_s1 + $0x120] sm:$0xff]  }
  0x36   : > { %4093 = vmatpush3.bf16.msra.mxu0 %v4632_v2  ;;  %4081 = vmatmul.mubr.bf16.gmra.mxu1 %v5008_v5  ;;  %v762_v2 = vsel %vm741_vm4, %v752_v44, %v761_v61 }
  0x37   : > { %4121 = vmatpush3.bf16.msra.mxu1 %v4633_v4  ;;  %4094 = vmatprep.subr.bf16.mxu0 %v4827_v1  ;;  %v4658_v4 = vld [vmem:[%s5872_s1 + $0x160] sm:$0xff]  }
  0x38   : > { %4122 = vmatprep.subr.bf16.mxu1 %v4827_v1  ;;  %4084 = vmatprep.mubr.msk.bf16.mxu1 %vm4828_vm0, %v4827_v1 }
  0x39   : > { %4056 = vmatprep.mubr.msk.bf16.mxu0 %vm4828_vm0, %v4827_v1 }
  0x3a   : > { %4095 = vmatpush3.bf16.msra.mxu0 %v4637_v6  ;;  %v5120_v6 = vld [vmem:[%s4909_s8 + $0xc] sm:$0xf8]  }
  0x3b   : > { %4123 = vmatpush3.bf16.msra.mxu1 %v4638_v7  ;;  %4096 = vmatprep.subr.bf16.mxu0 %v4827_v1  ;;  %v4659_v7 = vld [vmem:[%s5872_s1 + $0x118] sm:$0xff]   ;;  %v914_v14 = vshrl.u32 %v5120_v6, 16  ;;  %v917_v15 = vshll.u32 %v5120_v6, 16 }
  0x3c   : > { %4124 = vmatprep.subr.bf16.mxu1 %v4827_v1 }
  0x3d   : > { %4057 = vmatmul.mubr.bf16.gmra.mxu0 %v306_v0  ;;  %v4655_v0 = vld [vmem:[%s5872_s1 + $0x168] sm:$0xff]   ;;  %v919_v22 = vrot.slane %v917_v15, 4 }
  0x3e   : > { %4097 = vmatpush3.bf16.msra.mxu0 %v4639_v11  ;;  %4085 = vmatmul.mubr.bf16.gmra.mxu1 %v5029_v12  ;;  %v4662_v11 = vld [vmem:[%s5872_s1 + $0x150] sm:$0xff]  }
  0x3f   : > { %4125 = vmatpush3.bf16.msra.mxu1 %v4640_v16  ;;  %4098 = vmatprep.subr.bf16.mxu0 %v4827_v1  ;;  %v922_v16 = vshrl.u32 %v5126_v8, 16 }
  0x40   : > { %4126 = vmatprep.subr.bf16.mxu1 %v4827_v1  ;;  %4104 = vmatprep.mubr.msk.bf16.mxu0 %vm4828_vm0, %v4827_v1 }
  0x41   : > { %4132 = vmatprep.mubr.msk.bf16.mxu1 %vm4828_vm0, %v4827_v1  ;;  %v924_v23 = vrot.slane %v922_v16, 3 }
  0x42   : > { %4099 = vmatpush3.bf16.msra.mxu0 %v4641_v18  ;;  %v925_v18 = vshll.u32 %v5126_v8, 16  ;;  %v4758_v8 = vld [vmem:[%s5872_s1 + $0x3e0] sm:$0xff]  }
  0x43   : > { %4127 = vmatpush3.bf16.msra.mxu1 %v4642_v21  ;;  %4100 = vmatprep.subr.bf16.mxu0 %v4827_v1  ;;  %v916_v21 = vrot.slane %v914_v14, 3  ;;  %v4683_v14 = vld [vmem:[%s5872_s1 + $0x1c8] sm:$0xff]  }
  0x44   : > { %4128 = vmatprep.subr.bf16.mxu1 %v4827_v1  ;;  %v927_v26 = vrot.slane %v925_v18, 4 }
  0x45   : > { %v920_v29 = vor.u32 %v919_v22, %v916_v21  ;;  %v4684_v21 = vld [vmem:[%s5872_s1 + $0x180] sm:$0xff]  }
  0x46   : > { %4101 = vmatpush3.bf16.msra.mxu0 %v4643_v24  ;;  %v4665_v24 = vld [vmem:[%s5872_s1 + $0x100] sm:$0xff]   ;;  %v928_v30 = vor.u32 %v927_v26, %v924_v23 }
  0x47   : > { %4129 = vmatpush3.bf16.msra.mxu1 %v4644_v31  ;;  %4102 = vmatprep.subr.bf16.mxu0 %v4827_v1  ;;  %v931_v31 = vshrl.u32 %v3427_v27, 16  ;;  %v4685_v22 = vld [vmem:[%s5872_s1 + $0x1c0] sm:$0xff]  }
  0x48   : > { %4130 = vmatprep.subr.bf16.mxu1 %v4827_v1  ;;  %v929_v35 = vsel %vm741_vm4, %v920_v29, %v928_v30 }
  0x49   : > { %v933_v36 = vrot.slane %v931_v31, 3 }
  0x4a   : > { %4103 = vmatpush3.bf16.msra.mxu0 %v4645_v37  ;;  %v4670_v37 = vld [vmem:[%s5872_s1 + $0x1f8] sm:$0xff]  }
  0x4b   : > { %4131 = vmatpush3.bf16.msra.mxu1 %v4646_v38  ;;  %4144 = vmatprep.subr.bf16.mxu0 %v4827_v1  ;;  %v2314_v38 = vrot.slane %v5120_v6, 3  ;;  %v937_v41 = vor.u32 %v936_v25, %v933_v36  ;;  %v5247_v6 = vld [vmem:[%s4909_s8 + $0x28] sm:$0xf] }
  0x4c   : > { %4172 = vmatprep.subr.bf16.mxu1 %v4827_v1 }
  0x4d   : > { %4105 = vmatmul.mubr.bf16.vlgmr.msra.gmra.mxu0 %v594_v50  ;;  %v5189_v43 = vsel %vm2175_vm5, %v2314_v38, %v2315_v39  ;;  %v938_v44 = vsel %vm741_vm4, %v928_v30, %v937_v41  ;;  %v1335_v50 = vld [vmem:[%s4909_s8 + $0x18] sm:$0xe] }
  0x4e   : > { %4133 = vmatmul.mubr.bf16.vlgmr.msra.gmra.mxu1 %v753_v54  ;;  %4145 = vmatpush3.bf16.msra.mxu0 %v4649_v48  ;;  %v1177_v48 = vld [vmem:[%s4909_s8 + $0x10] sm:$0xe]  ;;  %v4677_v54 = vld [vmem:[%s5872_s1 + $0x1e0] sm:$0xff]   ;;  %v3502_v56 = vcombine.low %v1335_v50, %v5208_v51  ;;  %v4689_v30 = vld [vmem:[%s5872_s1 + $0x238] sm:$0xff]  }
  0x4f   : > { %4173 = vmatpush3.bf16.msra.mxu1 %v4650_v55  ;;  %4146 = vmatprep.subr.bf16.mxu0 %v4827_v1  ;;  %v3476_v55 = vcombine.low %v1177_v48, %v4930_v17  ;;  %v4679_v17 = vld [vmem:[%s5872_s1 + $0x1d8] sm:$0xff]   ;;  %v4696_v48 = vld [vmem:[%s5872_s1 + $0x220] sm:$0xff]  }
  0x50   : > { %4174 = vmatprep.subr.bf16.mxu1 %v4827_v1  ;;  %4108 = vmatprep.mubr.msk.bf16.mxu0 %vm4828_vm0, %v4827_v1  ;;  %v1511_v50 = vld [vmem:[%s4909_s8 + $0x18] sm:$0xc] }
  0x51   : > { %4136 = vmatprep.mubr.msk.bf16.mxu1 %vm4828_vm0, %v4827_v1 }
  0x52   : > { %4147 = vmatpush3.bf16.msra.mxu0 %v4651_v58  ;;  %v4678_v58 = vld [vmem:[%s5872_s1 + $0x198] sm:$0xff]  }
  0x53   : > { %4175 = vmatpush3.bf16.msra.mxu1 %v4652_v60  ;;  %4148 = vmatprep.subr.bf16.mxu0 %v4827_v1  ;;  %v1206_v60 = vshll.u32 %v3476_v55, 16 }
  0x54   : > { %4176 = vmatprep.subr.bf16.mxu1 %v4827_v1 }
  0x55   : > { %4109 = vmatmul.mubr.bf16.gmra.mxu0 %v603_v62  ;;  %v4680_v62 = vld [vmem:[%s5872_s1 + $0x190] sm:$0xff]   ;;  %v1208_v15 = vrot.slane %v1206_v60, 2 }
  0x56   : > { %4149 = vmatpush3.bf16.msra.mxu0 %v4654_v63  ;;  %4137 = vmatmul.mubr.bf16.gmra.mxu1 %v762_v2  ;;  %v1374_v63 = vshrl.u32 %v3502_v56, 16  ;;  %v5238_v2 = vshrl.u32 %v4688_v57, 16  ;;  %v4701_v60 = vld [vmem:[%s5872_s1 + $0x250] sm:$0xff]  }
  0x57   : > { %4177 = vmatpush3.bf16.msra.mxu1 %v4655_v0  ;;  %4150 = vmatprep.subr.bf16.mxu0 %v4827_v1  ;;  %v1377_v0 = vshll.u32 %v3502_v56, 16 }
  0x58   : > { %4178 = vmatprep.subr.bf16.mxu1 %v4827_v1  ;;  %4112 = vmatprep.mubr.msk.bf16.mxu0 %vm4828_vm0, %v4827_v1  ;;  %v1376_v16 = vrot.slane %v1374_v63, 1 }
  0x59   : > { %4140 = vmatprep.mubr.msk.bf16.mxu1 %vm4828_vm0, %v4827_v1  ;;  %v1379_v18 = vrot.slane %v1377_v0, 2 }
  0x5a   : > { %4151 = vmatpush3.bf16.msra.mxu0 %v4657_v3  ;;  %v5240_v3 = vshll.u32 %v4688_v57, 16  ;;  %v4699_v57 = vld [vmem:[%s5872_s1 + $0x258] sm:$0xff]  }
  0x5b   : > { %4179 = vmatpush3.bf16.msra.mxu1 %v4658_v4  ;;  %4152 = vmatprep.subr.bf16.mxu0 %v4827_v1  ;;  %v4681_v4 = vld [vmem:[%s5872_s1 + $0x1d0] sm:$0xff]  }
  0x5c   : > { %4180 = vmatprep.subr.bf16.mxu1 %v4827_v1  ;;  %v1387_v20 = vrot.slane %v5240_v3, 2 }
  0x5d   : > { %4113 = vmatmul.mubr.bf16.gmra.mxu0 %v602_v59  ;;  %v1203_v59 = vshrl.u32 %v3476_v55, 16  ;;  %v4698_v55 = vld [vmem:[%s5872_s1 + $0x218] sm:$0xff]  }
  0x5e   : > { %4153 = vmatpush3.bf16.msra.mxu0 %v4659_v7  ;;  %4141 = vmatmul.mubr.bf16.gmra.mxu1 %v761_v61  ;;  %v1178_v61 = vld [vmem:[%s4909_s8 + $0x24] sm:$0x3]  ;;  %v1340_v7 = vld [vmem:[%s4909_s8 + $0x2c] sm:$0x3] }
  0x5f   : > { %4181 = vmatpush3.bf16.msra.mxu1 %v4660_v9  ;;  %4154 = vmatprep.subr.bf16.mxu0 %v4827_v1  ;;  %v5255_v9 = vcombine.low %v4965_v45, %v1178_v61  ;;  %v3504_v19 = vcombine.low %v5247_v6, %v1340_v7  ;;  %v1384_v45 = vrot.slane %v5238_v2, 1  ;;  %v1670_v7 = vld [vmem:[%s4909_s8 + $0x2c] sm:$0xf] }
  0x60   : > { %4182 = vmatprep.subr.bf16.mxu1 %v4827_v1  ;;  %4160 = vmatprep.mubr.msk.bf16.mxu0 %vm4828_vm0, %v4827_v1 }
  0x61   : > { %4188 = vmatprep.mubr.msk.bf16.mxu1 %vm4828_vm0, %v4827_v1  ;;  %v1218_v26 = vshll.u32 %v5255_v9, 16  ;;  %v1391_v27 = vshrl.u32 %v3504_v19, 16  ;;  %v1388_v29 = vor.u32 %v1387_v20, %v1384_v45  ;;  %v3556_v45 = vcombine.low %v5247_v6, %v1670_v7  ;;  %v4704_v20 = vld [vmem:[%s5872_s1 + $0x200] sm:$0xff]  }
  0x62   : > { %4155 = vmatpush3.bf16.msra.mxu0 %v4661_v10  ;;  %v4682_v10 = vld [vmem:[%s5872_s1 + $0x188] sm:$0xff]  }
  0x63   : > { %4183 = vmatpush3.bf16.msra.mxu1 %v4662_v11  ;;  %4156 = vmatprep.subr.bf16.mxu0 %v4827_v1  ;;  %v1205_v11 = vrot.slane %v1203_v59, 1  ;;  %v1393_v36 = vrot.slane %v1391_v27, 1  ;;  %v1545_v59 = vrot.slane %v5240_v3, 3  ;;  %v1707_v27 = vshrl.u32 %v3556_v45, 16 }
  0x64   : > { %4184 = vmatprep.subr.bf16.mxu1 %v4827_v1 }
  0x65   : > { %v1209_v23 = vor.u32 %v1208_v15, %v1205_v11  ;;  %v1703_v11 = vrot.slane %v5240_v3, 4  ;;  %v4705_v3 = vld [vmem:[%s5872_s1 + $0x240] sm:$0xff]  }
  0x66   : > { %4157 = vmatpush3.bf16.msra.mxu0 %v4663_v13  ;;  %v1215_v13 = vshrl.u32 %v5255_v9, 16 }
  0x67   : > { %4185 = vmatpush3.bf16.msra.mxu1 %v4664_v28  ;;  %4158 = vmatprep.subr.bf16.mxu0 %v4827_v1  ;;  %v1394_v28 = vshll.u32 %v3504_v19, 16  ;;  %v1213_v32 = vsel %vm281_vm1, %v1209_v23, %v4971_v49 }
  0x68   : > { %4186 = vmatprep.subr.bf16.mxu1 %v4827_v1  ;;  %v1217_v31 = vrot.slane %v1215_v13, 1 }
  0x69   : > { %v1396_v25 = vrot.slane %v1394_v28, 2  ;;  %v1710_v28 = vshll.u32 %v3556_v45, 16  ;;  %v4726_v45 = vld [vmem:[%s4909_s8] sm:$0xff]  }
  0x6a   : > { %4159 = vmatpush3.bf16.msra.mxu0 %v4665_v24  ;;  %v1380_v24 = vor.u32 %v1379_v18, %v1376_v16 }
  0x6b   : > { %4187 = vmatpush3.bf16.msra.mxu1 %v4666_v33  ;;  %4200 = vmatprep.subr.bf16.mxu0 %v4827_v1  ;;  %v4690_v33 = vld [vmem:[%s5872_s1 + $0x278] sm:$0xff]  }
  0x6c   : > { %4228 = vmatprep.subr.bf16.mxu1 %v4827_v1 }
  0x6d   : > { %4161 = vmatmul.mubr.bf16.vlgmr.msra.gmra.mxu0 %v929_v35  ;;  %v1389_v35 = vsel %vm281_vm1, %v1380_v24, %v1388_v29  ;;  %v4708_v24 = vld [vmem:[%s5872_s1 + $0x2b8] sm:$0xff]  }
  0x6e   : > { %4189 = vmatmul.mubr.bf16.vlgmr.msra.gmra.mxu1 %v4979_v53  ;;  %4201 = vmatpush3.bf16.msra.mxu0 %v4669_v34  ;;  %v1220_v34 = vrot.slane %v1218_v26, 2 }
  0x6f   : > { %4229 = vmatpush3.bf16.msra.mxu1 %v4670_v37  ;;  %4202 = vmatprep.subr.bf16.mxu0 %v4827_v1  ;;  %v4691_v37 = vld [vmem:[%s5872_s1 + $0x230] sm:$0xff]  }
  0x70   : > { %4230 = vmatprep.subr.bf16.mxu1 %v4827_v1  ;;  %4164 = vmatprep.mubr.msk.bf16.mxu0 %vm4828_vm0, %v4827_v1  ;;  %v1221_v38 = vor.u32 %v1220_v34, %v1217_v31  ;;  %v1709_v34 = vrot.slane %v1707_v27, 3  ;;  %v4733_v27 = vld [vmem:[%s4909_s8 + $0x8] sm:$0xff]  }
  0x71   : > { %4192 = vmatprep.mubr.msk.bf16.mxu1 %vm4828_vm0, %v4827_v1 }
  0x72   : > { %4203 = vmatpush3.bf16.msra.mxu0 %v4671_v40  ;;  %v4692_v40 = vld [vmem:[%s5872_s1 + $0x270] sm:$0xff]  }
  0x73   : > { %4231 = vmatpush3.bf16.msra.mxu1 %v4672_v42  ;;  %4204 = vmatprep.subr.bf16.mxu0 %v4827_v1  ;;  %v1222_v42 = vsel %vm281_vm1, %v4971_v49, %v1221_v38  ;;  %v4697_v49 = vld [vmem:[%s5872_s1 + $0x260] sm:$0xff]  }
  0x74   : > { %4232 = vmatprep.subr.bf16.mxu1 %v4827_v1 }
  0x75   : > { %4165 = vmatmul.mubr.bf16.gmra.mxu0 %v938_v44  ;;  %v4693_v44 = vld [vmem:[%s5872_s1 + $0x228] sm:$0xff]  }
  0x76   : > { %4205 = vmatpush3.bf16.msra.mxu0 %v4674_v46  ;;  %4193 = vmatmul.mubr.bf16.gmra.mxu1 %v5008_v5  ;;  %v4694_v46 = vld [vmem:[%s5872_s1 + $0x268] sm:$0xff]  }
  0x77   : > { %4233 = vmatpush3.bf16.msra.mxu1 %v4675_v47  ;;  %4206 = vmatprep.subr.bf16.mxu0 %v4827_v1 }
  0x78   : > { %4234 = vmatprep.subr.bf16.mxu1 %v4827_v1  ;;  %4168 = vmatprep.mubr.msk.bf16.mxu0 %vm4828_vm0, %v4827_v1 }
  0x79   : > { %4196 = vmatprep.mubr.msk.bf16.mxu1 %vm4828_vm0, %v4827_v1 }
  0x7a   : > { %4207 = vmatpush3.bf16.msra.mxu0 %v4676_v52  ;;  %v1669_v52 = vld [vmem:[%s4909_s8 + $0x18] sm:$0x8] }
  0x7b   : > { %4235 = vmatpush3.bf16.msra.mxu1 %v4677_v54  ;;  %4208 = vmatprep.subr.bf16.mxu0 %v4827_v1  ;;  %v3529_v54 = vcombine.low %v1511_v50, %v5208_v51  ;;  %v3555_v56 = vcombine.low %v1669_v52, %v5208_v51  ;;  %v1702_v51 = vrot.slane %v5238_v2, 3  ;;  %v4718_v50 = vld [vmem:[%s5872_s1 + $0x298] sm:$0xff]  }
  0x7c   : > { %4236 = vmatprep.subr.bf16.mxu1 %v4827_v1 }
  0x7d   : > { %4169 = vmatmul.mubr.bf16.gmra.mxu0 %v937_v41  ;;  %v1397_v41 = vor.u32 %v1396_v25, %v1393_v36  ;;  %v1537_v61 = vshrl.u32 %v3529_v54, 16  ;;  %v1695_v63 = vshrl.u32 %v3555_v56, 16  ;;  %v1698_v0 = vshll.u32 %v3555_v56, 16  ;;  %v4710_v36 = vld [vmem:[%s5872_s1 + $0x2b0] sm:$0xff]  }
  0x7e   : > { %4209 = vmatpush3.bf16.msra.mxu0 %v4678_v58  ;;  %4197 = vmatmul.mubr.bf16.gmra.mxu1 %v5029_v12  ;;  %v4700_v58 = vld [vmem:[%s5872_s1 + $0x210] sm:$0xff]  }
  0x7f   : > { %4237 = vmatpush3.bf16.msra.mxu1 %v4679_v17  ;;  %4210 = vmatprep.subr.bf16.mxu0 %v4827_v1  ;;  %v1398_v47 = vsel %vm281_vm1, %v1388_v29, %v1397_v41  ;;  %v1544_v17 = vrot.slane %v5238_v2, 2  ;;  %v4702_v2 = vld [vmem:[%s5872_s1 + $0x208] sm:$0xff]   ;;  %v1697_v18 = vrot.slane %v1695_v63, 3  ;;  %v1700_v19 = vrot.slane %v1698_v0, 4  ;;  %v4709_v29 = vld [vmem:[%s5872_s1 + $0x2f8] sm:$0xff]  }
  0x80   : > { %4238 = vmatprep.subr.bf16.mxu1 %v4827_v1  ;;  %4216 = vmatprep.mubr.msk.bf16.mxu0 %vm4828_vm0, %v4827_v1  ;;  %v5435_v56 = vld [vmem:[%s4909_s8 + $0x10] sm:$0xf]  ;;  %v4723_v0 = vld [vmem:[%s5872_s1 + $0x2c8] sm:$0xff]  }
  0x81   : > { %4244 = vmatprep.mubr.msk.bf16.mxu1 %vm4828_vm0, %v4827_v1  ;;  %v1701_v26 = vor.u32 %v1700_v19, %v1697_v18 }
  0x82   : > { %4211 = vmatpush3.bf16.msra.mxu0 %v4680_v62  ;;  %v1540_v62 = vshll.u32 %v3529_v54, 16  ;;  %v5427_v54 = vld [vmem:[%s4909_s8 + $0x8] sm:$0xff]  }
  0x83   : > { %4239 = vmatpush3.bf16.msra.mxu1 %v4681_v4  ;;  %4212 = vmatprep.subr.bf16.mxu0 %v4827_v1  ;;  %v1512_v4 = vld [vmem:[%s4909_s8 + $0x2c] sm:$0x7] }
  0x84   : > { %4240 = vmatprep.subr.bf16.mxu1 %v4827_v1  ;;  %v1542_v15 = vrot.slane %v1540_v62, 3  ;;  %v3530_v16 = vcombine.low %v5247_v6, %v1512_v4  ;;  %v1704_v6 = vor.u32 %v1703_v11, %v1702_v51  ;;  %v2021_v51 = vshrl.u32 %v5427_v54, 16  ;;  %v4722_v62 = vld [vmem:[%s5872_s1 + $0x288] sm:$0xff]   ;;  %v4724_v11 = vld [vmem:[%s5872_s1 + $0x280] sm:$0xff]  }
  0x86   : > { %4213 = vmatpush3.bf16.msra.mxu0 %v4682_v10  ;;  %v4703_v10 = vld [vmem:[%s5872_s1 + $0x248] sm:$0xff]   ;;  %v1552_v23 = vshll.u32 %v3530_v16, 16 }
  0x87   : > { %4241 = vmatpush3.bf16.msra.mxu1 %v4683_v14  ;;  %4214 = vmatprep.subr.bf16.mxu0 %v4827_v1  ;;  %v1539_v14 = vrot.slane %v1537_v61, 2  ;;  %v4721_v61 = vld [vmem:[%s5872_s1 + $0x2d0] sm:$0xff]  }
  0x88   : > { %4242 = vmatprep.subr.bf16.mxu1 %v4827_v1 }
  0x89   : > { %v1543_v13 = vor.u32 %v1542_v15, %v1539_v14 }
  0x8a   : > { %4215 = vmatpush3.bf16.msra.mxu0 %v4684_v21  ;;  %v1546_v21 = vor.u32 %v1545_v59, %v1544_v17 }
  0x8b   : > { %4243 = vmatpush3.bf16.msra.mxu1 %v4685_v22  ;;  %4256 = vmatprep.subr.bf16.mxu0 %v4827_v1  ;;  %v1549_v22 = vshrl.u32 %v3530_v16, 16  ;;  %v4725_v16 = vld [vmem:[%s5872_s1 + $0x2c0] sm:$0xff]  }
  0x8c   : > { %4284 = vmatprep.subr.bf16.mxu1 %v4827_v1 }
  0x8d   : > { %4217 = vmatmul.mubr.bf16.vlgmr.msra.gmra.mxu0 %v1213_v32  ;;  %v1551_v31 = vrot.slane %v1549_v22, 2  ;;  %v1554_v32 = vrot.slane %v1552_v23, 3  ;;  %v4731_v23 = vld [vmem:[%s5872_s1 + $0x330] sm:$0xff]  }
  0x8e   : > { %4245 = vmatmul.mubr.bf16.vlgmr.msra.gmra.mxu1 %v1389_v35  ;;  %4257 = vmatpush3.bf16.msra.mxu0 %v4689_v30  ;;  %v1547_v30 = vsel %vm582_vm3, %v1543_v13, %v1546_v21  ;;  %v1712_v35 = vrot.slane %v1710_v28, 4  ;;  %v4730_v13 = vld [vmem:[%s5872_s1 + $0x378] sm:$0xff]   ;;  %v4734_v28 = vld [vmem:[%s5872_s1 + $0x328] sm:$0xff]  }
  0x8f   : > { %4285 = vmatpush3.bf16.msra.mxu1 %v4690_v33  ;;  %4258 = vmatprep.subr.bf16.mxu0 %v4827_v1  ;;  %v1705_v33 = vsel %vm741_vm4, %v1701_v26, %v1704_v6  ;;  %v1555_v25 = vor.u32 %v1554_v32, %v1551_v31  ;;  %v4732_v26 = vld [vmem:[%s5872_s1 + $0x370] sm:$0xff]   ;;  %v4738_v31 = vld [vmem:[%s5872_s1 + $0x360] sm:$0xff]  }
  0x90   : > { %4286 = vmatprep.subr.bf16.mxu1 %v4827_v1  ;;  %4220 = vmatprep.mubr.msk.bf16.mxu0 %vm4828_vm0, %v4827_v1  ;;  %v4739_v32 = vld [vmem:[%s4909_s8 + $0x10] ss:$0 sps:$4 sm:$0xff]  }
  0x91   : > { %4248 = vmatprep.mubr.msk.bf16.mxu1 %vm4828_vm0, %v4827_v1 }
  0x92   : > { %4259 = vmatpush3.bf16.msra.mxu0 %v4691_v37  ;;  %v4711_v37 = vld [vmem:[%s5872_s1 + $0x2f0] sm:$0xff]  }
  0x93   : > { %4287 = vmatpush3.bf16.msra.mxu1 %v4692_v40  ;;  %4260 = vmatprep.subr.bf16.mxu0 %v4827_v1  ;;  %v1556_v40 = vsel %vm582_vm3, %v1546_v21, %v1555_v25 }
  0x94   : > { %4288 = vmatprep.subr.bf16.mxu1 %v4827_v1 }
  0x95   : > { %4221 = vmatmul.mubr.bf16.gmra.mxu0 %v1222_v42  ;;  %v4714_v42 = vld [vmem:[%s5872_s1 + $0x2e8] sm:$0xff]  }
  0x96   : > { %4261 = vmatpush3.bf16.msra.mxu0 %v4693_v44  ;;  %4249 = vmatmul.mubr.bf16.gmra.mxu1 %v1398_v47  ;;  %v4717_v47 = vld [vmem:[%s5872_s1 + $0x2e0] sm:$0xff]  }
  0x97   : > { %4289 = vmatpush3.bf16.msra.mxu1 %v4694_v46  ;;  %4262 = vmatprep.subr.bf16.mxu0 %v4827_v1  ;;  %v4716_v46 = vld [vmem:[%s5872_s1 + $0x2a0] sm:$0xff]  }
  0x98   : > { %4290 = vmatprep.subr.bf16.mxu1 %v4827_v1  ;;  %4224 = vmatprep.mubr.msk.bf16.mxu0 %vm4828_vm0, %v4827_v1 }
  0x99   : > { %4252 = vmatprep.mubr.msk.bf16.mxu1 %vm4828_vm0, %v4827_v1 }
  0x9a   : > { %4263 = vmatpush3.bf16.msra.mxu0 %v4696_v48  ;;  %v1974_v48 = vld [vmem:[%s4909_s8] sm:$0xe] }
  0x9b   : > { %4291 = vmatpush3.bf16.msra.mxu1 %v4697_v49  ;;  %4264 = vmatprep.subr.bf16.mxu0 %v4827_v1  ;;  %v5415_v49 = vld [vmem:[%s4909_s8 + $0x4] sm:$0xf] }
  0x9c   : > { %4292 = vmatprep.subr.bf16.mxu1 %v4827_v1  ;;  %v3608_v52 = vcombine.low %v1974_v48, %v5415_v49  ;;  %v2293_v48 = vld [vmem:[%s4909_s8 + $0x20] sm:$0x7] }
  0x9d   : > { %4225 = vmatmul.mubr.bf16.gmra.mxu0 %v1221_v38  ;;  %v1713_v38 = vor.u32 %v1712_v35, %v1709_v34  ;;  %v4741_v34 = vld [vmem:[%s5872_s1 + $0x358] sm:$0xff]   ;;  %v4742_v35 = vld [vmem:[%s5872_s1 + $0x310] sm:$0xff]  }
  0x9e   : > { %4265 = vmatpush3.bf16.msra.mxu0 %v4698_v55  ;;  %4253 = vmatmul.mubr.bf16.gmra.mxu1 %v1397_v41  ;;  %v4713_v41 = vld [vmem:[%s5872_s1 + $0x2a8] sm:$0xff]   ;;  %v4719_v55 = vld [vmem:[%s5872_s1 + $0x2d8] sm:$0xff]   ;;  %v2013_v17 = vshrl.u32 %v3608_v52, 16  ;;  %v2016_v59 = vshll.u32 %v3608_v52, 16 }
  0x9f   : > { %4293 = vmatpush3.bf16.msra.mxu1 %v4699_v57  ;;  %4266 = vmatprep.subr.bf16.mxu0 %v4827_v1  ;;  %v1714_v44 = vsel %vm741_vm4, %v1704_v6, %v1713_v38  ;;  %v1979_v57 = vld [vmem:[%s4909_s8 + $0x14] sm:$0x3] }
  0xa0   : > { %4294 = vmatprep.subr.bf16.mxu1 %v4827_v1  ;;  %4272 = vmatprep.mubr.msk.bf16.mxu0 %vm4828_vm0, %v4827_v1  ;;  %v3610_v63 = vcombine.low %v5435_v56, %v1979_v57  ;;  %v2015_v4 = vrot.slane %v2013_v17, 1  ;;  %v2018_v7 = vrot.slane %v2016_v59, 2 }
  0xa1   : > { %4300 = vmatprep.mubr.msk.bf16.mxu1 %vm4828_vm0, %v4827_v1 }
  0xa2   : > { %4267 = vmatpush3.bf16.msra.mxu0 %v4700_v58  ;;  %v4720_v58 = vld [vmem:[%s5872_s1 + $0x290] sm:$0xff]   ;;  %v2030_v14 = vshrl.u32 %v3610_v63, 16  ;;  %v2033_v15 = vshll.u32 %v3610_v63, 16  ;;  %v2019_v18 = vor.u32 %v2018_v7, %v2015_v4  ;;  %v4754_v7 = vld [vmem:[%s5872_s1 + $0x3a8] sm:$0xff]  }
  0xa3   : > { %4295 = vmatpush3.bf16.msra.mxu1 %v4701_v60  ;;  %4268 = vmatprep.subr.bf16.mxu0 %v4827_v1  ;;  %v2024_v60 = vshll.u32 %v5427_v54, 16 }
  0xa4   : > { %4296 = vmatprep.subr.bf16.mxu1 %v4827_v1  ;;  %v2032_v21 = vrot.slane %v2030_v14, 1  ;;  %v2035_v22 = vrot.slane %v2033_v15, 2 }
  0xa6   : > { %4269 = vmatpush3.bf16.msra.mxu0 %v4702_v2  ;;  %v2023_v2 = vrot.slane %v2021_v51, 1  ;;  %v2036_v6 = vor.u32 %v2035_v22, %v2032_v21  ;;  %v4759_v21 = vld [vmem:[%s5872_s1 + $0x398] sm:$0xff]  }
  0xa7   : > { %4297 = vmatpush3.bf16.msra.mxu1 %v4703_v10  ;;  %4270 = vmatprep.subr.bf16.mxu0 %v4827_v1  ;;  %v2026_v10 = vrot.slane %v2024_v60, 2 }
  0xa8   : > { %4298 = vmatprep.subr.bf16.mxu1 %v4827_v1 }
  0xa9   : > { %v2027_v19 = vor.u32 %v2026_v10, %v2023_v2 }
  0xaa   : > { %4271 = vmatpush3.bf16.msra.mxu0 %v4704_v20  ;;  %v4729_v20 = vld [vmem:[%s5872_s1 + $0x338] sm:$0xff]  }
  0xab   : > { %4299 = vmatpush3.bf16.msra.mxu1 %v4705_v3  ;;  %4312 = vmatprep.subr.bf16.mxu0 %v4827_v1  ;;  %v2028_v3 = vsel %vm281_vm1, %v2019_v18, %v2027_v19 }
  0xac   : > { %4340 = vmatprep.subr.bf16.mxu1 %v4827_v1 }
  0xad   : > { %4273 = vmatmul.mubr.bf16.vlgmr.msra.gmra.mxu0 %v1547_v30  ;;  %v4737_v30 = vld [vmem:[%s5872_s1 + $0x320] sm:$0xff]  }
  0xae   : > { %4301 = vmatmul.mubr.bf16.vlgmr.msra.gmra.mxu1 %v1705_v33  ;;  %4313 = vmatpush3.bf16.msra.mxu0 %v4708_v24  ;;  %v4735_v24 = vld [vmem:[%s5872_s1 + $0x368] sm:$0xff]   ;;  %v4740_v33 = vld [vmem:[%s5872_s1 + $0x318] sm:$0xff]  }
  0xaf   : > { %4341 = vmatpush3.bf16.msra.mxu1 %v4709_v29  ;;  %4314 = vmatprep.subr.bf16.mxu0 %v4827_v1  ;;  %v2037_v29 = vsel %vm281_vm1, %v2027_v19, %v2036_v6  ;;  %v4757_v19 = vld [vmem:[%s5872_s1 + $0x3a0] sm:$0xff]  }
  0xb0   : > { %4342 = vmatprep.subr.bf16.mxu1 %v4827_v1  ;;  %4276 = vmatprep.mubr.msk.bf16.mxu0 %vm4828_vm0, %v4827_v1 }
  0xb1   : > { %4304 = vmatprep.mubr.msk.bf16.mxu1 %vm4828_vm0, %v4827_v1 }
  0xb2   : > { %4315 = vmatpush3.bf16.msra.mxu0 %v4710_v36  ;;  %v4743_v36 = vld [vmem:[%s5872_s1 + $0x350] sm:$0xff]  }
  0xb3   : > { %4343 = vmatpush3.bf16.msra.mxu1 %v4711_v37  ;;  %4316 = vmatprep.subr.bf16.mxu0 %v4827_v1  ;;  %v4744_v37 = vld [vmem:[%s5872_s1 + $0x308] sm:$0xff]  }
  0xb4   : > { %4344 = vmatprep.subr.bf16.mxu1 %v4827_v1 }
  0xb5   : > { %4277 = vmatmul.mubr.bf16.gmra.mxu0 %v1556_v40  ;;  %v4745_v40 = vld [vmem:[%s5872_s1 + $0x348] sm:$0xff]  }
  0xb6   : > { %4317 = vmatpush3.bf16.msra.mxu0 %v4713_v41  ;;  %4305 = vmatmul.mubr.bf16.gmra.mxu1 %v1714_v44  ;;  %v4746_v41 = vld [vmem:[%s5872_s1 + $0x300] sm:$0xff]   ;;  %v2177_v44 = vrot.slane %v5427_v54, 3  ;;  %v4750_v54 = vld [vmem:[%s5872_s1 + $0x3f8] sm:$0xff]  }
  0xb7   : > { %4345 = vmatpush3.bf16.msra.mxu1 %v4714_v42  ;;  %4318 = vmatprep.subr.bf16.mxu0 %v4827_v1 }
  0xb8   : > { %4346 = vmatprep.subr.bf16.mxu1 %v4827_v1  ;;  %4280 = vmatprep.mubr.msk.bf16.mxu0 %vm4828_vm0, %v4827_v1 }
  0xb9   : > { %4308 = vmatprep.mubr.msk.bf16.mxu1 %vm4828_vm0, %v4827_v1 }
  0xba   : > { %4319 = vmatpush3.bf16.msra.mxu0 %v4716_v46  ;;  %v4747_v46 = vld [vmem:[%s5872_s1 + $0x340] sm:$0xff]  }
  0xbb   : > { %4347 = vmatpush3.bf16.msra.mxu1 %v4717_v47  ;;  %4320 = vmatprep.subr.bf16.mxu0 %v4827_v1  ;;  %v2151_v47 = vld [vmem:[%s4909_s8 + $0x14] sm:$0x7] }
  0xbc   : > { %4348 = vmatprep.subr.bf16.mxu1 %v4827_v1  ;;  %v3636_v52 = vcombine.low %v5435_v56, %v2151_v47  ;;  %v4751_v56 = vld [vmem:[%s5872_s1 + $0x3b0] sm:$0xff]   ;;  %v4802_v47 = vld [vmem:[%s4909_s8 + $0x18] sm:$0xff]  }
  0xbd   : > { %4281 = vmatmul.mubr.bf16.gmra.mxu0 %v1555_v25  ;;  %v2150_v25 = vld [vmem:[%s4909_s8] sm:$0x8] }
  0xbe   : > { %4321 = vmatpush3.bf16.msra.mxu0 %v4718_v50  ;;  %4309 = vmatmul.mubr.bf16.gmra.mxu1 %v1713_v38  ;;  %v3635_v38 = vcombine.low %v2150_v25, %v5415_v49  ;;  %v4749_v50 = vld [vmem:[%s5872_s1 + $0x3b8] sm:$0xff]   ;;  %v2179_v59 = vrot.slane %v3636_v52, 3  ;;  %v4764_v25 = vld [vmem:[%s5872_s1 + $0x3c8] sm:$0xff]  }
  0xbf   : > { %4349 = vmatpush3.bf16.msra.mxu1 %v4719_v55  ;;  %4322 = vmatprep.subr.bf16.mxu0 %v4827_v1  ;;  %v4800_v55 = vld [vmem:[%s4909_s8 + $0x1c] sm:$0xf] }
  0xc0   : > { %4350 = vmatprep.subr.bf16.mxu1 %v4827_v1  ;;  %4328 = vmatprep.mubr.msk.bf16.mxu0 %vm4828_vm0, %v4827_v1  ;;  %v2176_v42 = vrot.slane %v3635_v38, 3  ;;  %v3661_v57 = vcombine.low %v4800_v55, %v2293_v48  ;;  %v2180_v4 = vsel %vm2175_vm5, %v2177_v44, %v2179_v59  ;;  %v4801_v38 = vld [vmem:[%s4909_s8 + $0x14] sm:$0xf]  ;;  %v2580_v48 = vrot.slane %v4802_v47, 2  ;;  %v4769_v52 = vld [vmem:[%s5872_s1 + $0x478] sm:$0xff]   ;;  %v4781_v47 = vld [vmem:[%s5872_s1 + $0x448] sm:$0xff]  }
  0xc1   : > { %4356 = vmatprep.mubr.msk.bf16.mxu1 %vm4828_vm0, %v4827_v1 }
  0xc2   : > { %4323 = vmatpush3.bf16.msra.mxu0 %v4720_v58  ;;  %v2178_v49 = vsel %vm2175_vm5, %v2176_v42, %v2177_v44  ;;  %v4765_v42 = vld [vmem:[%s5872_s1 + $0x380] sm:$0xff]  }
  0xc3   : > { %4351 = vmatpush3.bf16.msra.mxu1 %v4721_v61  ;;  %4324 = vmatprep.subr.bf16.mxu0 %v4827_v1  ;;  %v4752_v61 = vld [vmem:[%s5872_s1 + $0x3f0] sm:$0xff]   ;;  %v4766_v44 = vld [vmem:[%s5872_s1 + $0x3c0] sm:$0xff]  }
  0xc4   : > { %4352 = vmatprep.subr.bf16.mxu1 %v4827_v1 }
  0xc6   : > { %4325 = vmatpush3.bf16.msra.mxu0 %v4722_v62  ;;  %v2317_v62 = vrot.slane %v3661_v57, 3 }
  0xc7   : > { %4353 = vmatpush3.bf16.msra.mxu1 %v4723_v0  ;;  %4326 = vmatprep.subr.bf16.mxu0 %v4827_v1 }
  0xc8   : > { %4354 = vmatprep.subr.bf16.mxu1 %v4827_v1  ;;  %v2318_v14 = vsel %vm2175_vm5, %v2315_v39, %v2317_v62 }
  0xca   : > { %4327 = vmatpush3.bf16.msra.mxu0 %v4724_v11  ;;  %v4755_v11 = vld [vmem:[%s5872_s1 + $0x3e8] sm:$0xff]  }
  0xcb   : > { %4355 = vmatpush3.bf16.msra.mxu1 %v4725_v16  ;;  %4368 = vmatprep.subr.bf16.mxu0 %v4827_v1 }
  0xcc   : > { %4396 = vmatprep.subr.bf16.mxu1 %v4827_v1 }
  0xcd   : > { %4329 = vmatmul.mubr.bf16.vlgmr.msra.gmra.mxu0 %v4726_v45 }
  0xce   : > { %4357 = vmatmul.mubr.bf16.vlgmr.msra.gmra.mxu1 %v2028_v3  ;;  %4369 = vmatpush3.bf16.msra.mxu0 %v4729_v20 }
  0xcf   : > { %4397 = vmatpush3.bf16.msra.mxu1 %v4730_v13  ;;  %4370 = vmatprep.subr.bf16.mxu0 %v4827_v1 }
  0xd0   : > { %4398 = vmatprep.subr.bf16.mxu1 %v4827_v1  ;;  %4332 = vmatprep.mubr.msk.bf16.mxu0 %vm4828_vm0, %v4827_v1 }
  0xd1   : > { %4360 = vmatprep.mubr.msk.bf16.mxu1 %vm4828_vm0, %v4827_v1 }
  0xd2   : > { %4371 = vmatpush3.bf16.msra.mxu0 %v4731_v23  ;;  %v4760_v23 = vld [vmem:[%s5872_s1 + $0x3d8] sm:$0xff]  }
  0xd3   : > { %4399 = vmatpush3.bf16.msra.mxu1 %v4732_v26  ;;  %4372 = vmatprep.subr.bf16.mxu0 %v4827_v1 }
  0xd4   : > { %4400 = vmatprep.subr.bf16.mxu1 %v4827_v1 }
  0xd5   : > { %4333 = vmatmul.mubr.bf16.gmra.mxu0 %v4733_v27 }
  0xd6   : > { %4373 = vmatpush3.bf16.msra.mxu0 %v4734_v28  ;;  %4361 = vmatmul.mubr.bf16.gmra.mxu1 %v2037_v29  ;;  %v4762_v29 = vld [vmem:[%s5872_s1 + $0x3d0] sm:$0xff]  }
  0xd7   : > { %4401 = vmatpush3.bf16.msra.mxu1 %v4735_v24  ;;  %4374 = vmatprep.subr.bf16.mxu0 %v4827_v1  ;;  %v4761_v24 = vld [vmem:[%s5872_s1 + $0x390] sm:$0xff]  }
  0xd8   : > { %4402 = vmatprep.subr.bf16.mxu1 %v4827_v1  ;;  %4336 = vmatprep.mubr.msk.bf16.mxu0 %vm4828_vm0, %v4827_v1 }
  0xd9   : > { %4364 = vmatprep.mubr.msk.bf16.mxu1 %vm4828_vm0, %v4827_v1 }
  0xda   : > { %4375 = vmatpush3.bf16.msra.mxu0 %v4737_v30 }
  0xdb   : > { %4403 = vmatpush3.bf16.msra.mxu1 %v4738_v31  ;;  %4376 = vmatprep.subr.bf16.mxu0 %v4827_v1 }
  0xdc   : > { %4404 = vmatprep.subr.bf16.mxu1 %v4827_v1 }
  0xdd   : > { %4337 = vmatmul.mubr.bf16.gmra.mxu0 %v4739_v32 }
  0xde   : > { %4377 = vmatpush3.bf16.msra.mxu0 %v4740_v33  ;;  %4365 = vmatmul.mubr.bf16.gmra.mxu1 %v2036_v6  ;;  %v2557_v33 = vld [vmem:[%s4909_s8 + $0x10] sm:$0xc] }
  0xdf   : > { %4405 = vmatpush3.bf16.msra.mxu1 %v4741_v34  ;;  %4378 = vmatprep.subr.bf16.mxu0 %v4827_v1 }
  0xe0   : > { %4406 = vmatprep.subr.bf16.mxu1 %v4827_v1  ;;  %4384 = vmatprep.mubr.msk.bf16.mxu0 %vm4828_vm0, %v4827_v1 }
  0xe1   : > { %4412 = vmatprep.mubr.msk.bf16.mxu1 %vm4828_vm0, %v4827_v1 }
  0xe2   : > { %4379 = vmatpush3.bf16.msra.mxu0 %v4742_v35 }
  0xe3   : > { %4407 = vmatpush3.bf16.msra.mxu1 %v4743_v36  ;;  %4380 = vmatprep.subr.bf16.mxu0 %v4827_v1  ;;  %v4763_v36 = vld [vmem:[%s5872_s1 + $0x388] sm:$0xff]  }
  0xe4   : > { %4408 = vmatprep.subr.bf16.mxu1 %v4827_v1 }
  0xe6   : > { %4381 = vmatpush3.bf16.msra.mxu0 %v4744_v37 }
  0xe7   : > { %4409 = vmatpush3.bf16.msra.mxu1 %v4745_v40  ;;  %4382 = vmatprep.subr.bf16.mxu0 %v4827_v1  ;;  %v3710_v40 = vcombine.low %v2557_v33, %v4801_v38  ;;  %v2852_v38 = vld [vmem:[%s4909_s8 + $0x30] sm:$0xf] }
  0xe8   : > { %4410 = vmatprep.subr.bf16.mxu1 %v4827_v1 }
  0xea   : > { %4383 = vmatpush3.bf16.msra.mxu0 %v4746_v41 }
  0xeb   : > { %4411 = vmatpush3.bf16.msra.mxu1 %v4747_v46  ;;  %4424 = vmatprep.subr.bf16.mxu0 %v4827_v1  ;;  %v2579_v46 = vrot.slane %v3710_v40, 2 }
  0xec   : > { %4452 = vmatprep.subr.bf16.mxu1 %v4827_v1 }
  0xed   : > { %v393_v58 = vpop.f32.mrf.mxu0  ;;  %4385 = vmatmul.mubr.bf16.vlgmr.msra.gmra.mxu0 %v2178_v49  ;;  %v4768_v49 = vld [vmem:[%s5872_s1 + $0x438] sm:$0xff]  }
  0xee   : > { %v535_v17 = vpop.f32.mrf.mxu1  ;;  %4413 = vmatmul.mubr.bf16.vlgmr.msra.gmra.mxu1 %v5189_v43  ;;  %4425 = vmatpush3.bf16.msra.mxu0 %v4749_v50  ;;  %v2581_v50 = vsel %vm2578_vm6, %v2579_v46, %v2580_v48 }
  0xef   : > { %v5570_v51 = vadd.f32 %v535_v17, %v393_v58  ;;  %4453 = vmatpush3.bf16.msra.mxu1 %v4750_v54  ;;  %v4050_v60 = vpop.f32.mrf.mxu0  ;;  %4426 = vmatprep.subr.bf16.mxu0 %v4827_v1  ;;  %v4770_v58 = vld [vmem:[%s5872_s1 + $0x430] sm:$0xff]  }
  0xf0   : > { %v4078_v63 = vpop.f32.mrf.mxu1  ;;  %4454 = vmatprep.subr.bf16.mxu1 %v4827_v1  ;;  %4388 = vmatprep.mubr.msk.bf16.mxu0 %vm4828_vm0, %v4827_v1 }
  0xf1   : > { %v396_v43 = vpop.f32.mrf.mxu0  ;;  %4416 = vmatprep.mubr.msk.bf16.mxu1 %vm4828_vm0, %v4827_v1 }
  0xf2   : > { %v538_v0 = vpop.f32.mrf.mxu1  ;;  %4427 = vmatpush3.bf16.msra.mxu0 %v4751_v56  ;;  %v4771_v56 = vld [vmem:[%s5872_s1 + $0x470] sm:$0xff]  }
  0xf3   : > { %v5585_v2 = vadd.f32 %v538_v0, %v396_v43  ;;  %4455 = vmatpush3.bf16.msra.mxu1 %v4752_v61  ;;  %v4051_v10 = vpop.f32.mrf.mxu0  ;;  %4428 = vmatprep.subr.bf16.mxu0 %v4827_v1  ;;  %v4773_v43 = vld [vmem:[%s5872_s1 + $0x468] sm:$0xff]  }
  0xf4   : > { %v4079_v15 = vpop.f32.mrf.mxu1  ;;  %4456 = vmatprep.subr.bf16.mxu1 %v4827_v1 }
  0xf5   : > { %4389 = vmatmul.mubr.bf16.gmra.mxu0 %v2180_v4  ;;  %v401_v16 = vpop.f32.mrf.mxu0 }
  0xf6   : > { %4429 = vmatpush3.bf16.msra.mxu0 %v4754_v7  ;;  %4417 = vmatmul.mubr.bf16.gmra.mxu1 %v2318_v14  ;;  %v543_v18 = vpop.f32.mrf.mxu1  ;;  %v4774_v14 = vld [vmem:[%s5872_s1 + $0x420] sm:$0xff]  }
  0xf7   : > { %4457 = vmatpush3.bf16.msra.mxu1 %v4755_v11  ;;  %4430 = vmatprep.subr.bf16.mxu0 %v4827_v1  ;;  %v5599_v45 = vadd.f32 %v543_v18, %v401_v16  ;;  %v4054_v39 = vpop.f32.mrf.mxu0  ;;  %v4775_v16 = vld [vmem:[%s5872_s1 + $0x460] sm:$0xff]  }
  0xf8   : > { %4458 = vmatprep.subr.bf16.mxu1 %v4827_v1  ;;  %v4082_v20 = vpop.f32.mrf.mxu1  ;;  %4392 = vmatprep.mubr.msk.bf16.mxu0 %vm4828_vm0, %v4827_v1 }
  0xf9   : > { %v404_v3 = vpop.f32.mrf.mxu0  ;;  %4420 = vmatprep.mubr.msk.bf16.mxu1 %vm4828_vm0, %v4827_v1 }
  0xfa   : > { %4431 = vmatpush3.bf16.msra.mxu0 %v4757_v19  ;;  %v546_v13 = vpop.f32.mrf.mxu1  ;;  %v2697_v19 = vld [vmem:[%s4909_s8 + $0x20] sm:$0xf] }
  0xfb   : > { %4459 = vmatpush3.bf16.msra.mxu1 %v4758_v8  ;;  %4432 = vmatprep.subr.bf16.mxu0 %v4827_v1  ;;  %v5613_v22 = vadd.f32 %v546_v13, %v404_v3  ;;  %v4055_v26 = vpop.f32.mrf.mxu0  ;;  %v4776_v3 = vld [vmem:[%s5872_s1 + $0x418] sm:$0xff]   ;;  %v5713_v13 = vld [vmem:[%s4909_s8 + $0x24] sm:$0xff]  }
  0xfc   : > { %4460 = vmatprep.subr.bf16.mxu1 %v4827_v1  ;;  %v4083_v6 = vpop.f32.mrf.mxu1 }
  0xfd   : > { %4393 = vmatmul.mubr.bf16.gmra.mxu0 %v2179_v59  ;;  %v409_v27 = vpop.f32.mrf.mxu0  ;;  %v2582_v59 = vrot.slane %v5255_v9, 2  ;;  %v4772_v9 = vld [vmem:[%s5872_s1 + $0x428] sm:$0xff]  }
  0xfe   : > { %4433 = vmatpush3.bf16.msra.mxu0 %v4759_v21  ;;  %4421 = vmatmul.mubr.bf16.gmra.mxu1 %v2317_v62  ;;  %v551_v28 = vpop.f32.mrf.mxu1 }
  0xff   : > { %4461 = vmatpush3.bf16.msra.mxu1 %v4760_v23  ;;  %4434 = vmatprep.subr.bf16.mxu0 %v4827_v1  ;;  %v5626_v30 = vadd.f32 %v551_v28, %v409_v27  ;;  %v4058_v31 = vpop.f32.mrf.mxu0  ;;  %v2583_v0 = vsel %vm2578_vm6, %v2580_v48, %v2582_v59  ;;  %v4777_v23 = vld [vmem:[%s5872_s1 + $0x458] sm:$0xff]  }
 0x100   : > { %4462 = vmatprep.subr.bf16.mxu1 %v4827_v1  ;;  %v4086_v32 = vpop.f32.mrf.mxu1  ;;  %4440 = vmatprep.mubr.msk.bf16.mxu0 %vm4828_vm0, %v4827_v1  ;;  %v2885_v31 = vshrl.u32 %v5713_v13, 16 }
 0x101   : > { %v412_v34 = vpop.f32.mrf.mxu0  ;;  %4468 = vmatprep.mubr.msk.bf16.mxu1 %vm4828_vm0, %v4827_v1 }
 0x102   : > { %4435 = vmatpush3.bf16.msra.mxu0 %v4761_v24  ;;  %v554_v35 = vpop.f32.mrf.mxu1  ;;  %v2887_v46 = vrot.slane %v2885_v31, 3 }
 0x103   : > { %4463 = vmatpush3.bf16.msra.mxu1 %v4762_v29  ;;  %4436 = vmatprep.subr.bf16.mxu0 %v4827_v1  ;;  %v4059_v37 = vpop.f32.mrf.mxu0  ;;  %v4778_v29 = vld [vmem:[%s5872_s1 + $0x410] sm:$0xff]   ;;  %v2888_v35 = vshll.u32 %v5713_v13, 16 }
 0x104   : > { %4464 = vmatprep.subr.bf16.mxu1 %v4827_v1  ;;  %v4087_v41 = vpop.f32.mrf.mxu1  ;;  %v2700_v37 = vld [vmem:[%s4909_s8 + $0x2c] sm:$0xf] }
 0x106   : > { %4437 = vmatpush3.bf16.msra.mxu0 %v4763_v36 }
 0x107   : > { %4465 = vmatpush3.bf16.msra.mxu1 %v4764_v25  ;;  %4438 = vmatprep.subr.bf16.mxu0 %v4827_v1 }
 0x108   : > { %4466 = vmatprep.subr.bf16.mxu1 %v4827_v1 }
 0x10a   : > { %4439 = vmatpush3.bf16.msra.mxu0 %v4765_v42  ;;  %v4780_v42 = vld [vmem:[%s5872_s1 + $0x408] sm:$0xff]  }
 0x10b   : > { %4467 = vmatpush3.bf16.msra.mxu1 %v4766_v44  ;;  %4480 = vmatprep.subr.bf16.mxu0 %v4827_v1 }
 0x10c   : > { %4508 = vmatprep.subr.bf16.mxu1 %v4827_v1 }
 0x10d   : > { %v689_v54 = vpop.f32.mrf.mxu0  ;;  %4441 = vmatmul.mubr.bf16.vlgmr.msra.gmra.mxu0 %v4979_v53 }
 0x10e   : > { %v711_v55 = vadd.f32 %v689_v54, %v5570_v51  ;;  %v848_v57 = vpop.f32.mrf.mxu1  ;;  %4469 = vmatmul.mubr.bf16.vlgmr.msra.gmra.mxu1 %v2581_v50  ;;  %4481 = vmatpush3.bf16.msra.mxu0 %v4768_v49  ;;  %v3763_v54 = vcombine.low %v2700_v37, %v2852_v38 }
 0x10f   : > { %4509 = vmatpush3.bf16.msra.mxu1 %v4769_v52  ;;  %v4106_v17 = vpop.f32.mrf.mxu0  ;;  %4482 = vmatprep.subr.bf16.mxu0 %v4827_v1  ;;  %v2890_v52 = vrot.slane %v2888_v35, 4 }
 0x110   : > { %v5671_v53 = vadd.f32 %v848_v57, %v711_v55  ;;  %v4134_v51 = vpop.f32.mrf.mxu1  ;;  %4510 = vmatprep.subr.bf16.mxu1 %v4827_v1  ;;  %4444 = vmatprep.mubr.msk.bf16.mxu0 %vm4828_vm0, %v4827_v1  ;;  %v4782_v57 = vld [vmem:[%s5872_s1 + $0x400] sm:$0xff]   ;;  %v2735_v17 = vrot.slane %v5713_v13, 2  ;;  %v4791_v13 = vld [vmem:[%s5872_s1 + $0x4a8] sm:$0xff]  }
 0x111   : > { %v692_v60 = vpop.f32.mrf.mxu0  ;;  %4472 = vmatprep.mubr.msk.bf16.mxu1 %vm4828_vm0, %v4827_v1  ;;  %v2891_v51 = vor.u32 %v2890_v52, %v2887_v46  ;;  %v4799_v52 = vld [vmem:[%s4909_s8 + $0x30] sm:$0x1f]  }
 0x112   : > { %v712_v61 = vadd.f32 %v692_v60, %v5585_v2  ;;  %v851_v62 = vpop.f32.mrf.mxu1  ;;  %4483 = vmatpush3.bf16.msra.mxu0 %v4770_v58  ;;  %v2701_v60 = vld [vmem:[%s4909_s8 + $0x30] sm:$0x3] }
 0x113   : > { %4511 = vmatpush3.bf16.msra.mxu1 %v4771_v56  ;;  %v4107_v63 = vpop.f32.mrf.mxu0  ;;  %4484 = vmatprep.subr.bf16.mxu0 %v4827_v1  ;;  %v4783_v56 = vld [vmem:[%s5872_s1 + $0x440] sm:$0xff]  }
 0x114   : > { %v5687_v4 = vadd.f32 %v851_v62, %v712_v61  ;;  %v4135_v7 = vpop.f32.mrf.mxu1  ;;  %4512 = vmatprep.subr.bf16.mxu1 %v4827_v1  ;;  %v2894_v61 = vshrl.u32 %v3763_v54, 16  ;;  %v2897_v62 = vshll.u32 %v3763_v54, 16  ;;  %v4787_v63 = vld [vmem:[%s5872_s1 + $0x4b8] sm:$0xff]  }
 0x115   : > { %v697_v2 = vpop.f32.mrf.mxu0  ;;  %4445 = vmatmul.mubr.bf16.gmra.mxu0 %v5008_v5 }
 0x116   : > { %v713_v10 = vadd.f32 %v697_v2, %v5599_v45  ;;  %4485 = vmatpush3.bf16.msra.mxu0 %v4772_v9  ;;  %v856_v11 = vpop.f32.mrf.mxu1  ;;  %4473 = vmatmul.mubr.bf16.gmra.mxu1 %v2583_v0  ;;  %v2851_v45 = vld [vmem:[%s4909_s8 + $0x1c] sm:$0x8]  ;;  %v2896_v7 = vrot.slane %v2894_v61, 3  ;;  %v2899_v2 = vrot.slane %v2897_v62, 4 }
 0x117   : > { %4513 = vmatpush3.bf16.msra.mxu1 %v4773_v43  ;;  %v4110_v15 = vpop.f32.mrf.mxu0  ;;  %4486 = vmatprep.subr.bf16.mxu0 %v4827_v1  ;;  %v3762_v26 = vcombine.low %v2851_v45, %v2697_v19  ;;  %v3737_v43 = vcombine.low %v2700_v37, %v2701_v60 }
 0x118   : > { %v5699_v18 = vadd.f32 %v856_v11, %v713_v10  ;;  %v4138_v5 = vpop.f32.mrf.mxu1  ;;  %4514 = vmatprep.subr.bf16.mxu1 %v4827_v1  ;;  %4448 = vmatprep.mubr.msk.bf16.mxu0 %vm4828_vm0, %v4827_v1  ;;  %v4788_v15 = vld [vmem:[%s5872_s1 + $0x4b0] sm:$0xff]  }
 0x119   : > { %v700_v8 = vpop.f32.mrf.mxu0  ;;  %4476 = vmatprep.mubr.msk.bf16.mxu1 %vm4828_vm0, %v4827_v1  ;;  %v2877_v33 = vshrl.u32 %v3762_v26, 16  ;;  %v2880_v34 = vshll.u32 %v3762_v26, 16 }
 0x11a   : > { %v714_v39 = vadd.f32 %v700_v8, %v5613_v22  ;;  %4487 = vmatpush3.bf16.msra.mxu0 %v4774_v14  ;;  %v859_v20 = vpop.f32.mrf.mxu1 }
 0x11b   : > { %4515 = vmatpush3.bf16.msra.mxu1 %v4775_v16  ;;  %v4111_v21 = vpop.f32.mrf.mxu0  ;;  %4488 = vmatprep.subr.bf16.mxu0 %v4827_v1  ;;  %v2879_v49 = vrot.slane %v2877_v33, 3  ;;  %v2882_v50 = vrot.slane %v2880_v34, 4  ;;  %v2737_v16 = vrot.slane %v3737_v43, 2  ;;  %v4793_v33 = vld [vmem:[%s5872_s1 + $0x498] sm:$0xff]  }
 0x11c   : > { %v5719_v6 = vadd.f32 %v859_v20, %v714_v39  ;;  %v4139_v22 = vpop.f32.mrf.mxu1  ;;  %4516 = vmatprep.subr.bf16.mxu1 %v4827_v1 }
 0x11d   : > { %v705_v27 = vpop.f32.mrf.mxu0  ;;  %4449 = vmatmul.mubr.bf16.gmra.mxu0 %v5029_v12  ;;  %v4779_v12 = vld [vmem:[%s5872_s1 + $0x450] sm:$0xff]  }
 0x11e   : > { %v715_v28 = vadd.f32 %v705_v27, %v5626_v30  ;;  %4489 = vmatpush3.bf16.msra.mxu0 %v4776_v3  ;;  %v864_v24 = vpop.f32.mrf.mxu1  ;;  %4477 = vmatmul.mubr.bf16.gmra.mxu1 %v2582_v59  ;;  %v2696_v30 = vld [vmem:[%s4909_s8 + $0x1c] sm:$0xc]  ;;  %v2883_v59 = vor.u32 %v2882_v50, %v2879_v49  ;;  %v2738_v3 = vsel %vm2578_vm6, %v2735_v17, %v2737_v16  ;;  %v4798_v49 = vld [vmem:[%s4909_s8 + $0x28] sm:$0xff]  }
 0x11f   : > { %4517 = vmatpush3.bf16.msra.mxu1 %v4777_v23  ;;  %4490 = vmatprep.subr.bf16.mxu0 %v4827_v1  ;;  %v4114_v32 = vpop.f32.mrf.mxu0  ;;  %v3735_v44 = vcombine.low %v2696_v30, %v2697_v19  ;;  %v2900_v19 = vor.u32 %v2899_v2, %v2896_v7 }
 0x120   : > { %v5734_v36 = vadd.f32 %v864_v24, %v715_v28  ;;  %4518 = vmatprep.subr.bf16.mxu1 %v4827_v1  ;;  %v4142_v25 = vpop.f32.mrf.mxu1  ;;  %4496 = vmatprep.mubr.msk.bf16.mxu0 %vm4828_vm0, %v4827_v1  ;;  %v2892_v0 = vsel %vm741_vm4, %v2883_v59, %v2891_v51  ;;  %v4792_v24 = vld [vmem:[%s5872_s1 + $0x4a0] sm:$0xff]  }
 0x121   : > { %v708_v40 = vpop.f32.mrf.mxu0  ;;  %4524 = vmatprep.mubr.msk.bf16.mxu1 %vm4828_vm0, %v4827_v1  ;;  %v2734_v58 = vrot.slane %v3735_v44, 2  ;;  %v2901_v23 = vsel %vm741_vm4, %v2891_v51, %v2900_v19 }
 0x122   : > { %4491 = vmatpush3.bf16.msra.mxu0 %v4778_v29  ;;  %v867_v41 = vpop.f32.mrf.mxu1  ;;  %v4794_v40 = vld [vmem:[%s5872_s1 + $0x490] sm:$0xff]  }
 0x123   : > { %4519 = vmatpush3.bf16.msra.mxu1 %v4779_v12  ;;  %4492 = vmatprep.subr.bf16.mxu0 %v4827_v1  ;;  %v4115_v48 = vpop.f32.mrf.mxu0  ;;  %v2736_v9 = vsel %vm2578_vm6, %v2734_v58, %v2735_v17  ;;  %v3054_v58 = vrot.slane %v4798_v49, 1  ;;  %v3056_v17 = vrot.slane %v4799_v52, 1 }
 0x124   : > { %4520 = vmatprep.subr.bf16.mxu1 %v4827_v1  ;;  %v4143_v55 = vpop.f32.mrf.mxu1  ;;  %v4797_v48 = vld [vmem:[%s4909_s8 + $0x20] sm:$0xfe]  }
 0x125   : > { %v4796_v55 = vld [vmem:[%s5872_s1 + $0x480] sm:$0xff]   ;;  %v3057_v59 = vsel %vm3052_vm7, %v3054_v58, %v3056_v17 }
 0x126   : > { %4493 = vmatpush3.bf16.msra.mxu0 %v4780_v42 }
 0x127   : > { %4521 = vmatpush3.bf16.msra.mxu1 %v4781_v47  ;;  %4494 = vmatprep.subr.bf16.mxu0 %v4827_v1  ;;  %v4795_v47 = vld [vmem:[%s5872_s1 + $0x488] sm:$0xff]  }
 0x128   : > { %4522 = vmatprep.subr.bf16.mxu1 %v4827_v1 }
 0x12a   : > { %4495 = vmatpush3.bf16.msra.mxu0 %v4782_v57  ;;  %v3053_v57 = vrot.slane %v4797_v48, 1 }
 0x12b   : > { %4523 = vmatpush3.bf16.msra.mxu1 %v4783_v56  ;;  %4536 = vmatprep.subr.bf16.mxu0 %v4827_v1 }
 0x12c   : > { %4564 = vmatprep.subr.bf16.mxu1 %v4827_v1  ;;  %v3055_v56 = vsel %vm3052_vm7, %v3053_v57, %v3054_v58 }
 0x12d   : > { %v1024_v10 = vpop.f32.mrf.mxu0  ;;  %4497 = vmatmul.mubr.bf16.vlgmr.msra.gmra.mxu0 %v2736_v9 }
 0x12e   : > { %v1046_v11 = vadd.f32 %v1024_v10, %v5671_v53  ;;  %v1150_v14 = vpop.f32.mrf.mxu1  ;;  %4525 = vmatmul.mubr.bf16.vlgmr.msra.gmra.mxu1 %v2892_v0  ;;  %4537 = vmatpush3.bf16.msra.mxu0 %v4787_v63 }
 0x12f   : > { %4572 = vmatpush3.bf16.msra.mxu1 %v4787_v63  ;;  %v4162_v5 = vpop.f32.mrf.mxu0  ;;  %4538 = vmatprep.subr.bf16.mxu0 %v4827_v1 }
 0x130   : > { %v5773_v45 = vadd.f32 %v1150_v14, %v1046_v11  ;;  %v4190_v8 = vpop.f32.mrf.mxu1  ;;  %4565 = vmatprep.subr.bf16.mxu1 %v4827_v1  ;;  %4500 = vmatprep.mubr.msk.bf16.mxu0 %vm4828_vm0, %v4827_v1 }
 0x131   : > { %v1027_v53 = vpop.f32.mrf.mxu0  ;;  %4528 = vmatprep.mubr.msk.bf16.mxu1 %vm4828_vm0, %v4827_v1 }
 0x132   : > { %v1047_v39 = vadd.f32 %v1027_v53, %v5687_v4  ;;  %v1153_v20 = vpop.f32.mrf.mxu1  ;;  %4539 = vmatpush3.bf16.msra.mxu0 %v4788_v15 }
 0x133   : > { %4573 = vmatpush3.bf16.msra.mxu1 %v4788_v15  ;;  %v4163_v21 = vpop.f32.mrf.mxu0  ;;  %4540 = vmatprep.subr.bf16.mxu0 %v4827_v1 }
 0x134   : > { %v5787_v26 = vadd.f32 %v1153_v20, %v1047_v39  ;;  %v4191_v22 = vpop.f32.mrf.mxu1  ;;  %4566 = vmatprep.subr.bf16.mxu1 %v4827_v1 }
 0x135   : > { %v1032_v4 = vpop.f32.mrf.mxu0  ;;  %4501 = vmatmul.mubr.bf16.gmra.mxu0 %v2738_v3 }
 0x136   : > { %v1048_v27 = vadd.f32 %v1032_v4, %v5699_v18  ;;  %4541 = vmatpush3.bf16.msra.mxu0 %v4791_v13  ;;  %v1158_v28 = vpop.f32.mrf.mxu1  ;;  %4529 = vmatmul.mubr.bf16.gmra.mxu1 %v2901_v23 }
 0x137   : > { %4574 = vmatpush3.bf16.msra.mxu1 %v4791_v13  ;;  %v4166_v29 = vpop.f32.mrf.mxu0  ;;  %4542 = vmatprep.subr.bf16.mxu0 %v4827_v1 }
 0x138   : > { %v5795_v31 = vadd.f32 %v1158_v28, %v1048_v27  ;;  %v4194_v12 = vpop.f32.mrf.mxu1  ;;  %4567 = vmatprep.subr.bf16.mxu1 %v4827_v1  ;;  %4504 = vmatprep.mubr.msk.bf16.mxu0 %vm4828_vm0, %v4827_v1 }
 0x139   : > { %v1035_v18 = vpop.f32.mrf.mxu0  ;;  %4532 = vmatprep.mubr.msk.bf16.mxu1 %vm4828_vm0, %v4827_v1 }
 0x13a   : > { %v1049_v32 = vadd.f32 %v1035_v18, %v5719_v6  ;;  %4543 = vmatpush3.bf16.msra.mxu0 %v4792_v24  ;;  %v1161_v30 = vpop.f32.mrf.mxu1 }
 0x13b   : > { %4575 = vmatpush3.bf16.msra.mxu1 %v4792_v24  ;;  %v4167_v34 = vpop.f32.mrf.mxu0  ;;  %4544 = vmatprep.subr.bf16.mxu0 %v4827_v1 }
 0x13c   : > { %v5807_v35 = vadd.f32 %v1161_v30, %v1049_v32  ;;  %v4195_v25 = vpop.f32.mrf.mxu1  ;;  %4568 = vmatprep.subr.bf16.mxu1 %v4827_v1 }
 0x13d   : > { %v1040_v37 = vpop.f32.mrf.mxu0  ;;  %4505 = vmatmul.mubr.bf16.gmra.mxu0 %v2737_v16 }
 0x13e   : > { %v1050_v38 = vadd.f32 %v1040_v37, %v5734_v36  ;;  %4545 = vmatpush3.bf16.msra.mxu0 %v4793_v33  ;;  %v1166_v6 = vpop.f32.mrf.mxu1  ;;  %4533 = vmatmul.mubr.bf16.gmra.mxu1 %v2900_v19 }
 0x13f   : > { %4576 = vmatpush3.bf16.msra.mxu1 %v4793_v33  ;;  %4546 = vmatprep.subr.bf16.mxu0 %v4827_v1  ;;  %v4170_v41 = vpop.f32.mrf.mxu0 }
 0x140   : > { %v1176_v42 = vadd.f32 %v1166_v6, %v1050_v38  ;;  %4569 = vmatprep.subr.bf16.mxu1 %v4827_v1  ;;  %v4198_v44 = vpop.f32.mrf.mxu1  ;;  %4552 = vmatprep.mubr.msk.bf16.mxu0 %vm4828_vm0, %v4827_v1 }
 0x141   : > { %v1043_v36 = vpop.f32.mrf.mxu0  ;;  %4556 = vmatprep.mubr.msk.bf16.mxu1 %vm4828_vm0, %v4827_v1 }
 0x142   : > { %4547 = vmatpush3.bf16.msra.mxu0 %v4794_v40  ;;  %v1169_v46 = vpop.f32.mrf.mxu1 }
 0x143   : > { %4577 = vmatpush3.bf16.msra.mxu1 %v4794_v40  ;;  %4548 = vmatprep.subr.bf16.mxu0 %v4827_v1  ;;  %v4171_v50 = vpop.f32.mrf.mxu0 }
 0x144   : > { %4570 = vmatprep.subr.bf16.mxu1 %v4827_v1  ;;  %v4199_v54 = vpop.f32.mrf.mxu1 }
 0x146   : > { %4549 = vmatpush3.bf16.msra.mxu0 %v4795_v47 }
 0x147   : > { %4578 = vmatpush3.bf16.msra.mxu1 %v4795_v47  ;;  %4550 = vmatprep.subr.bf16.mxu0 %v4827_v1 }
 0x148   : > { %4571 = vmatprep.subr.bf16.mxu1 %v4827_v1 }
 0x14a   : > { %4551 = vmatpush3.bf16.msra.mxu0 %v4796_v55 }
 0x14b   : > { %4579 = vmatpush3.bf16.msra.mxu1 %v4796_v55 }
 0x14d   : > { %v1308_v51 = vpop.f32.mrf.mxu0  ;;  %4553 = vmatmul.mubr.bf16.vlgmr.msra.gmra.mxu0 %v3055_v56 }
 0x14e   : > { %v1330_v60 = vadd.f32 %v1308_v51, %v5773_v45  ;;  %v1484_v61 = vpop.f32.mrf.mxu1  ;;  %4557 = vmatmul.mubr.bf16.vlgmr.msra.gmra.mxu1 %v3057_v59 }
 0x14f   : > { %v4218_v62 = vpop.f32.mrf.mxu0  ;;  %4560 = vmatprep.mubr.msk.bf16.mxu1 %vm4828_vm0, %v4827_v1 }
 0x150   : > { %v1506_v9 = vadd.f32 %v1484_v61, %v1330_v60  ;;  %v4246_v63 = vpop.f32.mrf.mxu1 }
 0x151   : > { %v1311_v43 = vpop.f32.mrf.mxu0 }
 0x152   : > { %v1331_v0 = vadd.f32 %v1311_v43, %v5787_v26  ;;  %v1487_v7 = vpop.f32.mrf.mxu1 }
 0x153   : > { %v4219_v2 = vpop.f32.mrf.mxu0 }
 0x154   : > { %v1507_v10 = vadd.f32 %v1487_v7, %v1331_v0  ;;  %v4247_v11 = vpop.f32.mrf.mxu1 }
 0x155   : > { %v1316_v14 = vpop.f32.mrf.mxu0 }
 0x156   : > { %v1332_v15 = vadd.f32 %v1316_v14, %v5795_v31  ;;  %4561 = vmatmul.mubr.bf16.gmra.mxu1 %v3056_v17  ;;  %v1492_v16 = vpop.f32.mrf.mxu1 }
 0x157   : > { %v4222_v5 = vpop.f32.mrf.mxu0 }
 0x158   : > { %v1508_v19 = vadd.f32 %v1492_v16, %v1332_v15  ;;  %v4250_v45 = vpop.f32.mrf.mxu1 }
 0x159   : > { %v1319_v8 = vpop.f32.mrf.mxu0 }
 0x15a   : > { %v1333_v1 = vadd.f32 %v1319_v8, %v5807_v35  ;;  %v1495_v53 = vpop.f32.mrf.mxu1 }
 0x15b   : > { %v4223_v39 = vpop.f32.mrf.mxu0 }
 0x15c   : > { %v1509_v20 = vadd.f32 %v1495_v53, %v1333_v1  ;;  %v4251_v3 = vpop.f32.mrf.mxu1 }
 0x15d   : > { %v1324_v13 = vpop.f32.mrf.mxu0 }
 0x15e   : > { %v1334_v21 = vadd.f32 %v1324_v13, %v1176_v42  ;;  %v1500_v23 = vpop.f32.mrf.mxu1 }
 0x15f   : > { %v4226_v26 = vpop.f32.mrf.mxu0 }
 0x160   : > { %v1510_v22 = vadd.f32 %v1500_v23, %v1334_v21  ;;  %v4254_v4 = vpop.f32.mrf.mxu1 }
 0x161   : > { %v1327_v27 = vpop.f32.mrf.mxu0 }
 0x162   : > { %v1503_v28 = vpop.f32.mrf.mxu1 }
 0x163   : > { %v4227_v24 = vpop.f32.mrf.mxu0 }
 0x164   : > { %v4255_v29 = vpop.f32.mrf.mxu1 }
 0x16d   : > { %v1642_v31 = vpop.f32.mrf.mxu0 }
 0x16e   : > { %v1664_v12 = vadd.f32 %v1642_v31, %v1506_v9  ;;  %v1800_v18 = vpop.f32.mrf.mxu1 }
 0x16f   : > { %v4274_v32 = vpop.f32.mrf.mxu0 }
 0x170   : > { %v1822_v30 = vadd.f32 %v1800_v18, %v1664_v12  ;;  %v4302_v33 = vpop.f32.mrf.mxu1 }
 0x171   : > { %v1645_v34 = vpop.f32.mrf.mxu0 }
 0x172   : > { %v1665_v35 = vadd.f32 %v1645_v34, %v1507_v10  ;;  %v1803_v25 = vpop.f32.mrf.mxu1 }
 0x173   : > { %v4275_v37 = vpop.f32.mrf.mxu0 }
 0x174   : > { %v1823_v38 = vadd.f32 %v1803_v25, %v1665_v35  ;;  %v4303_v6 = vpop.f32.mrf.mxu1 }
 0x175   : > { %v1650_v40 = vpop.f32.mrf.mxu0 }
 0x176   : > { %v1666_v41 = vadd.f32 %v1650_v40, %v1508_v19  ;;  %v1808_v42 = vpop.f32.mrf.mxu1 }
 0x177   : > { %v4278_v44 = vpop.f32.mrf.mxu0 }
 0x178   : > { %v1824_v36 = vadd.f32 %v1808_v42, %v1666_v41  ;;  %v4306_v46 = vpop.f32.mrf.mxu1 }
 0x179   : > { %v1653_v47 = vpop.f32.mrf.mxu0 }
 0x17a   : > { %v1667_v48 = vadd.f32 %v1653_v47, %v1509_v20  ;;  %v1811_v49 = vpop.f32.mrf.mxu1 }
 0x17b   : > { %v4279_v50 = vpop.f32.mrf.mxu0 }
 0x17c   : > { %v1825_v52 = vadd.f32 %v1811_v49, %v1667_v48  ;;  %v4307_v54 = vpop.f32.mrf.mxu1 }
 0x17d   : > { %v1658_v55 = vpop.f32.mrf.mxu0 }
 0x17e   : > { %v1668_v57 = vadd.f32 %v1658_v55, %v1510_v22  ;;  %v1816_v58 = vpop.f32.mrf.mxu1 }
 0x17f   : > { %v4282_v17 = vpop.f32.mrf.mxu0 }
 0x180   : > { %v1826_v56 = vadd.f32 %v1816_v58, %v1668_v57  ;;  %v4310_v59 = vpop.f32.mrf.mxu1 }
 0x181   : > { %v1661_v51 = vpop.f32.mrf.mxu0 }
 0x182   : > { %v1819_v60 = vpop.f32.mrf.mxu1 }
 0x183   : > { %v4283_v61 = vpop.f32.mrf.mxu0 }
 0x184   : > { %v4311_v62 = vpop.f32.mrf.mxu1 }
 0x18d   : > { %v1947_v9 = vpop.f32.mrf.mxu0 }
 0x18e   : > { %v1969_v63 = vadd.f32 %v1947_v9, %v1822_v30  ;;  %v2123_v43 = vpop.f32.mrf.mxu1 }
 0x18f   : > { %v4330_v0 = vpop.f32.mrf.mxu0 }
 0x190   : > { %v2145_v7 = vadd.f32 %v2123_v43, %v1969_v63  ;;  %v4358_v2 = vpop.f32.mrf.mxu1 }
 0x191   : > { %v1950_v10 = vpop.f32.mrf.mxu0 }
 0x192   : > { %v1970_v11 = vadd.f32 %v1950_v10, %v1823_v38  ;;  %v2126_v14 = vpop.f32.mrf.mxu1 }
 0x193   : > { %v4331_v15 = vpop.f32.mrf.mxu0 }
 0x194   : > { %v2146_v16 = vadd.f32 %v2126_v14, %v1970_v11  ;;  %v4359_v5 = vpop.f32.mrf.mxu1 }
 0x195   : > { %v1955_v19 = vpop.f32.mrf.mxu0 }
 0x196   : > { %v1971_v45 = vadd.f32 %v1955_v19, %v1824_v36  ;;  %v2131_v8 = vpop.f32.mrf.mxu1 }
 0x197   : > { %v4334_v1 = vpop.f32.mrf.mxu0 }
 0x198   : > { %v2147_v53 = vadd.f32 %v2131_v8, %v1971_v45  ;;  %v4362_v39 = vpop.f32.mrf.mxu1 }
 0x199   : > { %v1958_v20 = vpop.f32.mrf.mxu0 }
 0x19a   : > { %v1972_v3 = vadd.f32 %v1958_v20, %v1825_v52  ;;  %v2134_v13 = vpop.f32.mrf.mxu1 }
 0x19b   : > { %v4335_v21 = vpop.f32.mrf.mxu0 }
 0x19c   : > { %v2148_v23 = vadd.f32 %v2134_v13, %v1972_v3  ;;  %v4363_v26 = vpop.f32.mrf.mxu1 }
 0x19d   : > { %v1963_v22 = vpop.f32.mrf.mxu0 }
 0x19e   : > { %v1973_v4 = vadd.f32 %v1963_v22, %v1826_v56  ;;  %v2139_v27 = vpop.f32.mrf.mxu1 }
 0x19f   : > { %v4338_v28 = vpop.f32.mrf.mxu0 }
 0x1a0   : > { %v2149_v24 = vadd.f32 %v2139_v27, %v1973_v4  ;;  %v4366_v29 = vpop.f32.mrf.mxu1 }
 0x1a1   : > { %v1966_v31 = vpop.f32.mrf.mxu0 }
 0x1a2   : > { %v2142_v12 = vpop.f32.mrf.mxu1 }
 0x1a3   : > { %v4339_v18 = vpop.f32.mrf.mxu0 }
 0x1a4   : > { %v4367_v32 = vpop.f32.mrf.mxu1 }
 0x1ad   : > { %v2266_v30 = vpop.f32.mrf.mxu0 }
 0x1ae   : > { %v2288_v33 = vadd.f32 %v2266_v30, %v2145_v7  ;;  %v2404_v34 = vpop.f32.mrf.mxu1 }
 0x1af   : > { %v4386_v35 = vpop.f32.mrf.mxu0 }
 0x1b0   : > { %v5839_v25 = vadd.f32 %v2404_v34, %v2288_v33  ;;  %v4414_v37 = vpop.f32.mrf.mxu1 }
 0x1b1   : > { %v2269_v38 = vpop.f32.mrf.mxu0 }
 0x1b2   : > { %v2289_v6 = vadd.f32 %v2269_v38, %v2146_v16  ;;  %v2407_v40 = vpop.f32.mrf.mxu1 }
 0x1b3   : > { %v4387_v41 = vpop.f32.mrf.mxu0 }
 0x1b4   : > { %v5841_v42 = vadd.f32 %v2407_v40, %v2289_v6  ;;  %v4415_v44 = vpop.f32.mrf.mxu1 }
 0x1b5   : > { %v2274_v36 = vpop.f32.mrf.mxu0 }
 0x1b6   : > { %v2290_v46 = vadd.f32 %v2274_v36, %v2147_v53  ;;  %v2412_v47 = vpop.f32.mrf.mxu1 }
 0x1b7   : > { %v4390_v48 = vpop.f32.mrf.mxu0 }
 0x1b8   : > { %v5843_v49 = vadd.f32 %v2412_v47, %v2290_v46  ;;  %v4418_v50 = vpop.f32.mrf.mxu1 }
 0x1b9   : > { %v2277_v52 = vpop.f32.mrf.mxu0 }
 0x1ba   : > { %v2291_v54 = vadd.f32 %v2277_v52, %v2148_v23  ;;  %v2415_v55 = vpop.f32.mrf.mxu1 }
 0x1bb   : > { %v4391_v57 = vpop.f32.mrf.mxu0 }
 0x1bc   : > { %v5845_v58 = vadd.f32 %v2415_v55, %v2291_v54  ;;  %v4419_v17 = vpop.f32.mrf.mxu1 }
 0x1bd   : > { %v2282_v56 = vpop.f32.mrf.mxu0 }
 0x1be   : > { %v2292_v59 = vadd.f32 %v2282_v56, %v2149_v24  ;;  %v2420_v51 = vpop.f32.mrf.mxu1 }
 0x1bf   : > { %v4394_v60 = vpop.f32.mrf.mxu0 }
 0x1c0   : > { %v5847_v61 = vadd.f32 %v2420_v51, %v2292_v59  ;;  %v4422_v62 = vpop.f32.mrf.mxu1 }
 0x1c1   : > { %v2285_v9 = vpop.f32.mrf.mxu0 }
 0x1c2   : > { %v2423_v63 = vpop.f32.mrf.mxu1 }
 0x1c3   : > { %v4395_v43 = vpop.f32.mrf.mxu0 }
 0x1c4   : > { %v4423_v0 = vpop.f32.mrf.mxu1 }
 0x1cd   : > { %v2530_v7 = vpop.f32.mrf.mxu0 }
 0x1ce   : > { %v2669_v2 = vpop.f32.mrf.mxu1  ;;  %v2552_v52 = vadd.f32 %v2530_v7, %v5839_v25 }
 0x1cf   : > { %v4442_v10 = vpop.f32.mrf.mxu0 }
 0x1d0   : > { %v4470_v11 = vpop.f32.mrf.mxu1  ;;  %v2691_v56 = vadd.f32 %v2669_v2, %v2552_v52 }
 0x1d1   : > { %v2533_v14 = vpop.f32.mrf.mxu0 }
 0x1d2   : > { %v2672_v15 = vpop.f32.mrf.mxu1  ;;  %v2553_v59 = vadd.f32 %v2533_v14, %v5841_v42 }
 0x1d3   : > { %v4443_v16 = vpop.f32.mrf.mxu0 }
 0x1d4   : > { %v4471_v5 = vpop.f32.mrf.mxu1  ;;  %v2692_v63 = vadd.f32 %v2672_v15, %v2553_v59 }
 0x1d5   : > { %v2538_v19 = vpop.f32.mrf.mxu0 }
 0x1d6   : > { %v2677_v45 = vpop.f32.mrf.mxu1  ;;  %v2554_v55 = vadd.f32 %v2538_v19, %v5843_v49 }
 0x1d7   : > { %v4446_v8 = vpop.f32.mrf.mxu0 }
 0x1d8   : > { %v4474_v1 = vpop.f32.mrf.mxu1  ;;  %v2693_v51 = vadd.f32 %v2677_v45, %v2554_v55 }
 0x1d9   : > { %v2541_v53 = vpop.f32.mrf.mxu0 }
 0x1da   : > { %v2680_v39 = vpop.f32.mrf.mxu1  ;;  %v2555_v60 = vadd.f32 %v2541_v53, %v5845_v58  ;;  %v3799_v58 = vld [vmem:[%s211_s16] ss:$0 sm:$0xff] }
 0x1db   : > { %v4447_v20 = vpop.f32.mrf.mxu0 }
 0x1dc   : > { %v4475_v3 = vpop.f32.mrf.mxu1  ;;  %v2694_v43 = vadd.f32 %v2680_v39, %v2555_v60 }
 0x1dd   : > { %v2546_v13 = vpop.f32.mrf.mxu0 }
 0x1de   : > { %v2685_v21 = vpop.f32.mrf.mxu1  ;;  %v2556_v0 = vadd.f32 %v2546_v13, %v5847_v61 }
 0x1df   : > { %v4450_v23 = vpop.f32.mrf.mxu0 }
 0x1e0   : > { %v4478_v26 = vpop.f32.mrf.mxu1  ;;  %v2695_v14 = vadd.f32 %v2685_v21, %v2556_v0 }
 0x1e1   : > { %v2549_v22 = vpop.f32.mrf.mxu0 }
 0x1e2   : > { %v2688_v4 = vpop.f32.mrf.mxu1 }
 0x1e3   : > { %v4451_v27 = vpop.f32.mrf.mxu0 }
 0x1e4   : > { %v4479_v28 = vpop.f32.mrf.mxu1 }
 0x1ed   : > { %v2824_v24 = vpop.f32.mrf.mxu0 }
 0x1ee   : > { %v2987_v29 = vpop.f32.mrf.mxu1  ;;  %v2846_v62 = vadd.f32 %v2824_v24, %v2691_v56 }
 0x1ef   : > { %v4498_v31 = vpop.f32.mrf.mxu0 }
 0x1f0   : > { %v4526_v12 = vpop.f32.mrf.mxu1  ;;  %v3009_v10 = vadd.f32 %v2987_v29, %v2846_v62 }
 0x1f1   : > { %v2827_v18 = vpop.f32.mrf.mxu0 }
 0x1f2   : > { %v2990_v32 = vpop.f32.mrf.mxu1  ;;  %v2847_v25 = vadd.f32 %v2827_v18, %v2692_v63 }
 0x1f3   : > { %v4499_v30 = vpop.f32.mrf.mxu0 }
 0x1f4   : > { %v4527_v33 = vpop.f32.mrf.mxu1  ;;  %v3010_v15 = vadd.f32 %v2990_v32, %v2847_v25 }
 0x1f5   : > { %v2832_v34 = vpop.f32.mrf.mxu0 }
 0x1f6   : > { %v2995_v35 = vpop.f32.mrf.mxu1  ;;  %v2848_v9 = vadd.f32 %v2832_v34, %v2693_v51 }
 0x1f7   : > { %v4502_v37 = vpop.f32.mrf.mxu0 }
 0x1f8   : > { %v4530_v38 = vpop.f32.mrf.mxu1  ;;  %v3011_v49 = vadd.f32 %v2995_v35, %v2848_v9 }
 0x1f9   : > { %v2835_v6 = vpop.f32.mrf.mxu0 }
 0x1fa   : > { %v2998_v40 = vpop.f32.mrf.mxu1  ;;  %v2849_v7 = vadd.f32 %v2835_v6, %v2694_v43 }
 0x1fb   : > { %v4503_v41 = vpop.f32.mrf.mxu0 }
 0x1fc   : > { %v4531_v44 = vpop.f32.mrf.mxu1  ;;  %v3012_v45 = vadd.f32 %v2998_v40, %v2849_v7 }
 0x1fd   : > { %v2840_v36 = vpop.f32.mrf.mxu0 }
 0x1fe   : > { %v3003_v46 = vpop.f32.mrf.mxu1  ;;  %v2850_v61 = vadd.f32 %v2840_v36, %v2695_v14 }
 0x1ff   : > { %v4506_v47 = vpop.f32.mrf.mxu0 }
 0x200   : > { %v4534_v48 = vpop.f32.mrf.mxu1  ;;  %v3013_v22 = vadd.f32 %v3003_v46, %v2850_v61 }
 0x201   : > { %v2843_v50 = vpop.f32.mrf.mxu0 }
 0x202   : > { %v3006_v54 = vpop.f32.mrf.mxu1 }
 0x203   : > { %v4507_v57 = vpop.f32.mrf.mxu0 }
 0x204   : > { %v4535_v17 = vpop.f32.mrf.mxu1 }
 0x20d   : > { %v3143_v2 = vpop.f32.mrf.mxu0 }
 0x20e   : > { %v3165_v42 = vadd.f32 %v3143_v2, %v3009_v10  ;;  %v3151_v11 = vpop.f32.mrf.mxu1 }
 0x20f   : > { %v3167_v16 = vadd.f32 %v3151_v11, %v3011_v49  ;;  %v4554_v5 = vpop.f32.mrf.mxu0 }
 0x210   : > { %v4558_v19 = vpop.f32.mrf.mxu1  ;;  %v3177_v1 = vadd.f32 %v3799_v58, %v3165_v42 }
 0x211   : > { %v3146_v8 = vpop.f32.mrf.mxu0  ;;  %v3179_v20 = vadd.f32 %v3799_v58, %v3167_v16 }
 0x212   : > { %v3166_v53 = vadd.f32 %v3146_v8, %v3010_v15  ;;  %v3154_v39 = vpop.f32.mrf.mxu1  ;;  %v3182_v21 = vmax.f32 %v3177_v1, 0.0 }
 0x213   : > { %v3168_v3 = vadd.f32 %v3154_v39, %v3012_v45  ;;  %v4555_v13 = vpop.f32.mrf.mxu0  ;;  %v3184_v24 = vmax.f32 %v3179_v20, 0.0 }
 0x214   : > { %v3178_v23 = vadd.f32 %v3799_v58, %v3166_v53  ;;  %v4559_v26 = vpop.f32.mrf.mxu1 }
 0x215   : > { %v3180_v4 = vadd.f32 %v3799_v58, %v3168_v3 }
 0x216   : > { %v3183_v27 = vmax.f32 %v3178_v23, 0.0  ;;  %v3159_v28 = vpop.f32.mrf.mxu1 }
 0x217   : > { %v3185_v29 = vmax.f32 %v3180_v4, 0.0  ;;  %v3169_v31 = vadd.f32 %v3159_v28, %v3013_v22 }
 0x218   : > { %v3815_v12 = vpack.c.bf16 %v3183_v27, %v3182_v21  ;;  %v4562_v18 = vpop.f32.mrf.mxu1 }
 0x219   : > { %v3820_v32 = vpack.c.bf16 %v3185_v29, %v3184_v24  ;;  %v3181_v30 = vadd.f32 %v3799_v58, %v3169_v31 }
 0x21a   : > { %3816 = vst [vmem:[%s220_s20] sm:$0xff] %v3815_v12   ;;  %v3162_v33 = vpop.f32.mrf.mxu1 }
 0x21b   : > { %3822 = vst [vmem:[%s220_s20 + $0x8] sm:$0xff] %v3820_v32   ;;  %v3186_v34 = vmax.f32 %v3181_v30, 0.0 }
 0x21c   : > { %v4563_v35 = vpop.f32.mrf.mxu1 }
 0x21d   : > { %v3811_v37 = vpack.c.bf16 %v3186_v34, %v3186_v34 }
 0x21f   : > { %3212 = vst [vmem:[%s220_s20 + $0x10] sm:$0xf] %v3811_v37 }
 0x220 PF: > { %s13_s14 = sadd.s32 1, %s4825_s14   ;;  %s5875_s12 = smov %s4821_s13 }
 0x221   : > { %p10_p5 = scmp.ge.s32.totalorder %s13_s14, 4   ;;  %s5876_s13 = smov %s5878_s15 }
 0x223   :  { %12 = sbr.rel (!%p10_p5) target bundleno = 2 (0x2), region = 83 }

// kernel: att_depth_forward.17
= control target key start
LH: loop header
LB: loop body
LE: loop exit
PB: predicated region body
PF: predicated region fallthrough
CT: control target
= control target key end

     0   :  { %s5611_s12 = smov 0   ;;  %s5613_s13 = smov 0   ;;  %s7115_s0 = inlined_call_operand.vmem [shape: bf16[2,1,326,128], index: 0, kind: input, shape index: {}]   ;;  %s7116_s1 = inlined_call_operand.vmem [shape: bf16[9,128,128], index: 1, kind: input, shape index: {}]   ;;  %s7117_s2 = inlined_call_operand.vmem [shape: f32[1,1,128], index: 2, kind: input, shape index: {}]   ;;  %s7118_s3 = inlined_call_operand.vmem [shape: bf16[2,288,128], index: 3, kind: output, shape index: {}]  }
   0x1   :  { %s5615_s14 = smov 0  }
   0x2 LB: > { %s25_s15 = sadd.s32 1, %s5585_s13  ;;  %p4242_p0 = scmp.ge.s32.totalorder %s5589_s14, 1  ;;  %s5589_s14 = sphi %s5615_s14, %s13_s14   ;;  %s5585_s13 = sphi %s5613_s13, %s7201_s13   ;;  %s5581_s12 = sphi %s5611_s12, %s7200_s12  }
   0x3   : > { %p27_p1 = scmp.ge.s32.totalorder %s25_s15, 2  ;;  %p157_p2 = scmp.lt.s32.totalorder %s5589_s14, 3 }
   0x5   : > { %s7203_s15 = smov (%p27_p1, %s25_s15), 0  ;;  %p158_p3 = pnand %p4242_p0, %p157_p2 }
   0x7   : > { %161 = sbr.rel (%p158_p3) target bundleno = 575 (0x23f), region = 32 }
   0xc   : > { %v5433_v0 = vld [vmem:[%s7116_s1 + $0x78] sm:$0xff]   ;;  %p189_p4 = scmp.lt.s32.totalorder %s5581_s12, 1  ;;  %v5434_v1 = vld [vmem:[%s7116_s1 + $0x70] sm:$0xff]   ;;  %v5435_v2 = vld [vmem:[%s7116_s1 + $0x68] sm:$0xff]   ;;  %vm372_vm0 = vsmask.f32 7424 }
   0xd   : > { %5391 = vmatprep.subr.bf16.mxu1 %v5433_v0  ;;  %4923 = vmatprep.subr.bf16.mxu0 %v5433_v0  ;;  %v5436_v3 = vld [vmem:[%s7116_s1 + $0x60] sm:$0xff]   ;;  %v5437_v6 = vld [vmem:[%s7116_s1 + $0x58] sm:$0xff]   ;;  %v5438_v17 = vld [vmem:[%s7116_s1 + $0x50] sm:$0xff]   ;;  %vm1028_vm1 = vcmask 1046528   ;;  %vm2300_vm2 = vcmask 1045504   ;;  %vm3572_vm4 = vcmask 1044480  }
   0xe   : > { %s7205_s12 = smov (!%p189_p4, %s5581_s12), 1  ;;  %5399 = vmatpush3.bf16.msra.mxu1 %v5433_v0  ;;  %4924 = vmatpush3.bf16.msra.mxu0 %v5433_v0  ;;  %v5439_v26 = vld [vmem:[%s7116_s1 + $0x48] sm:$0xff]   ;;  %v5440_v32 = vld [vmem:[%s7116_s1 + $0x40] sm:$0xff]   ;;  %v5444_v41 = vld [vmem:[%s7116_s1 + $0x38] sm:$0xff]   ;;  %vm1829_vm3 = vsmask.f32 6400 }
   0xf   : > { %5392 = vmatprep.subr.bf16.mxu1 %v5434_v1  ;;  %4925 = vmatprep.subr.bf16.mxu0 %v5434_v1  ;;  %s5407_s22 = smul.u32 164, %s7205_s12  ;;  %v5449_v47 = vld [vmem:[%s7116_s1 + $0xb8] sm:$0xff]   ;;  %v5448_v52 = vld [vmem:[%s7116_s1 + $0x30] sm:$0xff]   ;;  %vm3101_vm5 = vsmask.f32 5376 }
  0x10   : > { %v5452_v62 = vld [vmem:[%s7116_s1 + $0xb0] sm:$0xff]   ;;  %s5408_s6 = smul.u32 144, %s7205_s12 }
  0x11   : > { %s5644_s25 = scalar_lea.vmem %s7115_s0, %s5407_s22 }
  0x12   : > { %5400 = vmatpush3.bf16.msra.mxu1 %v5434_v1  ;;  %4926 = vmatpush3.bf16.msra.mxu0 %v5434_v1  ;;  %v5650_v4 = vld [vmem:[%s5644_s25 + $0x40] sm:$0xff]   ;;  %v5653_v5 = vld [vmem:[%s5644_s25 + $0x48] sm:$0xff]   ;;  %v5682_v22 = vld [vmem:[%s5644_s25 + $0x50] sm:$0xff]   ;;  %s7024_s12 = scalar_lea.vmem %s7118_s3, %s5408_s6 }
  0x13   : > { %5393 = vmatprep.subr.bf16.mxu1 %v5435_v2  ;;  %4927 = vmatprep.subr.bf16.mxu0 %v5435_v2  ;;  %v437_v7 = vshll.u32 %v5650_v4, 16  ;;  %v441_v8 = vshrl.u32 %v5650_v4, 16  ;;  %v445_v9 = vshll.u32 %v5653_v5, 16  ;;  %v209_v10 = vld [vmem:[%s5644_s25] sm:$0xf]  ;;  %v5671_v15 = vld [vmem:[%s5644_s25 + $0x8] sm:$0xff]  }
  0x14   : > { %v5665_v13 = vld [vmem:[%s5644_s25 + $0x4] sm:$0xf]  ;;  %v381_v20 = vshll.u32 %v5671_v15, 16  ;;  %v5685_v25 = vld [vmem:[%s5644_s25 + $0x10] sm:$0xff]   ;;  %v453_v28 = vshll.u32 %v5682_v22, 16  ;;  %v5692_v29 = vld [vmem:[%s5644_s25 + $0x58] sm:$0xff]  }
  0x15   : > { %v5662_v11 = vrot.slane %v437_v7, 1  ;;  %v447_v12 = vrot.slane %v445_v9, 1  ;;  %v5668_v14 = vcombine.low %v209_v10, %v5665_v13  ;;  %v449_v30 = vshrl.u32 %v5653_v5, 16  ;;  %v5702_v35 = vld [vmem:[%s5644_s25 + $0x18] sm:$0xff]   ;;  %v5707_v39 = vld [vmem:[%s5644_s25 + $0x60] sm:$0xff]   ;;  %v5721_v50 = vld [vmem:[%s5644_s25 + $0x68] sm:$0xff]  }
  0x16   : > { %5401 = vmatpush3.bf16.msra.mxu1 %v5435_v2  ;;  %4928 = vmatpush3.bf16.msra.mxu0 %v5435_v2  ;;  %v383_v24 = vrot.slane %v381_v20, 1  ;;  %v385_v33 = vshrl.u32 %v5671_v15, 16  ;;  %v389_v34 = vshll.u32 %v5685_v25, 16  ;;  %v455_v36 = vrot.slane %v453_v28, 1  ;;  %v5715_v46 = vld [vmem:[%s5644_s25 + $0x20] sm:$0xff]   ;;  %v5733_v60 = vld [vmem:[%s5644_s25 + $0x28] sm:$0xff]  }
  0x17   : > { %5394 = vmatprep.subr.bf16.mxu1 %v5436_v3  ;;  %4929 = vmatprep.subr.bf16.mxu0 %v5436_v3  ;;  %v443_v16 = vor.u32 %v441_v8, %v5662_v11  ;;  %v374_v18 = vshrl.u32 %v5668_v14, 16  ;;  %v376_v19 = vshll.u32 %v5668_v14, 16  ;;  %v457_v37 = vshrl.u32 %v5682_v22, 16  ;;  %v5742_v1 = vld [vmem:[%s5644_s25 + $0x70] sm:$0xff]   ;;  %v5453_v2 = vld [vmem:[%s7116_s1 + $0x28] sm:$0xff]  }
  0x18   : > { %v461_v38 = vshll.u32 %v5692_v29, 16  ;;  %v451_v40 = vor.u32 %v449_v30, %v447_v12  ;;  %v393_v42 = vshrl.u32 %v5685_v25, 16  ;;  %v397_v43 = vshll.u32 %v5702_v35, 16 }
  0x19   : > { %v448_v21 = vsel %vm372_vm0, %v443_v16, %v447_v12  ;;  %v378_v23 = vrot.slane %v376_v19, 1  ;;  %v387_v44 = vor.u32 %v385_v33, %v383_v24  ;;  %v391_v45 = vrot.slane %v389_v34, 1  ;;  %v5456_v16 = vld [vmem:[%s7116_s1 + $0xa8] sm:$0xff]   ;;  %v5769_v33 = vld [vmem:[%s5644_s25 + $0x38] sm:$0xff]   ;;  %v5460_v34 = vld [vmem:[%s7116_s1 + $0xa0] sm:$0xff]  }
  0x1a   : > { %5402 = vmatpush3.bf16.msra.mxu1 %v5436_v3  ;;  %4930 = vmatpush3.bf16.msra.mxu0 %v5436_v3  ;;  %v459_v48 = vor.u32 %v457_v37, %v455_v36  ;;  %v463_v49 = vrot.slane %v461_v38, 1  ;;  %v456_v51 = vsel %vm372_vm0, %v451_v40, %v455_v36  ;;  %v465_v53 = vshrl.u32 %v5692_v29, 16  ;;  %v5778_v40 = vld [vmem:[%s5644_s25 + $0x80] sm:$0xff]  }
  0x1b   : > { %5395 = vmatprep.subr.bf16.mxu1 %v5437_v6  ;;  %4931 = vmatprep.subr.bf16.mxu0 %v5437_v6  ;;  %v379_v27 = vor.u32 %v378_v23, %v374_v18  ;;  %v395_v54 = vor.u32 %v393_v42, %v391_v45  ;;  %v399_v55 = vrot.slane %v397_v43, 1  ;;  %v392_v56 = vsel %vm372_vm0, %v387_v44, %v391_v45  ;;  %v5759_v23 = vld [vmem:[%s5644_s25 + $0x78] sm:$0xff]  }
  0x1c   : > { %4955 = vmatprep.mubr.bf16.mxu1 %v448_v21  ;;  %v469_v57 = vshll.u32 %v5707_v39, 16  ;;  %v401_v58 = vshrl.u32 %v5702_v35, 16  ;;  %v405_v59 = vshll.u32 %v5715_v46, 16  ;;  %v464_v61 = vsel %vm372_vm0, %v459_v48, %v463_v49 }
  0x1d   : > { %v384_v31 = vsel %vm372_vm0, %v379_v27, %v383_v24  ;;  %v473_v63 = vshrl.u32 %v5707_v39, 16  ;;  %v477_v0 = vshll.u32 %v5721_v50, 16  ;;  %v400_v3 = vsel %vm372_vm0, %v395_v54, %v399_v55  ;;  %v5458_v24 = vld [vmem:[%s7116_s1 + $0x20] sm:$0xff]  }
  0x1e   : > { %5403 = vmatpush3.bf16.msra.mxu1 %v5437_v6  ;;  %4932 = vmatpush3.bf16.msra.mxu0 %v5437_v6  ;;  %v409_v6 = vshrl.u32 %v5715_v46, 16  ;;  %v413_v7 = vshll.u32 %v5733_v60, 16  ;;  %v467_v8 = vor.u32 %v465_v53, %v463_v49  ;;  %v471_v9 = vrot.slane %v469_v57, 1  ;;  %v5467_v57 = vld [vmem:[%s7116_s1 + $0x10] sm:$0xff]  }
  0x1f   : > { %5396 = vmatprep.subr.bf16.mxu1 %v5438_v17  ;;  %4933 = vmatprep.subr.bf16.mxu0 %v5438_v17  ;;  %v403_v10 = vor.u32 %v401_v58, %v399_v55  ;;  %v407_v12 = vrot.slane %v405_v59, 1  ;;  %v479_v19 = vrot.slane %v477_v0, 1  ;;  %v481_v20 = vshrl.u32 %v5721_v50, 16  ;;  %v1007_v0 = vld [vmem:[%s5644_s25] sm:$0xe] }
  0x20   : > { %4939 = vmatprep.mubr.bf16.mxu0 %v384_v31  ;;  %v475_v18 = vor.u32 %v473_v63, %v471_v9  ;;  %v485_v21 = vshll.u32 %v5742_v1, 16  ;;  %v415_v27 = vrot.slane %v413_v7, 1  ;;  %v417_v28 = vshrl.u32 %v5733_v60, 16  ;;  %v5468_v7 = vld [vmem:[%s7116_s1 + $0x90] sm:$0xff]  }
  0x21   : > { %v472_v30 = vsel %vm372_vm0, %v467_v8, %v471_v9  ;;  %v408_v31 = vsel %vm372_vm0, %v403_v10, %v407_v12  ;;  %v489_v36 = vshrl.u32 %v5742_v1, 16  ;;  %v493_v38 = vshll.u32 %v5759_v23, 16  ;;  %v5473_v8 = vld [vmem:[%s5644_s25 + $0x90] ss:$0 sps:$4 sm:$0x11]  }
  0x22   : > { %5404 = vmatpush3.bf16.msra.mxu1 %v5438_v17  ;;  %4934 = vmatpush3.bf16.msra.mxu0 %v5438_v17  ;;  %v5754_v17 = vld [vmem:[%s5644_s25 + $0x30] sm:$0xff]   ;;  %v480_v37 = vsel %vm372_vm0, %v475_v18, %v479_v19  ;;  %v429_v42 = vshll.u32 %v5769_v33, 16  ;;  %v483_v44 = vor.u32 %v481_v20, %v479_v19  ;;  %v487_v45 = vrot.slane %v485_v21, 1  ;;  %v5470_v19 = vld [vmem:[%s7116_s1 + $0x88] sm:$0xff]  }
  0x23   : > { %5397 = vmatprep.subr.bf16.mxu1 %v5439_v26  ;;  %4935 = vmatprep.subr.bf16.mxu0 %v5439_v26  ;;  %v419_v48 = vor.u32 %v417_v28, %v415_v27  ;;  %v495_v54 = vrot.slane %v493_v38, 1  ;;  %v497_v55 = vshrl.u32 %v5759_v23, 16  ;;  %v5471_v20 = vld [vmem:[%s7116_s1 + $0x8] sm:$0xff]  }
  0x24   : > { %v491_v53 = vor.u32 %v489_v36, %v487_v45  ;;  %v431_v59 = vrot.slane %v429_v42, 1  ;;  %v5475_v36 = vld [vmem:[%s7116_s1] sm:$0xff]   ;;  %v5477_v42 = vld [vmem:[%s7116_s1 + $0xf8] sm:$0xff]  }
  0x26   : > { %5405 = vmatpush3.bf16.msra.mxu1 %v5439_v26  ;;  %4936 = vmatpush3.bf16.msra.mxu0 %v5439_v26  ;;  %v411_v26 = vor.u32 %v409_v6, %v407_v12  ;;  %v496_v6 = vsel %vm372_vm0, %v491_v53, %v495_v54  ;;  %v4312_v12 = vcombine.low %v1007_v0, %v5665_v13  ;;  %v5480_v53 = vld [vmem:[%s7116_s1 + $0x130] sm:$0xff]   ;;  %v1042_v0 = vrot.slane %v5769_v33, 1 }
  0x27   : > { %5398 = vmatprep.subr.bf16.mxu1 %v5440_v32  ;;  %4937 = vmatprep.subr.bf16.mxu0 %v5440_v32 }
  0x28   : > { %v416_v43 = vsel %vm372_vm0, %v411_v26, %v415_v27  ;;  %v1029_v13 = vrot.slane %v4312_v12, 1  ;;  %v1030_v26 = vrot.slane %v5671_v15, 1  ;;  %v5490_v12 = vld [vmem:[%s7116_s1 + $0x108] sm:$0xff]  }
  0x2a   : > { %5406 = vmatpush3.bf16.msra.mxu1 %v5440_v32  ;;  %4938 = vmatpush3.bf16.msra.mxu0 %v5440_v32  ;;  %v421_v32 = vshll.u32 %v5754_v17, 16 }
  0x2b   : > { %4975 = vmatprep.subr.bf16.mxu1 %v5444_v41  ;;  %5027 = vmatprep.subr.bf16.mxu0 %v5449_v47 }
  0x2c   : > { %v423_v49 = vrot.slane %v421_v32, 1 }
  0x2d   : > { %4956 = vmatmul.mubr.bf16.vlgmr.msra.gmra.mxu1 %v456_v51  ;;  %4940 = vmatmul.mubr.bf16.vlgmr.msra.gmra.mxu0 %v392_v56  ;;  %v5464_v51 = vld [vmem:[%s7116_s1 + $0x98] sm:$0xff]   ;;  %v501_v56 = vshll.u32 %v5778_v40, 16 }
  0x2e   : > { %4976 = vmatpush3.bf16.msra.mxu1 %v5444_v41  ;;  %5028 = vmatpush3.bf16.msra.mxu0 %v5449_v47  ;;  %v425_v41 = vshrl.u32 %v5754_v17, 16  ;;  %v5462_v47 = vld [vmem:[%s7116_s1 + $0x18] sm:$0xff]   ;;  %v424_v63 = vsel %vm372_vm0, %v419_v48, %v423_v49 }
  0x2f   : > { %4977 = vmatprep.subr.bf16.mxu1 %v5448_v52  ;;  %4959 = vmatprep.mubr.bf16.mxu1 %v464_v61  ;;  %v433_v61 = vshrl.u32 %v5769_v33, 16  ;;  %v503_v9 = vrot.slane %v501_v56, 1  ;;  %v5482_v56 = vld [vmem:[%s7116_s1 + $0x128] sm:$0xff]  }
  0x30   : > { %5029 = vmatprep.subr.bf16.mxu0 %v5452_v62  ;;  %4943 = vmatprep.mubr.bf16.mxu0 %v400_v3  ;;  %v427_v58 = vor.u32 %v425_v41, %v423_v49  ;;  %v1032_v41 = vrot.slane %v5685_v25, 1 }
  0x31   : > { %v435_v18 = vor.u32 %v433_v61, %v431_v59  ;;  %v5484_v61 = vld [vmem:[%s7116_s1 + $0x120] sm:$0xff]  }
  0x32   : > { %4978 = vmatpush3.bf16.msra.mxu1 %v5448_v52  ;;  %5030 = vmatpush3.bf16.msra.mxu0 %v5452_v62  ;;  %v5790_v52 = vld [vmem:[%s5644_s25 + $0x88] sm:$0xff]   ;;  %v488_v62 = vsel %vm372_vm0, %v483_v44, %v487_v45  ;;  %v432_v10 = vsel %vm372_vm0, %v427_v58, %v431_v59  ;;  %v1034_v45 = vrot.slane %v5702_v35, 1  ;;  %v1033_v49 = vsel %vm1028_vm1, %v1030_v26, %v1032_v41  ;;  %v5479_v59 = vld [vmem:[%s7116_s1 + $0xf0] sm:$0xff]  }
  0x33   : > { %4979 = vmatprep.subr.bf16.mxu1 %v5453_v2  ;;  %5031 = vmatprep.subr.bf16.mxu0 %v5456_v16  ;;  %v509_v3 = vshll.u32 %v5790_v52, 16  ;;  %v440_v28 = vsel %vm372_vm0, %v435_v18, %v5662_v11  ;;  %v1062_v44 = vrot.slane %v5790_v52, 1  ;;  %v1050_v18 = vrot.slane %v5692_v29, 1 }
  0x35   : > { %4960 = vmatmul.mubr.bf16.gmra.mxu1 %v472_v30  ;;  %4944 = vmatmul.mubr.bf16.gmra.mxu0 %v408_v31  ;;  %v513_v30 = vshrl.u32 %v5790_v52, 16  ;;  %v517_v31 = vshll.u32 %v5473_v8, 16 }
  0x36   : > { %4980 = vmatpush3.bf16.msra.mxu1 %v5453_v2  ;;  %5032 = vmatpush3.bf16.msra.mxu0 %v5456_v16  ;;  %v505_v2 = vshrl.u32 %v5778_v40, 16  ;;  %v499_v16 = vor.u32 %v497_v55, %v495_v54  ;;  %v1035_v54 = vsel %vm1028_vm1, %v1032_v41, %v1034_v45  ;;  %v1036_v55 = vrot.slane %v5715_v46, 1 }
  0x37   : > { %4963 = vmatprep.mubr.bf16.mxu1 %v480_v37  ;;  %4981 = vmatprep.subr.bf16.mxu1 %v5458_v24  ;;  %v1031_v37 = vsel %vm1028_vm1, %v1029_v13, %v1030_v26  ;;  %v519_v38 = vrot.slane %v517_v31, 1  ;;  %v1345_v13 = vld [vmem:[%s5644_s25 + $0x8] sm:$0xe]  ;;  %v1346_v26 = vld [vmem:[%s5644_s25 + $0xc] sm:$0xf]  ;;  %v1054_v31 = vrot.slane %v5721_v50, 1 }
  0x38   : > { %5033 = vmatprep.subr.bf16.mxu0 %v5460_v34  ;;  %4947 = vmatprep.mubr.bf16.mxu0 %v416_v43  ;;  %v507_v21 = vor.u32 %v505_v2, %v503_v9  ;;  %v504_v27 = vsel %vm372_vm0, %v499_v16, %v503_v9  ;;  %v5478_v43 = vld [vmem:[%s7116_s1 + $0x138] sm:$0xff]   ;;  %v1037_v58 = vsel %vm1028_vm1, %v1034_v45, %v1036_v55  ;;  %v1048_v16 = vrot.slane %v5682_v22, 1 }
  0x39   : > { %v5485_v9 = vld [vmem:[%s7116_s1 + $0xd8] sm:$0xff]   ;;  %v1058_v45 = vrot.slane %v5759_v23, 1 }
  0x3a   : > { %4982 = vmatpush3.bf16.msra.mxu1 %v5458_v24  ;;  %5034 = vmatpush3.bf16.msra.mxu0 %v5460_v34  ;;  %v511_v24 = vrot.slane %v509_v3, 1  ;;  %v5474_v34 = vld [vmem:[%s7116_s1 + $0x80] sm:$0xff]   ;;  %v5486_v3 = vld [vmem:[%s7116_s1 + $0x118] sm:$0xff]  }
  0x3b   : > { %4983 = vmatprep.subr.bf16.mxu1 %v5462_v47  ;;  %5035 = vmatprep.subr.bf16.mxu0 %v5464_v51 }
  0x3c   : > { %v512_v32 = vsel %vm372_vm0, %v507_v21, %v511_v24  ;;  %v515_v11 = vor.u32 %v513_v30, %v511_v24  ;;  %v5491_v21 = vld [vmem:[%s7116_s1 + $0xc0] sm:$0xff]   ;;  %v5914_v24 = vld [vmem:[%s7116_s1 + $0x1b8] sm:$0xff]  }
  0x3d   : > { %4964 = vmatmul.mubr.bf16.gmra.mxu1 %v488_v62  ;;  %4948 = vmatmul.mubr.bf16.gmra.mxu0 %v424_v63  ;;  %v1040_v62 = vrot.slane %v5754_v17, 1  ;;  %v5481_v63 = vld [vmem:[%s7116_s1 + $0xe8] sm:$0xff]   ;;  %v5925_v30 = vld [vmem:[%s5644_s25 + $0x18] sm:$0xff]  }
  0x3e   : > { %4984 = vmatpush3.bf16.msra.mxu1 %v5462_v47  ;;  %5036 = vmatpush3.bf16.msra.mxu0 %v5464_v51  ;;  %v1064_v47 = vrot.slane %v5473_v8, 1  ;;  %v520_v48 = vsel %vm372_vm0, %v515_v11, %v519_v38  ;;  %v1046_v8 = vrot.slane %v5653_v5, 1  ;;  %v1056_v38 = vrot.slane %v5742_v1, 1 }
  0x3f   : > { %4967 = vmatprep.mubr.bf16.mxu1 %v496_v6  ;;  %4985 = vmatprep.subr.bf16.mxu1 %v5467_v57  ;;  %v1043_v2 = vsel %vm1028_vm1, %v1040_v62, %v1042_v0  ;;  %v1044_v6 = vrot.slane %v5650_v4, 1 }
  0x40   : > { %5037 = vmatprep.subr.bf16.mxu0 %v5468_v7  ;;  %4951 = vmatprep.mubr.bf16.mxu0 %v432_v10  ;;  %v5843_v51 = vsel %vm1028_vm1, %v1062_v44, %v1064_v47  ;;  %v5487_v10 = vld [vmem:[%s7116_s1 + $0xd0] sm:$0xff]   ;;  %v1057_v47 = vsel %vm1028_vm1, %v1054_v31, %v1056_v38 }
  0x42   : > { %4986 = vmatpush3.bf16.msra.mxu1 %v5467_v57  ;;  %5038 = vmatpush3.bf16.msra.mxu0 %v5468_v7  ;;  %v1038_v57 = vrot.slane %v5733_v60, 1  ;;  %v5488_v7 = vld [vmem:[%s7116_s1 + $0x110] sm:$0xff]  }
  0x43   : > { %5039 = vmatprep.subr.bf16.mxu0 %v5470_v19  ;;  %4987 = vmatprep.subr.bf16.mxu1 %v5471_v20 }
  0x45   : > { %4968 = vmatmul.mubr.bf16.gmra.mxu1 %v504_v27  ;;  %4952 = vmatmul.mubr.bf16.gmra.mxu0 %v440_v28  ;;  %v5920_v27 = vld [vmem:[%s5644_s25 + $0x10] sm:$0xff]   ;;  %v1052_v28 = vrot.slane %v5707_v39, 1 }
  0x46   : > { %5040 = vmatpush3.bf16.msra.mxu0 %v5470_v19  ;;  %4971 = vmatprep.mubr.bf16.mxu1 %v512_v32  ;;  %v5489_v19 = vld [vmem:[%s7116_s1 + $0xc8] sm:$0xff]   ;;  %v2302_v32 = vrot.slane %v5920_v27, 2 }
  0x47   : > { %4988 = vmatpush3.bf16.msra.mxu1 %v5471_v20  ;;  %5041 = vmatprep.subr.bf16.mxu0 %v5474_v34  ;;  %v1051_v20 = vsel %vm1028_vm1, %v1048_v16, %v1050_v18 }
  0x48   : > { %4989 = vmatprep.subr.bf16.mxu1 %v5475_v36  ;;  %5043 = vmatprep.mubr.bf16.mxu0 %v1031_v37  ;;  %v1055_v37 = vsel %vm1028_vm1, %v1052_v28, %v1054_v31 }
  0x4a   : > { %5042 = vmatpush3.bf16.msra.mxu0 %v5474_v34  ;;  %v1053_v34 = vsel %vm1028_vm1, %v1050_v18, %v1052_v28 }
  0x4b   : > { %4990 = vmatpush3.bf16.msra.mxu1 %v5475_v36  ;;  %5131 = vmatprep.subr.bf16.mxu0 %v5478_v43  ;;  %v5937_v36 = vcombine.low %v1345_v13, %v1346_v26 }
  0x4c   : > { %5079 = vmatprep.subr.bf16.mxu1 %v5477_v42 }
  0x4d   : > { %4972 = vmatmul.mubr.bf16.gmra.mxu1 %v520_v48  ;;  %5044 = vmatmul.mubr.bf16.vlgmr.msra.gmra.mxu0 %v1033_v49  ;;  %v1831_v41 = vshrl.u32 %v5937_v36, 16  ;;  %v1842_v48 = vshll.u32 %v5920_v27, 16  ;;  %v1851_v49 = vshll.u32 %v5925_v30, 16 }
  0x4e   : > { %4991 = vmatprep.mubr.bf16.mxu1 %v5668_v14  ;;  %5132 = vmatpush3.bf16.msra.mxu0 %v5478_v43  ;;  %v1039_v14 = vsel %vm1028_vm1, %v1036_v55, %v1038_v57  ;;  %v1839_v43 = vshrl.u32 %v5920_v27, 16 }
  0x4f   : > { %5047 = vmatprep.mubr.bf16.mxu0 %v1035_v54  ;;  %5133 = vmatprep.subr.bf16.mxu0 %v5480_v53  ;;  %v1833_v54 = vrot.slane %v1831_v41, 1 }
  0x52   : > { %5134 = vmatpush3.bf16.msra.mxu0 %v5480_v53  ;;  %v1492_v53 = vrot.slane %v5937_v36, 1 }
  0x53   : > { %5135 = vmatprep.subr.bf16.mxu0 %v5482_v56 }
  0x55   : > { %4992 = vmatmul.mubr.bf16.vlgmr.msra.gmra.mxu1 %v5671_v15  ;;  %5048 = vmatmul.mubr.bf16.gmra.mxu0 %v1037_v58  ;;  %v1041_v15 = vsel %vm1028_vm1, %v1038_v57, %v1040_v62  ;;  %v1493_v57 = vrot.slane %v5920_v27, 1  ;;  %v1059_v58 = vsel %vm1028_vm1, %v1056_v38, %v1058_v45  ;;  %v6021_v38 = vld [vmem:[%s5644_s25 + $0x58] sm:$0xff]  }
  0x56   : > { %5080 = vmatpush3.bf16.msra.mxu1 %v5477_v42  ;;  %4995 = vmatprep.mubr.bf16.mxu1 %v5685_v25  ;;  %v5483_v25 = vld [vmem:[%s7116_s1 + $0xe0] sm:$0xff]   ;;  %v1834_v42 = vshll.u32 %v5937_v36, 16  ;;  %v5506_v36 = vld [vmem:[%s7116_s1 + $0x1a8] sm:$0xff]  }
  0x57   : > { %5081 = vmatprep.subr.bf16.mxu1 %v5479_v59  ;;  %5051 = vmatprep.mubr.bf16.mxu0 %v1039_v14  ;;  %v5960_v14 = vld [vmem:[%s5644_s25 + $0x20] sm:$0xff]  }
  0x58   : > { %5136 = vmatpush3.bf16.msra.mxu0 %v5482_v56  ;;  %v1836_v55 = vrot.slane %v1834_v42, 2  ;;  %v1841_v56 = vrot.slane %v1839_v43, 1 }
  0x59   : > { %5137 = vmatprep.subr.bf16.mxu0 %v5484_v61 }
  0x5a   : > { %5082 = vmatpush3.bf16.msra.mxu1 %v5479_v59  ;;  %v1844_v59 = vrot.slane %v1842_v48, 2  ;;  %v1837_v31 = vor.u32 %v1836_v55, %v1833_v54  ;;  %v6035_v54 = vld [vmem:[%s5644_s25 + $0x60] sm:$0xff]  }
  0x5b   : > { %5083 = vmatprep.subr.bf16.mxu1 %v5481_v63 }
  0x5c   : > { %5138 = vmatpush3.bf16.msra.mxu0 %v5484_v61  ;;  %v2279_v61 = vld [vmem:[%s5644_s25 + $0x8] sm:$0xc] }
  0x5d   : > { %4996 = vmatmul.mubr.bf16.gmra.mxu1 %v5702_v35  ;;  %5052 = vmatmul.mubr.bf16.gmra.mxu0 %v1041_v15  ;;  %v1045_v35 = vsel %vm1028_vm1, %v1042_v0, %v1044_v6  ;;  %v4405_v0 = vcombine.low %v2279_v61, %v1346_v26  ;;  %v1853_v15 = vrot.slane %v1851_v49, 2  ;;  %v6046_v61 = vld [vmem:[%s5644_s25 + $0x68] sm:$0xff]  }
  0x5e   : > { %4999 = vmatprep.mubr.bf16.mxu1 %v5715_v46  ;;  %5084 = vmatpush3.bf16.msra.mxu1 %v5481_v63  ;;  %v1047_v46 = vsel %vm1028_vm1, %v1044_v6, %v1046_v8  ;;  %v5965_v63 = vld [vmem:[%s5644_s25 + $0x28] sm:$0xff]   ;;  %v2306_v6 = vrot.slane %v5960_v14, 2 }
  0x5f   : > { %5055 = vmatprep.mubr.bf16.mxu0 %v1043_v2  ;;  %5085 = vmatprep.subr.bf16.mxu1 %v5483_v25  ;;  %v1857_v2 = vshrl.u32 %v5960_v14, 16  ;;  %v1866_v13 = vshrl.u32 %v5965_v63, 16 }
  0x60   : > { %5139 = vmatprep.subr.bf16.mxu0 %v5486_v3 }
  0x61   : > { %5140 = vmatpush3.bf16.msra.mxu0 %v5486_v3  ;;  %v5970_v3 = vld [vmem:[%s5644_s25 + $0x30] sm:$0xff]   ;;  %v1859_v18 = vrot.slane %v1857_v2, 1  ;;  %v1868_v43 = vrot.slane %v1866_v13, 1 }
  0x62   : > { %5086 = vmatpush3.bf16.msra.mxu1 %v5483_v25  ;;  %5141 = vmatprep.subr.bf16.mxu0 %v5488_v7  ;;  %v2301_v25 = vrot.slane %v4405_v0, 2  ;;  %v1878_v48 = vshll.u32 %v5970_v3, 16  ;;  %v2322_v0 = vrot.slane %v6035_v54, 2  ;;  %v6052_v2 = vld [vmem:[%s5644_s25 + $0x70] sm:$0xff]  }
  0x63   : > { %5087 = vmatprep.subr.bf16.mxu1 %v5485_v9 }
  0x65   : > { %5000 = vmatmul.mubr.bf16.gmra.mxu1 %v5733_v60  ;;  %5056 = vmatmul.mubr.bf16.gmra.mxu0 %v1045_v35  ;;  %v5492_v60 = vld [vmem:[%s7116_s1 + $0x100] sm:$0xff]   ;;  %v1860_v35 = vshll.u32 %v5960_v14, 16 }
  0x66   : > { %5003 = vmatprep.mubr.bf16.mxu1 %v5754_v17  ;;  %5059 = vmatprep.mubr.bf16.mxu0 %v1047_v46  ;;  %v1049_v17 = vsel %vm1028_vm1, %v1046_v8, %v1048_v16  ;;  %v5976_v8 = vld [vmem:[%s5644_s25 + $0x38] sm:$0xff]   ;;  %v5984_v46 = vld [vmem:[%s5644_s25 + $0x40] sm:$0xff]  }
  0x67   : > { %5088 = vmatpush3.bf16.msra.mxu1 %v5485_v9  ;;  %5142 = vmatpush3.bf16.msra.mxu0 %v5488_v7  ;;  %v1495_v7 = vrot.slane %v5925_v30, 1  ;;  %v5979_v9 = vsel %vm2300_vm2, %v2301_v25, %v2302_v32  ;;  %v1884_v55 = vshrl.u32 %v5976_v8, 16 }
  0x68   : > { %5089 = vmatprep.subr.bf16.mxu1 %v5487_v10  ;;  %5143 = vmatprep.subr.bf16.mxu0 %v5490_v12 }
  0x6b   : > { %5090 = vmatpush3.bf16.msra.mxu1 %v5487_v10  ;;  %5144 = vmatpush3.bf16.msra.mxu0 %v5490_v12 }
  0x6c   : > { %5091 = vmatprep.subr.bf16.mxu1 %v5489_v19  ;;  %5145 = vmatprep.subr.bf16.mxu0 %v5492_v60 }
  0x6d   : > { %5004 = vmatmul.mubr.bf16.gmra.mxu1 %v5769_v33  ;;  %5060 = vmatmul.mubr.bf16.gmra.mxu0 %v1049_v17  ;;  %v5932_v33 = vld [vmem:[%s7116_s1 + $0x178] sm:$0xff]   ;;  %v2312_v17 = vrot.slane %v5976_v8, 2 }
  0x6e   : > { %5007 = vmatprep.mubr.bf16.mxu1 %v5650_v4  ;;  %5063 = vmatprep.mubr.bf16.mxu0 %v1051_v20  ;;  %v2304_v4 = vrot.slane %v5925_v30, 2  ;;  %v6000_v20 = vld [vmem:[%s5644_s25 + $0x48] sm:$0xff]  }
  0x6f   : > { %5092 = vmatpush3.bf16.msra.mxu1 %v5489_v19  ;;  %5146 = vmatpush3.bf16.msra.mxu0 %v5492_v60  ;;  %v1497_v19 = vrot.slane %v5960_v14, 1  ;;  %v2310_v60 = vrot.slane %v5970_v3, 2 }
  0x70   : > { %5093 = vmatprep.subr.bf16.mxu1 %v5491_v21  ;;  %5235 = vmatprep.subr.bf16.mxu0 %v5914_v24  ;;  %v5941_v11 = vsel %vm2300_vm2, %v2302_v32, %v2304_v4  ;;  %v5987_v10 = vsel %vm2300_vm2, %v2304_v4, %v2306_v6  ;;  %v6012_v32 = vld [vmem:[%s5644_s25 + $0x50] sm:$0xff]  }
  0x71   : > { %v6009_v28 = vsel %vm2300_vm2, %v2310_v60, %v2312_v17  ;;  %v2318_v42 = vrot.slane %v6012_v32, 2 }
  0x73   : > { %5094 = vmatpush3.bf16.msra.mxu1 %v5491_v21  ;;  %v2314_v21 = vrot.slane %v5984_v46, 2 }
  0x74   : > { %5183 = vmatprep.subr.bf16.mxu1 %v5932_v33 }
  0x75   : > { %5008 = vmatmul.mubr.bf16.gmra.mxu1 %v5653_v5  ;;  %5064 = vmatmul.mubr.bf16.gmra.mxu0 %v1053_v34  ;;  %v1060_v5 = vrot.slane %v5778_v40, 1  ;;  %v6015_v4 = vsel %vm2300_vm2, %v2312_v17, %v2314_v21  ;;  %v1869_v34 = vshll.u32 %v5965_v63, 16 }
  0x76   : > { %5011 = vmatprep.mubr.bf16.mxu1 %v5682_v22  ;;  %5067 = vmatprep.mubr.bf16.mxu0 %v1055_v37  ;;  %v1848_v22 = vshrl.u32 %v5925_v30, 16  ;;  %v1499_v37 = vrot.slane %v5965_v63, 1 }
  0x77   : > { %v1063_v16 = vsel %vm1028_vm1, %v1060_v5, %v1062_v44  ;;  %v1862_v44 = vrot.slane %v1860_v35, 2  ;;  %v1871_v49 = vrot.slane %v1869_v34, 2  ;;  %v6063_v35 = vld [vmem:[%s5644_s25 + $0x78] sm:$0xff]   ;;  %v1902_v34 = vshrl.u32 %v6000_v20, 16 }
  0x78   : > { %v1850_v62 = vrot.slane %v1848_v22, 1  ;;  %v2320_v22 = vrot.slane %v6021_v38, 2 }
  0x79   : > { %v1863_v25 = vor.u32 %v1862_v44, %v1859_v18  ;;  %v2326_v18 = vrot.slane %v6052_v2, 2 }
  0x7d   : > { %5012 = vmatmul.mubr.bf16.gmra.mxu1 %v5692_v29  ;;  %5068 = vmatmul.mubr.bf16.gmra.mxu0 %v1057_v47  ;;  %v2308_v29 = vrot.slane %v5965_v63, 2 }
  0x7e   : > { %5015 = vmatprep.mubr.bf16.mxu1 %v5707_v39  ;;  %5071 = vmatprep.mubr.bf16.mxu0 %v1059_v58  ;;  %v1061_v39 = vsel %vm1028_vm1, %v1058_v45, %v1060_v5  ;;  %v1875_v45 = vshrl.u32 %v5970_v3, 16  ;;  %v6042_v58 = vsel %vm2300_vm2, %v2318_v42, %v2320_v22 }
  0x7f   : > { %v5990_v12 = vsel %vm2300_vm2, %v2306_v6, %v2308_v29  ;;  %v6006_v26 = vsel %vm2300_vm2, %v2308_v29, %v2310_v60  ;;  %v6055_v6 = vsel %vm2300_vm2, %v2320_v22, %v2322_v0  ;;  %v2324_v29 = vrot.slane %v6046_v61, 2  ;;  %v5500_v22 = vld [vmem:[%s7116_s1 + $0x170] sm:$0xff]  }
  0x80   : > { %v1494_v60 = vsel %vm1028_vm1, %v1492_v53, %v1493_v57  ;;  %v1872_v53 = vor.u32 %v1871_v49, %v1868_v43  ;;  %v1496_v49 = vsel %vm1028_vm1, %v1493_v57, %v1495_v7 }
  0x85   : > { %5016 = vmatmul.mubr.bf16.gmra.mxu1 %v5721_v50  ;;  %5072 = vmatmul.mubr.bf16.gmra.mxu0 %v1061_v39  ;;  %v1845_v50 = vor.u32 %v1844_v59, %v1841_v56  ;;  %v1887_v56 = vshll.u32 %v5976_v8, 16  ;;  %v1854_v59 = vor.u32 %v1853_v15, %v1850_v62  ;;  %v1877_v62 = vrot.slane %v1875_v45, 1 }
  0x86   : > { %5019 = vmatprep.mubr.bf16.mxu1 %v5742_v1  ;;  %5075 = vmatprep.mubr.bf16.mxu0 %v1063_v16  ;;  %v2316_v1 = vrot.slane %v6000_v20, 2  ;;  %v1880_v15 = vrot.slane %v1878_v48, 2  ;;  %v6066_v16 = vsel %vm2300_vm2, %v2322_v0, %v2324_v29  ;;  %v6093_v48 = vld [vmem:[%s5644_s25 + $0x88] sm:$0xff]   ;;  %v1498_v0 = vsel %vm1028_vm1, %v1495_v7, %v1497_v19 }
  0x87   : > { %v1846_v47 = vsel %vm1829_vm3, %v1837_v31, %v1845_v50  ;;  %v1855_v39 = vsel %vm1829_vm3, %v1845_v50, %v1854_v59  ;;  %v1864_v17 = vsel %vm1829_vm3, %v1854_v59, %v1863_v25  ;;  %v1889_v44 = vrot.slane %v1887_v56, 2 }
  0x88   : > { %v6024_v41 = vsel %vm2300_vm2, %v2314_v21, %v2316_v1  ;;  %v6031_v5 = vsel %vm2300_vm2, %v2316_v1, %v2318_v42  ;;  %v1886_v21 = vrot.slane %v1884_v55, 1  ;;  %v6076_v50 = vsel %vm2300_vm2, %v2324_v29, %v2326_v18  ;;  %v6086_v42 = vld [vmem:[%s5644_s25 + $0x80] sm:$0xff]  }
  0x89   : > { %v2328_v1 = vrot.slane %v6063_v35, 2  ;;  %v2330_v43 = vrot.slane %v6086_v42, 2  ;;  %v1873_v55 = vsel %vm1829_vm3, %v1863_v25, %v1872_v53  ;;  %v1914_v56 = vshll.u32 %v6012_v32, 16 }
  0x8a   : > { %v2332_v59 = vrot.slane %v6093_v48, 2  ;;  %v1890_v25 = vor.u32 %v1889_v44, %v1886_v21  ;;  %v7119_v29 = vrot.slane %v5984_v46, 1  ;;  %v6143_v21 = vld [vmem:[%s5644_s25 + $0x98] ss:$0 sps:$4 sm:$0x33]  }
  0x8b   : > { %v6089_v45 = vsel %vm2300_vm2, %v2326_v18, %v2328_v1  ;;  %v6116_v27 = vsel %vm2300_vm2, %v2328_v1, %v2330_v43  ;;  %v1923_v18 = vshll.u32 %v6021_v38, 16  ;;  %v2618_v1 = vld [vmem:[%s5644_s25 + $0x14] sm:$0xf] }
  0x8d   : > { %5020 = vmatmul.mubr.bf16.gmra.mxu1 %v5759_v23  ;;  %5076 = vmatmul.mubr.bf16.gmra.mxu0 %v5843_v51  ;;  %v1893_v23 = vshrl.u32 %v5984_v46, 16  ;;  %v1896_v51 = vshll.u32 %v5984_v46, 16 }
  0x8e   : > { %5023 = vmatprep.mubr.bf16.mxu1 %v5778_v40  ;;  %5147 = vmatprep.mubr.bf16.mxu0 %v1846_v47  ;;  %v5501_v40 = vld [vmem:[%s7116_s1 + $0x1b0] sm:$0xff]   ;;  %v1881_v47 = vor.u32 %v1880_v15, %v1877_v62  ;;  %v1916_v15 = vrot.slane %v1914_v56, 2 }
  0x8f   : > { %v1895_v13 = vrot.slane %v1893_v23, 1  ;;  %v1898_v31 = vrot.slane %v1896_v51, 2  ;;  %v1501_v23 = vrot.slane %v5970_v3, 1  ;;  %v1503_v51 = vrot.slane %v5976_v8, 1  ;;  %v5511_v8 = vld [vmem:[%s7116_s1 + $0x1a0] sm:$0xff]  }
  0x90   : > { %v1882_v57 = vsel %vm1829_vm3, %v1872_v53, %v1881_v47  ;;  %v1904_v3 = vrot.slane %v1902_v34, 1  ;;  %v1891_v44 = vsel %vm1829_vm3, %v1881_v47, %v1890_v25 }
  0x91   : > { %v6123_v30 = vor.u32 %v1898_v31, %v1895_v13  ;;  %v1502_v13 = vsel %vm1028_vm1, %v1499_v37, %v1501_v23  ;;  %v6150_v14 = vsel %vm1028_vm1, %v1501_v23, %v1503_v51  ;;  %v2617_v31 = vld [vmem:[%s5644_s25 + $0x10] sm:$0xc] }
  0x92   : > { %v6171_v56 = vcombine.low %v2617_v31, %v2618_v1 }
  0x93   : > { %v1900_v53 = vsel %vm1829_vm3, %v1890_v25, %v6123_v30  ;;  %v1941_v25 = vshll.u32 %v6046_v61, 16 }
  0x95   : > { %5024 = vmatmul.mubr.bf16.gmra.mxu1 %v5790_v52  ;;  %5148 = vmatmul.mubr.bf16.vlgmr.msra.gmra.mxu0 %v1855_v39  ;;  %v1905_v52 = vshll.u32 %v6000_v20, 16  ;;  %v1920_v39 = vshrl.u32 %v6021_v38, 16 }
  0x96   : > { %5095 = vmatprep.mubr.bf16.mxu1 %v1494_v60  ;;  %5236 = vmatpush3.bf16.msra.mxu0 %v5914_v24  ;;  %v1911_v24 = vshrl.u32 %v6012_v32, 16  ;;  %v1500_v60 = vsel %vm1028_vm1, %v1497_v19, %v1499_v37  ;;  %v6155_v19 = vsel %vm1028_vm1, %v1503_v51, %v7119_v29  ;;  %v1932_v51 = vshll.u32 %v6035_v54, 16 }
  0x97   : > { %5151 = vmatprep.mubr.bf16.mxu0 %v1864_v17  ;;  %5237 = vmatprep.subr.bf16.mxu0 %v5501_v40  ;;  %v1907_v7 = vrot.slane %v1905_v52, 2  ;;  %v6140_v17 = vld [vmem:[%s5644_s25 + $0x90] sm:$0xff]   ;;  %v1925_v52 = vrot.slane %v1923_v18, 2 }
  0x98   : > { %v1913_v62 = vrot.slane %v1911_v24, 1  ;;  %v2334_v37 = vrot.slane %v6140_v17, 2  ;;  %v2336_v24 = vrot.slane %v6143_v21, 2  ;;  %v5519_v18 = vld [vmem:[%s7116_s1 + $0x190] sm:$0xff]  }
  0x99   : > { %v1908_v34 = vor.u32 %v1907_v7, %v1904_v3  ;;  %v5515_v3 = vld [vmem:[%s7116_s1 + $0x198] sm:$0xff]   ;;  %v6186_v7 = vld [vmem:[%s5644_s25 + $0x20] sm:$0xff]  }
  0x9a   : > { %5238 = vmatpush3.bf16.msra.mxu0 %v5501_v40  ;;  %v6121_v40 = vsel %vm2300_vm2, %v2330_v43, %v2332_v59  ;;  %v6163_v47 = vor.u32 %v1916_v15, %v1913_v62  ;;  %v3551_v43 = vld [vmem:[%s5644_s25 + $0x10] sm:$0x8]  ;;  %v6189_v62 = vsel %vm2300_vm2, %v2334_v37, %v2336_v24  ;;  %v3103_v15 = vshrl.u32 %v6171_v56, 16 }
  0x9b   : > { %5239 = vmatprep.subr.bf16.mxu0 %v5506_v36  ;;  %v4498_v23 = vcombine.low %v3551_v43, %v2618_v1  ;;  %7129 = vst [vmem:[#allocation3_spill] sm:$0xff] %v6189_v62  ;;  %v3576_v31 = vrot.slane %v6186_v7, 3  ;;  %v3120_v24 = vshrl.u32 %v6186_v7, 16  ;;  %v1909_v63 = vsel %vm1829_vm3, %v6123_v30, %v1908_v34 }
  0x9c   : > { %v1943_v62 = vrot.slane %v1941_v25, 2 }
  0x9d   : > { %5096 = vmatmul.mubr.bf16.vlgmr.msra.gmra.mxu1 %v1496_v49  ;;  %5152 = vmatmul.mubr.bf16.gmra.mxu0 %v1873_v55  ;;  %v5508_v49 = vld [vmem:[%s7116_s1 + $0x160] sm:$0xff]   ;;  %v1929_v55 = vshrl.u32 %v6035_v54, 16 }
  0x9e   : > { %5184 = vmatpush3.bf16.msra.mxu1 %v5932_v33  ;;  %5099 = vmatprep.mubr.bf16.mxu1 %v1498_v0  ;;  %v5504_v33 = vld [vmem:[%s7116_s1 + $0x168] sm:$0xff]   ;;  %v6174_v0 = vld [vmem:[%s5644_s25 + $0x18] sm:$0xff]  }
  0x9f   : > { %5185 = vmatprep.subr.bf16.mxu1 %v5500_v22  ;;  %5155 = vmatprep.mubr.bf16.mxu0 %v1882_v57  ;;  %v1938_v57 = vshrl.u32 %v6046_v61, 16  ;;  %v3111_v1 = vshrl.u32 %v6174_v0, 16 }
  0xa0   : > { %5240 = vmatpush3.bf16.msra.mxu0 %v5506_v36  ;;  %v1922_v36 = vrot.slane %v1920_v39, 1  ;;  %v3106_v39 = vshll.u32 %v6171_v56, 16 }
  0xa1   : > { %5241 = vmatprep.subr.bf16.mxu0 %v5511_v8  ;;  %v1940_v30 = vrot.slane %v1938_v57, 1 }
  0xa2   : > { %5186 = vmatpush3.bf16.msra.mxu1 %v5500_v22  ;;  %v6177_v22 = vsel %vm2300_vm2, %v2332_v59, %v2334_v37  ;;  %v3573_v59 = vrot.slane %v4498_v23, 3  ;;  %v3108_v37 = vrot.slane %v3106_v39, 3  ;;  %v3113_v23 = vrot.slane %v3111_v1, 2 }
  0xa3   : > { %5187 = vmatprep.subr.bf16.mxu1 %v5504_v33  ;;  %7128 = vst [vmem:[#allocation2_spill] sm:$0xff] %v6177_v22  ;;  %v1926_v39 = vor.u32 %v1925_v52, %v1922_v36  ;;  %v1918_v1 = vsel %vm1829_vm3, %v1908_v34, %v6163_v47  ;;  %v6217_v22 = vld [vmem:[%s5644_s25 + $0x28] sm:$0xff]   ;;  %v5518_v36 = vld [vmem:[%s7116_s1 + $0x150] sm:$0xff]  }
  0xa4   : > { %5242 = vmatpush3.bf16.msra.mxu0 %v5511_v8  ;;  %v3574_v8 = vrot.slane %v6174_v0, 3  ;;  %v6227_v52 = vld [vmem:[%s5644_s25 + $0x30] sm:$0xff]   ;;  %v3129_v57 = vshrl.u32 %v6217_v22, 16  ;;  %v3132_v25 = vshll.u32 %v6217_v22, 16 }
  0xa5   : > { %5100 = vmatmul.mubr.bf16.gmra.mxu1 %v1500_v60  ;;  %5156 = vmatmul.mubr.bf16.gmra.mxu0 %v1891_v44  ;;  %v3114_v60 = vshll.u32 %v6174_v0, 16  ;;  %v5513_v44 = vld [vmem:[%s7116_s1 + $0x158] sm:$0xff]  }
  0xa6   : > { %5103 = vmatprep.mubr.bf16.mxu1 %v1502_v13  ;;  %5188 = vmatpush3.bf16.msra.mxu1 %v5504_v33  ;;  %v6204_v13 = vsel %vm3572_vm4, %v3573_v59, %v3574_v8  ;;  %v3105_v33 = vrot.slane %v3103_v15, 2  ;;  %v6208_v43 = vsel %vm3572_vm4, %v3574_v8, %v3576_v31  ;;  %v3122_v15 = vrot.slane %v3120_v24, 2 }
  0xa7   : > { %5159 = vmatprep.mubr.bf16.mxu0 %v1900_v53  ;;  %5189 = vmatprep.subr.bf16.mxu1 %v5508_v49  ;;  %7130 = vst [vmem:[#allocation4_spill] sm:$0xff] %v6204_v13  ;;  %7131 = vst [vmem:[#allocation5_spill] sm:$0xff] %v6208_v43  ;;  %v3116_v29 = vrot.slane %v3114_v60, 3  ;;  %v3123_v53 = vshll.u32 %v6186_v7, 16  ;;  %v1931_v60 = vrot.slane %v1929_v55, 1  ;;  %v1934_v13 = vrot.slane %v1932_v51, 2 }
  0xa8   : > { %5243 = vmatprep.subr.bf16.mxu0 %v5515_v3  ;;  %v3109_v59 = vor.u32 %v3108_v37, %v3105_v33  ;;  %v1950_v55 = vshll.u32 %v6052_v2, 16  ;;  %v3578_v51 = vrot.slane %v6217_v22, 3  ;;  %v3580_v37 = vrot.slane %v6227_v52, 3 }
  0xa9   : > { %5244 = vmatpush3.bf16.msra.mxu0 %v5515_v3  ;;  %v3117_v8 = vor.u32 %v3116_v29, %v3113_v23  ;;  %v3125_v43 = vrot.slane %v3123_v53, 3  ;;  %v1947_v3 = vshrl.u32 %v6052_v2, 16  ;;  %v5523_v29 = vld [vmem:[%s7116_s1 + $0x188] sm:$0xff]   ;;  %v3138_v24 = vshrl.u32 %v6227_v52, 16 }
  0xaa   : > { %5190 = vmatpush3.bf16.msra.mxu1 %v5508_v49  ;;  %5245 = vmatprep.subr.bf16.mxu0 %v5519_v18  ;;  %v3131_v23 = vrot.slane %v3129_v57, 2  ;;  %v3134_v53 = vrot.slane %v3132_v25, 3 }
  0xab   : > { %5191 = vmatprep.subr.bf16.mxu1 %v5513_v44  ;;  %v6230_v34 = vsel %vm3101_vm5, %v3109_v59, %v3117_v8  ;;  %v3126_v49 = vor.u32 %v3125_v43, %v3122_v15  ;;  %v6247_v43 = vsel %vm3572_vm4, %v3576_v31, %v3578_v51  ;;  %v5522_v59 = vld [vmem:[%s7116_s1 + $0x148] sm:$0xff]   ;;  %v7135_v15 = vrot.slane %v6000_v20, 1  ;;  %v6277_v20 = vld [vmem:[%s5644_s25 + $0x38] sm:$0xff]  }
  0xac   : > { %7133 = vst [vmem:[#allocation7_spill] sm:$0xff] %v6247_v43  ;;  %v3135_v43 = vor.u32 %v3134_v53, %v3131_v23  ;;  %v1944_v23 = vor.u32 %v1943_v62, %v1940_v30  ;;  %v1968_v62 = vshll.u32 %v6086_v42, 16  ;;  %v3582_v30 = vrot.slane %v6277_v20, 3 }
  0xad   : > { %5104 = vmatmul.mubr.bf16.gmra.mxu1 %v6150_v14  ;;  %5160 = vmatmul.mubr.bf16.gmra.mxu0 %v1909_v63  ;;  %v6239_v33 = vsel %vm3101_vm5, %v3117_v8, %v3126_v49  ;;  %v3141_v14 = vshll.u32 %v6227_v52, 16  ;;  %v6244_v63 = vor.u32 %v1934_v13, %v1931_v60  ;;  %v5528_v13 = vld [vmem:[%s7116_s1 + $0x180] sm:$0xff]   ;;  %v7136_v8 = vrot.slane %v5984_v46, 1 }
  0xae   : > { %5107 = vmatprep.mubr.bf16.mxu1 %v6155_v19  ;;  %5163 = vmatprep.mubr.bf16.mxu0 %v1918_v1  ;;  %7132 = vst [vmem:[#allocation6_spill] sm:$0xff] %v6239_v33  ;;  %v1956_v19 = vshrl.u32 %v6063_v35, 16  ;;  %v7137_v60 = vrot.slane %v6012_v32, 1  ;;  %v7138_v57 = vmov %v7135_v15  ;;  %v1511_v33 = vrot.slane %v6021_v38, 1 }
  0xaf   : > { %5192 = vmatpush3.bf16.msra.mxu1 %v5513_v44  ;;  %5246 = vmatpush3.bf16.msra.mxu0 %v5519_v18  ;;  %v6257_v44 = vsel %vm3572_vm4, %v3578_v51, %v3580_v37  ;;  %v3140_v18 = vrot.slane %v3138_v24, 2  ;;  %v3143_v31 = vrot.slane %v3141_v14, 3  ;;  %v1508_v1 = vsel %vm1028_vm1, %v7136_v8, %v7135_v15 }
  0xb0   : > { %5193 = vmatprep.subr.bf16.mxu1 %v5518_v36  ;;  %5247 = vmatprep.subr.bf16.mxu0 %v5523_v29  ;;  %7134 = vst [vmem:[#allocation8_spill] sm:$0xff] %v6257_v44  ;;  %v1510_v25 = vsel %vm1028_vm1, %v7138_v57, %v7137_v60  ;;  %v1927_v51 = vsel %vm1829_vm3, %v6163_v47, %v1926_v39  ;;  %v1949_v24 = vrot.slane %v1947_v3, 1  ;;  %v1952_v14 = vrot.slane %v1950_v55, 2 }
  0xb1   : > { %v3144_v44 = vor.u32 %v3143_v31, %v3140_v18  ;;  %v1936_v46 = vsel %vm1829_vm3, %v1926_v39, %v6244_v63  ;;  %v1959_v8 = vshll.u32 %v6063_v35, 16  ;;  %v6280_v38 = vsel %vm3101_vm5, %v3126_v49, %v3135_v43  ;;  %v5526_v39 = vld [vmem:[%s7116_s1 + $0x140] sm:$0xff]  }
  0xb2   : > { %7139 = vst [vmem:[#allocation9_spill] sm:$0xff] %v6280_v38  ;;  %v1958_v47 = vrot.slane %v1956_v19, 1  ;;  %v1965_v3 = vshrl.u32 %v6086_v42, 16  ;;  %v3147_v55 = vshrl.u32 %v6277_v20, 16  ;;  %v3150_v53 = vshll.u32 %v6277_v20, 16 }
  0xb3   : > { %5194 = vmatpush3.bf16.msra.mxu1 %v5518_v36  ;;  %5248 = vmatpush3.bf16.msra.mxu0 %v5523_v29  ;;  %v6289_v36 = vld [vmem:[%s7116_s1 + $0x238] sm:$0xff]   ;;  %v6292_v29 = vld [vmem:[%s5644_s25 + $0x40] sm:$0xff]   ;;  %v6295_v49 = vsel %vm3101_vm5, %v3135_v43, %v3144_v44  ;;  %v1953_v19 = vor.u32 %v1952_v14, %v1949_v24  ;;  %v1961_v60 = vrot.slane %v1959_v8, 2  ;;  %v1974_v15 = vshrl.u32 %v6093_v48, 16 }
  0xb4   : > { %5195 = vmatprep.subr.bf16.mxu1 %v5522_v59  ;;  %5249 = vmatprep.subr.bf16.mxu0 %v5528_v13  ;;  %7140 = vst [vmem:[#allocation10_spill] sm:$0xff] %v6295_v49  ;;  %v3584_v18 = vrot.slane %v6292_v29, 3  ;;  %v3156_v31 = vshrl.u32 %v6292_v29, 16  ;;  %v3159_v43 = vshll.u32 %v6292_v29, 16  ;;  %v3149_v57 = vrot.slane %v3147_v55, 2 }
  0xb5   : > { %5108 = vmatmul.mubr.bf16.gmra.mxu1 %v1508_v1  ;;  %5164 = vmatmul.mubr.bf16.gmra.mxu0 %v1927_v51  ;;  %v6305_v1 = vsel %vm3572_vm4, %v3580_v37, %v3582_v30  ;;  %v3152_v51 = vrot.slane %v3150_v53, 3  ;;  %v1967_v37 = vrot.slane %v1965_v3, 1  ;;  %v1970_v14 = vrot.slane %v1968_v62, 2  ;;  %v6329_v62 = vld [vmem:[%s5644_s25 + $0x48] sm:$0xff]  }
  0xb6   : > { %5111 = vmatprep.mubr.bf16.mxu1 %v1510_v25  ;;  %5167 = vmatprep.mubr.bf16.mxu0 %v1936_v46  ;;  %7141 = vst [vmem:[#allocation11_spill] sm:$0xff] %v6305_v1  ;;  %v6311_v25 = vld [vmem:[%s7116_s1 + $0x1f8] sm:$0xff]   ;;  %v6315_v24 = vsel %vm3572_vm4, %v3582_v30, %v3584_v18  ;;  %v7142_v8 = vrot.slane %v6012_v32, 1  ;;  %v1945_v53 = vsel %vm1829_vm3, %v6244_v63, %v1944_v23  ;;  %v1515_v49 = vrot.slane %v6046_v61, 1  ;;  %v6337_v61 = vld [vmem:[%s5644_s25 + $0x50] sm:$0xff]  }
  0xb7   : > { %5196 = vmatpush3.bf16.msra.mxu1 %v5522_v59  ;;  %5250 = vmatpush3.bf16.msra.mxu0 %v5528_v13  ;;  %v3158_v59 = vrot.slane %v3156_v31, 2  ;;  %v3161_v13 = vrot.slane %v3159_v43, 3  ;;  %v3153_v46 = vor.u32 %v3152_v51, %v3149_v57  ;;  %v7143_v38 = vrot.slane %v6035_v54, 1 }
  0xb8   : > { %5197 = vmatprep.subr.bf16.mxu1 %v5526_v39  ;;  %5339 = vmatprep.subr.bf16.mxu0 %v6289_v36  ;;  %v1512_v55 = vsel %vm1028_vm1, %v7142_v8, %v1511_v33  ;;  %v1954_v31 = vsel %vm1829_vm3, %v1944_v23, %v1953_v19  ;;  %v1962_v43 = vor.u32 %v1961_v60, %v1958_v47  ;;  %v1976_v57 = vrot.slane %v1974_v15, 1 }
  0xb9   : > { %v3162_v1 = vor.u32 %v3161_v13, %v3158_v59  ;;  %v1514_v30 = vsel %vm1028_vm1, %v1511_v33, %v7143_v38  ;;  %v6332_v32 = vsel %vm3101_vm5, %v3144_v44, %v3153_v46  ;;  %v1977_v63 = vshll.u32 %v6093_v48, 16 }
  0xba   : > { %7144 = vst [vmem:[#allocation12_spill] sm:$0xff] %v6332_v32  ;;  %v1971_v38 = vor.u32 %v1970_v14, %v1967_v37  ;;  %v3586_v23 = vrot.slane %v6329_v62, 3  ;;  %v3168_v44 = vshll.u32 %v6329_v62, 16  ;;  %v1983_v15 = vshrl.u32 %v6140_v17, 16 }
  0xbb   : > { %5198 = vmatpush3.bf16.msra.mxu1 %v5526_v39  ;;  %v6340_v33 = vsel %vm3101_vm5, %v3153_v46, %v3162_v1  ;;  %v3165_v39 = vshrl.u32 %v6329_v62, 16  ;;  %v3588_v47 = vrot.slane %v6337_v61, 3  ;;  %v3174_v60 = vshrl.u32 %v6337_v61, 16 }
  0xbc   : > { %5287 = vmatprep.subr.bf16.mxu1 %v6311_v25  ;;  %7145 = vst [vmem:[#allocation13_spill] sm:$0xff] %v6340_v33  ;;  %v3177_v51 = vshll.u32 %v6337_v61, 16  ;;  %v1986_v59 = vshll.u32 %v6140_v17, 16  ;;  %v6351_v13 = vsel %vm3572_vm4, %v3584_v18, %v3586_v23  ;;  %v3170_v14 = vrot.slane %v3168_v44, 3 }
  0xbd   : > { %5112 = vmatmul.mubr.bf16.gmra.mxu1 %v1512_v55  ;;  %5168 = vmatmul.mubr.bf16.gmra.mxu0 %v1945_v53  ;;  %v3167_v37 = vrot.slane %v3165_v39, 2  ;;  %v1979_v46 = vrot.slane %v1977_v63, 2  ;;  %v6354_v8 = vsel %vm3572_vm4, %v3586_v23, %v3588_v47  ;;  %v3176_v55 = vrot.slane %v3174_v60, 2 }
  0xbe   : > { %5115 = vmatprep.mubr.bf16.mxu1 %v1514_v30  ;;  %5171 = vmatprep.mubr.bf16.mxu0 %v1954_v31  ;;  %7146 = vst [vmem:[#allocation14_spill] sm:$0xff] %v6354_v8  ;;  %v3179_v53 = vrot.slane %v3177_v51, 3  ;;  %v7147_v31 = vrot.slane %v6035_v54, 1  ;;  %v1963_v33 = vsel %vm1829_vm3, %v1953_v19, %v1962_v43  ;;  %v7148_v32 = vrot.slane %v6052_v2, 1  ;;  %v6365_v8 = vld [vmem:[%s5644_s25 + $0x58] sm:$0xff]   ;;  %v6373_v19 = vld [vmem:[%s5644_s25 + $0x60] sm:$0xff]  }
  0xbf   : > { %v3171_v30 = vor.u32 %v3170_v14, %v3167_v37  ;;  %v1972_v63 = vsel %vm1829_vm3, %v1962_v43, %v1971_v38  ;;  %v1985_v44 = vrot.slane %v1983_v15, 1  ;;  %v1988_v23 = vrot.slane %v1986_v59, 2 }
  0xc0   : > { %v1516_v3 = vsel %vm1028_vm1, %v7147_v31, %v1515_v49  ;;  %v1518_v18 = vsel %vm1028_vm1, %v1515_v49, %v7148_v32  ;;  %v3180_v39 = vor.u32 %v3179_v53, %v3176_v55  ;;  %v1519_v54 = vrot.slane %v6063_v35, 1 }
  0xc1   : > { %v6368_v60 = vsel %vm3101_vm5, %v3162_v1, %v3171_v30  ;;  %v1980_v51 = vor.u32 %v1979_v46, %v1976_v57  ;;  %v1521_v37 = vrot.slane %v6086_v42, 1  ;;  %v1992_v49 = vshrl.u32 %v6143_v21, 16 }
  0xc2   : > { %v6376_v14 = vsel %vm3101_vm5, %v3171_v30, %v3180_v39  ;;  %v3590_v32 = vrot.slane %v6365_v8, 3  ;;  %v3183_v43 = vshrl.u32 %v6365_v8, 16  ;;  %v3186_v1 = vshll.u32 %v6365_v8, 16 }
  0xc3   : > { %7149 = vst [vmem:[#allocation15_spill] sm:$0xff] %v6376_v14  ;;  %v1995_v35 = vshll.u32 %v6143_v21, 16  ;;  %v3592_v42 = vrot.slane %v6373_v19, 3  ;;  %v3192_v57 = vshrl.u32 %v6373_v19, 16  ;;  %v3195_v15 = vshll.u32 %v6373_v19, 16 }
  0xc4   : > { %v3185_v59 = vrot.slane %v3183_v43, 2  ;;  %v3188_v46 = vrot.slane %v3186_v1, 3  ;;  %v7150_v21 = vrot.slane %v6052_v2, 1  ;;  %v1994_v14 = vrot.slane %v1992_v49, 1  ;;  %v6399_v1 = vld [vmem:[%s5644_s25 + $0x68] sm:$0xff]  }
  0xc5   : > { %5116 = vmatmul.mubr.bf16.gmra.mxu1 %v1516_v3  ;;  %5172 = vmatmul.mubr.bf16.gmra.mxu0 %v1963_v33  ;;  %v1989_v3 = vor.u32 %v1988_v23, %v1985_v44  ;;  %v6387_v33 = vsel %vm3572_vm4, %v3588_v47, %v3590_v32  ;;  %v6390_v55 = vsel %vm3572_vm4, %v3590_v32, %v3592_v42  ;;  %v3194_v53 = vrot.slane %v3192_v57, 2 }
  0xc6   : > { %5119 = vmatprep.mubr.bf16.mxu1 %v1518_v18  ;;  %5175 = vmatprep.mubr.bf16.mxu0 %v1972_v63  ;;  %v3197_v30 = vrot.slane %v3195_v15, 3  ;;  %v1520_v31 = vsel %vm1028_vm1, %v7150_v21, %v1519_v54  ;;  %v3189_v18 = vor.u32 %v3188_v46, %v3185_v59  ;;  %v1981_v63 = vsel %vm1829_vm3, %v1971_v38, %v1980_v51  ;;  %v6407_v15 = vld [vmem:[%s5644_s25 + $0x70] sm:$0xff]  }
  0xc7   : > { %v1997_v44 = vrot.slane %v1995_v35, 2  ;;  %v1522_v47 = vsel %vm1028_vm1, %v1519_v54, %v1521_v37  ;;  %v1990_v43 = vsel %vm1829_vm3, %v1980_v51, %v1989_v3  ;;  %v1523_v57 = vrot.slane %v6093_v48, 1 }
  0xc8   : > { %v3198_v23 = vor.u32 %v3197_v30, %v3194_v53  ;;  %v6402_v32 = vsel %vm3101_vm5, %v3180_v39, %v3189_v18  ;;  %v1525_v2 = vrot.slane %v6140_v17, 1  ;;  %v2765_v54 = vrot.slane %v6174_v0, 2 }
  0xc9   : > { %v3594_v51 = vrot.slane %v6399_v1, 3  ;;  %v3201_v49 = vshrl.u32 %v6399_v1, 16  ;;  %v3204_v39 = vshll.u32 %v6399_v1, 16  ;;  %v1998_v48 = vor.u32 %v1997_v44, %v1994_v14 }
  0xca   : > { %v6410_v38 = vsel %vm3101_vm5, %v3189_v18, %v3198_v23  ;;  %v7120_v17 = vrot.slane %v6407_v15, 3  ;;  %v3210_v35 = vshrl.u32 %v6407_v15, 16  ;;  %v3213_v59 = vshll.u32 %v6407_v15, 16 }
  0xcb   : > { %v2764_v46 = vrot.slane %v6171_v56, 2  ;;  %v6421_v0 = vsel %vm3572_vm4, %v3592_v42, %v3594_v51  ;;  %v3203_v53 = vrot.slane %v3201_v49, 2  ;;  %v3206_v30 = vrot.slane %v3204_v39, 3 }
  0xcc   : > { %v6426_v21 = vsel %vm3572_vm4, %v3594_v51, %v7120_v17  ;;  %v3215_v14 = vrot.slane %v3213_v59, 3  ;;  %v1999_v44 = vsel %vm1829_vm3, %v1989_v3, %v1998_v48  ;;  %v1526_v56 = vsel %vm1028_vm1, %v1523_v57, %v1525_v2  ;;  %v5537_v59 = vld [vmem:[%s7116_s1 + $0x1f0] sm:$0xff]  }
  0xcd   : > { %5120 = vmatmul.mubr.bf16.gmra.mxu1 %v1520_v31  ;;  %5176 = vmatmul.mubr.bf16.gmra.mxu0 %v1981_v63  ;;  %v3212_v31 = vrot.slane %v3210_v35, 2  ;;  %v3207_v18 = vor.u32 %v3206_v30, %v3203_v53  ;;  %v1524_v63 = vsel %vm1028_vm1, %v1521_v37, %v1523_v57  ;;  %v2766_v42 = vsel %vm2300_vm2, %v2764_v46, %v2765_v54 }
  0xce   : > { %5123 = vmatprep.mubr.bf16.mxu1 %v1522_v47  ;;  %5179 = vmatprep.mubr.bf16.mxu0 %v1990_v43  ;;  %v5527_v47 = vld [vmem:[%s5644_s25 + $0x98] ss:$0 sps:$4 sm:$0x11]   ;;  %v2767_v3 = vrot.slane %v6186_v7, 2  ;;  %v2769_v39 = vrot.slane %v6217_v22, 2  ;;  %v2771_v7 = vrot.slane %v6227_v52, 2 }
  0xcf   : > { %v6431_v43 = vor.u32 %v3215_v14, %v3212_v31  ;;  %v6436_v49 = vsel %vm3101_vm5, %v3198_v23, %v3207_v18  ;;  %v1527_v37 = vrot.slane %v5527_v47, 1  ;;  %v5538_v23 = vld [vmem:[%s7116_s1 + $0x230] sm:$0xff]   ;;  %v5543_v22 = vld [vmem:[%s7116_s1 + $0x228] sm:$0xff]   ;;  %v5548_v52 = vld [vmem:[%s7116_s1 + $0x220] sm:$0xff]   ;;  %v2777_v46 = vrot.slane %v6329_v62, 2 }
  0xd0   : > { %7152 = vst [vmem:[#allocation17_spill] sm:$0xff] %v6436_v49  ;;  %v2768_v48 = vsel %vm2300_vm2, %v2765_v54, %v2767_v3  ;;  %v2770_v35 = vsel %vm2300_vm2, %v2767_v3, %v2769_v39  ;;  %v2772_v54 = vsel %vm2300_vm2, %v2769_v39, %v2771_v7  ;;  %v2779_v30 = vrot.slane %v6337_v61, 2  ;;  %v5556_v31 = vld [vmem:[%s7116_s1 + $0x210] sm:$0xff]  }
  0xd1   : > { %7151 = vst [vmem:[#allocation16_spill] sm:$0xff] %v6431_v43  ;;  %v6440_v51 = vsel %vm3101_vm5, %v3207_v18, %v6431_v43  ;;  %v1528_v57 = vsel %vm1028_vm1, %v1525_v2, %v1527_v37  ;;  %v2773_v2 = vrot.slane %v6277_v20, 2  ;;  %v2775_v20 = vrot.slane %v6292_v29, 2  ;;  %v5560_v37 = vld [vmem:[%s7116_s1 + $0x208] sm:$0xff]  }
  0xd2   : > { %7153 = vst [vmem:[#allocation18_spill] sm:$0xff] %v6440_v51 }
  0xd3   : > { %v2778_v29 = vsel %vm2300_vm2, %v2775_v20, %v2777_v46 }
  0xd5   : > { %5124 = vmatmul.mubr.bf16.gmra.mxu1 %v1524_v63  ;;  %5180 = vmatmul.mubr.bf16.gmra.mxu0 %v1999_v44  ;;  %v5550_v63 = vld [vmem:[%s7116_s1 + $0x1d8] sm:$0xff]   ;;  %v2780_v44 = vsel %vm2300_vm2, %v2777_v46, %v2779_v30 }
  0xd6   : > { %5127 = vmatprep.mubr.bf16.mxu1 %v1526_v56  ;;  %5251 = vmatprep.mubr.bf16.mxu0 %v2766_v42  ;;  %v5555_v42 = vld [vmem:[%s7116_s1 + $0x1d0] sm:$0xff]  }
  0xdd   : > { %5128 = vmatmul.mubr.bf16.gmra.mxu1 %v1528_v57  ;;  %5252 = vmatmul.mubr.bf16.vlgmr.msra.gmra.mxu0 %v2768_v48  ;;  %v2783_v57 = vrot.slane %v6373_v19, 2 }
  0xde   : > { %5199 = vmatprep.mubr.bf16.mxu1 %v5979_v9  ;;  %5340 = vmatpush3.bf16.msra.mxu0 %v6289_v36  ;;  %v2774_v9 = vsel %vm2300_vm2, %v2771_v7, %v2773_v2  ;;  %v5541_v36 = vld [vmem:[%s7116_s1 + $0x1e8] sm:$0xff]  }
  0xdf   : > { %5255 = vmatprep.mubr.bf16.mxu0 %v2770_v35  ;;  %5341 = vmatprep.subr.bf16.mxu0 %v5538_v23  ;;  %v2785_v35 = vrot.slane %v6399_v1, 2 }
  0xe2   : > { %5342 = vmatpush3.bf16.msra.mxu0 %v5538_v23 }
  0xe3   : > { %5343 = vmatprep.subr.bf16.mxu0 %v5543_v22 }
  0xe5   : > { %5200 = vmatmul.mubr.bf16.vlgmr.msra.gmra.mxu1 %v5941_v11  ;;  %5256 = vmatmul.mubr.bf16.gmra.mxu0 %v2772_v54  ;;  %v2776_v11 = vsel %vm2300_vm2, %v2773_v2, %v2775_v20  ;;  %v2786_v54 = vsel %vm2300_vm2, %v2783_v57, %v2785_v35 }
  0xe6   : > { %5288 = vmatpush3.bf16.msra.mxu1 %v6311_v25  ;;  %5203 = vmatprep.mubr.bf16.mxu1 %v5987_v10  ;;  %v5545_v10 = vld [vmem:[%s7116_s1 + $0x1e0] sm:$0xff]   ;;  %v5552_v25 = vld [vmem:[%s7116_s1 + $0x218] sm:$0xff]  }
  0xe7   : > { %5289 = vmatprep.subr.bf16.mxu1 %v5537_v59  ;;  %5259 = vmatprep.mubr.bf16.mxu0 %v2774_v9  ;;  %v5563_v9 = vld [vmem:[%s7116_s1 + $0x1c0] sm:$0xff]  }
  0xe8   : > { %5344 = vmatpush3.bf16.msra.mxu0 %v5543_v22 }
  0xe9   : > { %5345 = vmatprep.subr.bf16.mxu0 %v5548_v52 }
  0xea   : > { %5290 = vmatpush3.bf16.msra.mxu1 %v5537_v59  ;;  %v6544_v59 = vld [vmem:[%s5644_s25 + $0x78] sm:$0xff]  }
  0xeb   : > { %5291 = vmatprep.subr.bf16.mxu1 %v5541_v36 }
  0xec   : > { %5346 = vmatpush3.bf16.msra.mxu0 %v5548_v52 }
  0xed   : > { %v6481_v53 = vpop.f32.mrf.mxu1  ;;  %5204 = vmatmul.mubr.bf16.gmra.mxu1 %v5990_v12  ;;  %v6484_v62 = vpop.f32.mrf.mxu0  ;;  %5260 = vmatmul.mubr.bf16.gmra.mxu0 %v2776_v11  ;;  %v2781_v12 = vrot.slane %v6365_v8, 2 }
  0xee   : > { %5207 = vmatprep.mubr.bf16.mxu1 %v6006_v26  ;;  %5292 = vmatpush3.bf16.msra.mxu1 %v5541_v36  ;;  %v2787_v36 = vrot.slane %v6407_v15, 2 }
  0xef   : > { %v6491_v14 = vpop.f32.mrf.mxu1  ;;  %v6493_v18 = vpop.f32.mrf.mxu0  ;;  %5263 = vmatprep.mubr.bf16.mxu0 %v2778_v29  ;;  %5293 = vmatprep.subr.bf16.mxu1 %v5545_v10  ;;  %v2782_v8 = vsel %vm2300_vm2, %v2779_v30, %v2781_v12  ;;  %v2784_v22 = vsel %vm2300_vm2, %v2781_v12, %v2783_v57 }
  0xf0   : > { %5347 = vmatprep.subr.bf16.mxu0 %v5552_v25 }
  0xf1   : > { %v6499_v26 = vpop.f32.mrf.mxu1  ;;  %v6501_v61 = vpop.f32.mrf.mxu0  ;;  %5348 = vmatpush3.bf16.msra.mxu0 %v5552_v25  ;;  %v2788_v25 = vsel %vm2300_vm2, %v2785_v35, %v2787_v36 }
  0xf2   : > { %5294 = vmatpush3.bf16.msra.mxu1 %v5545_v10  ;;  %5349 = vmatprep.subr.bf16.mxu0 %v5556_v31  ;;  %v2789_v10 = vrot.slane %v6544_v59, 2 }
  0xf3   : > { %v6504_v47 = vpop.f32.mrf.mxu1  ;;  %v6506_v56 = vpop.f32.mrf.mxu0  ;;  %5295 = vmatprep.subr.bf16.mxu1 %v5550_v63 }
  0xf4   : > { %v2790_v12 = vsel %vm2300_vm2, %v2787_v36, %v2789_v10  ;;  %v6603_v36 = vld [vmem:[%s5644_s25 + $0x98] sm:$0xff]  }
  0xf5   : > { %v6515_v3 = vpop.f32.mrf.mxu1  ;;  %5208 = vmatmul.mubr.bf16.gmra.mxu1 %v6009_v28  ;;  %v6518_v39 = vpop.f32.mrf.mxu0  ;;  %5264 = vmatmul.mubr.bf16.gmra.mxu0 %v2780_v44  ;;  %v5559_v28 = vld [vmem:[%s7116_s1 + $0x1c8] sm:$0xff]   ;;  %7160 = vst [vmem:[#allocation25_spill] sm:$0xff] %v6603_v36 }
  0xf6   : > { %5211 = vmatprep.mubr.bf16.mxu1 %v6015_v4  ;;  %5267 = vmatprep.mubr.bf16.mxu0 %v2782_v8  ;;  %v5564_v4 = vld [vmem:[%s7116_s1 + $0x200] sm:$0xff]  }
  0xf7   : > { %v6522_v48 = vpop.f32.mrf.mxu1  ;;  %v6524_v23 = vpop.f32.mrf.mxu0  ;;  %5296 = vmatpush3.bf16.msra.mxu1 %v5550_v63  ;;  %5350 = vmatpush3.bf16.msra.mxu0 %v5556_v31  ;;  %v6575_v63 = vld [vmem:[%s5644_s25 + $0x88] sm:$0xff]  }
  0xf8   : > { %5297 = vmatprep.subr.bf16.mxu1 %v5555_v42  ;;  %5351 = vmatprep.subr.bf16.mxu0 %v5560_v37  ;;  %7154 = vst [vmem:[#allocation19_spill] sm:$0xff] %v6575_v63  ;;  %v2793_v35 = vrot.slane %v6575_v63, 2 }
  0xf9   : > { %v6533_v19 = vpop.f32.mrf.mxu1  ;;  %v6535_v7 = vpop.f32.mrf.mxu0 }
  0xfb   : > { %v6538_v2 = vpop.f32.mrf.mxu1  ;;  %v6540_v1 = vpop.f32.mrf.mxu0  ;;  %5298 = vmatpush3.bf16.msra.mxu1 %v5555_v42  ;;  %5352 = vmatpush3.bf16.msra.mxu0 %v5560_v37 }
  0xfc   : > { %5299 = vmatprep.subr.bf16.mxu1 %v5559_v28  ;;  %5353 = vmatprep.subr.bf16.mxu0 %v5564_v4 }
  0xfd   : > { %v6549_v52 = vpop.f32.mrf.mxu1  ;;  %5212 = vmatmul.mubr.bf16.gmra.mxu1 %v6024_v41  ;;  %v6552_v20 = vpop.f32.mrf.mxu0  ;;  %5268 = vmatmul.mubr.bf16.gmra.mxu0 %v2784_v22  ;;  %v6595_v22 = vld [vmem:[%s5644_s25 + $0x90] sm:$0xff]  }
  0xfe   : > { %5215 = vmatprep.mubr.bf16.mxu1 %v6031_v5  ;;  %5271 = vmatprep.mubr.bf16.mxu0 %v2786_v54  ;;  %v6567_v5 = vld [vmem:[%s5644_s25 + $0x80] sm:$0xff]   ;;  %7158 = vst [vmem:[#allocation23_spill] sm:$0xff] %v6595_v22 }
  0xff   : > { %v6556_v46 = vpop.f32.mrf.mxu1  ;;  %v6558_v11 = vpop.f32.mrf.mxu0  ;;  %5300 = vmatpush3.bf16.msra.mxu1 %v5559_v28  ;;  %5354 = vmatpush3.bf16.msra.mxu0 %v5564_v4  ;;  %v2791_v42 = vrot.slane %v6567_v5, 2 }
 0x100   : > { %5301 = vmatprep.subr.bf16.mxu1 %v5563_v9 }
 0x101   : > { %v6561_v29 = vpop.f32.mrf.mxu1  ;;  %v6563_v41 = vpop.f32.mrf.mxu0 }
 0x103   : > { %v6569_v30 = vpop.f32.mrf.mxu1  ;;  %v6571_v31 = vpop.f32.mrf.mxu0  ;;  %5302 = vmatpush3.bf16.msra.mxu1 %v5563_v9  ;;  %v2794_v9 = vsel %vm2300_vm2, %v2791_v42, %v2793_v35 }
 0x105   : > { %v6577_v44 = vpop.f32.mrf.mxu1  ;;  %5216 = vmatmul.mubr.bf16.gmra.mxu1 %v6042_v58  ;;  %v6580_v8 = vpop.f32.mrf.mxu0  ;;  %5272 = vmatmul.mubr.bf16.gmra.mxu0 %v2788_v25  ;;  %v2792_v58 = vsel %vm2300_vm2, %v2789_v10, %v2791_v42  ;;  %v2795_v10 = vrot.slane %v6595_v22, 2 }
 0x106   : > { %7155 = vst [vmem:[#allocation20_spill] sm:$0xff] %v6577_v44  ;;  %5219 = vmatprep.mubr.bf16.mxu1 %v6055_v6  ;;  %5275 = vmatprep.mubr.bf16.mxu0 %v2790_v12 }
 0x107   : > { %v6584_v37 = vpop.f32.mrf.mxu1  ;;  %v6586_v57 = vpop.f32.mrf.mxu0 }
 0x108   : > { %7156 = vst [vmem:[#allocation21_spill] sm:$0xff] %v6584_v37 }
 0x109   : > { %v6589_v28 = vpop.f32.mrf.mxu1  ;;  %v6591_v4 = vpop.f32.mrf.mxu0 }
 0x10a   : > { %7157 = vst [vmem:[#allocation22_spill] sm:$0xff] %v6589_v28  ;;  %v2796_v28 = vsel %vm2300_vm2, %v2793_v35, %v2795_v10 }
 0x10b   : > { %v6597_v54 = vpop.f32.mrf.mxu1  ;;  %v6599_v6 = vpop.f32.mrf.mxu0 }
 0x10c   : > { %7159 = vst [vmem:[#allocation24_spill] sm:$0xff] %v6597_v54  ;;  %v2797_v54 = vrot.slane %v6603_v36, 2 }
 0x10d   : > { %v6605_v25 = vpop.f32.mrf.mxu1  ;;  %5220 = vmatmul.mubr.bf16.gmra.mxu1 %v6066_v16  ;;  %v5045_v12 = vpop.f32.mrf.mxu0  ;;  %5276 = vmatmul.mubr.bf16.gmra.mxu0 %v2792_v58 }
 0x10e   : > { %7161 = vst [vmem:[#allocation26_spill] sm:$0xff] %v6605_v25  ;;  %5223 = vmatprep.mubr.bf16.mxu1 %v6076_v50  ;;  %5279 = vmatprep.mubr.bf16.mxu0 %v2794_v9  ;;  %v5562_v25 = vld [vmem:[%s5644_s25 + $0xa0] ss:$0 sps:$4 sm:$0x33]   ;;  %v2798_v58 = vsel %vm2300_vm2, %v2795_v10, %v2797_v54 }
 0x10f   : > { %v6610_v17 = vpop.f32.mrf.mxu1  ;;  %v1166_v51 = vpop.f32.mrf.mxu0 }
 0x110   : > { %7162 = vst [vmem:[#allocation27_spill] sm:$0xff] %v6610_v17 }
 0x111   : > { %v6613_v43 = vpop.f32.mrf.mxu1  ;;  %v5046_v42 = vpop.f32.mrf.mxu0 }
 0x112   : > { %7163 = vst [vmem:[#allocation28_spill] sm:$0xff] %v6613_v43  ;;  %v2799_v43 = vrot.slane %v5562_v25, 2 }
 0x113   : > { %v6617_v37 = vpop.f32.mrf.mxu1  ;;  %v1169_v16 = vpop.f32.mrf.mxu0 }
 0x114   : > { %7164 = vst [vmem:[#allocation29_spill] sm:$0xff] %v6617_v37 }
 0x115   : > { %v4993_v50 = vpop.f32.mrf.mxu1  ;;  %5224 = vmatmul.mubr.bf16.gmra.mxu1 %v6089_v45  ;;  %v5049_v9 = vpop.f32.mrf.mxu0  ;;  %5280 = vmatmul.mubr.bf16.gmra.mxu0 %v2796_v28  ;;  %v2800_v45 = vsel %vm2300_vm2, %v2797_v54, %v2799_v43 }
 0x116   : > { %v873_v17 = vadd.f32 %v4993_v50, %v6484_v62  ;;  %5227 = vmatprep.mubr.bf16.mxu1 %v6116_v27  ;;  %5283 = vmatprep.mubr.bf16.mxu0 %v2798_v58 }
 0x117   : > { %v864_v36 = vpop.f32.mrf.mxu1  ;;  %v1182_v22 = vpop.f32.mrf.mxu0 }
 0x118   : > { %v865_v35 = vadd.f32 %v864_v36, %v6493_v18  ;;  %v6624_v63 = vadd.f32 %v5045_v12, %v873_v17  ;;  %v7165_v36 = vld [vmem:[#allocation2_spill] sm:$0xff] }
 0x119   : > { %v4994_v37 = vpop.f32.mrf.mxu1  ;;  %v5050_v49 = vpop.f32.mrf.mxu0 }
 0x11a   : > { %v876_v10 = vadd.f32 %v4994_v37, %v6501_v61  ;;  %v6628_v44 = vadd.f32 %v1166_v51, %v865_v35  ;;  %v7166_v61 = vld [vmem:[#allocation4_spill] sm:$0xff] }
 0x11b   : > { %v867_v28 = vpop.f32.mrf.mxu1  ;;  %v1185_v62 = vpop.f32.mrf.mxu0 }
 0x11c   : > { %v868_v27 = vadd.f32 %v867_v28, %v6506_v56  ;;  %v6631_v58 = vadd.f32 %v5046_v42, %v876_v10  ;;  %v7167_v28 = vld [vmem:[#allocation3_spill] sm:$0xff] }
 0x11d   : > { %v4997_v25 = vpop.f32.mrf.mxu1  ;;  %5228 = vmatmul.mubr.bf16.gmra.mxu1 %v6121_v40  ;;  %v5053_v18 = vpop.f32.mrf.mxu0  ;;  %5284 = vmatmul.mubr.bf16.gmra.mxu0 %v2800_v45 }
 0x11e   : > { %v889_v17 = vadd.f32 %v4997_v25, %v6518_v39  ;;  %5231 = vmatprep.mubr.bf16.mxu1 %v7165_v36  ;;  %5355 = vmatprep.mubr.bf16.mxu0 %v7166_v61  ;;  %v6637_v43 = vadd.f32 %v1169_v16, %v868_v27  ;;  %v7168_v25 = vld [vmem:[#allocation5_spill] sm:$0xff] }
 0x11f   : > { %v880_v51 = vpop.f32.mrf.mxu1  ;;  %v1198_v37 = vpop.f32.mrf.mxu0 }
 0x120   : > { %v881_v54 = vadd.f32 %v880_v51, %v6524_v23  ;;  %v6640_v56 = vadd.f32 %v5049_v9, %v889_v17  ;;  %v7169_v9 = vld [vmem:[#allocation7_spill] sm:$0xff] }
 0x121   : > { %v4998_v12 = vpop.f32.mrf.mxu1  ;;  %v5054_v42 = vpop.f32.mrf.mxu0 }
 0x122   : > { %v892_v40 = vadd.f32 %v4998_v12, %v6535_v7  ;;  %v6643_v50 = vadd.f32 %v1182_v22, %v881_v54 }
 0x123   : > { %v883_v35 = vpop.f32.mrf.mxu1  ;;  %v1201_v39 = vpop.f32.mrf.mxu0 }
 0x124   : > { %v884_v10 = vadd.f32 %v883_v35, %v6540_v1  ;;  %v6646_v45 = vadd.f32 %v5050_v49, %v892_v40  ;;  %v7170_v35 = vld [vmem:[#allocation6_spill] sm:$0xff] }
 0x125   : > { %v5001_v16 = vpop.f32.mrf.mxu1  ;;  %5232 = vmatmul.mubr.bf16.gmra.mxu1 %v7167_v28  ;;  %v5057_v27 = vpop.f32.mrf.mxu0  ;;  %5356 = vmatmul.mubr.bf16.vlgmr.msra.gmra.mxu0 %v7168_v25  ;;  %v7173_v28 = vld [vmem:[#allocation11_spill] sm:$0xff] }
 0x126   : > { %v905_v23 = vadd.f32 %v5001_v16, %v6552_v20  ;;  %5303 = vmatprep.mubr.bf16.mxu1 %v6230_v34  ;;  %5359 = vmatprep.mubr.bf16.mxu0 %v7169_v9  ;;  %v6653_v7 = vadd.f32 %v1185_v62, %v884_v10  ;;  %v7171_v16 = vld [vmem:[#allocation8_spill] sm:$0xff] }
 0x127   : > { %v896_v22 = vpop.f32.mrf.mxu1  ;;  %v1214_v17 = vpop.f32.mrf.mxu0 }
 0x128   : > { %v897_v1 = vadd.f32 %v896_v22, %v6558_v11  ;;  %v6656_v49 = vadd.f32 %v5053_v18, %v905_v23  ;;  %v7172_v18 = vld [vmem:[#allocation9_spill] sm:$0xff] }
 0x129   : > { %v5002_v36 = vpop.f32.mrf.mxu1  ;;  %v5058_v61 = vpop.f32.mrf.mxu0 }
 0x12a   : > { %v908_v51 = vadd.f32 %v5002_v36, %v6563_v41  ;;  %v6659_v54 = vadd.f32 %v1198_v37, %v897_v1 }
 0x12b   : > { %v899_v12 = vpop.f32.mrf.mxu1  ;;  %v1217_v20 = vpop.f32.mrf.mxu0 }
 0x12c   : > { %v900_v34 = vadd.f32 %v899_v12, %v6571_v31  ;;  %v6662_v40 = vadd.f32 %v5054_v42, %v908_v51 }
 0x12d   : > { %v5005_v62 = vpop.f32.mrf.mxu1  ;;  %5304 = vmatmul.mubr.bf16.vlgmr.msra.gmra.mxu1 %v7170_v35  ;;  %v5061_v10 = vpop.f32.mrf.mxu0  ;;  %5360 = vmatmul.mubr.bf16.gmra.mxu0 %v7171_v16 }
 0x12e   : > { %v921_v11 = vadd.f32 %v5005_v62, %v6580_v8  ;;  %5307 = vmatprep.mubr.bf16.mxu1 %v7172_v18  ;;  %5363 = vmatprep.mubr.bf16.mxu0 %v7173_v28  ;;  %v6669_v41 = vadd.f32 %v1201_v39, %v900_v34  ;;  %v7174_v34 = vld [vmem:[#allocation10_spill] sm:$0xff] }
 0x12f   : > { %v912_v37 = vpop.f32.mrf.mxu1  ;;  %v1230_v25 = vpop.f32.mrf.mxu0 }
 0x130   : > { %v913_v31 = vadd.f32 %v912_v37, %v6586_v57  ;;  %v6672_v42 = vadd.f32 %v5057_v27, %v921_v11  ;;  %v7175_v27 = vld [vmem:[#allocation12_spill] sm:$0xff] }
 0x131   : > { %v5006_v23 = vpop.f32.mrf.mxu1  ;;  %v5062_v9 = vpop.f32.mrf.mxu0 }
 0x132   : > { %v924_v22 = vadd.f32 %v5006_v23, %v6591_v4  ;;  %v6675_v1 = vadd.f32 %v1214_v17, %v913_v31 }
 0x133   : > { %v915_v36 = vpop.f32.mrf.mxu1  ;;  %v1233_v8 = vpop.f32.mrf.mxu0 }
 0x134   : > { %v916_v51 = vadd.f32 %v915_v36, %v6599_v6  ;;  %v6678_v12 = vadd.f32 %v5058_v61, %v924_v22  ;;  %v7177_v22 = vld [vmem:[#allocation14_spill] sm:$0xff] }
 0x135   : > { %v5009_v39 = vpop.f32.mrf.mxu1  ;;  %5308 = vmatmul.mubr.bf16.gmra.mxu1 %v7174_v34  ;;  %v5065_v62 = vpop.f32.mrf.mxu0  ;;  %5364 = vmatmul.mubr.bf16.gmra.mxu0 %v6315_v24 }
 0x136   : > { %v937_v57 = vadd.f32 %v5009_v39, %v6481_v53  ;;  %5311 = vmatprep.mubr.bf16.mxu1 %v7175_v27  ;;  %5367 = vmatprep.mubr.bf16.mxu0 %v6351_v13  ;;  %v6685_v4 = vadd.f32 %v1217_v20, %v916_v51  ;;  %v7176_v20 = vld [vmem:[#allocation13_spill] sm:$0xff] }
 0x137   : > { %v928_v17 = vpop.f32.mrf.mxu1  ;;  %v1246_v35 = vpop.f32.mrf.mxu0 }
 0x138   : > { %v929_v6 = vadd.f32 %v928_v17, %v6491_v14  ;;  %v6688_v61 = vadd.f32 %v5061_v10, %v937_v57 }
 0x139   : > { %v5010_v16 = vpop.f32.mrf.mxu1  ;;  %v5066_v11 = vpop.f32.mrf.mxu0 }
 0x13a   : > { %v940_v18 = vadd.f32 %v5010_v16, %v6499_v26  ;;  %v6691_v28 = vadd.f32 %v1230_v25, %v929_v6  ;;  %v3219_v6 = vshrl.u32 %v6544_v59, 16  ;;  %v3222_v16 = vshll.u32 %v6544_v59, 16 }
 0x13b   : > { %v931_v24 = vpop.f32.mrf.mxu1  ;;  %v1249_v53 = vpop.f32.mrf.mxu0 }
 0x13c   : > { %v932_v37 = vadd.f32 %v931_v24, %v6504_v47  ;;  %v6694_v31 = vadd.f32 %v5062_v9, %v940_v18 }
 0x13d   : > { %v5013_v13 = vpop.f32.mrf.mxu1  ;;  %5312 = vmatmul.mubr.bf16.gmra.mxu1 %v7176_v20  ;;  %v5069_v23 = vpop.f32.mrf.mxu0  ;;  %5368 = vmatmul.mubr.bf16.gmra.mxu0 %v7177_v22  ;;  %v3221_v20 = vrot.slane %v3219_v6, 2  ;;  %v3224_v22 = vrot.slane %v3222_v16, 3 }
 0x13e   : > { %v953_v14 = vadd.f32 %v5013_v13, %v6515_v3  ;;  %5315 = vmatprep.mubr.bf16.mxu1 %v6368_v60  ;;  %5371 = vmatprep.mubr.bf16.mxu0 %v6387_v33  ;;  %v6701_v26 = vadd.f32 %v1233_v8, %v932_v37  ;;  %v7178_v8 = vld [vmem:[#allocation15_spill] sm:$0xff]  ;;  %v7179_v37 = vrot.slane %v6407_v15, 3  ;;  %v3228_v15 = vshrl.u32 %v6567_v5, 16 }
 0x13f   : > { %v944_v10 = vpop.f32.mrf.mxu1  ;;  %v1262_v25 = vpop.f32.mrf.mxu0 }
 0x140   : > { %v945_v47 = vadd.f32 %v944_v10, %v6522_v48  ;;  %v6704_v9 = vadd.f32 %v5065_v62, %v953_v14  ;;  %v7180_v10 = vld [vmem:[#allocation20_spill] sm:$0xff] }
 0x141   : > { %v5014_v36 = vpop.f32.mrf.mxu1  ;;  %v5070_v51 = vpop.f32.mrf.mxu0 }
 0x142   : > { %v956_v39 = vadd.f32 %v5014_v36, %v6533_v19  ;;  %v6707_v34 = vadd.f32 %v1246_v35, %v945_v47  ;;  %v7181_v47 = vld [vmem:[#allocation17_spill] sm:$0xff]  ;;  %v3231_v36 = vshll.u32 %v6567_v5, 16 }
 0x143   : > { %v947_v57 = vpop.f32.mrf.mxu1  ;;  %v1265_v3 = vpop.f32.mrf.mxu0 }
 0x144   : > { %v948_v60 = vadd.f32 %v947_v57, %v6538_v2  ;;  %v6710_v27 = vadd.f32 %v5066_v11, %v956_v39  ;;  %v3598_v2 = vrot.slane %v6544_v59, 3  ;;  %v3225_v57 = vor.u32 %v3224_v22, %v3221_v20  ;;  %v7185_v20 = vld [vmem:[#allocation16_spill] sm:$0xff] }
 0x145   : > { %v5017_v33 = vpop.f32.mrf.mxu1  ;;  %5316 = vmatmul.mubr.bf16.gmra.mxu1 %v7178_v8  ;;  %v5073_v17 = vpop.f32.mrf.mxu0  ;;  %5372 = vmatmul.mubr.bf16.gmra.mxu0 %v6390_v55  ;;  %v7183_v8 = vld [vmem:[#allocation21_spill] sm:$0xff] }
 0x146   : > { %v969_v48 = vadd.f32 %v5017_v33, %v6549_v52  ;;  %5319 = vmatprep.mubr.bf16.mxu1 %v6402_v32  ;;  %5375 = vmatprep.mubr.bf16.mxu0 %v6421_v0  ;;  %v6717_v19 = vadd.f32 %v1249_v53, %v948_v60  ;;  %v3599_v13 = vsel %vm3572_vm4, %v7179_v37, %v3598_v2 }
 0x147   : > { %v960_v62 = vpop.f32.mrf.mxu1  ;;  %v1278_v35 = vpop.f32.mrf.mxu0  ;;  %v3226_v22 = vsel %vm3101_vm5, %v7185_v20, %v3225_v57 }
 0x148   : > { %v961_v11 = vadd.f32 %v960_v62, %v6556_v46  ;;  %v6723_v18 = vadd.f32 %v5069_v23, %v969_v48 }
 0x149   : > { %v5018_v55 = vpop.f32.mrf.mxu1  ;;  %v5074_v52 = vpop.f32.mrf.mxu0 }
 0x14a   : > { %v972_v32 = vadd.f32 %v5018_v55, %v6561_v29  ;;  %v6726_v24 = vadd.f32 %v1262_v25, %v961_v11  ;;  %v3600_v29 = vrot.slane %v6567_v5, 3  ;;  %v7184_v5 = vld [vmem:[#allocation22_spill] sm:$0xff]  ;;  %v3230_v55 = vrot.slane %v3228_v15, 2 }
 0x14b   : > { %v963_v0 = vpop.f32.mrf.mxu1  ;;  %v1281_v53 = vpop.f32.mrf.mxu0 }
 0x14c   : > { %v964_v59 = vadd.f32 %v963_v0, %v6569_v30  ;;  %v6732_v14 = vadd.f32 %v5070_v51, %v972_v32  ;;  %v3601_v11 = vsel %vm3572_vm4, %v3598_v2, %v3600_v29  ;;  %v3233_v32 = vrot.slane %v3231_v36, 3 }
 0x14d   : > { %v5021_v46 = vpop.f32.mrf.mxu1  ;;  %5320 = vmatmul.mubr.bf16.gmra.mxu1 %v6410_v38  ;;  %v5077_v23 = vpop.f32.mrf.mxu0  ;;  %5376 = vmatmul.mubr.bf16.gmra.mxu0 %v6426_v21  ;;  %v7182_v38 = vld [vmem:[#allocation19_spill] sm:$0xff] }
 0x14e   : > { %v985_v25 = vadd.f32 %v5021_v46, %v7180_v10  ;;  %5323 = vmatprep.mubr.bf16.mxu1 %v7181_v47  ;;  %5379 = vmatprep.mubr.bf16.mxu0 %v3599_v13  ;;  %v6741_v30 = vadd.f32 %v1265_v3, %v964_v59  ;;  %v3602_v60 = vrot.slane %v7182_v38, 3  ;;  %v3237_v21 = vshrl.u32 %v7182_v38, 16  ;;  %v7186_v10 = vld [vmem:[#allocation24_spill] sm:$0xff] }
 0x14f   : > { %v976_v51 = vpop.f32.mrf.mxu1  ;;  %v1294_v39 = vpop.f32.mrf.mxu0  ;;  %v3240_v33 = vshll.u32 %v7182_v38, 16 }
 0x150   : > { %v977_v48 = vadd.f32 %v976_v51, %v7183_v8  ;;  %v6747_v62 = vadd.f32 %v5073_v17, %v985_v25  ;;  %v3603_v59 = vsel %vm3572_vm4, %v3600_v29, %v3602_v60  ;;  %v3239_v46 = vrot.slane %v3237_v21, 2  ;;  %v7188_v51 = vld [vmem:[#allocation18_spill] sm:$0xff] }
 0x151   : > { %v5022_v6 = vpop.f32.mrf.mxu1  ;;  %v5078_v16 = vpop.f32.mrf.mxu0  ;;  %v3242_v17 = vrot.slane %v3240_v33, 3  ;;  %v7190_v8 = vld [vmem:[#allocation26_spill] sm:$0xff] }
 0x152   : > { %v988_v3 = vadd.f32 %v5022_v6, %v7184_v5  ;;  %v6751_v0 = vadd.f32 %v1278_v35, %v977_v48  ;;  %v7189_v35 = vld [vmem:[#allocation23_spill] sm:$0xff]  ;;  %v3234_v6 = vor.u32 %v3233_v32, %v3230_v55 }
 0x153   : > { %v979_v37 = vpop.f32.mrf.mxu1  ;;  %v1297_v13 = vpop.f32.mrf.mxu0  ;;  %v3246_v36 = vshrl.u32 %v7189_v35, 16  ;;  %v3249_v38 = vshll.u32 %v7189_v35, 16  ;;  %v3604_v29 = vrot.slane %v7189_v35, 3  ;;  %v3243_v5 = vor.u32 %v3242_v17, %v3239_v46  ;;  %v5566_v35 = vld [vmem:[%s5644_s25 + $0xa0] ss:$0 sps:$4 sm:$0x77]  }
 0x154   : > { %v980_v25 = vadd.f32 %v979_v37, %v7186_v10  ;;  %v6757_v47 = vadd.f32 %v5074_v52, %v988_v3  ;;  %v7192_v3 = vld [vmem:[#allocation25_spill] sm:$0xff]  ;;  %v7193_v10 = vld [vmem:[#allocation27_spill] sm:$0xff] }
 0x155   : > { %v5025_v2 = vpop.f32.mrf.mxu1  ;;  %5324 = vmatmul.mubr.bf16.gmra.mxu1 %v7188_v51  ;;  %v5149_v15 = vpop.f32.mrf.mxu0  ;;  %5380 = vmatmul.mubr.bf16.gmra.mxu0 %v3601_v11  ;;  %v3606_v37 = vrot.slane %v7192_v3, 3  ;;  %v3255_v11 = vshrl.u32 %v7192_v3, 16  ;;  %v3258_v20 = vshll.u32 %v7192_v3, 16  ;;  %v3605_v46 = vsel %vm3572_vm4, %v3602_v60, %v3604_v29 }
 0x156   : > { %7187 = vst [vmem:[#allocation2_spill] sm:$0xff] %v6757_v47  ;;  %v1001_v48 = vadd.f32 %v5025_v2, %v7190_v8  ;;  %5327 = vmatprep.mubr.bf16.mxu1 %v3226_v22  ;;  %5383 = vmatprep.mubr.bf16.mxu0 %v3603_v59  ;;  %v6764_v21 = vadd.f32 %v1281_v53, %v980_v25  ;;  %v3248_v22 = vrot.slane %v3246_v36, 2  ;;  %v3251_v59 = vrot.slane %v3249_v38, 3  ;;  %v7195_v53 = vld [vmem:[#allocation28_spill] sm:$0xff] }
 0x157   : > { %v992_v52 = vpop.f32.mrf.mxu1  ;;  %v2100_v33 = vpop.f32.mrf.mxu0  ;;  %v3235_v8 = vsel %vm3101_vm5, %v3225_v57, %v3234_v6  ;;  %v3244_v3 = vsel %vm3101_vm5, %v3234_v6, %v3243_v5  ;;  %v3608_v60 = vrot.slane %v5566_v35, 3  ;;  %v3267_v6 = vshll.u32 %v5566_v35, 16 }
 0x158   : > { %7191 = vst [vmem:[#allocation4_spill] sm:$0xff] %v6764_v21  ;;  %v993_v51 = vadd.f32 %v992_v52, %v7193_v10  ;;  %v6770_v2 = vadd.f32 %v5077_v23, %v1001_v48  ;;  %v3607_v23 = vsel %vm3572_vm4, %v3604_v29, %v3606_v37  ;;  %v3257_v48 = vrot.slane %v3255_v11, 2  ;;  %v7196_v10 = vld [vmem:[#allocation29_spill] sm:$0xff] }
 0x159   : > { %v5026_v55 = vpop.f32.mrf.mxu1  ;;  %v5150_v32 = vpop.f32.mrf.mxu0  ;;  %v3260_v52 = vrot.slane %v3258_v20, 3  ;;  %v3252_v57 = vor.u32 %v3251_v59, %v3248_v22  ;;  %v3609_v59 = vsel %vm3572_vm4, %v3606_v37, %v3608_v60 }
 0x15a   : > { %7194 = vst [vmem:[#allocation3_spill] sm:$0xff] %v6770_v2  ;;  %v1004_v25 = vadd.f32 %v5026_v55, %v7195_v53  ;;  %v6776_v17 = vadd.f32 %v1294_v39, %v993_v51  ;;  %v3264_v51 = vshrl.u32 %v5566_v35, 16 }
 0x15b   : > { %v995_v21 = vpop.f32.mrf.mxu1  ;;  %v2103_v47 = vpop.f32.mrf.mxu0  ;;  %v3261_v20 = vor.u32 %v3260_v52, %v3257_v48 }
 0x15c   : > { %v996_v36 = vadd.f32 %v995_v21, %v7196_v10  ;;  %v6781_v38 = vadd.f32 %v5078_v16, %v1004_v25 }
 0x15d   : > { %v5097_v2 = vpop.f32.mrf.mxu1  ;;  %5328 = vmatmul.mubr.bf16.gmra.mxu1 %v3235_v8  ;;  %v5153_v55 = vpop.f32.mrf.mxu0  ;;  %5384 = vmatmul.mubr.bf16.gmra.mxu0 %v3605_v46  ;;  %v3253_v8 = vsel %vm3101_vm5, %v3243_v5, %v3252_v57  ;;  %v3269_v46 = vrot.slane %v3267_v6, 3 }
 0x15e   : > { %v1774_v39 = vadd.f32 %v5097_v2, %v6624_v63  ;;  %5331 = vmatprep.mubr.bf16.mxu1 %v3244_v3  ;;  %5387 = vmatprep.mubr.bf16.mxu0 %v3607_v23  ;;  %v6784_v53 = vadd.f32 %v1297_v13, %v996_v36  ;;  %v3266_v2 = vrot.slane %v3264_v51, 2  ;;  %v3262_v23 = vsel %vm3101_vm5, %v3252_v57, %v3261_v20 }
 0x15f   : > { %v1629_v29 = vpop.f32.mrf.mxu1  ;;  %v2116_v11 = vpop.f32.mrf.mxu0 }
 0x160   : > { %v1772_v16 = vadd.f32 %v1629_v29, %v6628_v44  ;;  %v6787_v21 = vadd.f32 %v5149_v15, %v1774_v39 }
 0x161   : > { %v5098_v25 = vpop.f32.mrf.mxu1  ;;  %v5154_v22 = vpop.f32.mrf.mxu0 }
 0x162   : > { %v1775_v63 = vadd.f32 %v5098_v25, %v6631_v58  ;;  %v6792_v35 = vadd.f32 %v2100_v33, %v1772_v16  ;;  %v3270_v58 = vor.u32 %v3269_v46, %v3266_v2 }
 0x163   : > { %v1632_v13 = vpop.f32.mrf.mxu1  ;;  %v2119_v3 = vpop.f32.mrf.mxu0 }
 0x164   : > { %v1773_v44 = vadd.f32 %v1632_v13, %v6637_v43  ;;  %v6796_v15 = vadd.f32 %v5150_v32, %v1775_v63  ;;  %v3271_v39 = vsel %vm3101_vm5, %v3261_v20, %v3270_v58 }
 0x165   : > { %v5101_v48 = vpop.f32.mrf.mxu1  ;;  %5332 = vmatmul.mubr.bf16.gmra.mxu1 %v3253_v8  ;;  %v5157_v5 = vpop.f32.mrf.mxu0  ;;  %5388 = vmatmul.mubr.bf16.gmra.mxu0 %v3609_v59 }
 0x166   : > { %v1778_v37 = vadd.f32 %v5101_v48, %v6640_v56  ;;  %5335 = vmatprep.mubr.bf16.mxu1 %v3262_v23  ;;  %v6799_v52 = vadd.f32 %v2103_v47, %v1773_v44 }
 0x167   : > { %v1645_v33 = vpop.f32.mrf.mxu1  ;;  %v2132_v10 = vpop.f32.mrf.mxu0 }
 0x168   : > { %v1776_v36 = vadd.f32 %v1645_v33, %v6643_v50  ;;  %v6802_v60 = vadd.f32 %v5153_v55, %v1778_v37 }
 0x169   : > { %v5102_v57 = vpop.f32.mrf.mxu1  ;;  %v5158_v43 = vpop.f32.mrf.mxu0 }
 0x16a   : > { %v1779_v32 = vadd.f32 %v5102_v57, %v6646_v45  ;;  %v6806_v51 = vadd.f32 %v2116_v11, %v1776_v36 }
 0x16b   : > { %v1648_v6 = vpop.f32.mrf.mxu1  ;;  %v2135_v56 = vpop.f32.mrf.mxu0 }
 0x16c   : > { %v1777_v29 = vadd.f32 %v1648_v6, %v6653_v7  ;;  %v6809_v47 = vadd.f32 %v5154_v22, %v1779_v32 }
 0x16d   : > { %v5105_v16 = vpop.f32.mrf.mxu1  ;;  %5336 = vmatmul.mubr.bf16.gmra.mxu1 %v3271_v39  ;;  %v5161_v25 = vpop.f32.mrf.mxu0 }
 0x16e   : > { %v1782_v50 = vadd.f32 %v5105_v16, %v6656_v49  ;;  %v6812_v55 = vadd.f32 %v2119_v3, %v1777_v29 }
 0x16f   : > { %v1661_v8 = vpop.f32.mrf.mxu1  ;;  %v2148_v59 = vpop.f32.mrf.mxu0 }
 0x170   : > { %v1780_v45 = vadd.f32 %v1661_v8, %v6659_v54  ;;  %v6815_v20 = vadd.f32 %v5157_v5, %v1782_v50 }
 0x171   : > { %v5106_v11 = vpop.f32.mrf.mxu1  ;;  %v5162_v63 = vpop.f32.mrf.mxu0 }
 0x172   : > { %v1783_v2 = vadd.f32 %v5106_v11, %v6662_v40  ;;  %v6818_v7 = vadd.f32 %v2132_v10, %v1780_v45 }
 0x173   : > { %v1664_v22 = vpop.f32.mrf.mxu1  ;;  %v2151_v46 = vpop.f32.mrf.mxu0 }
 0x174   : > { %v1781_v13 = vadd.f32 %v1664_v22, %v6669_v41  ;;  %v6821_v23 = vadd.f32 %v5158_v43, %v1783_v2 }
 0x175   : > { %v5109_v49 = vpop.f32.mrf.mxu1  ;;  %v5165_v3 = vpop.f32.mrf.mxu0 }
 0x176   : > { %v1786_v44 = vadd.f32 %v5109_v49, %v6672_v42  ;;  %v6824_v48 = vadd.f32 %v2135_v56, %v1781_v13 }
 0x177   : > { %v1677_v54 = vpop.f32.mrf.mxu1  ;;  %v2164_v5 = vpop.f32.mrf.mxu0 }
 0x178   : > { %v1784_v37 = vadd.f32 %v1677_v54, %v6675_v1  ;;  %v6827_v58 = vadd.f32 %v5161_v25, %v1786_v44 }
 0x179   : > { %v5110_v40 = vpop.f32.mrf.mxu1  ;;  %v5166_v33 = vpop.f32.mrf.mxu0 }
 0x17a   : > { %v1787_v10 = vadd.f32 %v5110_v40, %v6678_v12  ;;  %v6830_v36 = vadd.f32 %v2148_v59, %v1784_v37 }
 0x17b   : > { %v1680_v41 = vpop.f32.mrf.mxu1  ;;  %v2167_v57 = vpop.f32.mrf.mxu0 }
 0x17c   : > { %v1785_v43 = vadd.f32 %v1680_v41, %v6685_v4  ;;  %v6833_v32 = vadd.f32 %v5162_v63, %v1787_v10 }
 0x17d   : > { %v5113_v42 = vpop.f32.mrf.mxu1  ;;  %v5169_v39 = vpop.f32.mrf.mxu0 }
 0x17e   : > { %v1790_v6 = vadd.f32 %v5113_v42, %v6688_v61  ;;  %v6836_v56 = vadd.f32 %v2151_v46, %v1785_v43 }
 0x17f   : > { %v1693_v1 = vpop.f32.mrf.mxu1  ;;  %v2180_v29 = vpop.f32.mrf.mxu0 }
 0x180   : > { %v1788_v16 = vadd.f32 %v1693_v1, %v6691_v28  ;;  %v6839_v25 = vadd.f32 %v5165_v3, %v1790_v6 }
 0x181   : > { %v5114_v12 = vpop.f32.mrf.mxu1  ;;  %v5170_v50 = vpop.f32.mrf.mxu0 }
 0x182   : > { %v1791_v8 = vadd.f32 %v5114_v12, %v6694_v31  ;;  %v6842_v59 = vadd.f32 %v2164_v5, %v1788_v16 }
 0x183   : > { %v1696_v4 = vpop.f32.mrf.mxu1  ;;  %v2183_v45 = vpop.f32.mrf.mxu0 }
 0x184   : > { %v1789_v11 = vadd.f32 %v1696_v4, %v6701_v26  ;;  %v6845_v63 = vadd.f32 %v5166_v33, %v1791_v8 }
 0x185   : > { %v5117_v61 = vpop.f32.mrf.mxu1  ;;  %v5173_v2 = vpop.f32.mrf.mxu0 }
 0x186   : > { %v1794_v22 = vadd.f32 %v5117_v61, %v6704_v9  ;;  %v6848_v46 = vadd.f32 %v2167_v57, %v1789_v11 }
 0x187   : > { %v1709_v28 = vpop.f32.mrf.mxu1  ;;  %v2196_v13 = vpop.f32.mrf.mxu0 }
 0x188   : > { %v1792_v49 = vadd.f32 %v1709_v28, %v6707_v34  ;;  %v6851_v3 = vadd.f32 %v5169_v39, %v1794_v22  ;;  %v7197_v28 = vld [vmem:[#allocation2_spill] sm:$0xff] }
 0x189   : > { %v5118_v31 = vpop.f32.mrf.mxu1  ;;  %v5174_v44 = vpop.f32.mrf.mxu0 }
 0x18a   : > { %v1795_v54 = vadd.f32 %v5118_v31, %v6710_v27  ;;  %v6854_v5 = vadd.f32 %v2180_v29, %v1792_v49 }
 0x18b   : > { %v1712_v26 = vpop.f32.mrf.mxu1  ;;  %v2199_v37 = vpop.f32.mrf.mxu0 }
 0x18c   : > { %v1793_v40 = vadd.f32 %v1712_v26, %v6717_v19  ;;  %v6857_v33 = vadd.f32 %v5170_v50, %v1795_v54 }
 0x18d   : > { %v5121_v9 = vpop.f32.mrf.mxu1  ;;  %v5177_v10 = vpop.f32.mrf.mxu0 }
 0x18e   : > { %v1798_v41 = vadd.f32 %v5121_v9, %v6723_v18  ;;  %v6860_v57 = vadd.f32 %v2183_v45, %v1793_v40  ;;  %v7199_v40 = vld [vmem:[#allocation3_spill] sm:$0xff] }
 0x18f   : > { %v1725_v34 = vpop.f32.mrf.mxu1  ;;  %v2212_v43 = vpop.f32.mrf.mxu0 }
 0x190   : > { %v1796_v42 = vadd.f32 %v1725_v34, %v6726_v24  ;;  %v6863_v39 = vadd.f32 %v5173_v2, %v1798_v41 }
 0x191   : > { %v5122_v27 = vpop.f32.mrf.mxu1  ;;  %v5178_v6 = vpop.f32.mrf.mxu0 }
 0x192   : > { %v1799_v1 = vadd.f32 %v5122_v27, %v6732_v14  ;;  %v6866_v29 = vadd.f32 %v2196_v13, %v1796_v42 }
 0x193   : > { %v1728_v19 = vpop.f32.mrf.mxu1  ;;  %v2215_v16 = vpop.f32.mrf.mxu0 }
 0x194   : > { %v1797_v12 = vadd.f32 %v1728_v19, %v6741_v30  ;;  %v6869_v50 = vadd.f32 %v5174_v44, %v1799_v1  ;;  %v7198_v44 = vld [vmem:[#allocation4_spill] sm:$0xff] }
 0x195   : > { %v5125_v18 = vpop.f32.mrf.mxu1  ;;  %v5181_v8 = vpop.f32.mrf.mxu0 }
 0x196   : > { %v1802_v4 = vadd.f32 %v5125_v18, %v6747_v62  ;;  %v6872_v45 = vadd.f32 %v2199_v37, %v1797_v12 }
 0x197   : > { %v1741_v24 = vpop.f32.mrf.mxu1  ;;  %v2228_v11 = vpop.f32.mrf.mxu0 }
 0x198   : > { %v1800_v61 = vadd.f32 %v1741_v24, %v6751_v0  ;;  %v6875_v2 = vadd.f32 %v5177_v10, %v1802_v4 }
 0x199   : > { %v5126_v14 = vpop.f32.mrf.mxu1  ;;  %v5182_v22 = vpop.f32.mrf.mxu0 }
 0x19a   : > { %v1803_v13 = vadd.f32 %v5126_v14, %v7197_v28  ;;  %v6878_v49 = vadd.f32 %v2212_v43, %v1800_v61 }
 0x19b   : > { %v1744_v30 = vpop.f32.mrf.mxu1  ;;  %v2231_v31 = vpop.f32.mrf.mxu0 }
 0x19c   : > { %v1801_v54 = vadd.f32 %v1744_v30, %v7198_v44  ;;  %v6881_v26 = vadd.f32 %v5178_v6, %v1803_v13 }
 0x19d   : > { %v5129_v62 = vpop.f32.mrf.mxu1  ;;  %v5253_v37 = vpop.f32.mrf.mxu0 }
 0x19e   : > { %v1806_v9 = vadd.f32 %v5129_v62, %v7199_v40  ;;  %v6884_v41 = vadd.f32 %v2215_v16, %v1801_v54 }
 0x19f   : > { %v1757_v0 = vpop.f32.mrf.mxu1  ;;  %v2901_v10 = vpop.f32.mrf.mxu0 }
 0x1a0   : > { %v1804_v34 = vadd.f32 %v1757_v0, %v6776_v17  ;;  %v6887_v42 = vadd.f32 %v5181_v8, %v1806_v9 }
 0x1a1   : > { %v5130_v43 = vpop.f32.mrf.mxu1  ;;  %v5254_v27 = vpop.f32.mrf.mxu0 }
 0x1a2   : > { %v1807_v1 = vadd.f32 %v5130_v43, %v6781_v38  ;;  %v6890_v19 = vadd.f32 %v2228_v11, %v1804_v34 }
 0x1a3   : > { %v1760_v6 = vpop.f32.mrf.mxu1  ;;  %v2904_v12 = vpop.f32.mrf.mxu0 }
 0x1a4   : > { %v1805_v18 = vadd.f32 %v1760_v6, %v6784_v53  ;;  %v6893_v4 = vadd.f32 %v5182_v22, %v1807_v1 }
 0x1a5   : > { %v5201_v16 = vpop.f32.mrf.mxu1  ;;  %v5257_v24 = vpop.f32.mrf.mxu0 }
 0x1a6   : > { %v2583_v61 = vadd.f32 %v5201_v16, %v6787_v21  ;;  %v6896_v14 = vadd.f32 %v2231_v31, %v1805_v18 }
 0x1a7   : > { %v2438_v17 = vpop.f32.mrf.mxu1  ;;  %v2917_v8 = vpop.f32.mrf.mxu0 }
 0x1a8   : > { %v2581_v28 = vadd.f32 %v2438_v17, %v6792_v35  ;;  %v6899_v13 = vadd.f32 %v5253_v37, %v2583_v61 }
 0x1a9   : > { %v5202_v38 = vpop.f32.mrf.mxu1  ;;  %v5258_v11 = vpop.f32.mrf.mxu0 }
 0x1aa   : > { %v2584_v30 = vadd.f32 %v5202_v38, %v6796_v15  ;;  %v6902_v44 = vadd.f32 %v2901_v10, %v2581_v28 }
 0x1ab   : > { %v2441_v53 = vpop.f32.mrf.mxu1  ;;  %v2920_v22 = vpop.f32.mrf.mxu0 }
 0x1ac   : > { %v2582_v54 = vadd.f32 %v2441_v53, %v6799_v52  ;;  %v6905_v62 = vadd.f32 %v5254_v27, %v2584_v30 }
 0x1ad   : > { %v5205_v21 = vpop.f32.mrf.mxu1  ;;  %v5261_v31 = vpop.f32.mrf.mxu0 }
 0x1ae   : > { %v2587_v40 = vadd.f32 %v5205_v21, %v6802_v60  ;;  %v6908_v9 = vadd.f32 %v2904_v12, %v2582_v54 }
 0x1af   : > { %v2454_v35 = vpop.f32.mrf.mxu1  ;;  %v2933_v37 = vpop.f32.mrf.mxu0 }
 0x1b0   : > { %v2585_v0 = vadd.f32 %v2454_v35, %v6806_v51  ;;  %v6911_v34 = vadd.f32 %v5257_v24, %v2587_v40 }
 0x1b1   : > { %v5206_v15 = vpop.f32.mrf.mxu1  ;;  %v5262_v10 = vpop.f32.mrf.mxu0 }
 0x1b2   : > { %v2588_v43 = vadd.f32 %v5206_v15, %v6809_v47  ;;  %v6914_v1 = vadd.f32 %v2917_v8, %v2585_v0 }
 0x1b3   : > { %v2457_v52 = vpop.f32.mrf.mxu1  ;;  %v2936_v27 = vpop.f32.mrf.mxu0 }
 0x1b4   : > { %v2586_v6 = vadd.f32 %v2457_v52, %v6812_v55  ;;  %v6917_v18 = vadd.f32 %v5258_v11, %v2588_v43 }
 0x1b5   : > { %v5209_v60 = vpop.f32.mrf.mxu1  ;;  %v5265_v12 = vpop.f32.mrf.mxu0 }
 0x1b6   : > { %v2591_v16 = vadd.f32 %v5209_v60, %v6815_v20  ;;  %v6920_v61 = vadd.f32 %v2920_v22, %v2586_v6 }
 0x1b7   : > { %v2470_v51 = vpop.f32.mrf.mxu1  ;;  %v2949_v24 = vpop.f32.mrf.mxu0 }
 0x1b8   : > { %v2589_v17 = vadd.f32 %v2470_v51, %v6818_v7  ;;  %v6923_v28 = vadd.f32 %v5261_v31, %v2591_v16 }
 0x1b9   : > { %v5210_v47 = vpop.f32.mrf.mxu1  ;;  %v5266_v8 = vpop.f32.mrf.mxu0 }
 0x1ba   : > { %v2592_v38 = vadd.f32 %v5210_v47, %v6821_v23  ;;  %v6926_v30 = vadd.f32 %v2933_v37, %v2589_v17 }
 0x1bb   : > { %v2473_v55 = vpop.f32.mrf.mxu1  ;;  %v2952_v11 = vpop.f32.mrf.mxu0 }
 0x1bc   : > { %v2590_v53 = vadd.f32 %v2473_v55, %v6824_v48  ;;  %v6929_v54 = vadd.f32 %v5262_v10, %v2592_v38 }
 0x1bd   : > { %v5213_v20 = vpop.f32.mrf.mxu1  ;;  %v5269_v22 = vpop.f32.mrf.mxu0 }
 0x1be   : > { %v2595_v21 = vadd.f32 %v5213_v20, %v6827_v58  ;;  %v6932_v40 = vadd.f32 %v2936_v27, %v2590_v53 }
 0x1bf   : > { %v2486_v7 = vpop.f32.mrf.mxu1  ;;  %v2965_v31 = vpop.f32.mrf.mxu0 }
 0x1c0   : > { %v2593_v35 = vadd.f32 %v2486_v7, %v6830_v36  ;;  %v6935_v0 = vadd.f32 %v5265_v12, %v2595_v21 }
 0x1c1   : > { %v5214_v23 = vpop.f32.mrf.mxu1  ;;  %v5270_v37 = vpop.f32.mrf.mxu0 }
 0x1c2   : > { %v2596_v15 = vadd.f32 %v5214_v23, %v6833_v32  ;;  %v6938_v43 = vadd.f32 %v2949_v24, %v2593_v35 }
 0x1c3   : > { %v2489_v48 = vpop.f32.mrf.mxu1  ;;  %v2968_v10 = vpop.f32.mrf.mxu0 }
 0x1c4   : > { %v2594_v52 = vadd.f32 %v2489_v48, %v6836_v56  ;;  %v6941_v6 = vadd.f32 %v5266_v8, %v2596_v15 }
 0x1c5   : > { %v5217_v58 = vpop.f32.mrf.mxu1  ;;  %v5273_v27 = vpop.f32.mrf.mxu0 }
 0x1c6   : > { %v2599_v60 = vadd.f32 %v5217_v58, %v6839_v25  ;;  %v6944_v16 = vadd.f32 %v2952_v11, %v2594_v52 }
 0x1c7   : > { %v2502_v36 = vpop.f32.mrf.mxu1  ;;  %v2981_v12 = vpop.f32.mrf.mxu0 }
 0x1c8   : > { %v2597_v51 = vadd.f32 %v2502_v36, %v6842_v59  ;;  %v6947_v17 = vadd.f32 %v5269_v22, %v2599_v60 }
 0x1c9   : > { %v5218_v32 = vpop.f32.mrf.mxu1  ;;  %v5274_v24 = vpop.f32.mrf.mxu0 }
 0x1ca   : > { %v2600_v47 = vadd.f32 %v5218_v32, %v6845_v63  ;;  %v6950_v38 = vadd.f32 %v2965_v31, %v2597_v51 }
 0x1cb   : > { %v2505_v56 = vpop.f32.mrf.mxu1  ;;  %v2984_v8 = vpop.f32.mrf.mxu0 }
 0x1cc   : > { %v2598_v55 = vadd.f32 %v2505_v56, %v6848_v46  ;;  %v6953_v53 = vadd.f32 %v5270_v37, %v2600_v47 }
 0x1cd   : > { %v5221_v25 = vpop.f32.mrf.mxu1  ;;  %v5277_v11 = vpop.f32.mrf.mxu0 }
 0x1ce   : > { %v2603_v20 = vadd.f32 %v5221_v25, %v6851_v3  ;;  %v6956_v21 = vadd.f32 %v2968_v10, %v2598_v55 }
 0x1cf   : > { %v2518_v59 = vpop.f32.mrf.mxu1  ;;  %v2997_v22 = vpop.f32.mrf.mxu0 }
 0x1d0   : > { %v2601_v7 = vadd.f32 %v2518_v59, %v6854_v5  ;;  %v6959_v35 = vadd.f32 %v5273_v27, %v2603_v20 }
 0x1d1   : > { %v5222_v63 = vpop.f32.mrf.mxu1  ;;  %v5278_v31 = vpop.f32.mrf.mxu0 }
 0x1d2   : > { %v2604_v23 = vadd.f32 %v5222_v63, %v6857_v33  ;;  %v6962_v15 = vadd.f32 %v2981_v12, %v2601_v7 }
 0x1d3   : > { %v2521_v46 = vpop.f32.mrf.mxu1  ;;  %v3000_v37 = vpop.f32.mrf.mxu0 }
 0x1d4   : > { %v2602_v48 = vadd.f32 %v2521_v46, %v6860_v57  ;;  %v6965_v52 = vadd.f32 %v5274_v24, %v2604_v23 }
 0x1d5   : > { %v5225_v3 = vpop.f32.mrf.mxu1  ;;  %v5281_v10 = vpop.f32.mrf.mxu0 }
 0x1d6   : > { %v2607_v58 = vadd.f32 %v5225_v3, %v6863_v39  ;;  %v6968_v60 = vadd.f32 %v2984_v8, %v2602_v48 }
 0x1d7   : > { %v2534_v5 = vpop.f32.mrf.mxu1  ;;  %v3013_v27 = vpop.f32.mrf.mxu0 }
 0x1d8   : > { %v2605_v36 = vadd.f32 %v2534_v5, %v6866_v29  ;;  %v6971_v51 = vadd.f32 %v5277_v11, %v2607_v58 }
 0x1d9   : > { %v5226_v33 = vpop.f32.mrf.mxu1  ;;  %v5282_v12 = vpop.f32.mrf.mxu0 }
 0x1da   : > { %v2608_v32 = vadd.f32 %v5226_v33, %v6869_v50  ;;  %v6974_v47 = vadd.f32 %v2997_v22, %v2605_v36 }
 0x1db   : > { %v2537_v57 = vpop.f32.mrf.mxu1  ;;  %v3016_v24 = vpop.f32.mrf.mxu0 }
 0x1dc   : > { %v2606_v56 = vadd.f32 %v2537_v57, %v6872_v45  ;;  %v6977_v55 = vadd.f32 %v5278_v31, %v2608_v32 }
 0x1dd   : > { %v5229_v39 = vpop.f32.mrf.mxu1  ;;  %v5285_v8 = vpop.f32.mrf.mxu0 }
 0x1de   : > { %v2611_v25 = vadd.f32 %v5229_v39, %v6875_v2  ;;  %v6980_v20 = vadd.f32 %v3000_v37, %v2606_v56 }
 0x1df   : > { %v2550_v29 = vpop.f32.mrf.mxu1  ;;  %v3029_v11 = vpop.f32.mrf.mxu0 }
 0x1e0   : > { %v2609_v59 = vadd.f32 %v2550_v29, %v6878_v49  ;;  %v6983_v7 = vadd.f32 %v5281_v10, %v2611_v25 }
 0x1e1   : > { %v5230_v50 = vpop.f32.mrf.mxu1  ;;  %v5286_v22 = vpop.f32.mrf.mxu0 }
 0x1e2   : > { %v2612_v63 = vadd.f32 %v5230_v50, %v6881_v26  ;;  %v6986_v23 = vadd.f32 %v3013_v27, %v2609_v59 }
 0x1e3   : > { %v2553_v45 = vpop.f32.mrf.mxu1  ;;  %v3032_v31 = vpop.f32.mrf.mxu0 }
 0x1e4   : > { %v2610_v46 = vadd.f32 %v2553_v45, %v6884_v41  ;;  %v6989_v48 = vadd.f32 %v5282_v12, %v2612_v63 }
 0x1e5   : > { %v5233_v2 = vpop.f32.mrf.mxu1  ;;  %v5357_v37 = vpop.f32.mrf.mxu0 }
 0x1e6   : > { %v2615_v3 = vadd.f32 %v5233_v2, %v6887_v42  ;;  %v6992_v58 = vadd.f32 %v3016_v24, %v2610_v46 }
 0x1e7   : > { %v2566_v49 = vpop.f32.mrf.mxu1  ;;  %v3710_v10 = vpop.f32.mrf.mxu0 }
 0x1e8   : > { %v2613_v5 = vadd.f32 %v2566_v49, %v6890_v19  ;;  %v6995_v36 = vadd.f32 %v5285_v8, %v2615_v3 }
 0x1e9   : > { %v5234_v26 = vpop.f32.mrf.mxu1  ;;  %v5358_v27 = vpop.f32.mrf.mxu0 }
 0x1ea   : > { %v2616_v33 = vadd.f32 %v5234_v26, %v6893_v4  ;;  %v6998_v32 = vadd.f32 %v3029_v11, %v2613_v5  ;;  %v7010_v11 = vld [vmem:[%s7117_s2] ss:$0 sm:$0xff] }
 0x1eb   : > { %v2569_v41 = vpop.f32.mrf.mxu1  ;;  %v3713_v12 = vpop.f32.mrf.mxu0 }
 0x1ec   : > { %v2614_v57 = vadd.f32 %v2569_v41, %v6896_v14  ;;  %v7001_v56 = vadd.f32 %v5286_v22, %v2616_v33 }
 0x1ed   : > { %v5305_v42 = vpop.f32.mrf.mxu1  ;;  %v5361_v24 = vpop.f32.mrf.mxu0 }
 0x1ee   : > { %v3517_v39 = vadd.f32 %v5305_v42, %v6899_v13  ;;  %v7004_v19 = vadd.f32 %v3032_v31, %v2614_v57 }
 0x1ef   : > { %v3372_v8 = vpop.f32.mrf.mxu1  ;;  %v3726_v25 = vpop.f32.mrf.mxu0 }
 0x1f0   : > { %v3855_v29 = vadd.f32 %v5357_v37, %v3517_v39  ;;  %v3515_v4 = vadd.f32 %v3372_v8, %v6902_v44 }
 0x1f1   : > { %v5306_v14 = vpop.f32.mrf.mxu1  ;;  %v5362_v59 = vpop.f32.mrf.mxu0 }
 0x1f2   : > { %v3853_v50 = vadd.f32 %v3710_v10, %v3515_v4  ;;  %v3518_v22 = vadd.f32 %v5306_v14, %v6905_v62  ;;  %v3898_v45 = vadd.f32 %v7010_v11, %v3855_v29 }
 0x1f3   : > { %v3375_v63 = vpop.f32.mrf.mxu1  ;;  %v3729_v13 = vpop.f32.mrf.mxu0 }
 0x1f4   : > { %v3856_v31 = vadd.f32 %v5358_v27, %v3518_v22  ;;  %v3516_v46 = vadd.f32 %v3375_v63, %v6908_v9  ;;  %v3896_v37 = vadd.f32 %v7010_v11, %v3853_v50  ;;  %v3934_v62 = vmax.f32 %v3898_v45, 0.0 }
 0x1f5   : > { %v5309_v2 = vpop.f32.mrf.mxu1  ;;  %v5365_v44 = vpop.f32.mrf.mxu0 }
 0x1f6   : > { %v3899_v3 = vadd.f32 %v7010_v11, %v3856_v31  ;;  %v3854_v49 = vadd.f32 %v3713_v12, %v3516_v46  ;;  %v3521_v5 = vadd.f32 %v5309_v2, %v6911_v34  ;;  %v3932_v42 = vmax.f32 %v3896_v37, 0.0 }
 0x1f7   : > { %v3388_v10 = vpop.f32.mrf.mxu1  ;;  %v3742_v26 = vpop.f32.mrf.mxu0 }
 0x1f8   : > { %v3935_v33 = vmax.f32 %v3899_v3, 0.0  ;;  %v3897_v41 = vadd.f32 %v7010_v11, %v3854_v49  ;;  %v3519_v27 = vadd.f32 %v3388_v10, %v6914_v1  ;;  %v3859_v9 = vadd.f32 %v5361_v24, %v3521_v5 }
 0x1f9   : > { %v5310_v57 = vpop.f32.mrf.mxu1  ;;  %v5366_v12 = vpop.f32.mrf.mxu0 }
 0x1fa   : > { %v4590_v34 = vpack.c.bf16 %v3935_v33, %v3934_v62  ;;  %v3933_v39 = vmax.f32 %v3897_v41, 0.0  ;;  %v3857_v8 = vadd.f32 %v3726_v25, %v3519_v27  ;;  %v3522_v29 = vadd.f32 %v5310_v57, %v6917_v18 }
 0x1fb   : > { %v3391_v4 = vpop.f32.mrf.mxu1  ;;  %v3745_v14 = vpop.f32.mrf.mxu0  ;;  %v3902_v22 = vadd.f32 %v7010_v11, %v3859_v9 }
 0x1fc   : > { %4672 = vst [vmem:[%s7024_s12 + $0x8] sm:$0xff] %v4590_v34   ;;  %v4585_v1 = vpack.c.bf16 %v3933_v39, %v3932_v42  ;;  %v3520_v50 = vadd.f32 %v3391_v4, %v6920_v61  ;;  %v3860_v63 = vadd.f32 %v5362_v59, %v3522_v29  ;;  %v3900_v31 = vadd.f32 %v7010_v11, %v3857_v8 }
 0x1fd   : > { %v5313_v45 = vpop.f32.mrf.mxu1  ;;  %v5369_v24 = vpop.f32.mrf.mxu0  ;;  %v3938_v5 = vmax.f32 %v3902_v22, 0.0 }
 0x1fe   : > { %4586 = vst [vmem:[%s7024_s12] sm:$0xff] %v4585_v1   ;;  %v3858_v46 = vadd.f32 %v3729_v13, %v3520_v50  ;;  %v3525_v2 = vadd.f32 %v5313_v45, %v6923_v28  ;;  %v3903_v25 = vadd.f32 %v7010_v11, %v3860_v63  ;;  %v3936_v33 = vmax.f32 %v3900_v31, 0.0 }
 0x1ff   : > { %v3404_v18 = vpop.f32.mrf.mxu1  ;;  %v3758_v37 = vpop.f32.mrf.mxu0 }
 0x200   : > { %v3901_v3 = vadd.f32 %v7010_v11, %v3858_v46  ;;  %v3863_v49 = vadd.f32 %v5365_v44, %v3525_v2  ;;  %v3523_v61 = vadd.f32 %v3404_v18, %v6926_v30  ;;  %v3939_v59 = vmax.f32 %v3903_v25, 0.0 }
 0x201   : > { %v5314_v10 = vpop.f32.mrf.mxu1  ;;  %v5370_v62 = vpop.f32.mrf.mxu0 }
 0x202   : > { %v3937_v41 = vmax.f32 %v3901_v3, 0.0  ;;  %v3526_v13 = vadd.f32 %v5314_v10, %v6929_v54  ;;  %v4600_v28 = vpack.c.bf16 %v3939_v59, %v3938_v5  ;;  %v3861_v27 = vadd.f32 %v3742_v26, %v3523_v61 }
 0x203   : > { %v3407_v9 = vpop.f32.mrf.mxu1  ;;  %v3761_v57 = vpop.f32.mrf.mxu0  ;;  %v3906_v34 = vadd.f32 %v7010_v11, %v3863_v49 }
 0x204   : > { %v4595_v42 = vpack.c.bf16 %v3937_v41, %v3936_v33  ;;  %v3864_v44 = vadd.f32 %v5366_v12, %v3526_v13  ;;  %4674 = vst [vmem:[%s7024_s12 + $0x18] sm:$0xff] %v4600_v28   ;;  %v3524_v30 = vadd.f32 %v3407_v9, %v6932_v40  ;;  %v3904_v54 = vadd.f32 %v7010_v11, %v3861_v27 }
 0x205   : > { %v5317_v39 = vpop.f32.mrf.mxu1  ;;  %v5373_v8 = vpop.f32.mrf.mxu0  ;;  %v3942_v22 = vmax.f32 %v3906_v34, 0.0 }
 0x206   : > { %4673 = vst [vmem:[%s7024_s12 + $0x10] sm:$0xff] %v4595_v42   ;;  %v3907_v29 = vadd.f32 %v7010_v11, %v3864_v44  ;;  %v3529_v4 = vadd.f32 %v5317_v39, %v6935_v0  ;;  %v3862_v1 = vadd.f32 %v3745_v14, %v3524_v30  ;;  %v3940_v0 = vmax.f32 %v3904_v54, 0.0 }
 0x207   : > { %v3420_v26 = vpop.f32.mrf.mxu1  ;;  %v3774_v50 = vpop.f32.mrf.mxu0 }
 0x208   : > { %v3943_v63 = vmax.f32 %v3907_v29, 0.0  ;;  %v3867_v45 = vadd.f32 %v5369_v24, %v3529_v4  ;;  %v3527_v12 = vadd.f32 %v3420_v26, %v6938_v43  ;;  %v3905_v40 = vadd.f32 %v7010_v11, %v3862_v1 }
 0x209   : > { %v5318_v31 = vpop.f32.mrf.mxu1  ;;  %v5374_v46 = vpop.f32.mrf.mxu0 }
 0x20a   : > { %v4610_v2 = vpack.c.bf16 %v3943_v63, %v3942_v22  ;;  %v3865_v25 = vadd.f32 %v3758_v37, %v3527_v12  ;;  %v3530_v18 = vadd.f32 %v5318_v31, %v6941_v6  ;;  %v3941_v3 = vmax.f32 %v3905_v40, 0.0 }
 0x20b   : > { %v3423_v14 = vpop.f32.mrf.mxu1  ;;  %v3777_v49 = vpop.f32.mrf.mxu0  ;;  %v3910_v61 = vadd.f32 %v7010_v11, %v3867_v45 }
 0x20c   : > { %4676 = vst [vmem:[%s7024_s12 + $0x28] sm:$0xff] %v4610_v2   ;;  %v3868_v5 = vadd.f32 %v5370_v62, %v3530_v18  ;;  %v3528_v24 = vadd.f32 %v3423_v14, %v6944_v16  ;;  %v4605_v43 = vpack.c.bf16 %v3941_v3, %v3940_v0  ;;  %v3908_v33 = vadd.f32 %v7010_v11, %v3865_v25 }
 0x20d   : > { %v5321_v59 = vpop.f32.mrf.mxu1  ;;  %v5377_v10 = vpop.f32.mrf.mxu0  ;;  %v3946_v27 = vmax.f32 %v3910_v61, 0.0 }
 0x20e   : > { %v3911_v37 = vadd.f32 %v7010_v11, %v3868_v5  ;;  %v3866_v41 = vadd.f32 %v3761_v57, %v3528_v24  ;;  %v3533_v6 = vadd.f32 %v5321_v59, %v6947_v17  ;;  %4675 = vst [vmem:[%s7024_s12 + $0x20] sm:$0xff] %v4605_v43   ;;  %v3944_v30 = vmax.f32 %v3908_v33, 0.0 }
 0x20f   : > { %v3436_v13 = vpop.f32.mrf.mxu1  ;;  %v3790_v28 = vpop.f32.mrf.mxu0 }
 0x210   : > { %v3947_v9 = vmax.f32 %v3911_v37, 0.0  ;;  %v3909_v62 = vadd.f32 %v7010_v11, %v3866_v41  ;;  %v3531_v16 = vadd.f32 %v3436_v13, %v6950_v38  ;;  %v3871_v42 = vadd.f32 %v5373_v8, %v3533_v6 }
 0x211   : > { %v5322_v34 = vpop.f32.mrf.mxu1  ;;  %v5378_v44 = vpop.f32.mrf.mxu0 }
 0x212   : > { %v4620_v39 = vpack.c.bf16 %v3947_v9, %v3946_v27  ;;  %v3945_v29 = vmax.f32 %v3909_v62, 0.0  ;;  %v3869_v57 = vadd.f32 %v3774_v50, %v3531_v16  ;;  %v3534_v17 = vadd.f32 %v5322_v34, %v6953_v53 }
 0x213   : > { %v3439_v4 = vpop.f32.mrf.mxu1  ;;  %v3793_v54 = vpop.f32.mrf.mxu0  ;;  %v3914_v22 = vadd.f32 %v7010_v11, %v3871_v42 }
 0x214   : > { %4678 = vst [vmem:[%s7024_s12 + $0x38] sm:$0xff] %v4620_v39   ;;  %v4615_v1 = vpack.c.bf16 %v3945_v29, %v3944_v30  ;;  %v3532_v26 = vadd.f32 %v3439_v4, %v6956_v21  ;;  %v3872_v63 = vadd.f32 %v5374_v46, %v3534_v17  ;;  %v3912_v45 = vadd.f32 %v7010_v11, %v3869_v57 }
 0x215   : > { %v5325_v38 = vpop.f32.mrf.mxu1  ;;  %v5381_v8 = vpop.f32.mrf.mxu0  ;;  %v3950_v18 = vmax.f32 %v3914_v22, 0.0 }
 0x216   : > { %4677 = vst [vmem:[%s7024_s12 + $0x30] sm:$0xff] %v4615_v1   ;;  %v3870_v12 = vadd.f32 %v3777_v49, %v3532_v26  ;;  %v3537_v40 = vadd.f32 %v5325_v38, %v6959_v35  ;;  %v3915_v50 = vadd.f32 %v7010_v11, %v3872_v63  ;;  %v3948_v14 = vmax.f32 %v3912_v45, 0.0 }
 0x217   : > { %v3452_v53 = vpop.f32.mrf.mxu1  ;;  %v3806_v31 = vpop.f32.mrf.mxu0 }
 0x218   : > { %v3913_v2 = vadd.f32 %v7010_v11, %v3870_v12  ;;  %v3875_v25 = vadd.f32 %v5377_v10, %v3537_v40  ;;  %v3535_v21 = vadd.f32 %v3452_v53, %v6962_v15  ;;  %v3951_v46 = vmax.f32 %v3915_v50, 0.0 }
 0x219   : > { %v5326_v0 = vpop.f32.mrf.mxu1  ;;  %v5382_v3 = vpop.f32.mrf.mxu0 }
 0x21a   : > { %v3949_v61 = vmax.f32 %v3913_v2, 0.0  ;;  %v3538_v49 = vadd.f32 %v5326_v0, %v6965_v52  ;;  %v4630_v35 = vpack.c.bf16 %v3951_v46, %v3950_v18  ;;  %v3873_v5 = vadd.f32 %v3790_v28, %v3535_v21 }
 0x21b   : > { %v3455_v24 = vpop.f32.mrf.mxu1  ;;  %v3809_v43 = vpop.f32.mrf.mxu0  ;;  %v3918_v33 = vadd.f32 %v7010_v11, %v3875_v25 }
 0x21c   : > { %v4625_v59 = vpack.c.bf16 %v3949_v61, %v3948_v14  ;;  %v3876_v10 = vadd.f32 %v5378_v44, %v3538_v49  ;;  %4680 = vst [vmem:[%s7024_s12 + $0x48] sm:$0xff] %v4630_v35   ;;  %v3536_v15 = vadd.f32 %v3455_v24, %v6968_v60  ;;  %v3916_v52 = vadd.f32 %v7010_v11, %v3873_v5 }
 0x21d   : > { %v5329_v37 = vpop.f32.mrf.mxu1  ;;  %v5385_v41 = vpop.f32.mrf.mxu0  ;;  %v3954_v62 = vmax.f32 %v3918_v33, 0.0 }
 0x21e   : > { %4679 = vst [vmem:[%s7024_s12 + $0x40] sm:$0xff] %v4625_v59   ;;  %v3919_v6 = vadd.f32 %v7010_v11, %v3876_v10  ;;  %v3541_v13 = vadd.f32 %v5329_v37, %v6971_v51  ;;  %v3874_v27 = vadd.f32 %v3793_v54, %v3536_v15  ;;  %v3952_v57 = vmax.f32 %v3916_v52, 0.0 }
 0x21f   : > { %v3468_v28 = vpop.f32.mrf.mxu1  ;;  %v3822_v9 = vpop.f32.mrf.mxu0 }
 0x220   : > { %v3955_v16 = vmax.f32 %v3919_v6, 0.0  ;;  %v3879_v42 = vadd.f32 %v5381_v8, %v3541_v13  ;;  %v3539_v34 = vadd.f32 %v3468_v28, %v6974_v47  ;;  %v3917_v60 = vadd.f32 %v7010_v11, %v3874_v27 }
 0x221   : > { %v5330_v44 = vpop.f32.mrf.mxu1  ;;  %v5386_v51 = vpop.f32.mrf.mxu0 }
 0x222   : > { %v4640_v30 = vpack.c.bf16 %v3955_v16, %v3954_v62  ;;  %v3877_v39 = vadd.f32 %v3806_v31, %v3539_v34  ;;  %v3542_v29 = vadd.f32 %v5330_v44, %v6977_v55  ;;  %v3953_v17 = vmax.f32 %v3917_v60, 0.0 }
 0x223   : > { %v3471_v4 = vpop.f32.mrf.mxu1  ;;  %v3922_v54 = vadd.f32 %v7010_v11, %v3879_v42  ;;  %v3825_v45 = vpop.f32.mrf.mxu0 }
 0x224   : > { %4682 = vst [vmem:[%s7024_s12 + $0x58] sm:$0xff] %v4640_v30   ;;  %v3880_v1 = vadd.f32 %v5382_v3, %v3542_v29  ;;  %v3540_v26 = vadd.f32 %v3471_v4, %v6980_v20  ;;  %v4635_v22 = vpack.c.bf16 %v3953_v17, %v3952_v57  ;;  %v3920_v63 = vadd.f32 %v7010_v11, %v3877_v39 }
 0x225   : > { %v5333_v47 = vpop.f32.mrf.mxu1  ;;  %v3958_v40 = vmax.f32 %v3922_v54, 0.0  ;;  %v5389_v0 = vpop.f32.mrf.mxu0 }
 0x226   : > { %v3923_v38 = vadd.f32 %v7010_v11, %v3880_v1  ;;  %v3878_v8 = vadd.f32 %v3809_v43, %v3540_v26  ;;  %v3545_v55 = vadd.f32 %v5333_v47, %v6983_v7  ;;  %4681 = vst [vmem:[%s7024_s12 + $0x50] sm:$0xff] %v4635_v22   ;;  %v3956_v25 = vmax.f32 %v3920_v63, 0.0 }
 0x227   : > { %v3484_v12 = vpop.f32.mrf.mxu1  ;;  %v3838_v43 = vpop.f32.mrf.mxu0 }
 0x228   : > { %v3959_v50 = vmax.f32 %v3923_v38, 0.0  ;;  %v3921_v53 = vadd.f32 %v7010_v11, %v3878_v8  ;;  %v3543_v31 = vadd.f32 %v3484_v12, %v6986_v23  ;;  %v3883_v20 = vadd.f32 %v5385_v41, %v3545_v55 }
 0x229   : > { %v5334_v2 = vpop.f32.mrf.mxu1  ;;  %v5390_v27 = vpop.f32.mrf.mxu0 }
 0x22a   : > { %v4650_v21 = vpack.c.bf16 %v3959_v50, %v3958_v40  ;;  %v3957_v18 = vmax.f32 %v3921_v53, 0.0  ;;  %v3881_v46 = vadd.f32 %v3822_v9, %v3543_v31  ;;  %v3546_v7 = vadd.f32 %v5334_v2, %v6989_v48 }
 0x22b   : > { %v3487_v3 = vpop.f32.mrf.mxu1  ;;  %v3926_v49 = vadd.f32 %v7010_v11, %v3883_v20  ;;  %v3841_v60 = vpop.f32.mrf.mxu0 }
 0x22c   : > { %4684 = vst [vmem:[%s7024_s12 + $0x68] sm:$0xff] %v4650_v21   ;;  %v4645_v14 = vpack.c.bf16 %v3957_v18, %v3956_v25  ;;  %v3544_v61 = vadd.f32 %v3487_v3, %v6992_v58  ;;  %v3884_v35 = vadd.f32 %v5386_v51, %v3546_v7  ;;  %v3924_v23 = vadd.f32 %v7010_v11, %v3881_v46 }
 0x22d   : > { %v5337_v5 = vpop.f32.mrf.mxu1  ;;  %v3962_v37 = vmax.f32 %v3926_v49, 0.0 }
 0x22e   : > { %4683 = vst [vmem:[%s7024_s12 + $0x60] sm:$0xff] %v4645_v14   ;;  %v3882_v24 = vadd.f32 %v3825_v45, %v3544_v61  ;;  %v3549_v59 = vadd.f32 %v5337_v5, %v6995_v36  ;;  %v3927_v33 = vadd.f32 %v7010_v11, %v3884_v35  ;;  %v3960_v13 = vmax.f32 %v3924_v23, 0.0 }
 0x22f   : > { %v3500_v10 = vpop.f32.mrf.mxu1 }
 0x230   : > { %v3925_v48 = vadd.f32 %v7010_v11, %v3882_v24  ;;  %v3887_v15 = vadd.f32 %v5389_v0, %v3549_v59  ;;  %v3547_v58 = vadd.f32 %v3500_v10, %v6998_v32  ;;  %v3963_v41 = vmax.f32 %v3927_v33, 0.0 }
 0x231   : > { %v5338_v6 = vpop.f32.mrf.mxu1 }
 0x232   : > { %v3961_v52 = vmax.f32 %v3925_v48, 0.0  ;;  %v3550_v28 = vadd.f32 %v5338_v6, %v7001_v56  ;;  %v4660_v9 = vpack.c.bf16 %v3963_v41, %v3962_v37  ;;  %v3885_v36 = vadd.f32 %v3838_v43, %v3547_v58 }
 0x233   : > { %v3503_v62 = vpop.f32.mrf.mxu1  ;;  %v3930_v42 = vadd.f32 %v7010_v11, %v3887_v15 }
 0x234   : > { %v4655_v16 = vpack.c.bf16 %v3961_v52, %v3960_v13  ;;  %v3888_v34 = vadd.f32 %v5390_v27, %v3550_v28  ;;  %4686 = vst [vmem:[%s7024_s12 + $0x78] sm:$0xff] %v4660_v9   ;;  %v3548_v32 = vadd.f32 %v3503_v62, %v7004_v19  ;;  %v3928_v30 = vadd.f32 %v7010_v11, %v3885_v36 }
 0x235   : > { %v3966_v56 = vmax.f32 %v3930_v42, 0.0 }
 0x236   : > { %4685 = vst [vmem:[%s7024_s12 + $0x70] sm:$0xff] %v4655_v16   ;;  %v3931_v44 = vadd.f32 %v7010_v11, %v3888_v34  ;;  %v3886_v39 = vadd.f32 %v3841_v60, %v3548_v32  ;;  %v3964_v17 = vmax.f32 %v3928_v30, 0.0 }
 0x238   : > { %v3967_v29 = vmax.f32 %v3931_v44, 0.0  ;;  %v3929_v51 = vadd.f32 %v7010_v11, %v3886_v39 }
 0x23a   : > { %v4670_v57 = vpack.c.bf16 %v3967_v29, %v3966_v56  ;;  %v3965_v4 = vmax.f32 %v3929_v51, 0.0 }
 0x23c   : > { %4688 = vst [vmem:[%s7024_s12 + $0x88] sm:$0xff] %v4670_v57   ;;  %v4665_v54 = vpack.c.bf16 %v3965_v4, %v3964_v17 }
 0x23e   : > { %4687 = vst [vmem:[%s7024_s12 + $0x80] sm:$0xff] %v4665_v54  }
 0x23f PF: > { %s13_s14 = sadd.s32 1, %s5589_s14   ;;  %s7200_s12 = smov %s5585_s13 }
 0x240   : > { %p10_p5 = scmp.ge.s32.totalorder %s13_s14, 4   ;;  %s7201_s13 = smov %s7203_s15 }
 0x242   :  { %12 = sbr.rel (!%p10_p5) target bundleno = 2 (0x2), region = 70 }

// kernel: att_depth_forward.19
= control target key start
LH: loop header
LB: loop body
LE: loop exit
PB: predicated region body
PF: predicated region fallthrough
CT: control target
= control target key end

     0   :  { %s5575_s12 = smov 0   ;;  %s5577_s13 = smov 0   ;;  %s7079_s0 = inlined_call_operand.vmem [shape: bf16[2,1,326,128], index: 0, kind: input, shape index: {}]   ;;  %s7080_s1 = inlined_call_operand.vmem [shape: bf16[9,128,128], index: 1, kind: input, shape index: {}]   ;;  %s7081_s2 = inlined_call_operand.vmem [shape: f32[1,1,128], index: 2, kind: input, shape index: {}]   ;;  %s7082_s3 = inlined_call_operand.vmem [shape: bf16[2,288,128], index: 3, kind: output, shape index: {}]  }
   0x1   :  { %s5579_s14 = smov 0  }
   0x2 LB: > { %s25_s15 = sadd.s32 1, %s5549_s13  ;;  %p4206_p0 = scmp.ge.s32.totalorder %s5553_s14, 1  ;;  %s5553_s14 = sphi %s5579_s14, %s13_s14   ;;  %s5549_s13 = sphi %s5577_s13, %s7165_s13   ;;  %s5545_s12 = sphi %s5575_s12, %s7164_s12  }
   0x3   : > { %p27_p1 = scmp.ge.s32.totalorder %s25_s15, 2  ;;  %p157_p2 = scmp.lt.s32.totalorder %s5553_s14, 3 }
   0x5   : > { %s7167_s15 = smov (%p27_p1, %s25_s15), 0  ;;  %p158_p3 = pnand %p4206_p0, %p157_p2 }
   0x7   : > { %161 = sbr.rel (%p158_p3) target bundleno = 573 (0x23d), region = 32 }
   0xc   : > { %v5397_v0 = vld [vmem:[%s7080_s1 + $0x78] sm:$0xff]   ;;  %p189_p4 = scmp.lt.s32.totalorder %s5545_s12, 1  ;;  %v5398_v1 = vld [vmem:[%s7080_s1 + $0x70] sm:$0xff]   ;;  %v5399_v2 = vld [vmem:[%s7080_s1 + $0x68] sm:$0xff]   ;;  %vm372_vm0 = vsmask.f32 7424 }
   0xd   : > { %5355 = vmatprep.subr.bf16.mxu1 %v5397_v0  ;;  %4887 = vmatprep.subr.bf16.mxu0 %v5397_v0  ;;  %v5400_v3 = vld [vmem:[%s7080_s1 + $0x60] sm:$0xff]   ;;  %v5401_v6 = vld [vmem:[%s7080_s1 + $0x58] sm:$0xff]   ;;  %v5402_v17 = vld [vmem:[%s7080_s1 + $0x50] sm:$0xff]   ;;  %vm1028_vm1 = vcmask 1046528   ;;  %vm2300_vm2 = vcmask 1045504   ;;  %vm3572_vm4 = vcmask 1044480  }
   0xe   : > { %s7169_s12 = smov (!%p189_p4, %s5545_s12), 1  ;;  %5363 = vmatpush3.bf16.msra.mxu1 %v5397_v0  ;;  %4888 = vmatpush3.bf16.msra.mxu0 %v5397_v0  ;;  %v5403_v26 = vld [vmem:[%s7080_s1 + $0x48] sm:$0xff]   ;;  %v5404_v32 = vld [vmem:[%s7080_s1 + $0x40] sm:$0xff]   ;;  %v5408_v41 = vld [vmem:[%s7080_s1 + $0x38] sm:$0xff]   ;;  %vm1829_vm3 = vsmask.f32 6400 }
   0xf   : > { %5356 = vmatprep.subr.bf16.mxu1 %v5398_v1  ;;  %4889 = vmatprep.subr.bf16.mxu0 %v5398_v1  ;;  %s5371_s22 = smul.u32 164, %s7169_s12  ;;  %v5413_v47 = vld [vmem:[%s7080_s1 + $0xb8] sm:$0xff]   ;;  %v5412_v52 = vld [vmem:[%s7080_s1 + $0x30] sm:$0xff]   ;;  %vm3101_vm5 = vsmask.f32 5376 }
  0x10   : > { %v5416_v62 = vld [vmem:[%s7080_s1 + $0xb0] sm:$0xff]   ;;  %s5372_s6 = smul.u32 144, %s7169_s12 }
  0x11   : > { %s5608_s25 = scalar_lea.vmem %s7079_s0, %s5371_s22 }
  0x12   : > { %5364 = vmatpush3.bf16.msra.mxu1 %v5398_v1  ;;  %4890 = vmatpush3.bf16.msra.mxu0 %v5398_v1  ;;  %v5614_v4 = vld [vmem:[%s5608_s25 + $0x40] sm:$0xff]   ;;  %v5617_v5 = vld [vmem:[%s5608_s25 + $0x48] sm:$0xff]   ;;  %v5646_v22 = vld [vmem:[%s5608_s25 + $0x50] sm:$0xff]   ;;  %s6985_s9 = scalar_lea.vmem %s7082_s3, %s5372_s6 }
  0x13   : > { %5357 = vmatprep.subr.bf16.mxu1 %v5399_v2  ;;  %4891 = vmatprep.subr.bf16.mxu0 %v5399_v2  ;;  %v437_v7 = vshll.u32 %v5614_v4, 16  ;;  %v441_v8 = vshrl.u32 %v5614_v4, 16  ;;  %v445_v9 = vshll.u32 %v5617_v5, 16  ;;  %v209_v10 = vld [vmem:[%s5608_s25] sm:$0xf]  ;;  %v5635_v15 = vld [vmem:[%s5608_s25 + $0x8] sm:$0xff]  }
  0x14   : > { %v5629_v13 = vld [vmem:[%s5608_s25 + $0x4] sm:$0xf]  ;;  %v381_v20 = vshll.u32 %v5635_v15, 16  ;;  %v5649_v25 = vld [vmem:[%s5608_s25 + $0x10] sm:$0xff]   ;;  %v453_v28 = vshll.u32 %v5646_v22, 16  ;;  %v5656_v29 = vld [vmem:[%s5608_s25 + $0x58] sm:$0xff]  }
  0x15   : > { %v5626_v11 = vrot.slane %v437_v7, 1  ;;  %v447_v12 = vrot.slane %v445_v9, 1  ;;  %v5632_v14 = vcombine.low %v209_v10, %v5629_v13  ;;  %v449_v30 = vshrl.u32 %v5617_v5, 16  ;;  %v5666_v35 = vld [vmem:[%s5608_s25 + $0x18] sm:$0xff]   ;;  %v5671_v39 = vld [vmem:[%s5608_s25 + $0x60] sm:$0xff]   ;;  %v5685_v50 = vld [vmem:[%s5608_s25 + $0x68] sm:$0xff]  }
  0x16   : > { %5365 = vmatpush3.bf16.msra.mxu1 %v5399_v2  ;;  %4892 = vmatpush3.bf16.msra.mxu0 %v5399_v2  ;;  %v383_v24 = vrot.slane %v381_v20, 1  ;;  %v385_v33 = vshrl.u32 %v5635_v15, 16  ;;  %v389_v34 = vshll.u32 %v5649_v25, 16  ;;  %v455_v36 = vrot.slane %v453_v28, 1  ;;  %v5679_v46 = vld [vmem:[%s5608_s25 + $0x20] sm:$0xff]   ;;  %v5697_v60 = vld [vmem:[%s5608_s25 + $0x28] sm:$0xff]  }
  0x17   : > { %5358 = vmatprep.subr.bf16.mxu1 %v5400_v3  ;;  %4893 = vmatprep.subr.bf16.mxu0 %v5400_v3  ;;  %v443_v16 = vor.u32 %v441_v8, %v5626_v11  ;;  %v374_v18 = vshrl.u32 %v5632_v14, 16  ;;  %v376_v19 = vshll.u32 %v5632_v14, 16  ;;  %v457_v37 = vshrl.u32 %v5646_v22, 16  ;;  %v5706_v1 = vld [vmem:[%s5608_s25 + $0x70] sm:$0xff]   ;;  %v5417_v2 = vld [vmem:[%s7080_s1 + $0x28] sm:$0xff]  }
  0x18   : > { %v461_v38 = vshll.u32 %v5656_v29, 16  ;;  %v451_v40 = vor.u32 %v449_v30, %v447_v12  ;;  %v393_v42 = vshrl.u32 %v5649_v25, 16  ;;  %v397_v43 = vshll.u32 %v5666_v35, 16 }
  0x19   : > { %v448_v21 = vsel %vm372_vm0, %v443_v16, %v447_v12  ;;  %v378_v23 = vrot.slane %v376_v19, 1  ;;  %v387_v44 = vor.u32 %v385_v33, %v383_v24  ;;  %v391_v45 = vrot.slane %v389_v34, 1  ;;  %v5420_v16 = vld [vmem:[%s7080_s1 + $0xa8] sm:$0xff]   ;;  %v5733_v33 = vld [vmem:[%s5608_s25 + $0x38] sm:$0xff]   ;;  %v5424_v34 = vld [vmem:[%s7080_s1 + $0xa0] sm:$0xff]  }
  0x1a   : > { %5366 = vmatpush3.bf16.msra.mxu1 %v5400_v3  ;;  %4894 = vmatpush3.bf16.msra.mxu0 %v5400_v3  ;;  %v459_v48 = vor.u32 %v457_v37, %v455_v36  ;;  %v463_v49 = vrot.slane %v461_v38, 1  ;;  %v456_v51 = vsel %vm372_vm0, %v451_v40, %v455_v36  ;;  %v465_v53 = vshrl.u32 %v5656_v29, 16  ;;  %v5742_v40 = vld [vmem:[%s5608_s25 + $0x80] sm:$0xff]  }
  0x1b   : > { %5359 = vmatprep.subr.bf16.mxu1 %v5401_v6  ;;  %4895 = vmatprep.subr.bf16.mxu0 %v5401_v6  ;;  %v379_v27 = vor.u32 %v378_v23, %v374_v18  ;;  %v395_v54 = vor.u32 %v393_v42, %v391_v45  ;;  %v399_v55 = vrot.slane %v397_v43, 1  ;;  %v392_v56 = vsel %vm372_vm0, %v387_v44, %v391_v45  ;;  %v5723_v23 = vld [vmem:[%s5608_s25 + $0x78] sm:$0xff]  }
  0x1c   : > { %4919 = vmatprep.mubr.bf16.mxu1 %v448_v21  ;;  %v469_v57 = vshll.u32 %v5671_v39, 16  ;;  %v401_v58 = vshrl.u32 %v5666_v35, 16  ;;  %v405_v59 = vshll.u32 %v5679_v46, 16  ;;  %v464_v61 = vsel %vm372_vm0, %v459_v48, %v463_v49 }
  0x1d   : > { %v384_v31 = vsel %vm372_vm0, %v379_v27, %v383_v24  ;;  %v473_v63 = vshrl.u32 %v5671_v39, 16  ;;  %v477_v0 = vshll.u32 %v5685_v50, 16  ;;  %v400_v3 = vsel %vm372_vm0, %v395_v54, %v399_v55  ;;  %v5422_v24 = vld [vmem:[%s7080_s1 + $0x20] sm:$0xff]  }
  0x1e   : > { %5367 = vmatpush3.bf16.msra.mxu1 %v5401_v6  ;;  %4896 = vmatpush3.bf16.msra.mxu0 %v5401_v6  ;;  %v409_v6 = vshrl.u32 %v5679_v46, 16  ;;  %v413_v7 = vshll.u32 %v5697_v60, 16  ;;  %v467_v8 = vor.u32 %v465_v53, %v463_v49  ;;  %v471_v9 = vrot.slane %v469_v57, 1  ;;  %v5431_v57 = vld [vmem:[%s7080_s1 + $0x10] sm:$0xff]  }
  0x1f   : > { %5360 = vmatprep.subr.bf16.mxu1 %v5402_v17  ;;  %4897 = vmatprep.subr.bf16.mxu0 %v5402_v17  ;;  %v403_v10 = vor.u32 %v401_v58, %v399_v55  ;;  %v407_v12 = vrot.slane %v405_v59, 1  ;;  %v479_v19 = vrot.slane %v477_v0, 1  ;;  %v481_v20 = vshrl.u32 %v5685_v50, 16  ;;  %v1007_v0 = vld [vmem:[%s5608_s25] sm:$0xe] }
  0x20   : > { %4903 = vmatprep.mubr.bf16.mxu0 %v384_v31  ;;  %v475_v18 = vor.u32 %v473_v63, %v471_v9  ;;  %v485_v21 = vshll.u32 %v5706_v1, 16  ;;  %v415_v27 = vrot.slane %v413_v7, 1  ;;  %v417_v28 = vshrl.u32 %v5697_v60, 16  ;;  %v5432_v7 = vld [vmem:[%s7080_s1 + $0x90] sm:$0xff]  }
  0x21   : > { %v472_v30 = vsel %vm372_vm0, %v467_v8, %v471_v9  ;;  %v408_v31 = vsel %vm372_vm0, %v403_v10, %v407_v12  ;;  %v489_v36 = vshrl.u32 %v5706_v1, 16  ;;  %v493_v38 = vshll.u32 %v5723_v23, 16  ;;  %v5437_v8 = vld [vmem:[%s5608_s25 + $0x90] ss:$0 sps:$4 sm:$0x11]  }
  0x22   : > { %5368 = vmatpush3.bf16.msra.mxu1 %v5402_v17  ;;  %4898 = vmatpush3.bf16.msra.mxu0 %v5402_v17  ;;  %v5718_v17 = vld [vmem:[%s5608_s25 + $0x30] sm:$0xff]   ;;  %v480_v37 = vsel %vm372_vm0, %v475_v18, %v479_v19  ;;  %v429_v42 = vshll.u32 %v5733_v33, 16  ;;  %v483_v44 = vor.u32 %v481_v20, %v479_v19  ;;  %v487_v45 = vrot.slane %v485_v21, 1  ;;  %v5434_v19 = vld [vmem:[%s7080_s1 + $0x88] sm:$0xff]  }
  0x23   : > { %5361 = vmatprep.subr.bf16.mxu1 %v5403_v26  ;;  %4899 = vmatprep.subr.bf16.mxu0 %v5403_v26  ;;  %v419_v48 = vor.u32 %v417_v28, %v415_v27  ;;  %v495_v54 = vrot.slane %v493_v38, 1  ;;  %v497_v55 = vshrl.u32 %v5723_v23, 16  ;;  %v5435_v20 = vld [vmem:[%s7080_s1 + $0x8] sm:$0xff]  }
  0x24   : > { %v491_v53 = vor.u32 %v489_v36, %v487_v45  ;;  %v431_v59 = vrot.slane %v429_v42, 1  ;;  %v5439_v36 = vld [vmem:[%s7080_s1] sm:$0xff]   ;;  %v5441_v42 = vld [vmem:[%s7080_s1 + $0xf8] sm:$0xff]  }
  0x26   : > { %5369 = vmatpush3.bf16.msra.mxu1 %v5403_v26  ;;  %4900 = vmatpush3.bf16.msra.mxu0 %v5403_v26  ;;  %v411_v26 = vor.u32 %v409_v6, %v407_v12  ;;  %v496_v6 = vsel %vm372_vm0, %v491_v53, %v495_v54  ;;  %v4276_v12 = vcombine.low %v1007_v0, %v5629_v13  ;;  %v5444_v53 = vld [vmem:[%s7080_s1 + $0x130] sm:$0xff]   ;;  %v1042_v0 = vrot.slane %v5733_v33, 1 }
  0x27   : > { %5362 = vmatprep.subr.bf16.mxu1 %v5404_v32  ;;  %4901 = vmatprep.subr.bf16.mxu0 %v5404_v32 }
  0x28   : > { %v416_v43 = vsel %vm372_vm0, %v411_v26, %v415_v27  ;;  %v1029_v13 = vrot.slane %v4276_v12, 1  ;;  %v1030_v26 = vrot.slane %v5635_v15, 1  ;;  %v5454_v12 = vld [vmem:[%s7080_s1 + $0x108] sm:$0xff]  }
  0x2a   : > { %5370 = vmatpush3.bf16.msra.mxu1 %v5404_v32  ;;  %4902 = vmatpush3.bf16.msra.mxu0 %v5404_v32  ;;  %v421_v32 = vshll.u32 %v5718_v17, 16 }
  0x2b   : > { %4939 = vmatprep.subr.bf16.mxu1 %v5408_v41  ;;  %4991 = vmatprep.subr.bf16.mxu0 %v5413_v47 }
  0x2c   : > { %v423_v49 = vrot.slane %v421_v32, 1 }
  0x2d   : > { %4920 = vmatmul.mubr.bf16.vlgmr.msra.gmra.mxu1 %v456_v51  ;;  %4904 = vmatmul.mubr.bf16.vlgmr.msra.gmra.mxu0 %v392_v56  ;;  %v5428_v51 = vld [vmem:[%s7080_s1 + $0x98] sm:$0xff]   ;;  %v501_v56 = vshll.u32 %v5742_v40, 16 }
  0x2e   : > { %4940 = vmatpush3.bf16.msra.mxu1 %v5408_v41  ;;  %4992 = vmatpush3.bf16.msra.mxu0 %v5413_v47  ;;  %v425_v41 = vshrl.u32 %v5718_v17, 16  ;;  %v5426_v47 = vld [vmem:[%s7080_s1 + $0x18] sm:$0xff]   ;;  %v424_v63 = vsel %vm372_vm0, %v419_v48, %v423_v49 }
  0x2f   : > { %4941 = vmatprep.subr.bf16.mxu1 %v5412_v52  ;;  %4923 = vmatprep.mubr.bf16.mxu1 %v464_v61  ;;  %v433_v61 = vshrl.u32 %v5733_v33, 16  ;;  %v503_v9 = vrot.slane %v501_v56, 1  ;;  %v5446_v56 = vld [vmem:[%s7080_s1 + $0x128] sm:$0xff]  }
  0x30   : > { %4993 = vmatprep.subr.bf16.mxu0 %v5416_v62  ;;  %4907 = vmatprep.mubr.bf16.mxu0 %v400_v3  ;;  %v427_v58 = vor.u32 %v425_v41, %v423_v49  ;;  %v1032_v41 = vrot.slane %v5649_v25, 1 }
  0x31   : > { %v435_v18 = vor.u32 %v433_v61, %v431_v59  ;;  %v5448_v61 = vld [vmem:[%s7080_s1 + $0x120] sm:$0xff]  }
  0x32   : > { %4942 = vmatpush3.bf16.msra.mxu1 %v5412_v52  ;;  %4994 = vmatpush3.bf16.msra.mxu0 %v5416_v62  ;;  %v5754_v52 = vld [vmem:[%s5608_s25 + $0x88] sm:$0xff]   ;;  %v488_v62 = vsel %vm372_vm0, %v483_v44, %v487_v45  ;;  %v432_v10 = vsel %vm372_vm0, %v427_v58, %v431_v59  ;;  %v1034_v45 = vrot.slane %v5666_v35, 1  ;;  %v1033_v49 = vsel %vm1028_vm1, %v1030_v26, %v1032_v41  ;;  %v5443_v59 = vld [vmem:[%s7080_s1 + $0xf0] sm:$0xff]  }
  0x33   : > { %4943 = vmatprep.subr.bf16.mxu1 %v5417_v2  ;;  %4995 = vmatprep.subr.bf16.mxu0 %v5420_v16  ;;  %v509_v3 = vshll.u32 %v5754_v52, 16  ;;  %v440_v28 = vsel %vm372_vm0, %v435_v18, %v5626_v11  ;;  %v1062_v44 = vrot.slane %v5754_v52, 1  ;;  %v1050_v18 = vrot.slane %v5656_v29, 1 }
  0x35   : > { %4924 = vmatmul.mubr.bf16.gmra.mxu1 %v472_v30  ;;  %4908 = vmatmul.mubr.bf16.gmra.mxu0 %v408_v31  ;;  %v513_v30 = vshrl.u32 %v5754_v52, 16  ;;  %v517_v31 = vshll.u32 %v5437_v8, 16 }
  0x36   : > { %4944 = vmatpush3.bf16.msra.mxu1 %v5417_v2  ;;  %4996 = vmatpush3.bf16.msra.mxu0 %v5420_v16  ;;  %v505_v2 = vshrl.u32 %v5742_v40, 16  ;;  %v499_v16 = vor.u32 %v497_v55, %v495_v54  ;;  %v1035_v54 = vsel %vm1028_vm1, %v1032_v41, %v1034_v45  ;;  %v1036_v55 = vrot.slane %v5679_v46, 1 }
  0x37   : > { %4927 = vmatprep.mubr.bf16.mxu1 %v480_v37  ;;  %4945 = vmatprep.subr.bf16.mxu1 %v5422_v24  ;;  %v1031_v37 = vsel %vm1028_vm1, %v1029_v13, %v1030_v26  ;;  %v519_v38 = vrot.slane %v517_v31, 1  ;;  %v1345_v13 = vld [vmem:[%s5608_s25 + $0x8] sm:$0xe]  ;;  %v1346_v26 = vld [vmem:[%s5608_s25 + $0xc] sm:$0xf]  ;;  %v1054_v31 = vrot.slane %v5685_v50, 1 }
  0x38   : > { %4997 = vmatprep.subr.bf16.mxu0 %v5424_v34  ;;  %4911 = vmatprep.mubr.bf16.mxu0 %v416_v43  ;;  %v507_v21 = vor.u32 %v505_v2, %v503_v9  ;;  %v504_v27 = vsel %vm372_vm0, %v499_v16, %v503_v9  ;;  %v5442_v43 = vld [vmem:[%s7080_s1 + $0x138] sm:$0xff]   ;;  %v1037_v58 = vsel %vm1028_vm1, %v1034_v45, %v1036_v55  ;;  %v1048_v16 = vrot.slane %v5646_v22, 1 }
  0x39   : > { %v5449_v9 = vld [vmem:[%s7080_s1 + $0xd8] sm:$0xff]   ;;  %v1058_v45 = vrot.slane %v5723_v23, 1 }
  0x3a   : > { %4946 = vmatpush3.bf16.msra.mxu1 %v5422_v24  ;;  %4998 = vmatpush3.bf16.msra.mxu0 %v5424_v34  ;;  %v511_v24 = vrot.slane %v509_v3, 1  ;;  %v5438_v34 = vld [vmem:[%s7080_s1 + $0x80] sm:$0xff]   ;;  %v5450_v3 = vld [vmem:[%s7080_s1 + $0x118] sm:$0xff]  }
  0x3b   : > { %4947 = vmatprep.subr.bf16.mxu1 %v5426_v47  ;;  %4999 = vmatprep.subr.bf16.mxu0 %v5428_v51 }
  0x3c   : > { %v512_v32 = vsel %vm372_vm0, %v507_v21, %v511_v24  ;;  %v515_v11 = vor.u32 %v513_v30, %v511_v24  ;;  %v5455_v21 = vld [vmem:[%s7080_s1 + $0xc0] sm:$0xff]   ;;  %v5878_v24 = vld [vmem:[%s7080_s1 + $0x1b8] sm:$0xff]  }
  0x3d   : > { %4928 = vmatmul.mubr.bf16.gmra.mxu1 %v488_v62  ;;  %4912 = vmatmul.mubr.bf16.gmra.mxu0 %v424_v63  ;;  %v1040_v62 = vrot.slane %v5718_v17, 1  ;;  %v5445_v63 = vld [vmem:[%s7080_s1 + $0xe8] sm:$0xff]   ;;  %v5889_v30 = vld [vmem:[%s5608_s25 + $0x18] sm:$0xff]  }
  0x3e   : > { %4948 = vmatpush3.bf16.msra.mxu1 %v5426_v47  ;;  %5000 = vmatpush3.bf16.msra.mxu0 %v5428_v51  ;;  %v1064_v47 = vrot.slane %v5437_v8, 1  ;;  %v520_v48 = vsel %vm372_vm0, %v515_v11, %v519_v38  ;;  %v1046_v8 = vrot.slane %v5617_v5, 1  ;;  %v1056_v38 = vrot.slane %v5706_v1, 1 }
  0x3f   : > { %4931 = vmatprep.mubr.bf16.mxu1 %v496_v6  ;;  %4949 = vmatprep.subr.bf16.mxu1 %v5431_v57  ;;  %v1043_v2 = vsel %vm1028_vm1, %v1040_v62, %v1042_v0  ;;  %v1044_v6 = vrot.slane %v5614_v4, 1 }
  0x40   : > { %5001 = vmatprep.subr.bf16.mxu0 %v5432_v7  ;;  %4915 = vmatprep.mubr.bf16.mxu0 %v432_v10  ;;  %v5807_v51 = vsel %vm1028_vm1, %v1062_v44, %v1064_v47  ;;  %v5451_v10 = vld [vmem:[%s7080_s1 + $0xd0] sm:$0xff]   ;;  %v1057_v47 = vsel %vm1028_vm1, %v1054_v31, %v1056_v38 }
  0x42   : > { %4950 = vmatpush3.bf16.msra.mxu1 %v5431_v57  ;;  %5002 = vmatpush3.bf16.msra.mxu0 %v5432_v7  ;;  %v1038_v57 = vrot.slane %v5697_v60, 1  ;;  %v5452_v7 = vld [vmem:[%s7080_s1 + $0x110] sm:$0xff]  }
  0x43   : > { %5003 = vmatprep.subr.bf16.mxu0 %v5434_v19  ;;  %4951 = vmatprep.subr.bf16.mxu1 %v5435_v20 }
  0x45   : > { %4932 = vmatmul.mubr.bf16.gmra.mxu1 %v504_v27  ;;  %4916 = vmatmul.mubr.bf16.gmra.mxu0 %v440_v28  ;;  %v5884_v27 = vld [vmem:[%s5608_s25 + $0x10] sm:$0xff]   ;;  %v1052_v28 = vrot.slane %v5671_v39, 1 }
  0x46   : > { %5004 = vmatpush3.bf16.msra.mxu0 %v5434_v19  ;;  %4935 = vmatprep.mubr.bf16.mxu1 %v512_v32  ;;  %v5453_v19 = vld [vmem:[%s7080_s1 + $0xc8] sm:$0xff]   ;;  %v2302_v32 = vrot.slane %v5884_v27, 2 }
  0x47   : > { %4952 = vmatpush3.bf16.msra.mxu1 %v5435_v20  ;;  %5005 = vmatprep.subr.bf16.mxu0 %v5438_v34  ;;  %v1051_v20 = vsel %vm1028_vm1, %v1048_v16, %v1050_v18 }
  0x48   : > { %4953 = vmatprep.subr.bf16.mxu1 %v5439_v36  ;;  %5007 = vmatprep.mubr.bf16.mxu0 %v1031_v37  ;;  %v1055_v37 = vsel %vm1028_vm1, %v1052_v28, %v1054_v31 }
  0x4a   : > { %5006 = vmatpush3.bf16.msra.mxu0 %v5438_v34  ;;  %v1053_v34 = vsel %vm1028_vm1, %v1050_v18, %v1052_v28 }
  0x4b   : > { %4954 = vmatpush3.bf16.msra.mxu1 %v5439_v36  ;;  %5095 = vmatprep.subr.bf16.mxu0 %v5442_v43  ;;  %v5901_v36 = vcombine.low %v1345_v13, %v1346_v26 }
  0x4c   : > { %5043 = vmatprep.subr.bf16.mxu1 %v5441_v42 }
  0x4d   : > { %4936 = vmatmul.mubr.bf16.gmra.mxu1 %v520_v48  ;;  %5008 = vmatmul.mubr.bf16.vlgmr.msra.gmra.mxu0 %v1033_v49  ;;  %v1831_v41 = vshrl.u32 %v5901_v36, 16  ;;  %v1842_v48 = vshll.u32 %v5884_v27, 16  ;;  %v1851_v49 = vshll.u32 %v5889_v30, 16 }
  0x4e   : > { %4955 = vmatprep.mubr.bf16.mxu1 %v5632_v14  ;;  %5096 = vmatpush3.bf16.msra.mxu0 %v5442_v43  ;;  %v1039_v14 = vsel %vm1028_vm1, %v1036_v55, %v1038_v57  ;;  %v1839_v43 = vshrl.u32 %v5884_v27, 16 }
  0x4f   : > { %5011 = vmatprep.mubr.bf16.mxu0 %v1035_v54  ;;  %5097 = vmatprep.subr.bf16.mxu0 %v5444_v53  ;;  %v1833_v54 = vrot.slane %v1831_v41, 1 }
  0x52   : > { %5098 = vmatpush3.bf16.msra.mxu0 %v5444_v53  ;;  %v1492_v53 = vrot.slane %v5901_v36, 1 }
  0x53   : > { %5099 = vmatprep.subr.bf16.mxu0 %v5446_v56 }
  0x55   : > { %4956 = vmatmul.mubr.bf16.vlgmr.msra.gmra.mxu1 %v5635_v15  ;;  %5012 = vmatmul.mubr.bf16.gmra.mxu0 %v1037_v58  ;;  %v1041_v15 = vsel %vm1028_vm1, %v1038_v57, %v1040_v62  ;;  %v1493_v57 = vrot.slane %v5884_v27, 1  ;;  %v1059_v58 = vsel %vm1028_vm1, %v1056_v38, %v1058_v45  ;;  %v5985_v38 = vld [vmem:[%s5608_s25 + $0x58] sm:$0xff]  }
  0x56   : > { %5044 = vmatpush3.bf16.msra.mxu1 %v5441_v42  ;;  %4959 = vmatprep.mubr.bf16.mxu1 %v5649_v25  ;;  %v5447_v25 = vld [vmem:[%s7080_s1 + $0xe0] sm:$0xff]   ;;  %v1834_v42 = vshll.u32 %v5901_v36, 16  ;;  %v5470_v36 = vld [vmem:[%s7080_s1 + $0x1a8] sm:$0xff]  }
  0x57   : > { %5045 = vmatprep.subr.bf16.mxu1 %v5443_v59  ;;  %5015 = vmatprep.mubr.bf16.mxu0 %v1039_v14  ;;  %v5924_v14 = vld [vmem:[%s5608_s25 + $0x20] sm:$0xff]  }
  0x58   : > { %5100 = vmatpush3.bf16.msra.mxu0 %v5446_v56  ;;  %v1836_v55 = vrot.slane %v1834_v42, 2  ;;  %v1841_v56 = vrot.slane %v1839_v43, 1 }
  0x59   : > { %5101 = vmatprep.subr.bf16.mxu0 %v5448_v61 }
  0x5a   : > { %5046 = vmatpush3.bf16.msra.mxu1 %v5443_v59  ;;  %v1844_v59 = vrot.slane %v1842_v48, 2  ;;  %v1837_v31 = vor.u32 %v1836_v55, %v1833_v54  ;;  %v5999_v54 = vld [vmem:[%s5608_s25 + $0x60] sm:$0xff]  }
  0x5b   : > { %5047 = vmatprep.subr.bf16.mxu1 %v5445_v63 }
  0x5c   : > { %5102 = vmatpush3.bf16.msra.mxu0 %v5448_v61  ;;  %v2279_v61 = vld [vmem:[%s5608_s25 + $0x8] sm:$0xc] }
  0x5d   : > { %4960 = vmatmul.mubr.bf16.gmra.mxu1 %v5666_v35  ;;  %5016 = vmatmul.mubr.bf16.gmra.mxu0 %v1041_v15  ;;  %v1045_v35 = vsel %vm1028_vm1, %v1042_v0, %v1044_v6  ;;  %v4369_v0 = vcombine.low %v2279_v61, %v1346_v26  ;;  %v1853_v15 = vrot.slane %v1851_v49, 2  ;;  %v6010_v61 = vld [vmem:[%s5608_s25 + $0x68] sm:$0xff]  }
  0x5e   : > { %4963 = vmatprep.mubr.bf16.mxu1 %v5679_v46  ;;  %5048 = vmatpush3.bf16.msra.mxu1 %v5445_v63  ;;  %v1047_v46 = vsel %vm1028_vm1, %v1044_v6, %v1046_v8  ;;  %v5929_v63 = vld [vmem:[%s5608_s25 + $0x28] sm:$0xff]   ;;  %v2306_v6 = vrot.slane %v5924_v14, 2 }
  0x5f   : > { %5019 = vmatprep.mubr.bf16.mxu0 %v1043_v2  ;;  %5049 = vmatprep.subr.bf16.mxu1 %v5447_v25  ;;  %v1857_v2 = vshrl.u32 %v5924_v14, 16  ;;  %v1866_v13 = vshrl.u32 %v5929_v63, 16 }
  0x60   : > { %5103 = vmatprep.subr.bf16.mxu0 %v5450_v3 }
  0x61   : > { %5104 = vmatpush3.bf16.msra.mxu0 %v5450_v3  ;;  %v5934_v3 = vld [vmem:[%s5608_s25 + $0x30] sm:$0xff]   ;;  %v1859_v18 = vrot.slane %v1857_v2, 1  ;;  %v1868_v43 = vrot.slane %v1866_v13, 1 }
  0x62   : > { %5050 = vmatpush3.bf16.msra.mxu1 %v5447_v25  ;;  %5105 = vmatprep.subr.bf16.mxu0 %v5452_v7  ;;  %v2301_v25 = vrot.slane %v4369_v0, 2  ;;  %v1878_v48 = vshll.u32 %v5934_v3, 16  ;;  %v2322_v0 = vrot.slane %v5999_v54, 2  ;;  %v6016_v2 = vld [vmem:[%s5608_s25 + $0x70] sm:$0xff]  }
  0x63   : > { %5051 = vmatprep.subr.bf16.mxu1 %v5449_v9 }
  0x65   : > { %4964 = vmatmul.mubr.bf16.gmra.mxu1 %v5697_v60  ;;  %5020 = vmatmul.mubr.bf16.gmra.mxu0 %v1045_v35  ;;  %v5456_v60 = vld [vmem:[%s7080_s1 + $0x100] sm:$0xff]   ;;  %v1860_v35 = vshll.u32 %v5924_v14, 16 }
  0x66   : > { %4967 = vmatprep.mubr.bf16.mxu1 %v5718_v17  ;;  %5023 = vmatprep.mubr.bf16.mxu0 %v1047_v46  ;;  %v1049_v17 = vsel %vm1028_vm1, %v1046_v8, %v1048_v16  ;;  %v5940_v8 = vld [vmem:[%s5608_s25 + $0x38] sm:$0xff]   ;;  %v5948_v46 = vld [vmem:[%s5608_s25 + $0x40] sm:$0xff]  }
  0x67   : > { %5052 = vmatpush3.bf16.msra.mxu1 %v5449_v9  ;;  %5106 = vmatpush3.bf16.msra.mxu0 %v5452_v7  ;;  %v1495_v7 = vrot.slane %v5889_v30, 1  ;;  %v5943_v9 = vsel %vm2300_vm2, %v2301_v25, %v2302_v32  ;;  %v1884_v55 = vshrl.u32 %v5940_v8, 16 }
  0x68   : > { %5053 = vmatprep.subr.bf16.mxu1 %v5451_v10  ;;  %5107 = vmatprep.subr.bf16.mxu0 %v5454_v12 }
  0x6b   : > { %5054 = vmatpush3.bf16.msra.mxu1 %v5451_v10  ;;  %5108 = vmatpush3.bf16.msra.mxu0 %v5454_v12 }
  0x6c   : > { %5055 = vmatprep.subr.bf16.mxu1 %v5453_v19  ;;  %5109 = vmatprep.subr.bf16.mxu0 %v5456_v60 }
  0x6d   : > { %4968 = vmatmul.mubr.bf16.gmra.mxu1 %v5733_v33  ;;  %5024 = vmatmul.mubr.bf16.gmra.mxu0 %v1049_v17  ;;  %v5896_v33 = vld [vmem:[%s7080_s1 + $0x178] sm:$0xff]   ;;  %v2312_v17 = vrot.slane %v5940_v8, 2 }
  0x6e   : > { %4971 = vmatprep.mubr.bf16.mxu1 %v5614_v4  ;;  %5027 = vmatprep.mubr.bf16.mxu0 %v1051_v20  ;;  %v2304_v4 = vrot.slane %v5889_v30, 2  ;;  %v5964_v20 = vld [vmem:[%s5608_s25 + $0x48] sm:$0xff]  }
  0x6f   : > { %5056 = vmatpush3.bf16.msra.mxu1 %v5453_v19  ;;  %5110 = vmatpush3.bf16.msra.mxu0 %v5456_v60  ;;  %v1497_v19 = vrot.slane %v5924_v14, 1  ;;  %v2310_v60 = vrot.slane %v5934_v3, 2 }
  0x70   : > { %5057 = vmatprep.subr.bf16.mxu1 %v5455_v21  ;;  %5199 = vmatprep.subr.bf16.mxu0 %v5878_v24  ;;  %v5905_v11 = vsel %vm2300_vm2, %v2302_v32, %v2304_v4  ;;  %v5951_v10 = vsel %vm2300_vm2, %v2304_v4, %v2306_v6  ;;  %v5976_v32 = vld [vmem:[%s5608_s25 + $0x50] sm:$0xff]  }
  0x71   : > { %v5973_v28 = vsel %vm2300_vm2, %v2310_v60, %v2312_v17  ;;  %v2318_v42 = vrot.slane %v5976_v32, 2 }
  0x73   : > { %5058 = vmatpush3.bf16.msra.mxu1 %v5455_v21  ;;  %v2314_v21 = vrot.slane %v5948_v46, 2 }
  0x74   : > { %5147 = vmatprep.subr.bf16.mxu1 %v5896_v33 }
  0x75   : > { %4972 = vmatmul.mubr.bf16.gmra.mxu1 %v5617_v5  ;;  %5028 = vmatmul.mubr.bf16.gmra.mxu0 %v1053_v34  ;;  %v1060_v5 = vrot.slane %v5742_v40, 1  ;;  %v5979_v4 = vsel %vm2300_vm2, %v2312_v17, %v2314_v21  ;;  %v1869_v34 = vshll.u32 %v5929_v63, 16 }
  0x76   : > { %4975 = vmatprep.mubr.bf16.mxu1 %v5646_v22  ;;  %5031 = vmatprep.mubr.bf16.mxu0 %v1055_v37  ;;  %v1848_v22 = vshrl.u32 %v5889_v30, 16  ;;  %v1499_v37 = vrot.slane %v5929_v63, 1 }
  0x77   : > { %v1063_v16 = vsel %vm1028_vm1, %v1060_v5, %v1062_v44  ;;  %v1862_v44 = vrot.slane %v1860_v35, 2  ;;  %v1871_v49 = vrot.slane %v1869_v34, 2  ;;  %v6027_v35 = vld [vmem:[%s5608_s25 + $0x78] sm:$0xff]   ;;  %v1902_v34 = vshrl.u32 %v5964_v20, 16 }
  0x78   : > { %v1850_v62 = vrot.slane %v1848_v22, 1  ;;  %v2320_v22 = vrot.slane %v5985_v38, 2 }
  0x79   : > { %v1863_v25 = vor.u32 %v1862_v44, %v1859_v18  ;;  %v2326_v18 = vrot.slane %v6016_v2, 2 }
  0x7d   : > { %4976 = vmatmul.mubr.bf16.gmra.mxu1 %v5656_v29  ;;  %5032 = vmatmul.mubr.bf16.gmra.mxu0 %v1057_v47  ;;  %v2308_v29 = vrot.slane %v5929_v63, 2 }
  0x7e   : > { %4979 = vmatprep.mubr.bf16.mxu1 %v5671_v39  ;;  %5035 = vmatprep.mubr.bf16.mxu0 %v1059_v58  ;;  %v1061_v39 = vsel %vm1028_vm1, %v1058_v45, %v1060_v5  ;;  %v1875_v45 = vshrl.u32 %v5934_v3, 16  ;;  %v6006_v58 = vsel %vm2300_vm2, %v2318_v42, %v2320_v22 }
  0x7f   : > { %v5954_v12 = vsel %vm2300_vm2, %v2306_v6, %v2308_v29  ;;  %v5970_v26 = vsel %vm2300_vm2, %v2308_v29, %v2310_v60  ;;  %v6019_v6 = vsel %vm2300_vm2, %v2320_v22, %v2322_v0  ;;  %v2324_v29 = vrot.slane %v6010_v61, 2  ;;  %v5464_v22 = vld [vmem:[%s7080_s1 + $0x170] sm:$0xff]  }
  0x80   : > { %v1494_v60 = vsel %vm1028_vm1, %v1492_v53, %v1493_v57  ;;  %v1872_v53 = vor.u32 %v1871_v49, %v1868_v43  ;;  %v1496_v49 = vsel %vm1028_vm1, %v1493_v57, %v1495_v7 }
  0x85   : > { %4980 = vmatmul.mubr.bf16.gmra.mxu1 %v5685_v50  ;;  %5036 = vmatmul.mubr.bf16.gmra.mxu0 %v1061_v39  ;;  %v1845_v50 = vor.u32 %v1844_v59, %v1841_v56  ;;  %v1887_v56 = vshll.u32 %v5940_v8, 16  ;;  %v1854_v59 = vor.u32 %v1853_v15, %v1850_v62  ;;  %v1877_v62 = vrot.slane %v1875_v45, 1 }
  0x86   : > { %4983 = vmatprep.mubr.bf16.mxu1 %v5706_v1  ;;  %5039 = vmatprep.mubr.bf16.mxu0 %v1063_v16  ;;  %v2316_v1 = vrot.slane %v5964_v20, 2  ;;  %v1880_v15 = vrot.slane %v1878_v48, 2  ;;  %v6030_v16 = vsel %vm2300_vm2, %v2322_v0, %v2324_v29  ;;  %v6057_v48 = vld [vmem:[%s5608_s25 + $0x88] sm:$0xff]   ;;  %v1498_v0 = vsel %vm1028_vm1, %v1495_v7, %v1497_v19 }
  0x87   : > { %v1846_v47 = vsel %vm1829_vm3, %v1837_v31, %v1845_v50  ;;  %v1855_v39 = vsel %vm1829_vm3, %v1845_v50, %v1854_v59  ;;  %v1864_v17 = vsel %vm1829_vm3, %v1854_v59, %v1863_v25  ;;  %v1889_v44 = vrot.slane %v1887_v56, 2 }
  0x88   : > { %v5988_v41 = vsel %vm2300_vm2, %v2314_v21, %v2316_v1  ;;  %v5995_v5 = vsel %vm2300_vm2, %v2316_v1, %v2318_v42  ;;  %v1886_v21 = vrot.slane %v1884_v55, 1  ;;  %v6040_v50 = vsel %vm2300_vm2, %v2324_v29, %v2326_v18  ;;  %v6050_v42 = vld [vmem:[%s5608_s25 + $0x80] sm:$0xff]  }
  0x89   : > { %v2328_v1 = vrot.slane %v6027_v35, 2  ;;  %v2330_v43 = vrot.slane %v6050_v42, 2  ;;  %v1873_v55 = vsel %vm1829_vm3, %v1863_v25, %v1872_v53  ;;  %v1914_v56 = vshll.u32 %v5976_v32, 16 }
  0x8a   : > { %v2332_v59 = vrot.slane %v6057_v48, 2  ;;  %v1890_v25 = vor.u32 %v1889_v44, %v1886_v21  ;;  %v7083_v29 = vrot.slane %v5948_v46, 1  ;;  %v6107_v21 = vld [vmem:[%s5608_s25 + $0x98] ss:$0 sps:$4 sm:$0x33]  }
  0x8b   : > { %v6053_v45 = vsel %vm2300_vm2, %v2326_v18, %v2328_v1  ;;  %v6080_v27 = vsel %vm2300_vm2, %v2328_v1, %v2330_v43  ;;  %v1923_v18 = vshll.u32 %v5985_v38, 16  ;;  %v2618_v1 = vld [vmem:[%s5608_s25 + $0x14] sm:$0xf] }
  0x8d   : > { %4984 = vmatmul.mubr.bf16.gmra.mxu1 %v5723_v23  ;;  %5040 = vmatmul.mubr.bf16.gmra.mxu0 %v5807_v51  ;;  %v1893_v23 = vshrl.u32 %v5948_v46, 16  ;;  %v1896_v51 = vshll.u32 %v5948_v46, 16 }
  0x8e   : > { %4987 = vmatprep.mubr.bf16.mxu1 %v5742_v40  ;;  %5111 = vmatprep.mubr.bf16.mxu0 %v1846_v47  ;;  %v5465_v40 = vld [vmem:[%s7080_s1 + $0x1b0] sm:$0xff]   ;;  %v1881_v47 = vor.u32 %v1880_v15, %v1877_v62  ;;  %v1916_v15 = vrot.slane %v1914_v56, 2 }
  0x8f   : > { %v1895_v13 = vrot.slane %v1893_v23, 1  ;;  %v1898_v31 = vrot.slane %v1896_v51, 2  ;;  %v1501_v23 = vrot.slane %v5934_v3, 1  ;;  %v1503_v51 = vrot.slane %v5940_v8, 1  ;;  %v5475_v8 = vld [vmem:[%s7080_s1 + $0x1a0] sm:$0xff]  }
  0x90   : > { %v1882_v57 = vsel %vm1829_vm3, %v1872_v53, %v1881_v47  ;;  %v1904_v3 = vrot.slane %v1902_v34, 1  ;;  %v1891_v44 = vsel %vm1829_vm3, %v1881_v47, %v1890_v25 }
  0x91   : > { %v6087_v30 = vor.u32 %v1898_v31, %v1895_v13  ;;  %v1502_v13 = vsel %vm1028_vm1, %v1499_v37, %v1501_v23  ;;  %v6114_v14 = vsel %vm1028_vm1, %v1501_v23, %v1503_v51  ;;  %v2617_v31 = vld [vmem:[%s5608_s25 + $0x10] sm:$0xc] }
  0x92   : > { %v6135_v56 = vcombine.low %v2617_v31, %v2618_v1 }
  0x93   : > { %v1900_v53 = vsel %vm1829_vm3, %v1890_v25, %v6087_v30  ;;  %v1941_v25 = vshll.u32 %v6010_v61, 16 }
  0x95   : > { %4988 = vmatmul.mubr.bf16.gmra.mxu1 %v5754_v52  ;;  %5112 = vmatmul.mubr.bf16.vlgmr.msra.gmra.mxu0 %v1855_v39  ;;  %v1905_v52 = vshll.u32 %v5964_v20, 16  ;;  %v1920_v39 = vshrl.u32 %v5985_v38, 16 }
  0x96   : > { %5059 = vmatprep.mubr.bf16.mxu1 %v1494_v60  ;;  %5200 = vmatpush3.bf16.msra.mxu0 %v5878_v24  ;;  %v1911_v24 = vshrl.u32 %v5976_v32, 16  ;;  %v1500_v60 = vsel %vm1028_vm1, %v1497_v19, %v1499_v37  ;;  %v6119_v19 = vsel %vm1028_vm1, %v1503_v51, %v7083_v29  ;;  %v1932_v51 = vshll.u32 %v5999_v54, 16 }
  0x97   : > { %5115 = vmatprep.mubr.bf16.mxu0 %v1864_v17  ;;  %5201 = vmatprep.subr.bf16.mxu0 %v5465_v40  ;;  %v1907_v7 = vrot.slane %v1905_v52, 2  ;;  %v6104_v17 = vld [vmem:[%s5608_s25 + $0x90] sm:$0xff]   ;;  %v1925_v52 = vrot.slane %v1923_v18, 2 }
  0x98   : > { %v1913_v62 = vrot.slane %v1911_v24, 1  ;;  %v2334_v37 = vrot.slane %v6104_v17, 2  ;;  %v2336_v24 = vrot.slane %v6107_v21, 2  ;;  %v5483_v18 = vld [vmem:[%s7080_s1 + $0x190] sm:$0xff]  }
  0x99   : > { %v1908_v34 = vor.u32 %v1907_v7, %v1904_v3  ;;  %v5479_v3 = vld [vmem:[%s7080_s1 + $0x198] sm:$0xff]   ;;  %v6150_v7 = vld [vmem:[%s5608_s25 + $0x20] sm:$0xff]  }
  0x9a   : > { %5202 = vmatpush3.bf16.msra.mxu0 %v5465_v40  ;;  %v6085_v40 = vsel %vm2300_vm2, %v2330_v43, %v2332_v59  ;;  %v6127_v47 = vor.u32 %v1916_v15, %v1913_v62  ;;  %v3551_v43 = vld [vmem:[%s5608_s25 + $0x10] sm:$0x8]  ;;  %v6153_v62 = vsel %vm2300_vm2, %v2334_v37, %v2336_v24  ;;  %v3103_v15 = vshrl.u32 %v6135_v56, 16 }
  0x9b   : > { %5203 = vmatprep.subr.bf16.mxu0 %v5470_v36  ;;  %v4462_v23 = vcombine.low %v3551_v43, %v2618_v1  ;;  %7093 = vst [vmem:[#allocation3_spill] sm:$0xff] %v6153_v62  ;;  %v3576_v31 = vrot.slane %v6150_v7, 3  ;;  %v3120_v24 = vshrl.u32 %v6150_v7, 16  ;;  %v1909_v63 = vsel %vm1829_vm3, %v6087_v30, %v1908_v34 }
  0x9c   : > { %v1943_v62 = vrot.slane %v1941_v25, 2 }
  0x9d   : > { %5060 = vmatmul.mubr.bf16.vlgmr.msra.gmra.mxu1 %v1496_v49  ;;  %5116 = vmatmul.mubr.bf16.gmra.mxu0 %v1873_v55  ;;  %v5472_v49 = vld [vmem:[%s7080_s1 + $0x160] sm:$0xff]   ;;  %v1929_v55 = vshrl.u32 %v5999_v54, 16 }
  0x9e   : > { %5148 = vmatpush3.bf16.msra.mxu1 %v5896_v33  ;;  %5063 = vmatprep.mubr.bf16.mxu1 %v1498_v0  ;;  %v5468_v33 = vld [vmem:[%s7080_s1 + $0x168] sm:$0xff]   ;;  %v6138_v0 = vld [vmem:[%s5608_s25 + $0x18] sm:$0xff]  }
  0x9f   : > { %5149 = vmatprep.subr.bf16.mxu1 %v5464_v22  ;;  %5119 = vmatprep.mubr.bf16.mxu0 %v1882_v57  ;;  %v1938_v57 = vshrl.u32 %v6010_v61, 16  ;;  %v3111_v1 = vshrl.u32 %v6138_v0, 16 }
  0xa0   : > { %5204 = vmatpush3.bf16.msra.mxu0 %v5470_v36  ;;  %v1922_v36 = vrot.slane %v1920_v39, 1  ;;  %v3106_v39 = vshll.u32 %v6135_v56, 16 }
  0xa1   : > { %5205 = vmatprep.subr.bf16.mxu0 %v5475_v8  ;;  %v1940_v30 = vrot.slane %v1938_v57, 1 }
  0xa2   : > { %5150 = vmatpush3.bf16.msra.mxu1 %v5464_v22  ;;  %v6141_v22 = vsel %vm2300_vm2, %v2332_v59, %v2334_v37  ;;  %v3573_v59 = vrot.slane %v4462_v23, 3  ;;  %v3108_v37 = vrot.slane %v3106_v39, 3  ;;  %v3113_v23 = vrot.slane %v3111_v1, 2 }
  0xa3   : > { %5151 = vmatprep.subr.bf16.mxu1 %v5468_v33  ;;  %7092 = vst [vmem:[#allocation2_spill] sm:$0xff] %v6141_v22  ;;  %v1926_v39 = vor.u32 %v1925_v52, %v1922_v36  ;;  %v1918_v1 = vsel %vm1829_vm3, %v1908_v34, %v6127_v47  ;;  %v6181_v22 = vld [vmem:[%s5608_s25 + $0x28] sm:$0xff]   ;;  %v5482_v36 = vld [vmem:[%s7080_s1 + $0x150] sm:$0xff]  }
  0xa4   : > { %5206 = vmatpush3.bf16.msra.mxu0 %v5475_v8  ;;  %v3574_v8 = vrot.slane %v6138_v0, 3  ;;  %v6191_v52 = vld [vmem:[%s5608_s25 + $0x30] sm:$0xff]   ;;  %v3129_v57 = vshrl.u32 %v6181_v22, 16  ;;  %v3132_v25 = vshll.u32 %v6181_v22, 16 }
  0xa5   : > { %5064 = vmatmul.mubr.bf16.gmra.mxu1 %v1500_v60  ;;  %5120 = vmatmul.mubr.bf16.gmra.mxu0 %v1891_v44  ;;  %v3114_v60 = vshll.u32 %v6138_v0, 16  ;;  %v5477_v44 = vld [vmem:[%s7080_s1 + $0x158] sm:$0xff]  }
  0xa6   : > { %5067 = vmatprep.mubr.bf16.mxu1 %v1502_v13  ;;  %5152 = vmatpush3.bf16.msra.mxu1 %v5468_v33  ;;  %v6168_v13 = vsel %vm3572_vm4, %v3573_v59, %v3574_v8  ;;  %v3105_v33 = vrot.slane %v3103_v15, 2  ;;  %v6172_v43 = vsel %vm3572_vm4, %v3574_v8, %v3576_v31  ;;  %v3122_v15 = vrot.slane %v3120_v24, 2 }
  0xa7   : > { %5123 = vmatprep.mubr.bf16.mxu0 %v1900_v53  ;;  %5153 = vmatprep.subr.bf16.mxu1 %v5472_v49  ;;  %7094 = vst [vmem:[#allocation4_spill] sm:$0xff] %v6168_v13  ;;  %7095 = vst [vmem:[#allocation5_spill] sm:$0xff] %v6172_v43  ;;  %v3116_v29 = vrot.slane %v3114_v60, 3  ;;  %v3123_v53 = vshll.u32 %v6150_v7, 16  ;;  %v1931_v60 = vrot.slane %v1929_v55, 1  ;;  %v1934_v13 = vrot.slane %v1932_v51, 2 }
  0xa8   : > { %5207 = vmatprep.subr.bf16.mxu0 %v5479_v3  ;;  %v3109_v59 = vor.u32 %v3108_v37, %v3105_v33  ;;  %v1950_v55 = vshll.u32 %v6016_v2, 16  ;;  %v3578_v51 = vrot.slane %v6181_v22, 3  ;;  %v3580_v37 = vrot.slane %v6191_v52, 3 }
  0xa9   : > { %5208 = vmatpush3.bf16.msra.mxu0 %v5479_v3  ;;  %v3117_v8 = vor.u32 %v3116_v29, %v3113_v23  ;;  %v3125_v43 = vrot.slane %v3123_v53, 3  ;;  %v1947_v3 = vshrl.u32 %v6016_v2, 16  ;;  %v5487_v29 = vld [vmem:[%s7080_s1 + $0x188] sm:$0xff]   ;;  %v3138_v24 = vshrl.u32 %v6191_v52, 16 }
  0xaa   : > { %5154 = vmatpush3.bf16.msra.mxu1 %v5472_v49  ;;  %5209 = vmatprep.subr.bf16.mxu0 %v5483_v18  ;;  %v3131_v23 = vrot.slane %v3129_v57, 2  ;;  %v3134_v53 = vrot.slane %v3132_v25, 3 }
  0xab   : > { %5155 = vmatprep.subr.bf16.mxu1 %v5477_v44  ;;  %v6194_v34 = vsel %vm3101_vm5, %v3109_v59, %v3117_v8  ;;  %v3126_v49 = vor.u32 %v3125_v43, %v3122_v15  ;;  %v6211_v43 = vsel %vm3572_vm4, %v3576_v31, %v3578_v51  ;;  %v5486_v59 = vld [vmem:[%s7080_s1 + $0x148] sm:$0xff]   ;;  %v7099_v15 = vrot.slane %v5964_v20, 1  ;;  %v6241_v20 = vld [vmem:[%s5608_s25 + $0x38] sm:$0xff]  }
  0xac   : > { %7097 = vst [vmem:[#allocation7_spill] sm:$0xff] %v6211_v43  ;;  %v3135_v43 = vor.u32 %v3134_v53, %v3131_v23  ;;  %v1944_v23 = vor.u32 %v1943_v62, %v1940_v30  ;;  %v1968_v62 = vshll.u32 %v6050_v42, 16  ;;  %v3582_v30 = vrot.slane %v6241_v20, 3 }
  0xad   : > { %5068 = vmatmul.mubr.bf16.gmra.mxu1 %v6114_v14  ;;  %5124 = vmatmul.mubr.bf16.gmra.mxu0 %v1909_v63  ;;  %v6203_v33 = vsel %vm3101_vm5, %v3117_v8, %v3126_v49  ;;  %v3141_v14 = vshll.u32 %v6191_v52, 16  ;;  %v6208_v63 = vor.u32 %v1934_v13, %v1931_v60  ;;  %v5492_v13 = vld [vmem:[%s7080_s1 + $0x180] sm:$0xff]   ;;  %v7100_v8 = vrot.slane %v5948_v46, 1 }
  0xae   : > { %5071 = vmatprep.mubr.bf16.mxu1 %v6119_v19  ;;  %5127 = vmatprep.mubr.bf16.mxu0 %v1918_v1  ;;  %7096 = vst [vmem:[#allocation6_spill] sm:$0xff] %v6203_v33  ;;  %v1956_v19 = vshrl.u32 %v6027_v35, 16  ;;  %v7101_v60 = vrot.slane %v5976_v32, 1  ;;  %v7102_v57 = vmov %v7099_v15  ;;  %v1511_v33 = vrot.slane %v5985_v38, 1 }
  0xaf   : > { %5156 = vmatpush3.bf16.msra.mxu1 %v5477_v44  ;;  %5210 = vmatpush3.bf16.msra.mxu0 %v5483_v18  ;;  %v6221_v44 = vsel %vm3572_vm4, %v3578_v51, %v3580_v37  ;;  %v3140_v18 = vrot.slane %v3138_v24, 2  ;;  %v3143_v31 = vrot.slane %v3141_v14, 3  ;;  %v1508_v1 = vsel %vm1028_vm1, %v7100_v8, %v7099_v15 }
  0xb0   : > { %5157 = vmatprep.subr.bf16.mxu1 %v5482_v36  ;;  %5211 = vmatprep.subr.bf16.mxu0 %v5487_v29  ;;  %7098 = vst [vmem:[#allocation8_spill] sm:$0xff] %v6221_v44  ;;  %v1510_v25 = vsel %vm1028_vm1, %v7102_v57, %v7101_v60  ;;  %v1927_v51 = vsel %vm1829_vm3, %v6127_v47, %v1926_v39  ;;  %v1949_v24 = vrot.slane %v1947_v3, 1  ;;  %v1952_v14 = vrot.slane %v1950_v55, 2 }
  0xb1   : > { %v3144_v44 = vor.u32 %v3143_v31, %v3140_v18  ;;  %v1936_v46 = vsel %vm1829_vm3, %v1926_v39, %v6208_v63  ;;  %v1959_v8 = vshll.u32 %v6027_v35, 16  ;;  %v6244_v38 = vsel %vm3101_vm5, %v3126_v49, %v3135_v43  ;;  %v5490_v39 = vld [vmem:[%s7080_s1 + $0x140] sm:$0xff]  }
  0xb2   : > { %7103 = vst [vmem:[#allocation9_spill] sm:$0xff] %v6244_v38  ;;  %v1958_v47 = vrot.slane %v1956_v19, 1  ;;  %v1965_v3 = vshrl.u32 %v6050_v42, 16  ;;  %v3147_v55 = vshrl.u32 %v6241_v20, 16  ;;  %v3150_v53 = vshll.u32 %v6241_v20, 16 }
  0xb3   : > { %5158 = vmatpush3.bf16.msra.mxu1 %v5482_v36  ;;  %5212 = vmatpush3.bf16.msra.mxu0 %v5487_v29  ;;  %v6253_v36 = vld [vmem:[%s7080_s1 + $0x238] sm:$0xff]   ;;  %v6256_v29 = vld [vmem:[%s5608_s25 + $0x40] sm:$0xff]   ;;  %v6259_v49 = vsel %vm3101_vm5, %v3135_v43, %v3144_v44  ;;  %v1953_v19 = vor.u32 %v1952_v14, %v1949_v24  ;;  %v1961_v60 = vrot.slane %v1959_v8, 2  ;;  %v1974_v15 = vshrl.u32 %v6057_v48, 16 }
  0xb4   : > { %5159 = vmatprep.subr.bf16.mxu1 %v5486_v59  ;;  %5213 = vmatprep.subr.bf16.mxu0 %v5492_v13  ;;  %7104 = vst [vmem:[#allocation10_spill] sm:$0xff] %v6259_v49  ;;  %v3584_v18 = vrot.slane %v6256_v29, 3  ;;  %v3156_v31 = vshrl.u32 %v6256_v29, 16  ;;  %v3159_v43 = vshll.u32 %v6256_v29, 16  ;;  %v3149_v57 = vrot.slane %v3147_v55, 2 }
  0xb5   : > { %5072 = vmatmul.mubr.bf16.gmra.mxu1 %v1508_v1  ;;  %5128 = vmatmul.mubr.bf16.gmra.mxu0 %v1927_v51  ;;  %v6269_v1 = vsel %vm3572_vm4, %v3580_v37, %v3582_v30  ;;  %v3152_v51 = vrot.slane %v3150_v53, 3  ;;  %v1967_v37 = vrot.slane %v1965_v3, 1  ;;  %v1970_v14 = vrot.slane %v1968_v62, 2  ;;  %v6293_v62 = vld [vmem:[%s5608_s25 + $0x48] sm:$0xff]  }
  0xb6   : > { %5075 = vmatprep.mubr.bf16.mxu1 %v1510_v25  ;;  %5131 = vmatprep.mubr.bf16.mxu0 %v1936_v46  ;;  %7105 = vst [vmem:[#allocation11_spill] sm:$0xff] %v6269_v1  ;;  %v6275_v25 = vld [vmem:[%s7080_s1 + $0x1f8] sm:$0xff]   ;;  %v6279_v24 = vsel %vm3572_vm4, %v3582_v30, %v3584_v18  ;;  %v7106_v8 = vrot.slane %v5976_v32, 1  ;;  %v1945_v53 = vsel %vm1829_vm3, %v6208_v63, %v1944_v23  ;;  %v1515_v49 = vrot.slane %v6010_v61, 1  ;;  %v6301_v61 = vld [vmem:[%s5608_s25 + $0x50] sm:$0xff]  }
  0xb7   : > { %5160 = vmatpush3.bf16.msra.mxu1 %v5486_v59  ;;  %5214 = vmatpush3.bf16.msra.mxu0 %v5492_v13  ;;  %v3158_v59 = vrot.slane %v3156_v31, 2  ;;  %v3161_v13 = vrot.slane %v3159_v43, 3  ;;  %v3153_v46 = vor.u32 %v3152_v51, %v3149_v57  ;;  %v7107_v38 = vrot.slane %v5999_v54, 1 }
  0xb8   : > { %5161 = vmatprep.subr.bf16.mxu1 %v5490_v39  ;;  %5303 = vmatprep.subr.bf16.mxu0 %v6253_v36  ;;  %v1512_v55 = vsel %vm1028_vm1, %v7106_v8, %v1511_v33  ;;  %v1954_v31 = vsel %vm1829_vm3, %v1944_v23, %v1953_v19  ;;  %v1962_v43 = vor.u32 %v1961_v60, %v1958_v47  ;;  %v1976_v57 = vrot.slane %v1974_v15, 1 }
  0xb9   : > { %v3162_v1 = vor.u32 %v3161_v13, %v3158_v59  ;;  %v1514_v30 = vsel %vm1028_vm1, %v1511_v33, %v7107_v38  ;;  %v6296_v32 = vsel %vm3101_vm5, %v3144_v44, %v3153_v46  ;;  %v1977_v63 = vshll.u32 %v6057_v48, 16 }
  0xba   : > { %7108 = vst [vmem:[#allocation12_spill] sm:$0xff] %v6296_v32  ;;  %v1971_v38 = vor.u32 %v1970_v14, %v1967_v37  ;;  %v3586_v23 = vrot.slane %v6293_v62, 3  ;;  %v3168_v44 = vshll.u32 %v6293_v62, 16  ;;  %v1983_v15 = vshrl.u32 %v6104_v17, 16 }
  0xbb   : > { %5162 = vmatpush3.bf16.msra.mxu1 %v5490_v39  ;;  %v6304_v33 = vsel %vm3101_vm5, %v3153_v46, %v3162_v1  ;;  %v3165_v39 = vshrl.u32 %v6293_v62, 16  ;;  %v3588_v47 = vrot.slane %v6301_v61, 3  ;;  %v3174_v60 = vshrl.u32 %v6301_v61, 16 }
  0xbc   : > { %5251 = vmatprep.subr.bf16.mxu1 %v6275_v25  ;;  %7109 = vst [vmem:[#allocation13_spill] sm:$0xff] %v6304_v33  ;;  %v3177_v51 = vshll.u32 %v6301_v61, 16  ;;  %v1986_v59 = vshll.u32 %v6104_v17, 16  ;;  %v6315_v13 = vsel %vm3572_vm4, %v3584_v18, %v3586_v23  ;;  %v3170_v14 = vrot.slane %v3168_v44, 3 }
  0xbd   : > { %5076 = vmatmul.mubr.bf16.gmra.mxu1 %v1512_v55  ;;  %5132 = vmatmul.mubr.bf16.gmra.mxu0 %v1945_v53  ;;  %v3167_v37 = vrot.slane %v3165_v39, 2  ;;  %v1979_v46 = vrot.slane %v1977_v63, 2  ;;  %v6318_v8 = vsel %vm3572_vm4, %v3586_v23, %v3588_v47  ;;  %v3176_v55 = vrot.slane %v3174_v60, 2 }
  0xbe   : > { %5079 = vmatprep.mubr.bf16.mxu1 %v1514_v30  ;;  %5135 = vmatprep.mubr.bf16.mxu0 %v1954_v31  ;;  %7110 = vst [vmem:[#allocation14_spill] sm:$0xff] %v6318_v8  ;;  %v3179_v53 = vrot.slane %v3177_v51, 3  ;;  %v7111_v31 = vrot.slane %v5999_v54, 1  ;;  %v1963_v33 = vsel %vm1829_vm3, %v1953_v19, %v1962_v43  ;;  %v7112_v32 = vrot.slane %v6016_v2, 1  ;;  %v6329_v8 = vld [vmem:[%s5608_s25 + $0x58] sm:$0xff]   ;;  %v6337_v19 = vld [vmem:[%s5608_s25 + $0x60] sm:$0xff]  }
  0xbf   : > { %v3171_v30 = vor.u32 %v3170_v14, %v3167_v37  ;;  %v1972_v63 = vsel %vm1829_vm3, %v1962_v43, %v1971_v38  ;;  %v1985_v44 = vrot.slane %v1983_v15, 1  ;;  %v1988_v23 = vrot.slane %v1986_v59, 2 }
  0xc0   : > { %v1516_v3 = vsel %vm1028_vm1, %v7111_v31, %v1515_v49  ;;  %v1518_v18 = vsel %vm1028_vm1, %v1515_v49, %v7112_v32  ;;  %v3180_v39 = vor.u32 %v3179_v53, %v3176_v55  ;;  %v1519_v54 = vrot.slane %v6027_v35, 1 }
  0xc1   : > { %v6332_v60 = vsel %vm3101_vm5, %v3162_v1, %v3171_v30  ;;  %v1980_v51 = vor.u32 %v1979_v46, %v1976_v57  ;;  %v1521_v37 = vrot.slane %v6050_v42, 1  ;;  %v1992_v49 = vshrl.u32 %v6107_v21, 16 }
  0xc2   : > { %v6340_v14 = vsel %vm3101_vm5, %v3171_v30, %v3180_v39  ;;  %v3590_v32 = vrot.slane %v6329_v8, 3  ;;  %v3183_v43 = vshrl.u32 %v6329_v8, 16  ;;  %v3186_v1 = vshll.u32 %v6329_v8, 16 }
  0xc3   : > { %7113 = vst [vmem:[#allocation15_spill] sm:$0xff] %v6340_v14  ;;  %v1995_v35 = vshll.u32 %v6107_v21, 16  ;;  %v3592_v42 = vrot.slane %v6337_v19, 3  ;;  %v3192_v57 = vshrl.u32 %v6337_v19, 16  ;;  %v3195_v15 = vshll.u32 %v6337_v19, 16 }
  0xc4   : > { %v3185_v59 = vrot.slane %v3183_v43, 2  ;;  %v3188_v46 = vrot.slane %v3186_v1, 3  ;;  %v7114_v21 = vrot.slane %v6016_v2, 1  ;;  %v1994_v14 = vrot.slane %v1992_v49, 1  ;;  %v6363_v1 = vld [vmem:[%s5608_s25 + $0x68] sm:$0xff]  }
  0xc5   : > { %5080 = vmatmul.mubr.bf16.gmra.mxu1 %v1516_v3  ;;  %5136 = vmatmul.mubr.bf16.gmra.mxu0 %v1963_v33  ;;  %v1989_v3 = vor.u32 %v1988_v23, %v1985_v44  ;;  %v6351_v33 = vsel %vm3572_vm4, %v3588_v47, %v3590_v32  ;;  %v6354_v55 = vsel %vm3572_vm4, %v3590_v32, %v3592_v42  ;;  %v3194_v53 = vrot.slane %v3192_v57, 2 }
  0xc6   : > { %5083 = vmatprep.mubr.bf16.mxu1 %v1518_v18  ;;  %5139 = vmatprep.mubr.bf16.mxu0 %v1972_v63  ;;  %v3197_v30 = vrot.slane %v3195_v15, 3  ;;  %v1520_v31 = vsel %vm1028_vm1, %v7114_v21, %v1519_v54  ;;  %v3189_v18 = vor.u32 %v3188_v46, %v3185_v59  ;;  %v1981_v63 = vsel %vm1829_vm3, %v1971_v38, %v1980_v51  ;;  %v6371_v15 = vld [vmem:[%s5608_s25 + $0x70] sm:$0xff]  }
  0xc7   : > { %v1997_v44 = vrot.slane %v1995_v35, 2  ;;  %v1522_v47 = vsel %vm1028_vm1, %v1519_v54, %v1521_v37  ;;  %v1990_v43 = vsel %vm1829_vm3, %v1980_v51, %v1989_v3  ;;  %v1523_v57 = vrot.slane %v6057_v48, 1 }
  0xc8   : > { %v3198_v23 = vor.u32 %v3197_v30, %v3194_v53  ;;  %v6366_v32 = vsel %vm3101_vm5, %v3180_v39, %v3189_v18  ;;  %v1525_v2 = vrot.slane %v6104_v17, 1  ;;  %v2765_v54 = vrot.slane %v6138_v0, 2 }
  0xc9   : > { %v3594_v51 = vrot.slane %v6363_v1, 3  ;;  %v3201_v49 = vshrl.u32 %v6363_v1, 16  ;;  %v3204_v39 = vshll.u32 %v6363_v1, 16  ;;  %v1998_v48 = vor.u32 %v1997_v44, %v1994_v14 }
  0xca   : > { %v6374_v38 = vsel %vm3101_vm5, %v3189_v18, %v3198_v23  ;;  %v7084_v17 = vrot.slane %v6371_v15, 3  ;;  %v3210_v35 = vshrl.u32 %v6371_v15, 16  ;;  %v3213_v59 = vshll.u32 %v6371_v15, 16 }
  0xcb   : > { %v2764_v46 = vrot.slane %v6135_v56, 2  ;;  %v6385_v0 = vsel %vm3572_vm4, %v3592_v42, %v3594_v51  ;;  %v3203_v53 = vrot.slane %v3201_v49, 2  ;;  %v3206_v30 = vrot.slane %v3204_v39, 3 }
  0xcc   : > { %v6390_v21 = vsel %vm3572_vm4, %v3594_v51, %v7084_v17  ;;  %v3215_v14 = vrot.slane %v3213_v59, 3  ;;  %v1999_v44 = vsel %vm1829_vm3, %v1989_v3, %v1998_v48  ;;  %v1526_v56 = vsel %vm1028_vm1, %v1523_v57, %v1525_v2  ;;  %v5501_v59 = vld [vmem:[%s7080_s1 + $0x1f0] sm:$0xff]  }
  0xcd   : > { %5084 = vmatmul.mubr.bf16.gmra.mxu1 %v1520_v31  ;;  %5140 = vmatmul.mubr.bf16.gmra.mxu0 %v1981_v63  ;;  %v3212_v31 = vrot.slane %v3210_v35, 2  ;;  %v3207_v18 = vor.u32 %v3206_v30, %v3203_v53  ;;  %v1524_v63 = vsel %vm1028_vm1, %v1521_v37, %v1523_v57  ;;  %v2766_v42 = vsel %vm2300_vm2, %v2764_v46, %v2765_v54 }
  0xce   : > { %5087 = vmatprep.mubr.bf16.mxu1 %v1522_v47  ;;  %5143 = vmatprep.mubr.bf16.mxu0 %v1990_v43  ;;  %v5491_v47 = vld [vmem:[%s5608_s25 + $0x98] ss:$0 sps:$4 sm:$0x11]   ;;  %v2767_v3 = vrot.slane %v6150_v7, 2  ;;  %v2769_v39 = vrot.slane %v6181_v22, 2  ;;  %v2771_v7 = vrot.slane %v6191_v52, 2 }
  0xcf   : > { %v6395_v43 = vor.u32 %v3215_v14, %v3212_v31  ;;  %v6400_v49 = vsel %vm3101_vm5, %v3198_v23, %v3207_v18  ;;  %v1527_v37 = vrot.slane %v5491_v47, 1  ;;  %v5502_v23 = vld [vmem:[%s7080_s1 + $0x230] sm:$0xff]   ;;  %v5507_v22 = vld [vmem:[%s7080_s1 + $0x228] sm:$0xff]   ;;  %v5512_v52 = vld [vmem:[%s7080_s1 + $0x220] sm:$0xff]   ;;  %v2777_v46 = vrot.slane %v6293_v62, 2 }
  0xd0   : > { %7116 = vst [vmem:[#allocation17_spill] sm:$0xff] %v6400_v49  ;;  %v2768_v48 = vsel %vm2300_vm2, %v2765_v54, %v2767_v3  ;;  %v2770_v35 = vsel %vm2300_vm2, %v2767_v3, %v2769_v39  ;;  %v2772_v54 = vsel %vm2300_vm2, %v2769_v39, %v2771_v7  ;;  %v2779_v30 = vrot.slane %v6301_v61, 2  ;;  %v5520_v31 = vld [vmem:[%s7080_s1 + $0x210] sm:$0xff]  }
  0xd1   : > { %7115 = vst [vmem:[#allocation16_spill] sm:$0xff] %v6395_v43  ;;  %v6404_v51 = vsel %vm3101_vm5, %v3207_v18, %v6395_v43  ;;  %v1528_v57 = vsel %vm1028_vm1, %v1525_v2, %v1527_v37  ;;  %v2773_v2 = vrot.slane %v6241_v20, 2  ;;  %v2775_v20 = vrot.slane %v6256_v29, 2  ;;  %v5524_v37 = vld [vmem:[%s7080_s1 + $0x208] sm:$0xff]  }
  0xd2   : > { %7117 = vst [vmem:[#allocation18_spill] sm:$0xff] %v6404_v51 }
  0xd3   : > { %v2778_v29 = vsel %vm2300_vm2, %v2775_v20, %v2777_v46 }
  0xd5   : > { %5088 = vmatmul.mubr.bf16.gmra.mxu1 %v1524_v63  ;;  %5144 = vmatmul.mubr.bf16.gmra.mxu0 %v1999_v44  ;;  %v5514_v63 = vld [vmem:[%s7080_s1 + $0x1d8] sm:$0xff]   ;;  %v2780_v44 = vsel %vm2300_vm2, %v2777_v46, %v2779_v30 }
  0xd6   : > { %5091 = vmatprep.mubr.bf16.mxu1 %v1526_v56  ;;  %5215 = vmatprep.mubr.bf16.mxu0 %v2766_v42  ;;  %v5519_v42 = vld [vmem:[%s7080_s1 + $0x1d0] sm:$0xff]  }
  0xdd   : > { %5092 = vmatmul.mubr.bf16.gmra.mxu1 %v1528_v57  ;;  %5216 = vmatmul.mubr.bf16.vlgmr.msra.gmra.mxu0 %v2768_v48  ;;  %v2783_v57 = vrot.slane %v6337_v19, 2 }
  0xde   : > { %5163 = vmatprep.mubr.bf16.mxu1 %v5943_v9  ;;  %5304 = vmatpush3.bf16.msra.mxu0 %v6253_v36  ;;  %v2774_v9 = vsel %vm2300_vm2, %v2771_v7, %v2773_v2  ;;  %v5505_v36 = vld [vmem:[%s7080_s1 + $0x1e8] sm:$0xff]  }
  0xdf   : > { %5219 = vmatprep.mubr.bf16.mxu0 %v2770_v35  ;;  %5305 = vmatprep.subr.bf16.mxu0 %v5502_v23  ;;  %v2785_v35 = vrot.slane %v6363_v1, 2 }
  0xe2   : > { %5306 = vmatpush3.bf16.msra.mxu0 %v5502_v23 }
  0xe3   : > { %5307 = vmatprep.subr.bf16.mxu0 %v5507_v22 }
  0xe5   : > { %5164 = vmatmul.mubr.bf16.vlgmr.msra.gmra.mxu1 %v5905_v11  ;;  %5220 = vmatmul.mubr.bf16.gmra.mxu0 %v2772_v54  ;;  %v2776_v11 = vsel %vm2300_vm2, %v2773_v2, %v2775_v20  ;;  %v2786_v54 = vsel %vm2300_vm2, %v2783_v57, %v2785_v35 }
  0xe6   : > { %5252 = vmatpush3.bf16.msra.mxu1 %v6275_v25  ;;  %5167 = vmatprep.mubr.bf16.mxu1 %v5951_v10  ;;  %v5509_v10 = vld [vmem:[%s7080_s1 + $0x1e0] sm:$0xff]   ;;  %v5516_v25 = vld [vmem:[%s7080_s1 + $0x218] sm:$0xff]  }
  0xe7   : > { %5253 = vmatprep.subr.bf16.mxu1 %v5501_v59  ;;  %5223 = vmatprep.mubr.bf16.mxu0 %v2774_v9  ;;  %v5527_v9 = vld [vmem:[%s7080_s1 + $0x1c0] sm:$0xff]  }
  0xe8   : > { %5308 = vmatpush3.bf16.msra.mxu0 %v5507_v22 }
  0xe9   : > { %5309 = vmatprep.subr.bf16.mxu0 %v5512_v52 }
  0xea   : > { %5254 = vmatpush3.bf16.msra.mxu1 %v5501_v59  ;;  %v6508_v59 = vld [vmem:[%s5608_s25 + $0x78] sm:$0xff]  }
  0xeb   : > { %5255 = vmatprep.subr.bf16.mxu1 %v5505_v36 }
  0xec   : > { %5310 = vmatpush3.bf16.msra.mxu0 %v5512_v52 }
  0xed   : > { %v6445_v53 = vpop.f32.mrf.mxu1  ;;  %5168 = vmatmul.mubr.bf16.gmra.mxu1 %v5954_v12  ;;  %v6448_v62 = vpop.f32.mrf.mxu0  ;;  %5224 = vmatmul.mubr.bf16.gmra.mxu0 %v2776_v11  ;;  %v2781_v12 = vrot.slane %v6329_v8, 2 }
  0xee   : > { %5171 = vmatprep.mubr.bf16.mxu1 %v5970_v26  ;;  %5256 = vmatpush3.bf16.msra.mxu1 %v5505_v36  ;;  %v2787_v36 = vrot.slane %v6371_v15, 2 }
  0xef   : > { %v6455_v14 = vpop.f32.mrf.mxu1  ;;  %v6457_v18 = vpop.f32.mrf.mxu0  ;;  %5227 = vmatprep.mubr.bf16.mxu0 %v2778_v29  ;;  %5257 = vmatprep.subr.bf16.mxu1 %v5509_v10  ;;  %v2782_v8 = vsel %vm2300_vm2, %v2779_v30, %v2781_v12  ;;  %v2784_v22 = vsel %vm2300_vm2, %v2781_v12, %v2783_v57 }
  0xf0   : > { %5311 = vmatprep.subr.bf16.mxu0 %v5516_v25 }
  0xf1   : > { %v6463_v26 = vpop.f32.mrf.mxu1  ;;  %v6465_v61 = vpop.f32.mrf.mxu0  ;;  %5312 = vmatpush3.bf16.msra.mxu0 %v5516_v25  ;;  %v2788_v25 = vsel %vm2300_vm2, %v2785_v35, %v2787_v36 }
  0xf2   : > { %5258 = vmatpush3.bf16.msra.mxu1 %v5509_v10  ;;  %5313 = vmatprep.subr.bf16.mxu0 %v5520_v31  ;;  %v2789_v10 = vrot.slane %v6508_v59, 2 }
  0xf3   : > { %v6468_v47 = vpop.f32.mrf.mxu1  ;;  %v6470_v56 = vpop.f32.mrf.mxu0  ;;  %5259 = vmatprep.subr.bf16.mxu1 %v5514_v63 }
  0xf4   : > { %v2790_v12 = vsel %vm2300_vm2, %v2787_v36, %v2789_v10  ;;  %v6567_v36 = vld [vmem:[%s5608_s25 + $0x98] sm:$0xff]  }
  0xf5   : > { %v6479_v3 = vpop.f32.mrf.mxu1  ;;  %5172 = vmatmul.mubr.bf16.gmra.mxu1 %v5973_v28  ;;  %v6482_v39 = vpop.f32.mrf.mxu0  ;;  %5228 = vmatmul.mubr.bf16.gmra.mxu0 %v2780_v44  ;;  %v5523_v28 = vld [vmem:[%s7080_s1 + $0x1c8] sm:$0xff]   ;;  %7124 = vst [vmem:[#allocation25_spill] sm:$0xff] %v6567_v36 }
  0xf6   : > { %5175 = vmatprep.mubr.bf16.mxu1 %v5979_v4  ;;  %5231 = vmatprep.mubr.bf16.mxu0 %v2782_v8  ;;  %v5528_v4 = vld [vmem:[%s7080_s1 + $0x200] sm:$0xff]  }
  0xf7   : > { %v6486_v48 = vpop.f32.mrf.mxu1  ;;  %v6488_v23 = vpop.f32.mrf.mxu0  ;;  %5260 = vmatpush3.bf16.msra.mxu1 %v5514_v63  ;;  %5314 = vmatpush3.bf16.msra.mxu0 %v5520_v31  ;;  %v6539_v63 = vld [vmem:[%s5608_s25 + $0x88] sm:$0xff]  }
  0xf8   : > { %5261 = vmatprep.subr.bf16.mxu1 %v5519_v42  ;;  %5315 = vmatprep.subr.bf16.mxu0 %v5524_v37  ;;  %7118 = vst [vmem:[#allocation19_spill] sm:$0xff] %v6539_v63  ;;  %v2793_v35 = vrot.slane %v6539_v63, 2 }
  0xf9   : > { %v6497_v19 = vpop.f32.mrf.mxu1  ;;  %v6499_v7 = vpop.f32.mrf.mxu0 }
  0xfb   : > { %v6502_v2 = vpop.f32.mrf.mxu1  ;;  %v6504_v1 = vpop.f32.mrf.mxu0  ;;  %5262 = vmatpush3.bf16.msra.mxu1 %v5519_v42  ;;  %5316 = vmatpush3.bf16.msra.mxu0 %v5524_v37 }
  0xfc   : > { %5263 = vmatprep.subr.bf16.mxu1 %v5523_v28  ;;  %5317 = vmatprep.subr.bf16.mxu0 %v5528_v4 }
  0xfd   : > { %v6513_v52 = vpop.f32.mrf.mxu1  ;;  %5176 = vmatmul.mubr.bf16.gmra.mxu1 %v5988_v41  ;;  %v6516_v20 = vpop.f32.mrf.mxu0  ;;  %5232 = vmatmul.mubr.bf16.gmra.mxu0 %v2784_v22  ;;  %v6559_v22 = vld [vmem:[%s5608_s25 + $0x90] sm:$0xff]  }
  0xfe   : > { %5179 = vmatprep.mubr.bf16.mxu1 %v5995_v5  ;;  %5235 = vmatprep.mubr.bf16.mxu0 %v2786_v54  ;;  %v6531_v5 = vld [vmem:[%s5608_s25 + $0x80] sm:$0xff]   ;;  %7122 = vst [vmem:[#allocation23_spill] sm:$0xff] %v6559_v22 }
  0xff   : > { %v6520_v46 = vpop.f32.mrf.mxu1  ;;  %v6522_v11 = vpop.f32.mrf.mxu0  ;;  %5264 = vmatpush3.bf16.msra.mxu1 %v5523_v28  ;;  %5318 = vmatpush3.bf16.msra.mxu0 %v5528_v4  ;;  %v2791_v42 = vrot.slane %v6531_v5, 2 }
 0x100   : > { %5265 = vmatprep.subr.bf16.mxu1 %v5527_v9 }
 0x101   : > { %v6525_v29 = vpop.f32.mrf.mxu1  ;;  %v6527_v41 = vpop.f32.mrf.mxu0 }
 0x103   : > { %v6533_v30 = vpop.f32.mrf.mxu1  ;;  %v6535_v31 = vpop.f32.mrf.mxu0  ;;  %5266 = vmatpush3.bf16.msra.mxu1 %v5527_v9  ;;  %v2794_v9 = vsel %vm2300_vm2, %v2791_v42, %v2793_v35 }
 0x105   : > { %v6541_v44 = vpop.f32.mrf.mxu1  ;;  %5180 = vmatmul.mubr.bf16.gmra.mxu1 %v6006_v58  ;;  %v6544_v8 = vpop.f32.mrf.mxu0  ;;  %5236 = vmatmul.mubr.bf16.gmra.mxu0 %v2788_v25  ;;  %v2792_v58 = vsel %vm2300_vm2, %v2789_v10, %v2791_v42  ;;  %v2795_v10 = vrot.slane %v6559_v22, 2 }
 0x106   : > { %7119 = vst [vmem:[#allocation20_spill] sm:$0xff] %v6541_v44  ;;  %5183 = vmatprep.mubr.bf16.mxu1 %v6019_v6  ;;  %5239 = vmatprep.mubr.bf16.mxu0 %v2790_v12 }
 0x107   : > { %v6548_v37 = vpop.f32.mrf.mxu1  ;;  %v6550_v57 = vpop.f32.mrf.mxu0 }
 0x108   : > { %7120 = vst [vmem:[#allocation21_spill] sm:$0xff] %v6548_v37 }
 0x109   : > { %v6553_v28 = vpop.f32.mrf.mxu1  ;;  %v6555_v4 = vpop.f32.mrf.mxu0 }
 0x10a   : > { %7121 = vst [vmem:[#allocation22_spill] sm:$0xff] %v6553_v28  ;;  %v2796_v28 = vsel %vm2300_vm2, %v2793_v35, %v2795_v10 }
 0x10b   : > { %v6561_v54 = vpop.f32.mrf.mxu1  ;;  %v6563_v6 = vpop.f32.mrf.mxu0 }
 0x10c   : > { %7123 = vst [vmem:[#allocation24_spill] sm:$0xff] %v6561_v54  ;;  %v2797_v54 = vrot.slane %v6567_v36, 2 }
 0x10d   : > { %v6569_v25 = vpop.f32.mrf.mxu1  ;;  %5184 = vmatmul.mubr.bf16.gmra.mxu1 %v6030_v16  ;;  %v5009_v12 = vpop.f32.mrf.mxu0  ;;  %5240 = vmatmul.mubr.bf16.gmra.mxu0 %v2792_v58 }
 0x10e   : > { %7125 = vst [vmem:[#allocation26_spill] sm:$0xff] %v6569_v25  ;;  %5187 = vmatprep.mubr.bf16.mxu1 %v6040_v50  ;;  %5243 = vmatprep.mubr.bf16.mxu0 %v2794_v9  ;;  %v5526_v25 = vld [vmem:[%s5608_s25 + $0xa0] ss:$0 sps:$4 sm:$0x33]   ;;  %v2798_v58 = vsel %vm2300_vm2, %v2795_v10, %v2797_v54 }
 0x10f   : > { %v6574_v17 = vpop.f32.mrf.mxu1  ;;  %v1166_v51 = vpop.f32.mrf.mxu0 }
 0x110   : > { %7126 = vst [vmem:[#allocation27_spill] sm:$0xff] %v6574_v17 }
 0x111   : > { %v6577_v43 = vpop.f32.mrf.mxu1  ;;  %v5010_v42 = vpop.f32.mrf.mxu0 }
 0x112   : > { %7127 = vst [vmem:[#allocation28_spill] sm:$0xff] %v6577_v43  ;;  %v2799_v43 = vrot.slane %v5526_v25, 2 }
 0x113   : > { %v6581_v37 = vpop.f32.mrf.mxu1  ;;  %v1169_v16 = vpop.f32.mrf.mxu0 }
 0x114   : > { %7128 = vst [vmem:[#allocation29_spill] sm:$0xff] %v6581_v37 }
 0x115   : > { %v4957_v50 = vpop.f32.mrf.mxu1  ;;  %5188 = vmatmul.mubr.bf16.gmra.mxu1 %v6053_v45  ;;  %v5013_v9 = vpop.f32.mrf.mxu0  ;;  %5244 = vmatmul.mubr.bf16.gmra.mxu0 %v2796_v28  ;;  %v2800_v45 = vsel %vm2300_vm2, %v2797_v54, %v2799_v43 }
 0x116   : > { %v873_v17 = vadd.f32 %v4957_v50, %v6448_v62  ;;  %5191 = vmatprep.mubr.bf16.mxu1 %v6080_v27  ;;  %5247 = vmatprep.mubr.bf16.mxu0 %v2798_v58 }
 0x117   : > { %v864_v36 = vpop.f32.mrf.mxu1  ;;  %v1182_v22 = vpop.f32.mrf.mxu0 }
 0x118   : > { %v865_v35 = vadd.f32 %v864_v36, %v6457_v18  ;;  %v6588_v63 = vadd.f32 %v5009_v12, %v873_v17  ;;  %v7129_v36 = vld [vmem:[#allocation2_spill] sm:$0xff] }
 0x119   : > { %v4958_v37 = vpop.f32.mrf.mxu1  ;;  %v5014_v49 = vpop.f32.mrf.mxu0 }
 0x11a   : > { %v876_v10 = vadd.f32 %v4958_v37, %v6465_v61  ;;  %v6592_v44 = vadd.f32 %v1166_v51, %v865_v35  ;;  %v7130_v61 = vld [vmem:[#allocation4_spill] sm:$0xff] }
 0x11b   : > { %v867_v28 = vpop.f32.mrf.mxu1  ;;  %v1185_v62 = vpop.f32.mrf.mxu0 }
 0x11c   : > { %v868_v27 = vadd.f32 %v867_v28, %v6470_v56  ;;  %v6595_v58 = vadd.f32 %v5010_v42, %v876_v10  ;;  %v7131_v28 = vld [vmem:[#allocation3_spill] sm:$0xff] }
 0x11d   : > { %v4961_v25 = vpop.f32.mrf.mxu1  ;;  %5192 = vmatmul.mubr.bf16.gmra.mxu1 %v6085_v40  ;;  %v5017_v18 = vpop.f32.mrf.mxu0  ;;  %5248 = vmatmul.mubr.bf16.gmra.mxu0 %v2800_v45 }
 0x11e   : > { %v889_v17 = vadd.f32 %v4961_v25, %v6482_v39  ;;  %5195 = vmatprep.mubr.bf16.mxu1 %v7129_v36  ;;  %5319 = vmatprep.mubr.bf16.mxu0 %v7130_v61  ;;  %v6601_v43 = vadd.f32 %v1169_v16, %v868_v27  ;;  %v7132_v25 = vld [vmem:[#allocation5_spill] sm:$0xff] }
 0x11f   : > { %v880_v51 = vpop.f32.mrf.mxu1  ;;  %v1198_v37 = vpop.f32.mrf.mxu0 }
 0x120   : > { %v881_v54 = vadd.f32 %v880_v51, %v6488_v23  ;;  %v6604_v56 = vadd.f32 %v5013_v9, %v889_v17  ;;  %v7133_v9 = vld [vmem:[#allocation7_spill] sm:$0xff] }
 0x121   : > { %v4962_v12 = vpop.f32.mrf.mxu1  ;;  %v5018_v42 = vpop.f32.mrf.mxu0 }
 0x122   : > { %v892_v40 = vadd.f32 %v4962_v12, %v6499_v7  ;;  %v6607_v50 = vadd.f32 %v1182_v22, %v881_v54 }
 0x123   : > { %v883_v35 = vpop.f32.mrf.mxu1  ;;  %v1201_v39 = vpop.f32.mrf.mxu0 }
 0x124   : > { %v884_v10 = vadd.f32 %v883_v35, %v6504_v1  ;;  %v6610_v45 = vadd.f32 %v5014_v49, %v892_v40  ;;  %v7134_v35 = vld [vmem:[#allocation6_spill] sm:$0xff] }
 0x125   : > { %v4965_v16 = vpop.f32.mrf.mxu1  ;;  %5196 = vmatmul.mubr.bf16.gmra.mxu1 %v7131_v28  ;;  %v5021_v27 = vpop.f32.mrf.mxu0  ;;  %5320 = vmatmul.mubr.bf16.vlgmr.msra.gmra.mxu0 %v7132_v25  ;;  %v7137_v28 = vld [vmem:[#allocation11_spill] sm:$0xff] }
 0x126   : > { %v905_v23 = vadd.f32 %v4965_v16, %v6516_v20  ;;  %5267 = vmatprep.mubr.bf16.mxu1 %v6194_v34  ;;  %5323 = vmatprep.mubr.bf16.mxu0 %v7133_v9  ;;  %v6617_v7 = vadd.f32 %v1185_v62, %v884_v10  ;;  %v7135_v16 = vld [vmem:[#allocation8_spill] sm:$0xff] }
 0x127   : > { %v896_v22 = vpop.f32.mrf.mxu1  ;;  %v1214_v17 = vpop.f32.mrf.mxu0 }
 0x128   : > { %v897_v1 = vadd.f32 %v896_v22, %v6522_v11  ;;  %v6620_v49 = vadd.f32 %v5017_v18, %v905_v23  ;;  %v7136_v18 = vld [vmem:[#allocation9_spill] sm:$0xff] }
 0x129   : > { %v4966_v36 = vpop.f32.mrf.mxu1  ;;  %v5022_v61 = vpop.f32.mrf.mxu0 }
 0x12a   : > { %v908_v51 = vadd.f32 %v4966_v36, %v6527_v41  ;;  %v6623_v54 = vadd.f32 %v1198_v37, %v897_v1 }
 0x12b   : > { %v899_v12 = vpop.f32.mrf.mxu1  ;;  %v1217_v20 = vpop.f32.mrf.mxu0 }
 0x12c   : > { %v900_v34 = vadd.f32 %v899_v12, %v6535_v31  ;;  %v6626_v40 = vadd.f32 %v5018_v42, %v908_v51 }
 0x12d   : > { %v4969_v62 = vpop.f32.mrf.mxu1  ;;  %5268 = vmatmul.mubr.bf16.vlgmr.msra.gmra.mxu1 %v7134_v35  ;;  %v5025_v10 = vpop.f32.mrf.mxu0  ;;  %5324 = vmatmul.mubr.bf16.gmra.mxu0 %v7135_v16 }
 0x12e   : > { %v921_v11 = vadd.f32 %v4969_v62, %v6544_v8  ;;  %5271 = vmatprep.mubr.bf16.mxu1 %v7136_v18  ;;  %5327 = vmatprep.mubr.bf16.mxu0 %v7137_v28  ;;  %v6633_v41 = vadd.f32 %v1201_v39, %v900_v34  ;;  %v7138_v34 = vld [vmem:[#allocation10_spill] sm:$0xff] }
 0x12f   : > { %v912_v37 = vpop.f32.mrf.mxu1  ;;  %v1230_v25 = vpop.f32.mrf.mxu0 }
 0x130   : > { %v913_v31 = vadd.f32 %v912_v37, %v6550_v57  ;;  %v6636_v42 = vadd.f32 %v5021_v27, %v921_v11  ;;  %v7139_v27 = vld [vmem:[#allocation12_spill] sm:$0xff] }
 0x131   : > { %v4970_v23 = vpop.f32.mrf.mxu1  ;;  %v5026_v9 = vpop.f32.mrf.mxu0 }
 0x132   : > { %v924_v22 = vadd.f32 %v4970_v23, %v6555_v4  ;;  %v6639_v1 = vadd.f32 %v1214_v17, %v913_v31 }
 0x133   : > { %v915_v36 = vpop.f32.mrf.mxu1  ;;  %v1233_v8 = vpop.f32.mrf.mxu0 }
 0x134   : > { %v916_v51 = vadd.f32 %v915_v36, %v6563_v6  ;;  %v6642_v12 = vadd.f32 %v5022_v61, %v924_v22  ;;  %v7141_v22 = vld [vmem:[#allocation14_spill] sm:$0xff] }
 0x135   : > { %v4973_v39 = vpop.f32.mrf.mxu1  ;;  %5272 = vmatmul.mubr.bf16.gmra.mxu1 %v7138_v34  ;;  %v5029_v62 = vpop.f32.mrf.mxu0  ;;  %5328 = vmatmul.mubr.bf16.gmra.mxu0 %v6279_v24 }
 0x136   : > { %v937_v57 = vadd.f32 %v4973_v39, %v6445_v53  ;;  %5275 = vmatprep.mubr.bf16.mxu1 %v7139_v27  ;;  %5331 = vmatprep.mubr.bf16.mxu0 %v6315_v13  ;;  %v6649_v4 = vadd.f32 %v1217_v20, %v916_v51  ;;  %v7140_v20 = vld [vmem:[#allocation13_spill] sm:$0xff] }
 0x137   : > { %v928_v17 = vpop.f32.mrf.mxu1  ;;  %v1246_v35 = vpop.f32.mrf.mxu0 }
 0x138   : > { %v929_v6 = vadd.f32 %v928_v17, %v6455_v14  ;;  %v6652_v61 = vadd.f32 %v5025_v10, %v937_v57 }
 0x139   : > { %v4974_v16 = vpop.f32.mrf.mxu1  ;;  %v5030_v11 = vpop.f32.mrf.mxu0 }
 0x13a   : > { %v940_v18 = vadd.f32 %v4974_v16, %v6463_v26  ;;  %v6655_v28 = vadd.f32 %v1230_v25, %v929_v6  ;;  %v3219_v6 = vshrl.u32 %v6508_v59, 16  ;;  %v3222_v16 = vshll.u32 %v6508_v59, 16 }
 0x13b   : > { %v931_v24 = vpop.f32.mrf.mxu1  ;;  %v1249_v53 = vpop.f32.mrf.mxu0 }
 0x13c   : > { %v932_v37 = vadd.f32 %v931_v24, %v6468_v47  ;;  %v6658_v31 = vadd.f32 %v5026_v9, %v940_v18 }
 0x13d   : > { %v4977_v13 = vpop.f32.mrf.mxu1  ;;  %5276 = vmatmul.mubr.bf16.gmra.mxu1 %v7140_v20  ;;  %v5033_v23 = vpop.f32.mrf.mxu0  ;;  %5332 = vmatmul.mubr.bf16.gmra.mxu0 %v7141_v22  ;;  %v3221_v20 = vrot.slane %v3219_v6, 2  ;;  %v3224_v22 = vrot.slane %v3222_v16, 3 }
 0x13e   : > { %v953_v14 = vadd.f32 %v4977_v13, %v6479_v3  ;;  %5279 = vmatprep.mubr.bf16.mxu1 %v6332_v60  ;;  %5335 = vmatprep.mubr.bf16.mxu0 %v6351_v33  ;;  %v6665_v26 = vadd.f32 %v1233_v8, %v932_v37  ;;  %v7142_v8 = vld [vmem:[#allocation15_spill] sm:$0xff]  ;;  %v7143_v37 = vrot.slane %v6371_v15, 3  ;;  %v3228_v15 = vshrl.u32 %v6531_v5, 16 }
 0x13f   : > { %v944_v10 = vpop.f32.mrf.mxu1  ;;  %v1262_v25 = vpop.f32.mrf.mxu0 }
 0x140   : > { %v945_v47 = vadd.f32 %v944_v10, %v6486_v48  ;;  %v6668_v9 = vadd.f32 %v5029_v62, %v953_v14  ;;  %v7144_v10 = vld [vmem:[#allocation20_spill] sm:$0xff] }
 0x141   : > { %v4978_v36 = vpop.f32.mrf.mxu1  ;;  %v5034_v51 = vpop.f32.mrf.mxu0 }
 0x142   : > { %v956_v39 = vadd.f32 %v4978_v36, %v6497_v19  ;;  %v6671_v34 = vadd.f32 %v1246_v35, %v945_v47  ;;  %v7145_v47 = vld [vmem:[#allocation17_spill] sm:$0xff]  ;;  %v3231_v36 = vshll.u32 %v6531_v5, 16 }
 0x143   : > { %v947_v57 = vpop.f32.mrf.mxu1  ;;  %v1265_v3 = vpop.f32.mrf.mxu0 }
 0x144   : > { %v948_v60 = vadd.f32 %v947_v57, %v6502_v2  ;;  %v6674_v27 = vadd.f32 %v5030_v11, %v956_v39  ;;  %v3598_v2 = vrot.slane %v6508_v59, 3  ;;  %v3225_v57 = vor.u32 %v3224_v22, %v3221_v20  ;;  %v7149_v20 = vld [vmem:[#allocation16_spill] sm:$0xff] }
 0x145   : > { %v4981_v33 = vpop.f32.mrf.mxu1  ;;  %5280 = vmatmul.mubr.bf16.gmra.mxu1 %v7142_v8  ;;  %v5037_v17 = vpop.f32.mrf.mxu0  ;;  %5336 = vmatmul.mubr.bf16.gmra.mxu0 %v6354_v55  ;;  %v7147_v8 = vld [vmem:[#allocation21_spill] sm:$0xff] }
 0x146   : > { %v969_v48 = vadd.f32 %v4981_v33, %v6513_v52  ;;  %5283 = vmatprep.mubr.bf16.mxu1 %v6366_v32  ;;  %5339 = vmatprep.mubr.bf16.mxu0 %v6385_v0  ;;  %v6681_v19 = vadd.f32 %v1249_v53, %v948_v60  ;;  %v3599_v13 = vsel %vm3572_vm4, %v7143_v37, %v3598_v2 }
 0x147   : > { %v960_v62 = vpop.f32.mrf.mxu1  ;;  %v1278_v35 = vpop.f32.mrf.mxu0  ;;  %v3226_v22 = vsel %vm3101_vm5, %v7149_v20, %v3225_v57 }
 0x148   : > { %v961_v11 = vadd.f32 %v960_v62, %v6520_v46  ;;  %v6687_v18 = vadd.f32 %v5033_v23, %v969_v48 }
 0x149   : > { %v4982_v55 = vpop.f32.mrf.mxu1  ;;  %v5038_v52 = vpop.f32.mrf.mxu0 }
 0x14a   : > { %v972_v32 = vadd.f32 %v4982_v55, %v6525_v29  ;;  %v6690_v24 = vadd.f32 %v1262_v25, %v961_v11  ;;  %v3600_v29 = vrot.slane %v6531_v5, 3  ;;  %v7148_v5 = vld [vmem:[#allocation22_spill] sm:$0xff]  ;;  %v3230_v55 = vrot.slane %v3228_v15, 2 }
 0x14b   : > { %v963_v0 = vpop.f32.mrf.mxu1  ;;  %v1281_v53 = vpop.f32.mrf.mxu0 }
 0x14c   : > { %v964_v59 = vadd.f32 %v963_v0, %v6533_v30  ;;  %v6696_v14 = vadd.f32 %v5034_v51, %v972_v32  ;;  %v3601_v11 = vsel %vm3572_vm4, %v3598_v2, %v3600_v29  ;;  %v3233_v32 = vrot.slane %v3231_v36, 3 }
 0x14d   : > { %v4985_v46 = vpop.f32.mrf.mxu1  ;;  %5284 = vmatmul.mubr.bf16.gmra.mxu1 %v6374_v38  ;;  %v5041_v23 = vpop.f32.mrf.mxu0  ;;  %5340 = vmatmul.mubr.bf16.gmra.mxu0 %v6390_v21  ;;  %v7146_v38 = vld [vmem:[#allocation19_spill] sm:$0xff] }
 0x14e   : > { %v985_v25 = vadd.f32 %v4985_v46, %v7144_v10  ;;  %5287 = vmatprep.mubr.bf16.mxu1 %v7145_v47  ;;  %5343 = vmatprep.mubr.bf16.mxu0 %v3599_v13  ;;  %v6705_v30 = vadd.f32 %v1265_v3, %v964_v59  ;;  %v3602_v60 = vrot.slane %v7146_v38, 3  ;;  %v3237_v21 = vshrl.u32 %v7146_v38, 16  ;;  %v7150_v10 = vld [vmem:[#allocation24_spill] sm:$0xff] }
 0x14f   : > { %v976_v51 = vpop.f32.mrf.mxu1  ;;  %v1294_v39 = vpop.f32.mrf.mxu0  ;;  %v3240_v33 = vshll.u32 %v7146_v38, 16 }
 0x150   : > { %v977_v48 = vadd.f32 %v976_v51, %v7147_v8  ;;  %v6711_v62 = vadd.f32 %v5037_v17, %v985_v25  ;;  %v3603_v59 = vsel %vm3572_vm4, %v3600_v29, %v3602_v60  ;;  %v3239_v46 = vrot.slane %v3237_v21, 2  ;;  %v7152_v51 = vld [vmem:[#allocation18_spill] sm:$0xff] }
 0x151   : > { %v4986_v6 = vpop.f32.mrf.mxu1  ;;  %v5042_v16 = vpop.f32.mrf.mxu0  ;;  %v3242_v17 = vrot.slane %v3240_v33, 3  ;;  %v7154_v8 = vld [vmem:[#allocation26_spill] sm:$0xff] }
 0x152   : > { %v988_v3 = vadd.f32 %v4986_v6, %v7148_v5  ;;  %v6715_v0 = vadd.f32 %v1278_v35, %v977_v48  ;;  %v7153_v35 = vld [vmem:[#allocation23_spill] sm:$0xff]  ;;  %v3234_v6 = vor.u32 %v3233_v32, %v3230_v55 }
 0x153   : > { %v979_v37 = vpop.f32.mrf.mxu1  ;;  %v1297_v13 = vpop.f32.mrf.mxu0  ;;  %v3246_v36 = vshrl.u32 %v7153_v35, 16  ;;  %v3249_v38 = vshll.u32 %v7153_v35, 16  ;;  %v3604_v29 = vrot.slane %v7153_v35, 3  ;;  %v3243_v5 = vor.u32 %v3242_v17, %v3239_v46  ;;  %v5530_v35 = vld [vmem:[%s5608_s25 + $0xa0] ss:$0 sps:$4 sm:$0x77]  }
 0x154   : > { %v980_v25 = vadd.f32 %v979_v37, %v7150_v10  ;;  %v6721_v47 = vadd.f32 %v5038_v52, %v988_v3  ;;  %v7156_v3 = vld [vmem:[#allocation25_spill] sm:$0xff]  ;;  %v7157_v10 = vld [vmem:[#allocation27_spill] sm:$0xff] }
 0x155   : > { %v4989_v2 = vpop.f32.mrf.mxu1  ;;  %5288 = vmatmul.mubr.bf16.gmra.mxu1 %v7152_v51  ;;  %v5113_v15 = vpop.f32.mrf.mxu0  ;;  %5344 = vmatmul.mubr.bf16.gmra.mxu0 %v3601_v11  ;;  %v3606_v37 = vrot.slane %v7156_v3, 3  ;;  %v3255_v11 = vshrl.u32 %v7156_v3, 16  ;;  %v3258_v20 = vshll.u32 %v7156_v3, 16  ;;  %v3605_v46 = vsel %vm3572_vm4, %v3602_v60, %v3604_v29 }
 0x156   : > { %7151 = vst [vmem:[#allocation2_spill] sm:$0xff] %v6721_v47  ;;  %v1001_v48 = vadd.f32 %v4989_v2, %v7154_v8  ;;  %5291 = vmatprep.mubr.bf16.mxu1 %v3226_v22  ;;  %5347 = vmatprep.mubr.bf16.mxu0 %v3603_v59  ;;  %v6728_v21 = vadd.f32 %v1281_v53, %v980_v25  ;;  %v3248_v22 = vrot.slane %v3246_v36, 2  ;;  %v3251_v59 = vrot.slane %v3249_v38, 3  ;;  %v7159_v53 = vld [vmem:[#allocation28_spill] sm:$0xff] }
 0x157   : > { %v992_v52 = vpop.f32.mrf.mxu1  ;;  %v2100_v33 = vpop.f32.mrf.mxu0  ;;  %v3235_v8 = vsel %vm3101_vm5, %v3225_v57, %v3234_v6  ;;  %v3244_v3 = vsel %vm3101_vm5, %v3234_v6, %v3243_v5  ;;  %v3608_v60 = vrot.slane %v5530_v35, 3  ;;  %v3267_v6 = vshll.u32 %v5530_v35, 16 }
 0x158   : > { %7155 = vst [vmem:[#allocation4_spill] sm:$0xff] %v6728_v21  ;;  %v993_v51 = vadd.f32 %v992_v52, %v7157_v10  ;;  %v6734_v2 = vadd.f32 %v5041_v23, %v1001_v48  ;;  %v3607_v23 = vsel %vm3572_vm4, %v3604_v29, %v3606_v37  ;;  %v3257_v48 = vrot.slane %v3255_v11, 2  ;;  %v7160_v10 = vld [vmem:[#allocation29_spill] sm:$0xff] }
 0x159   : > { %v4990_v55 = vpop.f32.mrf.mxu1  ;;  %v5114_v32 = vpop.f32.mrf.mxu0  ;;  %v3260_v52 = vrot.slane %v3258_v20, 3  ;;  %v3252_v57 = vor.u32 %v3251_v59, %v3248_v22  ;;  %v3609_v59 = vsel %vm3572_vm4, %v3606_v37, %v3608_v60 }
 0x15a   : > { %7158 = vst [vmem:[#allocation3_spill] sm:$0xff] %v6734_v2  ;;  %v1004_v25 = vadd.f32 %v4990_v55, %v7159_v53  ;;  %v6740_v17 = vadd.f32 %v1294_v39, %v993_v51  ;;  %v3264_v51 = vshrl.u32 %v5530_v35, 16 }
 0x15b   : > { %v995_v21 = vpop.f32.mrf.mxu1  ;;  %v2103_v47 = vpop.f32.mrf.mxu0  ;;  %v3261_v20 = vor.u32 %v3260_v52, %v3257_v48 }
 0x15c   : > { %v996_v36 = vadd.f32 %v995_v21, %v7160_v10  ;;  %v6745_v38 = vadd.f32 %v5042_v16, %v1004_v25 }
 0x15d   : > { %v5061_v2 = vpop.f32.mrf.mxu1  ;;  %5292 = vmatmul.mubr.bf16.gmra.mxu1 %v3235_v8  ;;  %v5117_v55 = vpop.f32.mrf.mxu0  ;;  %5348 = vmatmul.mubr.bf16.gmra.mxu0 %v3605_v46  ;;  %v3253_v8 = vsel %vm3101_vm5, %v3243_v5, %v3252_v57  ;;  %v3269_v46 = vrot.slane %v3267_v6, 3 }
 0x15e   : > { %v1774_v39 = vadd.f32 %v5061_v2, %v6588_v63  ;;  %5295 = vmatprep.mubr.bf16.mxu1 %v3244_v3  ;;  %5351 = vmatprep.mubr.bf16.mxu0 %v3607_v23  ;;  %v6748_v53 = vadd.f32 %v1297_v13, %v996_v36  ;;  %v3266_v2 = vrot.slane %v3264_v51, 2  ;;  %v3262_v23 = vsel %vm3101_vm5, %v3252_v57, %v3261_v20 }
 0x15f   : > { %v1629_v29 = vpop.f32.mrf.mxu1  ;;  %v2116_v11 = vpop.f32.mrf.mxu0 }
 0x160   : > { %v1772_v16 = vadd.f32 %v1629_v29, %v6592_v44  ;;  %v6751_v21 = vadd.f32 %v5113_v15, %v1774_v39 }
 0x161   : > { %v5062_v25 = vpop.f32.mrf.mxu1  ;;  %v5118_v22 = vpop.f32.mrf.mxu0 }
 0x162   : > { %v1775_v63 = vadd.f32 %v5062_v25, %v6595_v58  ;;  %v6756_v35 = vadd.f32 %v2100_v33, %v1772_v16  ;;  %v3270_v58 = vor.u32 %v3269_v46, %v3266_v2 }
 0x163   : > { %v1632_v13 = vpop.f32.mrf.mxu1  ;;  %v2119_v3 = vpop.f32.mrf.mxu0 }
 0x164   : > { %v1773_v44 = vadd.f32 %v1632_v13, %v6601_v43  ;;  %v6760_v15 = vadd.f32 %v5114_v32, %v1775_v63  ;;  %v3271_v39 = vsel %vm3101_vm5, %v3261_v20, %v3270_v58 }
 0x165   : > { %v5065_v48 = vpop.f32.mrf.mxu1  ;;  %5296 = vmatmul.mubr.bf16.gmra.mxu1 %v3253_v8  ;;  %v5121_v5 = vpop.f32.mrf.mxu0  ;;  %5352 = vmatmul.mubr.bf16.gmra.mxu0 %v3609_v59 }
 0x166   : > { %v1778_v37 = vadd.f32 %v5065_v48, %v6604_v56  ;;  %5299 = vmatprep.mubr.bf16.mxu1 %v3262_v23  ;;  %v6763_v52 = vadd.f32 %v2103_v47, %v1773_v44 }
 0x167   : > { %v1645_v33 = vpop.f32.mrf.mxu1  ;;  %v2132_v10 = vpop.f32.mrf.mxu0 }
 0x168   : > { %v1776_v36 = vadd.f32 %v1645_v33, %v6607_v50  ;;  %v6766_v60 = vadd.f32 %v5117_v55, %v1778_v37 }
 0x169   : > { %v5066_v57 = vpop.f32.mrf.mxu1  ;;  %v5122_v43 = vpop.f32.mrf.mxu0 }
 0x16a   : > { %v1779_v32 = vadd.f32 %v5066_v57, %v6610_v45  ;;  %v6770_v51 = vadd.f32 %v2116_v11, %v1776_v36 }
 0x16b   : > { %v1648_v6 = vpop.f32.mrf.mxu1  ;;  %v2135_v56 = vpop.f32.mrf.mxu0 }
 0x16c   : > { %v1777_v29 = vadd.f32 %v1648_v6, %v6617_v7  ;;  %v6773_v47 = vadd.f32 %v5118_v22, %v1779_v32 }
 0x16d   : > { %v5069_v16 = vpop.f32.mrf.mxu1  ;;  %5300 = vmatmul.mubr.bf16.gmra.mxu1 %v3271_v39  ;;  %v5125_v25 = vpop.f32.mrf.mxu0 }
 0x16e   : > { %v1782_v50 = vadd.f32 %v5069_v16, %v6620_v49  ;;  %v6776_v55 = vadd.f32 %v2119_v3, %v1777_v29 }
 0x16f   : > { %v1661_v8 = vpop.f32.mrf.mxu1  ;;  %v2148_v59 = vpop.f32.mrf.mxu0 }
 0x170   : > { %v1780_v45 = vadd.f32 %v1661_v8, %v6623_v54  ;;  %v6779_v20 = vadd.f32 %v5121_v5, %v1782_v50 }
 0x171   : > { %v5070_v11 = vpop.f32.mrf.mxu1  ;;  %v5126_v63 = vpop.f32.mrf.mxu0 }
 0x172   : > { %v1783_v2 = vadd.f32 %v5070_v11, %v6626_v40  ;;  %v6782_v7 = vadd.f32 %v2132_v10, %v1780_v45 }
 0x173   : > { %v1664_v22 = vpop.f32.mrf.mxu1  ;;  %v2151_v46 = vpop.f32.mrf.mxu0 }
 0x174   : > { %v1781_v13 = vadd.f32 %v1664_v22, %v6633_v41  ;;  %v6785_v23 = vadd.f32 %v5122_v43, %v1783_v2 }
 0x175   : > { %v5073_v49 = vpop.f32.mrf.mxu1  ;;  %v5129_v3 = vpop.f32.mrf.mxu0 }
 0x176   : > { %v1786_v44 = vadd.f32 %v5073_v49, %v6636_v42  ;;  %v6788_v48 = vadd.f32 %v2135_v56, %v1781_v13 }
 0x177   : > { %v1677_v54 = vpop.f32.mrf.mxu1  ;;  %v2164_v5 = vpop.f32.mrf.mxu0 }
 0x178   : > { %v1784_v37 = vadd.f32 %v1677_v54, %v6639_v1  ;;  %v6791_v58 = vadd.f32 %v5125_v25, %v1786_v44 }
 0x179   : > { %v5074_v40 = vpop.f32.mrf.mxu1  ;;  %v5130_v33 = vpop.f32.mrf.mxu0 }
 0x17a   : > { %v1787_v10 = vadd.f32 %v5074_v40, %v6642_v12  ;;  %v6794_v36 = vadd.f32 %v2148_v59, %v1784_v37 }
 0x17b   : > { %v1680_v41 = vpop.f32.mrf.mxu1  ;;  %v2167_v57 = vpop.f32.mrf.mxu0 }
 0x17c   : > { %v1785_v43 = vadd.f32 %v1680_v41, %v6649_v4  ;;  %v6797_v32 = vadd.f32 %v5126_v63, %v1787_v10 }
 0x17d   : > { %v5077_v42 = vpop.f32.mrf.mxu1  ;;  %v5133_v39 = vpop.f32.mrf.mxu0 }
 0x17e   : > { %v1790_v6 = vadd.f32 %v5077_v42, %v6652_v61  ;;  %v6800_v56 = vadd.f32 %v2151_v46, %v1785_v43 }
 0x17f   : > { %v1693_v1 = vpop.f32.mrf.mxu1  ;;  %v2180_v29 = vpop.f32.mrf.mxu0 }
 0x180   : > { %v1788_v16 = vadd.f32 %v1693_v1, %v6655_v28  ;;  %v6803_v25 = vadd.f32 %v5129_v3, %v1790_v6 }
 0x181   : > { %v5078_v12 = vpop.f32.mrf.mxu1  ;;  %v5134_v50 = vpop.f32.mrf.mxu0 }
 0x182   : > { %v1791_v8 = vadd.f32 %v5078_v12, %v6658_v31  ;;  %v6806_v59 = vadd.f32 %v2164_v5, %v1788_v16 }
 0x183   : > { %v1696_v4 = vpop.f32.mrf.mxu1  ;;  %v2183_v45 = vpop.f32.mrf.mxu0 }
 0x184   : > { %v1789_v11 = vadd.f32 %v1696_v4, %v6665_v26  ;;  %v6809_v63 = vadd.f32 %v5130_v33, %v1791_v8 }
 0x185   : > { %v5081_v61 = vpop.f32.mrf.mxu1  ;;  %v5137_v2 = vpop.f32.mrf.mxu0 }
 0x186   : > { %v1794_v22 = vadd.f32 %v5081_v61, %v6668_v9  ;;  %v6812_v46 = vadd.f32 %v2167_v57, %v1789_v11 }
 0x187   : > { %v1709_v28 = vpop.f32.mrf.mxu1  ;;  %v2196_v13 = vpop.f32.mrf.mxu0 }
 0x188   : > { %v1792_v49 = vadd.f32 %v1709_v28, %v6671_v34  ;;  %v6815_v3 = vadd.f32 %v5133_v39, %v1794_v22  ;;  %v7161_v28 = vld [vmem:[#allocation2_spill] sm:$0xff] }
 0x189   : > { %v5082_v31 = vpop.f32.mrf.mxu1  ;;  %v5138_v44 = vpop.f32.mrf.mxu0 }
 0x18a   : > { %v1795_v54 = vadd.f32 %v5082_v31, %v6674_v27  ;;  %v6818_v5 = vadd.f32 %v2180_v29, %v1792_v49 }
 0x18b   : > { %v1712_v26 = vpop.f32.mrf.mxu1  ;;  %v2199_v37 = vpop.f32.mrf.mxu0 }
 0x18c   : > { %v1793_v40 = vadd.f32 %v1712_v26, %v6681_v19  ;;  %v6821_v33 = vadd.f32 %v5134_v50, %v1795_v54 }
 0x18d   : > { %v5085_v9 = vpop.f32.mrf.mxu1  ;;  %v5141_v10 = vpop.f32.mrf.mxu0 }
 0x18e   : > { %v1798_v41 = vadd.f32 %v5085_v9, %v6687_v18  ;;  %v6824_v57 = vadd.f32 %v2183_v45, %v1793_v40  ;;  %v7163_v40 = vld [vmem:[#allocation3_spill] sm:$0xff] }
 0x18f   : > { %v1725_v34 = vpop.f32.mrf.mxu1  ;;  %v2212_v43 = vpop.f32.mrf.mxu0 }
 0x190   : > { %v1796_v42 = vadd.f32 %v1725_v34, %v6690_v24  ;;  %v6827_v39 = vadd.f32 %v5137_v2, %v1798_v41 }
 0x191   : > { %v5086_v27 = vpop.f32.mrf.mxu1  ;;  %v5142_v6 = vpop.f32.mrf.mxu0 }
 0x192   : > { %v1799_v1 = vadd.f32 %v5086_v27, %v6696_v14  ;;  %v6830_v29 = vadd.f32 %v2196_v13, %v1796_v42 }
 0x193   : > { %v1728_v19 = vpop.f32.mrf.mxu1  ;;  %v2215_v16 = vpop.f32.mrf.mxu0 }
 0x194   : > { %v1797_v12 = vadd.f32 %v1728_v19, %v6705_v30  ;;  %v6833_v50 = vadd.f32 %v5138_v44, %v1799_v1  ;;  %v7162_v44 = vld [vmem:[#allocation4_spill] sm:$0xff] }
 0x195   : > { %v5089_v18 = vpop.f32.mrf.mxu1  ;;  %v5145_v8 = vpop.f32.mrf.mxu0 }
 0x196   : > { %v1802_v4 = vadd.f32 %v5089_v18, %v6711_v62  ;;  %v6836_v45 = vadd.f32 %v2199_v37, %v1797_v12 }
 0x197   : > { %v1741_v24 = vpop.f32.mrf.mxu1  ;;  %v2228_v11 = vpop.f32.mrf.mxu0 }
 0x198   : > { %v1800_v61 = vadd.f32 %v1741_v24, %v6715_v0  ;;  %v6839_v2 = vadd.f32 %v5141_v10, %v1802_v4 }
 0x199   : > { %v5090_v14 = vpop.f32.mrf.mxu1  ;;  %v5146_v22 = vpop.f32.mrf.mxu0 }
 0x19a   : > { %v1803_v13 = vadd.f32 %v5090_v14, %v7161_v28  ;;  %v6842_v49 = vadd.f32 %v2212_v43, %v1800_v61 }
 0x19b   : > { %v1744_v30 = vpop.f32.mrf.mxu1  ;;  %v2231_v31 = vpop.f32.mrf.mxu0 }
 0x19c   : > { %v1801_v54 = vadd.f32 %v1744_v30, %v7162_v44  ;;  %v6845_v26 = vadd.f32 %v5142_v6, %v1803_v13 }
 0x19d   : > { %v5093_v62 = vpop.f32.mrf.mxu1  ;;  %v5217_v37 = vpop.f32.mrf.mxu0 }
 0x19e   : > { %v1806_v9 = vadd.f32 %v5093_v62, %v7163_v40  ;;  %v6848_v41 = vadd.f32 %v2215_v16, %v1801_v54 }
 0x19f   : > { %v1757_v0 = vpop.f32.mrf.mxu1  ;;  %v2901_v10 = vpop.f32.mrf.mxu0 }
 0x1a0   : > { %v1804_v34 = vadd.f32 %v1757_v0, %v6740_v17  ;;  %v6851_v42 = vadd.f32 %v5145_v8, %v1806_v9 }
 0x1a1   : > { %v5094_v43 = vpop.f32.mrf.mxu1  ;;  %v5218_v27 = vpop.f32.mrf.mxu0 }
 0x1a2   : > { %v1807_v1 = vadd.f32 %v5094_v43, %v6745_v38  ;;  %v6854_v19 = vadd.f32 %v2228_v11, %v1804_v34 }
 0x1a3   : > { %v1760_v6 = vpop.f32.mrf.mxu1  ;;  %v2904_v12 = vpop.f32.mrf.mxu0 }
 0x1a4   : > { %v1805_v18 = vadd.f32 %v1760_v6, %v6748_v53  ;;  %v6857_v4 = vadd.f32 %v5146_v22, %v1807_v1 }
 0x1a5   : > { %v5165_v16 = vpop.f32.mrf.mxu1  ;;  %v5221_v24 = vpop.f32.mrf.mxu0 }
 0x1a6   : > { %v2583_v61 = vadd.f32 %v5165_v16, %v6751_v21  ;;  %v6860_v14 = vadd.f32 %v2231_v31, %v1805_v18 }
 0x1a7   : > { %v2438_v17 = vpop.f32.mrf.mxu1  ;;  %v2917_v8 = vpop.f32.mrf.mxu0 }
 0x1a8   : > { %v2581_v28 = vadd.f32 %v2438_v17, %v6756_v35  ;;  %v6863_v13 = vadd.f32 %v5217_v37, %v2583_v61 }
 0x1a9   : > { %v5166_v38 = vpop.f32.mrf.mxu1  ;;  %v5222_v11 = vpop.f32.mrf.mxu0 }
 0x1aa   : > { %v2584_v30 = vadd.f32 %v5166_v38, %v6760_v15  ;;  %v6866_v44 = vadd.f32 %v2901_v10, %v2581_v28 }
 0x1ab   : > { %v2441_v53 = vpop.f32.mrf.mxu1  ;;  %v2920_v22 = vpop.f32.mrf.mxu0 }
 0x1ac   : > { %v2582_v54 = vadd.f32 %v2441_v53, %v6763_v52  ;;  %v6869_v62 = vadd.f32 %v5218_v27, %v2584_v30 }
 0x1ad   : > { %v5169_v21 = vpop.f32.mrf.mxu1  ;;  %v5225_v31 = vpop.f32.mrf.mxu0 }
 0x1ae   : > { %v2587_v40 = vadd.f32 %v5169_v21, %v6766_v60  ;;  %v6872_v9 = vadd.f32 %v2904_v12, %v2582_v54 }
 0x1af   : > { %v2454_v35 = vpop.f32.mrf.mxu1  ;;  %v2933_v37 = vpop.f32.mrf.mxu0 }
 0x1b0   : > { %v2585_v0 = vadd.f32 %v2454_v35, %v6770_v51  ;;  %v6875_v34 = vadd.f32 %v5221_v24, %v2587_v40 }
 0x1b1   : > { %v5170_v15 = vpop.f32.mrf.mxu1  ;;  %v5226_v10 = vpop.f32.mrf.mxu0 }
 0x1b2   : > { %v2588_v43 = vadd.f32 %v5170_v15, %v6773_v47  ;;  %v6878_v1 = vadd.f32 %v2917_v8, %v2585_v0 }
 0x1b3   : > { %v2457_v52 = vpop.f32.mrf.mxu1  ;;  %v2936_v27 = vpop.f32.mrf.mxu0 }
 0x1b4   : > { %v2586_v6 = vadd.f32 %v2457_v52, %v6776_v55  ;;  %v6881_v18 = vadd.f32 %v5222_v11, %v2588_v43 }
 0x1b5   : > { %v5173_v60 = vpop.f32.mrf.mxu1  ;;  %v5229_v12 = vpop.f32.mrf.mxu0 }
 0x1b6   : > { %v2591_v16 = vadd.f32 %v5173_v60, %v6779_v20  ;;  %v6884_v61 = vadd.f32 %v2920_v22, %v2586_v6 }
 0x1b7   : > { %v2470_v51 = vpop.f32.mrf.mxu1  ;;  %v2949_v24 = vpop.f32.mrf.mxu0 }
 0x1b8   : > { %v2589_v17 = vadd.f32 %v2470_v51, %v6782_v7  ;;  %v6887_v28 = vadd.f32 %v5225_v31, %v2591_v16 }
 0x1b9   : > { %v5174_v47 = vpop.f32.mrf.mxu1  ;;  %v5230_v8 = vpop.f32.mrf.mxu0 }
 0x1ba   : > { %v2592_v38 = vadd.f32 %v5174_v47, %v6785_v23  ;;  %v6890_v30 = vadd.f32 %v2933_v37, %v2589_v17 }
 0x1bb   : > { %v2473_v55 = vpop.f32.mrf.mxu1  ;;  %v2952_v11 = vpop.f32.mrf.mxu0 }
 0x1bc   : > { %v2590_v53 = vadd.f32 %v2473_v55, %v6788_v48  ;;  %v6893_v54 = vadd.f32 %v5226_v10, %v2592_v38 }
 0x1bd   : > { %v5177_v20 = vpop.f32.mrf.mxu1  ;;  %v5233_v22 = vpop.f32.mrf.mxu0 }
 0x1be   : > { %v2595_v21 = vadd.f32 %v5177_v20, %v6791_v58  ;;  %v6896_v40 = vadd.f32 %v2936_v27, %v2590_v53 }
 0x1bf   : > { %v2486_v7 = vpop.f32.mrf.mxu1  ;;  %v2965_v31 = vpop.f32.mrf.mxu0 }
 0x1c0   : > { %v2593_v35 = vadd.f32 %v2486_v7, %v6794_v36  ;;  %v6899_v0 = vadd.f32 %v5229_v12, %v2595_v21 }
 0x1c1   : > { %v5178_v23 = vpop.f32.mrf.mxu1  ;;  %v5234_v37 = vpop.f32.mrf.mxu0 }
 0x1c2   : > { %v2596_v15 = vadd.f32 %v5178_v23, %v6797_v32  ;;  %v6902_v43 = vadd.f32 %v2949_v24, %v2593_v35 }
 0x1c3   : > { %v2489_v48 = vpop.f32.mrf.mxu1  ;;  %v2968_v10 = vpop.f32.mrf.mxu0 }
 0x1c4   : > { %v2594_v52 = vadd.f32 %v2489_v48, %v6800_v56  ;;  %v6905_v6 = vadd.f32 %v5230_v8, %v2596_v15 }
 0x1c5   : > { %v5181_v58 = vpop.f32.mrf.mxu1  ;;  %v5237_v27 = vpop.f32.mrf.mxu0 }
 0x1c6   : > { %v2599_v60 = vadd.f32 %v5181_v58, %v6803_v25  ;;  %v6908_v16 = vadd.f32 %v2952_v11, %v2594_v52 }
 0x1c7   : > { %v2502_v36 = vpop.f32.mrf.mxu1  ;;  %v2981_v12 = vpop.f32.mrf.mxu0 }
 0x1c8   : > { %v2597_v51 = vadd.f32 %v2502_v36, %v6806_v59  ;;  %v6911_v17 = vadd.f32 %v5233_v22, %v2599_v60 }
 0x1c9   : > { %v5182_v32 = vpop.f32.mrf.mxu1  ;;  %v5238_v24 = vpop.f32.mrf.mxu0 }
 0x1ca   : > { %v2600_v47 = vadd.f32 %v5182_v32, %v6809_v63  ;;  %v6914_v38 = vadd.f32 %v2965_v31, %v2597_v51 }
 0x1cb   : > { %v2505_v56 = vpop.f32.mrf.mxu1  ;;  %v2984_v8 = vpop.f32.mrf.mxu0 }
 0x1cc   : > { %v2598_v55 = vadd.f32 %v2505_v56, %v6812_v46  ;;  %v6917_v53 = vadd.f32 %v5234_v37, %v2600_v47 }
 0x1cd   : > { %v5185_v25 = vpop.f32.mrf.mxu1  ;;  %v5241_v11 = vpop.f32.mrf.mxu0 }
 0x1ce   : > { %v2603_v20 = vadd.f32 %v5185_v25, %v6815_v3  ;;  %v6920_v21 = vadd.f32 %v2968_v10, %v2598_v55 }
 0x1cf   : > { %v2518_v59 = vpop.f32.mrf.mxu1  ;;  %v2997_v22 = vpop.f32.mrf.mxu0 }
 0x1d0   : > { %v2601_v7 = vadd.f32 %v2518_v59, %v6818_v5  ;;  %v6923_v35 = vadd.f32 %v5237_v27, %v2603_v20 }
 0x1d1   : > { %v5186_v63 = vpop.f32.mrf.mxu1  ;;  %v5242_v31 = vpop.f32.mrf.mxu0 }
 0x1d2   : > { %v2604_v23 = vadd.f32 %v5186_v63, %v6821_v33  ;;  %v6926_v15 = vadd.f32 %v2981_v12, %v2601_v7 }
 0x1d3   : > { %v2521_v46 = vpop.f32.mrf.mxu1  ;;  %v3000_v37 = vpop.f32.mrf.mxu0 }
 0x1d4   : > { %v2602_v48 = vadd.f32 %v2521_v46, %v6824_v57  ;;  %v6929_v52 = vadd.f32 %v5238_v24, %v2604_v23 }
 0x1d5   : > { %v5189_v3 = vpop.f32.mrf.mxu1  ;;  %v5245_v10 = vpop.f32.mrf.mxu0 }
 0x1d6   : > { %v2607_v58 = vadd.f32 %v5189_v3, %v6827_v39  ;;  %v6932_v60 = vadd.f32 %v2984_v8, %v2602_v48 }
 0x1d7   : > { %v2534_v5 = vpop.f32.mrf.mxu1  ;;  %v3013_v27 = vpop.f32.mrf.mxu0 }
 0x1d8   : > { %v2605_v36 = vadd.f32 %v2534_v5, %v6830_v29  ;;  %v6935_v51 = vadd.f32 %v5241_v11, %v2607_v58 }
 0x1d9   : > { %v5190_v33 = vpop.f32.mrf.mxu1  ;;  %v5246_v12 = vpop.f32.mrf.mxu0 }
 0x1da   : > { %v2608_v32 = vadd.f32 %v5190_v33, %v6833_v50  ;;  %v6938_v47 = vadd.f32 %v2997_v22, %v2605_v36 }
 0x1db   : > { %v2537_v57 = vpop.f32.mrf.mxu1  ;;  %v3016_v24 = vpop.f32.mrf.mxu0 }
 0x1dc   : > { %v2606_v56 = vadd.f32 %v2537_v57, %v6836_v45  ;;  %v6941_v55 = vadd.f32 %v5242_v31, %v2608_v32 }
 0x1dd   : > { %v5193_v39 = vpop.f32.mrf.mxu1  ;;  %v5249_v8 = vpop.f32.mrf.mxu0 }
 0x1de   : > { %v2611_v25 = vadd.f32 %v5193_v39, %v6839_v2  ;;  %v6944_v20 = vadd.f32 %v3000_v37, %v2606_v56 }
 0x1df   : > { %v2550_v29 = vpop.f32.mrf.mxu1  ;;  %v3029_v11 = vpop.f32.mrf.mxu0 }
 0x1e0   : > { %v2609_v59 = vadd.f32 %v2550_v29, %v6842_v49  ;;  %v6947_v7 = vadd.f32 %v5245_v10, %v2611_v25 }
 0x1e1   : > { %v5194_v50 = vpop.f32.mrf.mxu1  ;;  %v5250_v22 = vpop.f32.mrf.mxu0 }
 0x1e2   : > { %v2612_v63 = vadd.f32 %v5194_v50, %v6845_v26  ;;  %v6950_v23 = vadd.f32 %v3013_v27, %v2609_v59 }
 0x1e3   : > { %v2553_v45 = vpop.f32.mrf.mxu1  ;;  %v3032_v31 = vpop.f32.mrf.mxu0 }
 0x1e4   : > { %v2610_v46 = vadd.f32 %v2553_v45, %v6848_v41  ;;  %v6953_v48 = vadd.f32 %v5246_v12, %v2612_v63 }
 0x1e5   : > { %v5197_v2 = vpop.f32.mrf.mxu1  ;;  %v5321_v37 = vpop.f32.mrf.mxu0 }
 0x1e6   : > { %v2615_v3 = vadd.f32 %v5197_v2, %v6851_v42  ;;  %v6956_v58 = vadd.f32 %v3016_v24, %v2610_v46 }
 0x1e7   : > { %v2566_v49 = vpop.f32.mrf.mxu1  ;;  %v3710_v10 = vpop.f32.mrf.mxu0 }
 0x1e8   : > { %v2613_v5 = vadd.f32 %v2566_v49, %v6854_v19  ;;  %v6959_v36 = vadd.f32 %v5249_v8, %v2615_v3 }
 0x1e9   : > { %v5198_v26 = vpop.f32.mrf.mxu1  ;;  %v5322_v27 = vpop.f32.mrf.mxu0 }
 0x1ea   : > { %v2616_v33 = vadd.f32 %v5198_v26, %v6857_v4  ;;  %v6962_v32 = vadd.f32 %v3029_v11, %v2613_v5 }
 0x1eb   : > { %v2569_v41 = vpop.f32.mrf.mxu1  ;;  %v3713_v12 = vpop.f32.mrf.mxu0 }
 0x1ec   : > { %v2614_v57 = vadd.f32 %v2569_v41, %v6860_v14  ;;  %v6965_v42 = vadd.f32 %v5250_v22, %v2616_v33  ;;  %v6975_v14 = vld [vmem:[%s7081_s2] ss:$0 sm:$0xff] }
 0x1ed   : > { %v5269_v24 = vpop.f32.mrf.mxu1  ;;  %v5325_v56 = vpop.f32.mrf.mxu0 }
 0x1ee   : > { %v3517_v39 = vadd.f32 %v5269_v24, %v6863_v13  ;;  %v6968_v19 = vadd.f32 %v3032_v31, %v2614_v57 }
 0x1ef   : > { %v3372_v8 = vpop.f32.mrf.mxu1  ;;  %v3726_v25 = vpop.f32.mrf.mxu0 }
 0x1f0   : > { %v3515_v29 = vadd.f32 %v3372_v8, %v6866_v44  ;;  %v3855_v59 = vadd.f32 %v5321_v37, %v3517_v39 }
 0x1f1   : > { %v5270_v4 = vpop.f32.mrf.mxu1  ;;  %v5326_v11 = vpop.f32.mrf.mxu0 }
 0x1f2   : > { %v3518_v50 = vadd.f32 %v5270_v4, %v6869_v62  ;;  %v3853_v13 = vadd.f32 %v3710_v10, %v3515_v29  ;;  %v3898_v44 = vadd.f32 %v6975_v14, %v3855_v59 }
 0x1f3   : > { %v3375_v22 = vpop.f32.mrf.mxu1  ;;  %v3729_v63 = vpop.f32.mrf.mxu0 }
 0x1f4   : > { %v3856_v45 = vadd.f32 %v5322_v27, %v3518_v50  ;;  %v3516_v31 = vadd.f32 %v3375_v22, %v6872_v9  ;;  %v3896_v9 = vadd.f32 %v6975_v14, %v3853_v13 }
 0x1f5   : > { %v5273_v46 = vpop.f32.mrf.mxu1  ;;  %v5329_v2 = vpop.f32.mrf.mxu0 }
 0x1f6   : > { %v3899_v37 = vadd.f32 %v6975_v14, %v3856_v45  ;;  %v3854_v3 = vadd.f32 %v3713_v12, %v3516_v31  ;;  %v3521_v62 = vadd.f32 %v5273_v46, %v6875_v34 }
 0x1f7   : > { %v3388_v49 = vpop.f32.mrf.mxu1  ;;  %v3742_v10 = vpop.f32.mrf.mxu0 }
 0x1f8   : > { %v4554_v5 = vpack.c.bf16 %v3899_v37, %v3898_v44  ;;  %v3897_v26 = vadd.f32 %v6975_v14, %v3854_v3  ;;  %v3519_v27 = vadd.f32 %v3388_v49, %v6878_v1  ;;  %v3859_v12 = vadd.f32 %v5325_v56, %v3521_v62 }
 0x1f9   : > { %v5274_v33 = vpop.f32.mrf.mxu1  ;;  %v5330_v41 = vpop.f32.mrf.mxu0 }
 0x1fa   : > { %4636 = vst [vmem:[%s6985_s9 + $0x8] sm:$0xff] %v4554_v5   ;;  %v4549_v34 = vpack.c.bf16 %v3897_v26, %v3896_v9  ;;  %v3522_v57 = vadd.f32 %v5274_v33, %v6881_v18  ;;  %v3857_v8 = vadd.f32 %v3726_v25, %v3519_v27  ;;  %v3902_v22 = vadd.f32 %v6975_v14, %v3859_v12 }
 0x1fb   : > { %v3391_v24 = vpop.f32.mrf.mxu1  ;;  %v3745_v39 = vpop.f32.mrf.mxu0 }
 0x1fc   : > { %4550 = vst [vmem:[%s6985_s9] sm:$0xff] %v4549_v34   ;;  %v3860_v29 = vadd.f32 %v5326_v11, %v3522_v57  ;;  %v3520_v4 = vadd.f32 %v3391_v24, %v6884_v61  ;;  %v3900_v31 = vadd.f32 %v6975_v14, %v3857_v8 }
 0x1fd   : > { %v5277_v59 = vpop.f32.mrf.mxu1  ;;  %v5333_v50 = vpop.f32.mrf.mxu0 }
 0x1fe   : > { %v3903_v1 = vadd.f32 %v6975_v14, %v3860_v29  ;;  %v3858_v13 = vadd.f32 %v3729_v63, %v3520_v4  ;;  %v3525_v56 = vadd.f32 %v5277_v59, %v6887_v28 }
 0x1ff   : > { %v3404_v45 = vpop.f32.mrf.mxu1  ;;  %v3758_v18 = vpop.f32.mrf.mxu0 }
 0x200   : > { %v4564_v46 = vpack.c.bf16 %v3903_v1, %v3902_v22  ;;  %v3901_v25 = vadd.f32 %v6975_v14, %v3858_v13  ;;  %v3523_v11 = vadd.f32 %v3404_v45, %v6890_v30  ;;  %v3863_v3 = vadd.f32 %v5329_v2, %v3525_v56 }
 0x201   : > { %v5278_v61 = vpop.f32.mrf.mxu1  ;;  %v5334_v44 = vpop.f32.mrf.mxu0 }
 0x202   : > { %4638 = vst [vmem:[%s6985_s9 + $0x18] sm:$0xff] %v4564_v46   ;;  %v4559_v37 = vpack.c.bf16 %v3901_v25, %v3900_v31  ;;  %v3526_v62 = vadd.f32 %v5278_v61, %v6893_v54  ;;  %v3861_v28 = vadd.f32 %v3742_v10, %v3523_v11  ;;  %v3906_v33 = vadd.f32 %v6975_v14, %v3863_v3 }
 0x203   : > { %v3407_v63 = vpop.f32.mrf.mxu1  ;;  %v3761_v49 = vpop.f32.mrf.mxu0 }
 0x204   : > { %4637 = vst [vmem:[%s6985_s9 + $0x10] sm:$0xff] %v4559_v37   ;;  %v3864_v9 = vadd.f32 %v5330_v41, %v3526_v62  ;;  %v3524_v5 = vadd.f32 %v3407_v63, %v6896_v40  ;;  %v3904_v57 = vadd.f32 %v6975_v14, %v3861_v28 }
 0x205   : > { %v5281_v26 = vpop.f32.mrf.mxu1  ;;  %v5337_v27 = vpop.f32.mrf.mxu0 }
 0x206   : > { %v3907_v30 = vadd.f32 %v6975_v14, %v3864_v9  ;;  %v3862_v34 = vadd.f32 %v3745_v39, %v3524_v5  ;;  %v3529_v2 = vadd.f32 %v5281_v26, %v6899_v0 }
 0x207   : > { %v3420_v12 = vpop.f32.mrf.mxu1  ;;  %v3774_v54 = vpop.f32.mrf.mxu0 }
 0x208   : > { %v4574_v24 = vpack.c.bf16 %v3907_v30, %v3906_v33  ;;  %v3905_v10 = vadd.f32 %v6975_v14, %v3862_v34  ;;  %v3527_v41 = vadd.f32 %v3420_v12, %v6902_v43  ;;  %v3867_v4 = vadd.f32 %v5333_v50, %v3529_v2 }
 0x209   : > { %v5282_v40 = vpop.f32.mrf.mxu1  ;;  %v5338_v8 = vpop.f32.mrf.mxu0 }
 0x20a   : > { %4640 = vst [vmem:[%s6985_s9 + $0x28] sm:$0xff] %v4574_v24   ;;  %v4569_v29 = vpack.c.bf16 %v3905_v10, %v3904_v57  ;;  %v3530_v59 = vadd.f32 %v5282_v40, %v6905_v6  ;;  %v3865_v0 = vadd.f32 %v3758_v18, %v3527_v41  ;;  %v3910_v31 = vadd.f32 %v6975_v14, %v3867_v4 }
 0x20b   : > { %v3423_v39 = vpop.f32.mrf.mxu1  ;;  %v3777_v22 = vpop.f32.mrf.mxu0 }
 0x20c   : > { %4639 = vst [vmem:[%s6985_s9 + $0x20] sm:$0xff] %v4569_v29   ;;  %v3868_v1 = vadd.f32 %v5334_v44, %v3530_v59  ;;  %v3528_v13 = vadd.f32 %v3423_v39, %v6908_v16  ;;  %v3908_v11 = vadd.f32 %v6975_v14, %v3865_v0 }
 0x20d   : > { %v5285_v56 = vpop.f32.mrf.mxu1  ;;  %v5341_v45 = vpop.f32.mrf.mxu0 }
 0x20e   : > { %v3911_v43 = vadd.f32 %v6975_v14, %v3868_v1  ;;  %v3866_v46 = vadd.f32 %v3761_v49, %v3528_v13  ;;  %v3533_v50 = vadd.f32 %v5285_v56, %v6911_v17 }
 0x20f   : > { %v3436_v25 = vpop.f32.mrf.mxu1  ;;  %v3790_v6 = vpop.f32.mrf.mxu0 }
 0x210   : > { %v4584_v61 = vpack.c.bf16 %v3911_v43, %v3910_v31  ;;  %v3909_v18 = vadd.f32 %v6975_v14, %v3866_v46  ;;  %v3531_v44 = vadd.f32 %v3436_v25, %v6914_v38  ;;  %v3871_v62 = vadd.f32 %v5337_v27, %v3533_v50 }
 0x211   : > { %v5286_v16 = vpop.f32.mrf.mxu1  ;;  %v5342_v37 = vpop.f32.mrf.mxu0 }
 0x212   : > { %4642 = vst [vmem:[%s6985_s9 + $0x38] sm:$0xff] %v4584_v61   ;;  %v4579_v3 = vpack.c.bf16 %v3909_v18, %v3908_v11  ;;  %v3534_v63 = vadd.f32 %v5286_v16, %v6917_v53  ;;  %v3869_v17 = vadd.f32 %v3774_v54, %v3531_v44  ;;  %v3914_v30 = vadd.f32 %v6975_v14, %v3871_v62 }
 0x213   : > { %v3439_v49 = vpop.f32.mrf.mxu1  ;;  %v3793_v28 = vpop.f32.mrf.mxu0 }
 0x214   : > { %4641 = vst [vmem:[%s6985_s9 + $0x30] sm:$0xff] %v4579_v3   ;;  %v3872_v9 = vadd.f32 %v5338_v8, %v3534_v63  ;;  %v3532_v5 = vadd.f32 %v3439_v49, %v6920_v21  ;;  %v3912_v12 = vadd.f32 %v6975_v14, %v3869_v17 }
 0x215   : > { %v5289_v26 = vpop.f32.mrf.mxu1  ;;  %v5345_v33 = vpop.f32.mrf.mxu0 }
 0x216   : > { %v3915_v38 = vadd.f32 %v6975_v14, %v3872_v9  ;;  %v3870_v34 = vadd.f32 %v3777_v22, %v3532_v5  ;;  %v3537_v27 = vadd.f32 %v5289_v26, %v6923_v35 }
 0x217   : > { %v3452_v2 = vpop.f32.mrf.mxu1  ;;  %v3806_v53 = vpop.f32.mrf.mxu0 }
 0x218   : > { %v4594_v57 = vpack.c.bf16 %v3915_v38, %v3914_v30  ;;  %v3913_v54 = vadd.f32 %v6975_v14, %v3870_v34  ;;  %v3535_v24 = vadd.f32 %v3452_v2, %v6926_v15  ;;  %v3875_v40 = vadd.f32 %v5341_v45, %v3537_v27 }
 0x219   : > { %v5290_v21 = vpop.f32.mrf.mxu1  ;;  %v5346_v10 = vpop.f32.mrf.mxu0 }
 0x21a   : > { %4644 = vst [vmem:[%s6985_s9 + $0x48] sm:$0xff] %v4594_v57   ;;  %v4589_v41 = vpack.c.bf16 %v3913_v54, %v3912_v12  ;;  %v3538_v8 = vadd.f32 %v5290_v21, %v6929_v52  ;;  %v3873_v35 = vadd.f32 %v3790_v6, %v3535_v24  ;;  %v3918_v1 = vadd.f32 %v6975_v14, %v3875_v40 }
 0x21b   : > { %v3455_v29 = vpop.f32.mrf.mxu1  ;;  %v3809_v4 = vpop.f32.mrf.mxu0 }
 0x21c   : > { %4643 = vst [vmem:[%s6985_s9 + $0x40] sm:$0xff] %v4589_v41   ;;  %v3876_v59 = vadd.f32 %v5342_v37, %v3538_v8  ;;  %v3536_v39 = vadd.f32 %v3455_v29, %v6932_v60  ;;  %v3916_v31 = vadd.f32 %v6975_v14, %v3873_v35 }
 0x21d   : > { %v5293_v22 = vpop.f32.mrf.mxu1  ;;  %v5349_v0 = vpop.f32.mrf.mxu0 }
 0x21e   : > { %v3919_v15 = vadd.f32 %v6975_v14, %v3876_v59  ;;  %v3874_v13 = vadd.f32 %v3793_v28, %v3536_v39  ;;  %v3541_v56 = vadd.f32 %v5293_v22, %v6935_v51 }
 0x21f   : > { %v3468_v45 = vpop.f32.mrf.mxu1  ;;  %v3822_v52 = vpop.f32.mrf.mxu0 }
 0x220   : > { %v4604_v43 = vpack.c.bf16 %v3919_v15, %v3918_v1  ;;  %v3917_v46 = vadd.f32 %v6975_v14, %v3874_v13  ;;  %v3539_v50 = vadd.f32 %v3468_v45, %v6938_v47  ;;  %v3879_v11 = vadd.f32 %v5345_v33, %v3541_v56 }
 0x221   : > { %v5294_v60 = vpop.f32.mrf.mxu1  ;;  %v5350_v25 = vpop.f32.mrf.mxu0 }
 0x222   : > { %4646 = vst [vmem:[%s6985_s9 + $0x58] sm:$0xff] %v4604_v43   ;;  %v4599_v6 = vpack.c.bf16 %v3917_v46, %v3916_v31  ;;  %v3542_v61 = vadd.f32 %v5294_v60, %v6941_v55  ;;  %v3877_v44 = vadd.f32 %v3806_v53, %v3539_v50  ;;  %v3922_v62 = vadd.f32 %v6975_v14, %v3879_v11 }
 0x223   : > { %v3471_v18 = vpop.f32.mrf.mxu1  ;;  %v3825_v3 = vpop.f32.mrf.mxu0 }
 0x224   : > { %4645 = vst [vmem:[%s6985_s9 + $0x50] sm:$0xff] %v4599_v6   ;;  %v3880_v51 = vadd.f32 %v5346_v10, %v3542_v61  ;;  %v3540_v16 = vadd.f32 %v3471_v18, %v6944_v20  ;;  %v3920_v55 = vadd.f32 %v6975_v14, %v3877_v44 }
 0x225   : > { %v5297_v37 = vpop.f32.mrf.mxu1  ;;  %v5353_v20 = vpop.f32.mrf.mxu0 }
 0x226   : > { %v3923_v47 = vadd.f32 %v6975_v14, %v3880_v51  ;;  %v3878_v63 = vadd.f32 %v3809_v4, %v3540_v16  ;;  %v3545_v49 = vadd.f32 %v5297_v37, %v6947_v7 }
 0x227   : > { %v3484_v28 = vpop.f32.mrf.mxu1  ;;  %v3838_v53 = vpop.f32.mrf.mxu0 }
 0x228   : > { %v4614_v17 = vpack.c.bf16 %v3923_v47, %v3922_v62  ;;  %v3921_v9 = vadd.f32 %v6975_v14, %v3878_v63  ;;  %v3543_v5 = vadd.f32 %v3484_v28, %v6950_v23  ;;  %v3883_v30 = vadd.f32 %v5349_v0, %v3545_v49 }
 0x229   : > { %v5298_v26 = vpop.f32.mrf.mxu1  ;;  %v5354_v8 = vpop.f32.mrf.mxu0 }
 0x22a   : > { %4648 = vst [vmem:[%s6985_s9 + $0x68] sm:$0xff] %v4614_v17   ;;  %v4609_v33 = vpack.c.bf16 %v3921_v9, %v3920_v55  ;;  %v3546_v38 = vadd.f32 %v5298_v26, %v6953_v48  ;;  %v3881_v27 = vadd.f32 %v3822_v52, %v3543_v5  ;;  %v3926_v57 = vadd.f32 %v6975_v14, %v3883_v30 }
 0x22b   : > { %v3487_v34 = vpop.f32.mrf.mxu1  ;;  %v3841_v0 = vpop.f32.mrf.mxu0 }
 0x22c   : > { %4647 = vst [vmem:[%s6985_s9 + $0x60] sm:$0xff] %v4609_v33   ;;  %v3884_v7 = vadd.f32 %v5350_v25, %v3546_v38  ;;  %v3544_v2 = vadd.f32 %v3487_v34, %v6956_v58  ;;  %v3924_v48 = vadd.f32 %v6975_v14, %v3881_v27 }
 0x22d   : > { %v5301_v12 = vpop.f32.mrf.mxu1 }
 0x22e   : > { %v3927_v23 = vadd.f32 %v6975_v14, %v3884_v7  ;;  %v3882_v54 = vadd.f32 %v3825_v3, %v3544_v2  ;;  %v3549_v24 = vadd.f32 %v5301_v12, %v6959_v36 }
 0x22f   : > { %v3500_v21 = vpop.f32.mrf.mxu1 }
 0x230   : > { %v4624_v10 = vpack.c.bf16 %v3927_v23, %v3926_v57  ;;  %v3925_v41 = vadd.f32 %v6975_v14, %v3882_v54  ;;  %v3547_v40 = vadd.f32 %v3500_v21, %v6962_v32  ;;  %v3887_v4 = vadd.f32 %v5353_v20, %v3549_v24 }
 0x231   : > { %v5302_v58 = vpop.f32.mrf.mxu1 }
 0x232   : > { %4650 = vst [vmem:[%s6985_s9 + $0x78] sm:$0xff] %v4624_v10   ;;  %v4619_v29 = vpack.c.bf16 %v3925_v41, %v3924_v48  ;;  %v3550_v35 = vadd.f32 %v5302_v58, %v6965_v42  ;;  %v3885_v36 = vadd.f32 %v3838_v53, %v3547_v40  ;;  %v3930_v1 = vadd.f32 %v6975_v14, %v3887_v4 }
 0x233   : > { %v3503_v59 = vpop.f32.mrf.mxu1 }
 0x234   : > { %4649 = vst [vmem:[%s6985_s9 + $0x70] sm:$0xff] %v4619_v29   ;;  %v3888_v39 = vadd.f32 %v5354_v8, %v3550_v35  ;;  %v3548_v22 = vadd.f32 %v3503_v59, %v6968_v19  ;;  %v3928_v13 = vadd.f32 %v6975_v14, %v3885_v36 }
 0x236   : > { %v3931_v32 = vadd.f32 %v6975_v14, %v3888_v39  ;;  %v3886_v15 = vadd.f32 %v3841_v0, %v3548_v22 }
 0x238   : > { %v4634_v56 = vpack.c.bf16 %v3931_v32, %v3930_v1  ;;  %v3929_v45 = vadd.f32 %v6975_v14, %v3886_v15 }
 0x23a   : > { %4652 = vst [vmem:[%s6985_s9 + $0x88] sm:$0xff] %v4634_v56   ;;  %v4629_v52 = vpack.c.bf16 %v3929_v45, %v3928_v13 }
 0x23c   : > { %4651 = vst [vmem:[%s6985_s9 + $0x80] sm:$0xff] %v4629_v52  }
 0x23d PF: > { %s13_s14 = sadd.s32 1, %s5553_s14   ;;  %s7164_s12 = smov %s5549_s13 }
 0x23e   : > { %p10_p5 = scmp.ge.s32.totalorder %s13_s14, 4   ;;  %s7165_s13 = smov %s7167_s15 }
 0x240   :  { %12 = sbr.rel (!%p10_p5) target bundleno = 2 (0x2), region = 70 }

</bundles_post_ra>
